<compile_context>
chip_gen: v7x
topology: tpu7x:2x2x1
jax: 0.10.0
libtpu: 0.0.40
codegen_flags: <defaults>
</compile_context>

<pallas_src>
import jax
import jax.numpy as jnp
import numpy as np
from jax.experimental import pallas as pl
from jax.experimental.pallas import tpu as pltpu

T_IN = 77     # Conv chain: 77 -(k=1)-> 77 -(k=5)-> 73 -(k=2)-> 72 ; 72*64 = 4608
T_PAD = 80    # per-sample time rows, padded to a multiple of 8 (sublane tile)
T2 = 73
T3 = 72
C_HID = 64
FLAT = 4608
H1 = 128


def _round_up(x, m):
    return ((x + m - 1) // m) * m


def _make_features_kernel(bt, c_in):
    """Conv1d(c_in,64,1)+ReLU -> Conv1d(64,64,5)+ReLU -> Conv1d(64,64,2)+ReLU.

    Processes `bt` batch elements per grid step; activations are (bt*80, 64)
    with channels on lanes.  Rows b*80 + t, t in [0,77) hold real data.
    """
    R = bt * T_PAD

    def kernel(x_ref, w1_ref, b1_ref, w2_ref, b2_ref, w3_ref, b3_ref, o_ref):
        x = x_ref[...]                                          # (R, c_in) f32
        w1 = w1_ref[...]                                        # (c_in, 64) f32
        b1 = b1_ref[...]                                        # (1, 64)    f32

        # --- Conv1d(c_in, 64, k=1) + ReLU -------------------------------------
        if c_in <= 8:
            # K=c_in is far too shallow for the MXU: do it on the VPU as a few
            # broadcast multiply-adds (avoids a padded (...,4)-lane operand).
            y1 = jnp.broadcast_to(b1, (R, C_HID)).astype(jnp.float32)
            for ci in range(c_in):
                y1 = y1 + x[:, ci:ci + 1] * w1[ci:ci + 1, :]
        else:
            y1 = jnp.dot(x, w1, preferred_element_type=jnp.float32) + b1
        y1 = jnp.maximum(y1, 0.0).astype(jnp.bfloat16)          # (R, 64)

        # --- Conv1d(64, 64, k=5) + ReLU ---------------------------------------
        # Full-height bf16 matmul per tap (aligned MXU operands), then shift the
        # f32 result rows by -k and accumulate.  Valid output rows (t < 73) only
        # ever read rows t+k <= 76 < 80, so shifts never mix batch elements.
        acc = jnp.zeros((R, C_HID), jnp.float32)
        for k in range(5):
            z = jnp.dot(y1, w2_ref[k], preferred_element_type=jnp.float32)
            if k:
                z = jnp.roll(z, -k, axis=0)
            acc = acc + z
        y2 = jnp.maximum(acc + b2_ref[...], 0.0).astype(jnp.bfloat16)

        # --- Conv1d(64, 64, k=2) + ReLU ---------------------------------------
        acc = jnp.zeros((R, C_HID), jnp.float32)
        for k in range(2):
            z = jnp.dot(y2, w3_ref[k], preferred_element_type=jnp.float32)
            if k:
                z = jnp.roll(z, -k, axis=0)
            acc = acc + z
        y3 = jnp.maximum(acc + b3_ref[...], 0.0).astype(jnp.bfloat16)  # (R, 64)

        # Drop the per-sample time padding (keep the 72 valid steps); both the
        # source offset (b*80) and the 72-row extent are sublane-aligned.
        for b in range(bt):
            o_ref[b] = y3[b * T_PAD: b * T_PAD + T3, :]

    return kernel


def _classifier_kernel(x_ref, w1_ref, b1_ref, w2_ref, b2_ref, o_ref):
    # Linear(4608, 128) + ReLU + Linear(128, NC_PAD); bf16 MXU, f32 accumulate.
    h = jnp.dot(x_ref[...], w1_ref[...],
                preferred_element_type=jnp.float32) + b1_ref[...]
    h = jnp.maximum(h, 0.0).astype(jnp.bfloat16)
    o_ref[...] = jnp.dot(h, w2_ref[...],
                         preferred_element_type=jnp.float32) + b2_ref[...]


def har_forward(x_nct, params):
    """x_nct: (B, input_size, 77) — same NCW layout as the PyTorch module."""
    (w1, b1, w2, b2, w3, b3, fw1, fb1, fw2, fb2) = params
    B, c_in, L = x_nct.shape
    assert L == T_IN, "sequence length must be 77 so the flatten gives 4608"
    num_classes = fw2.shape[0]
    nc_pad = _round_up(num_classes, 128)

    # Batch tiling: BT samples per grid step (capped so per-step VMEM stays small).
    BT = min(16, _round_up(B, 8))
    B_pad = _round_up(B, BT)
    grid = (B_pad // BT,)

    # ---- host/XLA-side glue: layout + padding + weight reordering ------------
    x_btc = jnp.transpose(x_nct, (0, 2, 1)).astype(jnp.float32)     # (B, 77, Cin)
    x_btc = jnp.pad(x_btc, ((0, B_pad - B), (0, T_PAD - T_IN), (0, 0)))
    x2d = x_btc.reshape(B_pad * T_PAD, c_in)                        # (B_pad*80, Cin)

    # Conv weights -> channels-last matmul form; bf16 for MXU operands.
    w1m = jnp.transpose(w1[:, :, 0], (1, 0)).astype(jnp.float32)    # (Cin, 64)
    w2m = jnp.transpose(w2, (2, 1, 0)).astype(jnp.bfloat16)         # (5, 64, 64)
    w3m = jnp.transpose(w3, (2, 1, 0)).astype(jnp.bfloat16)         # (2, 64, 64)
    # PyTorch flattens (B, 64, 72) channel-major; our features are time-major
    # (B, 72, 64), so permute fc1's weight: [j, c*72+t] -> [t*64+c, j].
    fw1m = jnp.transpose(fw1.reshape(H1, C_HID, T3),
                         (2, 1, 0)).reshape(FLAT, H1).astype(jnp.bfloat16)
    fw2p = jnp.zeros((H1, nc_pad), jnp.float32)
    fw2p = fw2p.at[:, :num_classes].set(jnp.transpose(fw2, (1, 0)))
    fw2p = fw2p.astype(jnp.bfloat16)                                # (128, nc_pad)

    b1m = b1.reshape(1, C_HID).astype(jnp.float32)
    b2m = b2.reshape(1, C_HID).astype(jnp.float32)
    b3m = b3.reshape(1, C_HID).astype(jnp.float32)
    fb1m = fb1.reshape(1, H1).astype(jnp.float32)
    fb2p = jnp.zeros((1, nc_pad), jnp.float32).at[0, :num_classes].set(fb2)

    # ---- kernel 1: conv feature stack ----------------------------------------
    feats = pl.pallas_call(
        _make_features_kernel(BT, c_in),
        out_shape=jax.ShapeDtypeStruct((B_pad, T3, C_HID), jnp.bfloat16),
        grid=grid,
        in_specs=[
            pl.BlockSpec((BT * T_PAD, c_in), lambda i: (i, 0)),
            pl.BlockSpec((c_in, C_HID), lambda i: (0, 0)),
            pl.BlockSpec((1, C_HID), lambda i: (0, 0)),
            pl.BlockSpec((5, C_HID, C_HID), lambda i: (0, 0, 0)),
            pl.BlockSpec((1, C_HID), lambda i: (0, 0)),
            pl.BlockSpec((2, C_HID, C_HID), lambda i: (0, 0, 0)),
            pl.BlockSpec((1, C_HID), lambda i: (0, 0)),
        ],
        out_specs=pl.BlockSpec((BT, T3, C_HID), lambda i: (i, 0, 0)),
        compiler_params=pltpu.CompilerParams(dimension_semantics=("parallel",)),
    )(x2d, w1m, b1m, w2m, b2m, w3m, b3m)

    # Contiguous (B_pad, 72, 64) -> (B_pad, 4608): zero-copy metadata reshape.
    flat = feats.reshape(B_pad, FLAT)

    # ---- kernel 2: MLP classifier, tiled over batch --------------------------
    out_p = pl.pallas_call(
        _classifier_kernel,
        out_shape=jax.ShapeDtypeStruct((B_pad, nc_pad), jnp.float32),
        grid=grid,
        in_specs=[
            pl.BlockSpec((BT, FLAT), lambda i: (i, 0)),
            pl.BlockSpec((FLAT, H1), lambda i: (0, 0)),
            pl.BlockSpec((1, H1), lambda i: (0, 0)),
            pl.BlockSpec((H1, nc_pad), lambda i: (0, 0)),
            pl.BlockSpec((1, nc_pad), lambda i: (0, 0)),
        ],
        out_specs=pl.BlockSpec((BT, nc_pad), lambda i: (i, 0)),
        compiler_params=pltpu.CompilerParams(dimension_semantics=("parallel",)),
    )(flat, fw1m, fb1m, fw2p, fb2p)

    return out_p[:B, :num_classes]


def ref_forward(x_nct, params):
    """Pure-JAX reference with PyTorch semantics (NCW convs, C-major flatten)."""
    (w1, b1, w2, b2, w3, b3, fw1, fb1, fw2, fb2) = params

    def conv1d(x, w, b):  # x (B, Ci, L), w (Co, Ci, K)
        K = w.shape[2]
        Lout = x.shape[2] - K + 1
        out = jnp.zeros((x.shape[0], w.shape[0], Lout), jnp.float32)
        for k in range(K):
            out = out + jnp.einsum('bil,oi->bol', x[:, :, k:k + Lout], w[:, :, k])
        return out + b[None, :, None]

    y = jax.nn.relu(conv1d(x_nct, w1, b1))
    y = jax.nn.relu(conv1d(y, w2, b2))
    y = jax.nn.relu(conv1d(y, w3, b3))
    flat = y.reshape(y.shape[0], -1)
    h = jax.nn.relu(flat @ fw1.T + fb1)
    return h @ fw2.T + fb2


def init_params(key, input_size, num_classes):
    ks = jax.random.split(key, 10)
    s = 0.05
    w1 = s * jax.random.normal(ks[0], (C_HID, input_size, 1), jnp.float32)
    b1 = s * jax.random.normal(ks[1], (C_HID,), jnp.float32)
    w2 = s * jax.random.normal(ks[2], (C_HID, C_HID, 5), jnp.float32)
    b2 = s * jax.random.normal(ks[3], (C_HID,), jnp.float32)
    w3 = s * jax.random.normal(ks[4], (C_HID, C_HID, 2), jnp.float32)
    b3 = s * jax.random.normal(ks[5], (C_HID,), jnp.float32)
    fw1 = s * jax.random.normal(ks[6], (H1, FLAT), jnp.float32)
    fb1 = s * jax.random.normal(ks[7], (H1,), jnp.float32)
    fw2 = s * jax.random.normal(ks[8], (num_classes, H1), jnp.float32)
    fb2 = s * jax.random.normal(ks[9], (num_classes,), jnp.float32)
    return (w1, b1, w2, b2, w3, b3, fw1, fb1, fw2, fb2)


if __name__ == "__main__":
    key = jax.random.PRNGKey(0)
    k_x, k_p = jax.random.split(key)

    B, input_size, num_classes = 2, 4, 6
    x = jax.random.normal(k_x, (B, input_size, T_IN), jnp.float32)  # NCW like PyTorch
    params = init_params(k_p, input_size, num_classes)

    out = jax.block_until_ready(har_forward(x, params))
    ref = jax.block_until_ready(ref_forward(x, params))

    assert out.shape == (B, num_classes)
    # bf16 MXU operands with f32 accumulation -> loosen tolerance accordingly.
    np.testing.assert_allclose(np.asarray(out), np.asarray(ref), rtol=2e-2, atol=2e-2)
    print("KERNEL_OK")
</pallas_src>

<mosaic_0001>
module attributes {stable_mosaic.version = 11 : i64} {
  func.func @kernel(%arg0: i32, %arg1: memref<640x4xf32, #tpu.memory_space<vmem>>, %arg2: memref<4x64xf32, #tpu.memory_space<vmem>>, %arg3: memref<1x64xf32, #tpu.memory_space<vmem>>, %arg4: memref<5x64x64xbf16, #tpu.memory_space<vmem>>, %arg5: memref<1x64xf32, #tpu.memory_space<vmem>>, %arg6: memref<2x64x64xbf16, #tpu.memory_space<vmem>>, %arg7: memref<1x64xf32, #tpu.memory_space<vmem>>, %arg8: memref<8x72x64xbf16, #tpu.memory_space<vmem>>) attributes {dimension_semantics = [#tpu.dimension_semantics<parallel>], iteration_bounds = array<i64: 1>, scalar_prefetch = 0 : i64, scratch_operands = 0 : i64, tpu.core_type = #tpu.core_type<tc>, window_params = [{transform_indices = @transform_0, window_bounds = array<i64: 640, 4>}, {pipeline_mode = #tpu.pipeline_mode<synchronous>, transform_indices = @transform_1, window_bounds = array<i64: 4, 64>}, {pipeline_mode = #tpu.pipeline_mode<synchronous>, transform_indices = @transform_2, window_bounds = array<i64: 1, 64>}, {pipeline_mode = #tpu.pipeline_mode<synchronous>, transform_indices = @transform_3, window_bounds = array<i64: 5, 64, 64>}, {pipeline_mode = #tpu.pipeline_mode<synchronous>, transform_indices = @transform_4, window_bounds = array<i64: 1, 64>}, {pipeline_mode = #tpu.pipeline_mode<synchronous>, transform_indices = @transform_5, window_bounds = array<i64: 2, 64, 64>}, {pipeline_mode = #tpu.pipeline_mode<synchronous>, transform_indices = @transform_6, window_bounds = array<i64: 1, 64>}, {transform_indices = @transform_7, window_bounds = array<i64: 8, 72, 64>}]} {
    %c0 = arith.constant 0 : index
    %c0_0 = arith.constant 0 : index
    %0 = vector.load %arg1[%c0, %c0_0] : memref<640x4xf32, #tpu.memory_space<vmem>>, vector<640x4xf32>
    %c0_1 = arith.constant 0 : index
    %c0_2 = arith.constant 0 : index
    %1 = vector.load %arg2[%c0_1, %c0_2] : memref<4x64xf32, #tpu.memory_space<vmem>>, vector<4x64xf32>
    %c0_3 = arith.constant 0 : index
    %c0_4 = arith.constant 0 : index
    %2 = vector.load %arg3[%c0_3, %c0_4] : memref<1x64xf32, #tpu.memory_space<vmem>>, vector<1x64xf32>
    %3 = vector.shape_cast %2 : vector<1x64xf32> to vector<1x64xf32>
    %4 = vector.broadcast %3 : vector<1x64xf32> to vector<640x64xf32>
    %5 = vector.extract_strided_slice %0 {offsets = [0, 0], sizes = [640, 1], strides = [1, 1]} : vector<640x4xf32> to vector<640x1xf32>
    %6 = vector.extract_strided_slice %1 {offsets = [0, 0], sizes = [1, 64], strides = [1, 1]} : vector<4x64xf32> to vector<1x64xf32>
    %7 = vector.broadcast %5 : vector<640x1xf32> to vector<640x64xf32>
    %8 = vector.broadcast %6 : vector<1x64xf32> to vector<640x64xf32>
    %9 = arith.mulf %7, %8 : vector<640x64xf32>
    %10 = arith.addf %4, %9 : vector<640x64xf32>
    %11 = vector.extract_strided_slice %0 {offsets = [0, 1], sizes = [640, 1], strides = [1, 1]} : vector<640x4xf32> to vector<640x1xf32>
    %12 = vector.extract_strided_slice %1 {offsets = [1, 0], sizes = [1, 64], strides = [1, 1]} : vector<4x64xf32> to vector<1x64xf32>
    %13 = vector.broadcast %11 : vector<640x1xf32> to vector<640x64xf32>
    %14 = vector.broadcast %12 : vector<1x64xf32> to vector<640x64xf32>
    %15 = arith.mulf %13, %14 : vector<640x64xf32>
    %16 = arith.addf %10, %15 : vector<640x64xf32>
    %17 = vector.extract_strided_slice %0 {offsets = [0, 2], sizes = [640, 1], strides = [1, 1]} : vector<640x4xf32> to vector<640x1xf32>
    %18 = vector.extract_strided_slice %1 {offsets = [2, 0], sizes = [1, 64], strides = [1, 1]} : vector<4x64xf32> to vector<1x64xf32>
    %19 = vector.broadcast %17 : vector<640x1xf32> to vector<640x64xf32>
    %20 = vector.broadcast %18 : vector<1x64xf32> to vector<640x64xf32>
    %21 = arith.mulf %19, %20 : vector<640x64xf32>
    %22 = arith.addf %16, %21 : vector<640x64xf32>
    %23 = vector.extract_strided_slice %0 {offsets = [0, 3], sizes = [640, 1], strides = [1, 1]} : vector<640x4xf32> to vector<640x1xf32>
    %24 = vector.extract_strided_slice %1 {offsets = [3, 0], sizes = [1, 64], strides = [1, 1]} : vector<4x64xf32> to vector<1x64xf32>
    %25 = vector.broadcast %23 : vector<640x1xf32> to vector<640x64xf32>
    %26 = vector.broadcast %24 : vector<1x64xf32> to vector<640x64xf32>
    %27 = arith.mulf %25, %26 : vector<640x64xf32>
    %28 = arith.addf %22, %27 : vector<640x64xf32>
    %cst = arith.constant 0.000000e+00 : f32
    %29 = vector.broadcast %cst : f32 to vector<640x64xf32>
    %30 = arith.maximumf %28, %29 : vector<640x64xf32>
    %31 = arith.truncf %30 : vector<640x64xf32> to vector<640x64xbf16>
    %cst_5 = arith.constant 0.000000e+00 : f32
    %32 = vector.broadcast %cst_5 : f32 to vector<640x64xf32>
    %c0_6 = arith.constant 0 : index
    %c0_7 = arith.constant 0 : index
    %c0_8 = arith.constant 0 : index
    %33 = vector.load %arg4[%c0_6, %c0_7, %c0_8] : memref<5x64x64xbf16, #tpu.memory_space<vmem>>, vector<1x64x64xbf16>
    %34 = vector.shape_cast %33 : vector<1x64x64xbf16> to vector<64x64xbf16>
    %cst_9 = arith.constant dense<0.000000e+00> : vector<640x64xf32>
    %35 = tpu.matmul %31, %34, %cst_9 {dimension_numbers = #tpu.dot_dimension_numbers<[1], [0], [0], [1], [0, 0, 1, 1], [], []>} : vector<640x64xbf16>, vector<64x64xbf16>, vector<640x64xf32> -> vector<640x64xf32>
    %36 = arith.addf %32, %35 : vector<640x64xf32>
    %c1 = arith.constant 1 : index
    %c0_10 = arith.constant 0 : index
    %c0_11 = arith.constant 0 : index
    %37 = vector.load %arg4[%c1, %c0_10, %c0_11] : memref<5x64x64xbf16, #tpu.memory_space<vmem>>, vector<1x64x64xbf16>
    %38 = vector.shape_cast %37 : vector<1x64x64xbf16> to vector<64x64xbf16>
    %cst_12 = arith.constant dense<0.000000e+00> : vector<640x64xf32>
    %39 = tpu.matmul %31, %38, %cst_12 {dimension_numbers = #tpu.dot_dimension_numbers<[1], [0], [0], [1], [0, 0, 1, 1], [], []>} : vector<640x64xbf16>, vector<64x64xbf16>, vector<640x64xf32> -> vector<640x64xf32>
    %40 = vector.extract_strided_slice %39 {offsets = [1, 0], sizes = [639, 64], strides = [1, 1]} : vector<640x64xf32> to vector<639x64xf32>
    %41 = vector.extract_strided_slice %39 {offsets = [0, 0], sizes = [1, 64], strides = [1, 1]} : vector<640x64xf32> to vector<1x64xf32>
    %42 = tpu.concatenate %40, %41 in 0 : vector<639x64xf32>, vector<1x64xf32> -> vector<640x64xf32>
    %43 = arith.addf %36, %42 : vector<640x64xf32>
    %c2 = arith.constant 2 : index
    %c0_13 = arith.constant 0 : index
    %c0_14 = arith.constant 0 : index
    %44 = vector.load %arg4[%c2, %c0_13, %c0_14] : memref<5x64x64xbf16, #tpu.memory_space<vmem>>, vector<1x64x64xbf16>
    %45 = vector.shape_cast %44 : vector<1x64x64xbf16> to vector<64x64xbf16>
    %cst_15 = arith.constant dense<0.000000e+00> : vector<640x64xf32>
    %46 = tpu.matmul %31, %45, %cst_15 {dimension_numbers = #tpu.dot_dimension_numbers<[1], [0], [0], [1], [0, 0, 1, 1], [], []>} : vector<640x64xbf16>, vector<64x64xbf16>, vector<640x64xf32> -> vector<640x64xf32>
    %47 = vector.extract_strided_slice %46 {offsets = [2, 0], sizes = [638, 64], strides = [1, 1]} : vector<640x64xf32> to vector<638x64xf32>
    %48 = vector.extract_strided_slice %46 {offsets = [0, 0], sizes = [2, 64], strides = [1, 1]} : vector<640x64xf32> to vector<2x64xf32>
    %49 = tpu.concatenate %47, %48 in 0 : vector<638x64xf32>, vector<2x64xf32> -> vector<640x64xf32>
    %50 = arith.addf %43, %49 : vector<640x64xf32>
    %c3 = arith.constant 3 : index
    %c0_16 = arith.constant 0 : index
    %c0_17 = arith.constant 0 : index
    %51 = vector.load %arg4[%c3, %c0_16, %c0_17] : memref<5x64x64xbf16, #tpu.memory_space<vmem>>, vector<1x64x64xbf16>
    %52 = vector.shape_cast %51 : vector<1x64x64xbf16> to vector<64x64xbf16>
    %cst_18 = arith.constant dense<0.000000e+00> : vector<640x64xf32>
    %53 = tpu.matmul %31, %52, %cst_18 {dimension_numbers = #tpu.dot_dimension_numbers<[1], [0], [0], [1], [0, 0, 1, 1], [], []>} : vector<640x64xbf16>, vector<64x64xbf16>, vector<640x64xf32> -> vector<640x64xf32>
    %54 = vector.extract_strided_slice %53 {offsets = [3, 0], sizes = [637, 64], strides = [1, 1]} : vector<640x64xf32> to vector<637x64xf32>
    %55 = vector.extract_strided_slice %53 {offsets = [0, 0], sizes = [3, 64], strides = [1, 1]} : vector<640x64xf32> to vector<3x64xf32>
    %56 = tpu.concatenate %54, %55 in 0 : vector<637x64xf32>, vector<3x64xf32> -> vector<640x64xf32>
    %57 = arith.addf %50, %56 : vector<640x64xf32>
    %c4 = arith.constant 4 : index
    %c0_19 = arith.constant 0 : index
    %c0_20 = arith.constant 0 : index
    %58 = vector.load %arg4[%c4, %c0_19, %c0_20] : memref<5x64x64xbf16, #tpu.memory_space<vmem>>, vector<1x64x64xbf16>
    %59 = vector.shape_cast %58 : vector<1x64x64xbf16> to vector<64x64xbf16>
    %cst_21 = arith.constant dense<0.000000e+00> : vector<640x64xf32>
    %60 = tpu.matmul %31, %59, %cst_21 {dimension_numbers = #tpu.dot_dimension_numbers<[1], [0], [0], [1], [0, 0, 1, 1], [], []>} : vector<640x64xbf16>, vector<64x64xbf16>, vector<640x64xf32> -> vector<640x64xf32>
    %61 = vector.extract_strided_slice %60 {offsets = [4, 0], sizes = [636, 64], strides = [1, 1]} : vector<640x64xf32> to vector<636x64xf32>
    %62 = vector.extract_strided_slice %60 {offsets = [0, 0], sizes = [4, 64], strides = [1, 1]} : vector<640x64xf32> to vector<4x64xf32>
    %63 = tpu.concatenate %61, %62 in 0 : vector<636x64xf32>, vector<4x64xf32> -> vector<640x64xf32>
    %64 = arith.addf %57, %63 : vector<640x64xf32>
    %c0_22 = arith.constant 0 : index
    %c0_23 = arith.constant 0 : index
    %65 = vector.load %arg5[%c0_22, %c0_23] : memref<1x64xf32, #tpu.memory_space<vmem>>, vector<1x64xf32>
    %66 = vector.broadcast %65 : vector<1x64xf32> to vector<640x64xf32>
    %67 = arith.addf %64, %66 : vector<640x64xf32>
    %cst_24 = arith.constant 0.000000e+00 : f32
    %68 = vector.broadcast %cst_24 : f32 to vector<640x64xf32>
    %69 = arith.maximumf %67, %68 : vector<640x64xf32>
    %70 = arith.truncf %69 : vector<640x64xf32> to vector<640x64xbf16>
    %cst_25 = arith.constant 0.000000e+00 : f32
    %71 = vector.broadcast %cst_25 : f32 to vector<640x64xf32>
    %c0_26 = arith.constant 0 : index
    %c0_27 = arith.constant 0 : index
    %c0_28 = arith.constant 0 : index
    %72 = vector.load %arg6[%c0_26, %c0_27, %c0_28] : memref<2x64x64xbf16, #tpu.memory_space<vmem>>, vector<1x64x64xbf16>
    %73 = vector.shape_cast %72 : vector<1x64x64xbf16> to vector<64x64xbf16>
    %cst_29 = arith.constant dense<0.000000e+00> : vector<640x64xf32>
    %74 = tpu.matmul %70, %73, %cst_29 {dimension_numbers = #tpu.dot_dimension_numbers<[1], [0], [0], [1], [0, 0, 1, 1], [], []>} : vector<640x64xbf16>, vector<64x64xbf16>, vector<640x64xf32> -> vector<640x64xf32>
    %75 = arith.addf %71, %74 : vector<640x64xf32>
    %c1_30 = arith.constant 1 : index
    %c0_31 = arith.constant 0 : index
    %c0_32 = arith.constant 0 : index
    %76 = vector.load %arg6[%c1_30, %c0_31, %c0_32] : memref<2x64x64xbf16, #tpu.memory_space<vmem>>, vector<1x64x64xbf16>
    %77 = vector.shape_cast %76 : vector<1x64x64xbf16> to vector<64x64xbf16>
    %cst_33 = arith.constant dense<0.000000e+00> : vector<640x64xf32>
    %78 = tpu.matmul %70, %77, %cst_33 {dimension_numbers = #tpu.dot_dimension_numbers<[1], [0], [0], [1], [0, 0, 1, 1], [], []>} : vector<640x64xbf16>, vector<64x64xbf16>, vector<640x64xf32> -> vector<640x64xf32>
    %79 = vector.extract_strided_slice %78 {offsets = [1, 0], sizes = [639, 64], strides = [1, 1]} : vector<640x64xf32> to vector<639x64xf32>
    %80 = vector.extract_strided_slice %78 {offsets = [0, 0], sizes = [1, 64], strides = [1, 1]} : vector<640x64xf32> to vector<1x64xf32>
    %81 = tpu.concatenate %79, %80 in 0 : vector<639x64xf32>, vector<1x64xf32> -> vector<640x64xf32>
    %82 = arith.addf %75, %81 : vector<640x64xf32>
    %c0_34 = arith.constant 0 : index
    %c0_35 = arith.constant 0 : index
    %83 = vector.load %arg7[%c0_34, %c0_35] : memref<1x64xf32, #tpu.memory_space<vmem>>, vector<1x64xf32>
    %84 = vector.broadcast %83 : vector<1x64xf32> to vector<640x64xf32>
    %85 = arith.addf %82, %84 : vector<640x64xf32>
    %cst_36 = arith.constant 0.000000e+00 : f32
    %86 = vector.broadcast %cst_36 : f32 to vector<640x64xf32>
    %87 = arith.maximumf %85, %86 : vector<640x64xf32>
    %88 = arith.truncf %87 : vector<640x64xf32> to vector<640x64xbf16>
    %89 = vector.extract_strided_slice %88 {offsets = [0, 0], sizes = [72, 64], strides = [1, 1]} : vector<640x64xbf16> to vector<72x64xbf16>
    %c0_37 = arith.constant 0 : index
    %c0_38 = arith.constant 0 : index
    %c0_39 = arith.constant 0 : index
    %90 = vector.load %arg8[%c0_37, %c0_38, %c0_39] : memref<8x72x64xbf16, #tpu.memory_space<vmem>>, vector<1x72x64xbf16>
    %91 = vector.shape_cast %90 : vector<1x72x64xbf16> to vector<72x64xbf16>
    %92 = vector.shape_cast %89 : vector<72x64xbf16> to vector<1x72x64xbf16>
    tpu.vector_store %arg8[%c0_37, %c0_38, %c0_39], %92 {strides = array<i32>} : memref<8x72x64xbf16, #tpu.memory_space<vmem>>, vector<1x72x64xbf16>,
    %93 = vector.extract_strided_slice %88 {offsets = [80, 0], sizes = [72, 64], strides = [1, 1]} : vector<640x64xbf16> to vector<72x64xbf16>
    %c1_40 = arith.constant 1 : index
    %c0_41 = arith.constant 0 : index
    %c0_42 = arith.constant 0 : index
    %94 = vector.load %arg8[%c1_40, %c0_41, %c0_42] : memref<8x72x64xbf16, #tpu.memory_space<vmem>>, vector<1x72x64xbf16>
    %95 = vector.shape_cast %94 : vector<1x72x64xbf16> to vector<72x64xbf16>
    %96 = vector.shape_cast %93 : vector<72x64xbf16> to vector<1x72x64xbf16>
    tpu.vector_store %arg8[%c1_40, %c0_41, %c0_42], %96 {strides = array<i32>} : memref<8x72x64xbf16, #tpu.memory_space<vmem>>, vector<1x72x64xbf16>,
    %97 = vector.extract_strided_slice %88 {offsets = [160, 0], sizes = [72, 64], strides = [1, 1]} : vector<640x64xbf16> to vector<72x64xbf16>
    %c2_43 = arith.constant 2 : index
    %c0_44 = arith.constant 0 : index
    %c0_45 = arith.constant 0 : index
    %98 = vector.load %arg8[%c2_43, %c0_44, %c0_45] : memref<8x72x64xbf16, #tpu.memory_space<vmem>>, vector<1x72x64xbf16>
    %99 = vector.shape_cast %98 : vector<1x72x64xbf16> to vector<72x64xbf16>
    %100 = vector.shape_cast %97 : vector<72x64xbf16> to vector<1x72x64xbf16>
    tpu.vector_store %arg8[%c2_43, %c0_44, %c0_45], %100 {strides = array<i32>} : memref<8x72x64xbf16, #tpu.memory_space<vmem>>, vector<1x72x64xbf16>,
    %101 = vector.extract_strided_slice %88 {offsets = [240, 0], sizes = [72, 64], strides = [1, 1]} : vector<640x64xbf16> to vector<72x64xbf16>
    %c3_46 = arith.constant 3 : index
    %c0_47 = arith.constant 0 : index
    %c0_48 = arith.constant 0 : index
    %102 = vector.load %arg8[%c3_46, %c0_47, %c0_48] : memref<8x72x64xbf16, #tpu.memory_space<vmem>>, vector<1x72x64xbf16>
    %103 = vector.shape_cast %102 : vector<1x72x64xbf16> to vector<72x64xbf16>
    %104 = vector.shape_cast %101 : vector<72x64xbf16> to vector<1x72x64xbf16>
    tpu.vector_store %arg8[%c3_46, %c0_47, %c0_48], %104 {strides = array<i32>} : memref<8x72x64xbf16, #tpu.memory_space<vmem>>, vector<1x72x64xbf16>,
    %105 = vector.extract_strided_slice %88 {offsets = [320, 0], sizes = [72, 64], strides = [1, 1]} : vector<640x64xbf16> to vector<72x64xbf16>
    %c4_49 = arith.constant 4 : index
    %c0_50 = arith.constant 0 : index
    %c0_51 = arith.constant 0 : index
    %106 = vector.load %arg8[%c4_49, %c0_50, %c0_51] : memref<8x72x64xbf16, #tpu.memory_space<vmem>>, vector<1x72x64xbf16>
    %107 = vector.shape_cast %106 : vector<1x72x64xbf16> to vector<72x64xbf16>
    %108 = vector.shape_cast %105 : vector<72x64xbf16> to vector<1x72x64xbf16>
    tpu.vector_store %arg8[%c4_49, %c0_50, %c0_51], %108 {strides = array<i32>} : memref<8x72x64xbf16, #tpu.memory_space<vmem>>, vector<1x72x64xbf16>,
    %109 = vector.extract_strided_slice %88 {offsets = [400, 0], sizes = [72, 64], strides = [1, 1]} : vector<640x64xbf16> to vector<72x64xbf16>
    %c5 = arith.constant 5 : index
    %c0_52 = arith.constant 0 : index
    %c0_53 = arith.constant 0 : index
    %110 = vector.load %arg8[%c5, %c0_52, %c0_53] : memref<8x72x64xbf16, #tpu.memory_space<vmem>>, vector<1x72x64xbf16>
    %111 = vector.shape_cast %110 : vector<1x72x64xbf16> to vector<72x64xbf16>
    %112 = vector.shape_cast %109 : vector<72x64xbf16> to vector<1x72x64xbf16>
    tpu.vector_store %arg8[%c5, %c0_52, %c0_53], %112 {strides = array<i32>} : memref<8x72x64xbf16, #tpu.memory_space<vmem>>, vector<1x72x64xbf16>,
    %113 = vector.extract_strided_slice %88 {offsets = [480, 0], sizes = [72, 64], strides = [1, 1]} : vector<640x64xbf16> to vector<72x64xbf16>
    %c6 = arith.constant 6 : index
    %c0_54 = arith.constant 0 : index
    %c0_55 = arith.constant 0 : index
    %114 = vector.load %arg8[%c6, %c0_54, %c0_55] : memref<8x72x64xbf16, #tpu.memory_space<vmem>>, vector<1x72x64xbf16>
    %115 = vector.shape_cast %114 : vector<1x72x64xbf16> to vector<72x64xbf16>
    %116 = vector.shape_cast %113 : vector<72x64xbf16> to vector<1x72x64xbf16>
    tpu.vector_store %arg8[%c6, %c0_54, %c0_55], %116 {strides = array<i32>} : memref<8x72x64xbf16, #tpu.memory_space<vmem>>, vector<1x72x64xbf16>,
    %117 = vector.extract_strided_slice %88 {offsets = [560, 0], sizes = [72, 64], strides = [1, 1]} : vector<640x64xbf16> to vector<72x64xbf16>
    %c7 = arith.constant 7 : index
    %c0_56 = arith.constant 0 : index
    %c0_57 = arith.constant 0 : index
    %118 = vector.load %arg8[%c7, %c0_56, %c0_57] : memref<8x72x64xbf16, #tpu.memory_space<vmem>>, vector<1x72x64xbf16>
    %119 = vector.shape_cast %118 : vector<1x72x64xbf16> to vector<72x64xbf16>
    %120 = vector.shape_cast %117 : vector<72x64xbf16> to vector<1x72x64xbf16>
    tpu.vector_store %arg8[%c7, %c0_56, %c0_57], %120 {strides = array<i32>} : memref<8x72x64xbf16, #tpu.memory_space<vmem>>, vector<1x72x64xbf16>,
    return
  }
  func.func @transform_0(%arg0: i32) -> (i32, i32) {
    %c0_i32 = arith.constant 0 : i32
    %c0_i32_0 = arith.constant 0 : i32
    return %arg0, %c0_i32 : i32, i32
  }
  func.func @transform_1(%arg0: i32) -> (i32, i32) {
    %c0_i32 = arith.constant 0 : i32
    %c0_i32_0 = arith.constant 0 : i32
    %c0_i32_1 = arith.constant 0 : i32
    return %c0_i32, %c0_i32_0 : i32, i32
  }
  func.func @transform_2(%arg0: i32) -> (i32, i32) {
    %c0_i32 = arith.constant 0 : i32
    %c0_i32_0 = arith.constant 0 : i32
    %c0_i32_1 = arith.constant 0 : i32
    return %c0_i32, %c0_i32_0 : i32, i32
  }
  func.func @transform_3(%arg0: i32) -> (i32, i32, i32) {
    %c0_i32 = arith.constant 0 : i32
    %c0_i32_0 = arith.constant 0 : i32
    %c0_i32_1 = arith.constant 0 : i32
    %c0_i32_2 = arith.constant 0 : i32
    return %c0_i32, %c0_i32_0, %c0_i32_1 : i32, i32, i32
  }
  func.func @transform_4(%arg0: i32) -> (i32, i32) {
    %c0_i32 = arith.constant 0 : i32
    %c0_i32_0 = arith.constant 0 : i32
    %c0_i32_1 = arith.constant 0 : i32
    return %c0_i32, %c0_i32_0 : i32, i32
  }
  func.func @transform_5(%arg0: i32) -> (i32, i32, i32) {
    %c0_i32 = arith.constant 0 : i32
    %c0_i32_0 = arith.constant 0 : i32
    %c0_i32_1 = arith.constant 0 : i32
    %c0_i32_2 = arith.constant 0 : i32
    return %c0_i32, %c0_i32_0, %c0_i32_1 : i32, i32, i32
  }
  func.func @transform_6(%arg0: i32) -> (i32, i32) {
    %c0_i32 = arith.constant 0 : i32
    %c0_i32_0 = arith.constant 0 : i32
    %c0_i32_1 = arith.constant 0 : i32
    return %c0_i32, %c0_i32_0 : i32, i32
  }
  func.func @transform_7(%arg0: i32) -> (i32, i32, i32) {
    %c0_i32 = arith.constant 0 : i32
    %c0_i32_0 = arith.constant 0 : i32
    %c0_i32_1 = arith.constant 0 : i32
    return %arg0, %c0_i32, %c0_i32_0 : i32, i32, i32
  }
}

</mosaic_0001>

<bundles_post_ra>
// kernel: tpu_custom_call.1
= control target key start
LH: loop header
LB: loop body
LE: loop exit
PB: predicated region body
PF: predicated region fallthrough
CT: control target
= control target key end

     0   :  { %v9445_v0 = vmov 0   ;;  %vm2292_vm0 = vcmask 523264   ;;  %vm2846_vm1 = vcmask 1046528   ;;  %vm3931_vm2 = vcmask 1045504   ;;  %s14094_s0 = inlined_call_operand.vmem [shape: f32[640,4], index: 0, kind: input, shape index: {}]   ;;  %s14095_s3 = inlined_call_operand.vmem [shape: bf16[5,64,64], index: 3, kind: input, shape index: {}]   ;;  %s14096_s1 = inlined_call_operand.vmem [shape: f32[4,64], index: 1, kind: input, shape index: {}]   ;;  %s14097_s2 = inlined_call_operand.vmem [shape: f32[1,64], index: 2, kind: input, shape index: {}]   ;;  %s14098_s5 = inlined_call_operand.vmem [shape: bf16[2,64,64], index: 5, kind: input, shape index: {}]   ;;  %s14099_s4 = inlined_call_operand.vmem [shape: f32[1,64], index: 4, kind: input, shape index: {}]   ;;  %s14100_s6 = inlined_call_operand.vmem [shape: f32[1,64], index: 6, kind: input, shape index: {}]   ;;  %s14101_s7 = inlined_call_operand.vmem [shape: bf16[8,72,64], index: 7, kind: output, shape index: {}]  }
   0x1   :  { %9290 = vset.pattern.permute.xlu1 %v9445_v0  ;;  %9289 = vset.pattern.permute.xlu0 %v9445_v0  ;;  %v9492_v1 = vld [vmem:[%s14094_s0 + $0x10] sm:$0xff]  ;;  %v9497_v2 = vld [vmem:[%s14094_s0] sm:$0xff]  ;;  %v9504_v3 = vld [vmem:[%s14094_s0 + $0x18] sm:$0xff]  ;;  %vm4719_vm3 = vcmask 1044480   ;;  %vm5507_vm4 = vcmask 1043456   ;;  %vm7487_vm5 = vcmask 519168  }
   0x2   :  { %127 = vperm.xlu1 %9290, %v9492_v1   ;;  %117 = vperm.xlu0 %9289, %v9497_v2   ;;  %v9509_v4 = vld [vmem:[%s14094_s0 + $0x8] sm:$0xff]  ;;  %v9521_v6 = vld [vmem:[%s14094_s0 + $0x20] sm:$0xff]  ;;  %v9528_v7 = vld [vmem:[%s14094_s0 + $0x38] sm:$0xff] }
   0x3   :  { %v9516_v5 = vld [vmem:[%s14094_s0 + $0x28] sm:$0xff]  ;;  %v9533_v8 = vld [vmem:[%s14094_s0 + $0x30] sm:$0xff]  ;;  %v9545_v10 = vld [vmem:[%s14094_s0 + $0x40] sm:$0xff] }
   0x4   :  { %v9540_v9 = vld [vmem:[%s14094_s0 + $0x48] sm:$0xff]  ;;  %v9552_v11 = vld [vmem:[%s14094_s0 + $0x58] sm:$0xff]  ;;  %v9557_v12 = vld [vmem:[%s14094_s0 + $0x50] sm:$0xff] }
   0x5   :  { %v9564_v13 = vld [vmem:[%s14094_s0 + $0x68] sm:$0xff]  ;;  %v9569_v14 = vld [vmem:[%s14094_s0 + $0x60] sm:$0xff]  ;;  %v9576_v15 = vld [vmem:[%s14094_s0 + $0x78] sm:$0xff] }
   0x6   :  { %132 = vperm.xlu1 %9290, %v9504_v3   ;;  %122 = vperm.xlu0 %9289, %v9509_v4   ;;  %v9581_v16 = vld [vmem:[%s14094_s0 + $0x70] sm:$0xff]  ;;  %v9588_v17 = vld [vmem:[%s14094_s0 + $0x88] sm:$0xff]  ;;  %v9593_v18 = vld [vmem:[%s14094_s0 + $0x80] sm:$0xff] }
   0x7   :  { %14184 = vst [vmem:[#allocation2_spill] sm:$0xff] %v9581_v16  ;;  %v9600_v19 = vld [vmem:[%s14094_s0 + $0x98] sm:$0xff]  ;;  %v9605_v20 = vld [vmem:[%s14094_s0 + $0x90] sm:$0xff]  ;;  %v48_v21 = vld [vmem:[%s14094_s0 + $0xa8] sm:$0xff] }
   0x8   :  { %14185 = vst [vmem:[#allocation3_spill] sm:$0xff] %v9605_v20  ;;  %v9615_v22 = vld [vmem:[%s14094_s0 + $0xa0] sm:$0xff]  ;;  %v9621_v23 = vld [vmem:[%s14094_s0 + $0xb8] sm:$0xff]  ;;  %v49_v24 = vld [vmem:[%s14094_s0 + $0xb0] sm:$0xff] }
   0x9   :  { %v9630_v25 = vld [vmem:[%s14094_s0 + $0xc8] sm:$0xff]  ;;  %v9635_v26 = vld [vmem:[%s14094_s0 + $0xc0] sm:$0xff]  ;;  %v9642_v27 = vld [vmem:[%s14094_s0 + $0xd8] sm:$0xff] }
   0xa   :  { %142 = vperm.xlu1 %9290, %v9516_v5   ;;  %137 = vperm.xlu0 %9289, %v9521_v6   ;;  %14186 = vst [vmem:[#allocation4_spill] sm:$0xff] %v9635_v26  ;;  %14187 = vst [vmem:[#allocation5_spill] sm:$0xff] %v9642_v27  ;;  %v53_v28 = vld [vmem:[%s14094_s0 + $0xd0] sm:$0xff]  ;;  %v56_v29 = vld [vmem:[%s14094_s0 + $0xe8] sm:$0xff] }
   0xb   :  { %v9654_v30 = vld [vmem:[%s14094_s0 + $0xe0] sm:$0xff]  ;;  %v9660_v31 = vld [vmem:[%s14094_s0 + $0xf8] sm:$0xff]  ;;  %v57_v32 = vld [vmem:[%s14094_s0 + $0xf0] sm:$0xff] }
   0xc   :  { %v9669_v33 = vld [vmem:[%s14094_s0 + $0x108] sm:$0xff]  ;;  %v9674_v34 = vld [vmem:[%s14094_s0 + $0x100] sm:$0xff]  ;;  %v9681_v35 = vld [vmem:[%s14094_s0 + $0x118] sm:$0xff] }
   0xd   :  { %14188 = vst [vmem:[#allocation6_spill] sm:$0xff] %v9674_v34  ;;  %14189 = vst [vmem:[#allocation7_spill] sm:$0xff] %v9681_v35  ;;  %v61_v36 = vld [vmem:[%s14094_s0 + $0x110] sm:$0xff]  ;;  %v64_v37 = vld [vmem:[%s14094_s0 + $0x128] sm:$0xff] }
   0xe   :  { %152 = vperm.xlu1 %9290, %v9528_v7   ;;  %147 = vperm.xlu0 %9289, %v9533_v8   ;;  %v9693_v38 = vld [vmem:[%s14094_s0 + $0x120] sm:$0xff]  ;;  %v9699_v39 = vld [vmem:[%s14094_s0 + $0x138] sm:$0xff]  ;;  %v65_v40 = vld [vmem:[%s14094_s0 + $0x130] sm:$0xff] }
   0xf   :  { %v9708_v41 = vld [vmem:[%s14094_s0 + $0x148] sm:$0xff]  ;;  %v9713_v42 = vld [vmem:[%s14094_s0 + $0x140] sm:$0xff]  ;;  %v9720_v43 = vld [vmem:[%s14094_s0 + $0x158] sm:$0xff] }
  0x10   :  { %v9725_v44 = vld [vmem:[%s14094_s0 + $0x150] sm:$0xff]  ;;  %v9732_v45 = vld [vmem:[%s14094_s0 + $0x168] sm:$0xff]  ;;  %v9737_v46 = vld [vmem:[%s14094_s0 + $0x160] sm:$0xff] }
  0x11   :  { %v9744_v47 = vld [vmem:[%s14094_s0 + $0x178] sm:$0xff]  ;;  %v9749_v48 = vld [vmem:[%s14094_s0 + $0x170] sm:$0xff]  ;;  %v9756_v49 = vld [vmem:[%s14094_s0 + $0x188] sm:$0xff] }
  0x12   :  { %162 = vperm.xlu1 %9290, %v9540_v9   ;;  %157 = vperm.xlu0 %9289, %v9545_v10   ;;  %v9761_v50 = vld [vmem:[%s14094_s0 + $0x180] sm:$0xff]  ;;  %v9768_v51 = vld [vmem:[%s14094_s0 + $0x198] sm:$0xff]  ;;  %v9773_v52 = vld [vmem:[%s14094_s0 + $0x190] sm:$0xff] }
  0x13   :  { %v9780_v53 = vld [vmem:[%s14094_s0 + $0x1a8] sm:$0xff]  ;;  %v9785_v54 = vld [vmem:[%s14094_s0 + $0x1a0] sm:$0xff]  ;;  %v9792_v55 = vld [vmem:[%s14094_s0 + $0x1b8] sm:$0xff] }
  0x14   :  { %v9797_v56 = vld [vmem:[%s14094_s0 + $0x1b0] sm:$0xff]  ;;  %v9804_v57 = vld [vmem:[%s14094_s0 + $0x1c8] sm:$0xff]  ;;  %v9809_v58 = vld [vmem:[%s14094_s0 + $0x1c0] sm:$0xff] }
  0x15   :  { %v9816_v59 = vld [vmem:[%s14094_s0 + $0x1d8] sm:$0xff]  ;;  %v9821_v60 = vld [vmem:[%s14094_s0 + $0x1d0] sm:$0xff]  ;;  %v9828_v61 = vld [vmem:[%s14094_s0 + $0x1e8] sm:$0xff] }
  0x16   :  { %172 = vperm.xlu1 %9290, %v9552_v11   ;;  %167 = vperm.xlu0 %9289, %v9557_v12   ;;  %v9833_v62 = vld [vmem:[%s14094_s0 + $0x1e0] sm:$0xff]  ;;  %v9840_v63 = vld [vmem:[%s14094_s0 + $0x1f8] sm:$0xff]  ;;  %v9845_v0 = vld [vmem:[%s14094_s0 + $0x1f0] sm:$0xff] }
  0x17   :  { %14190 = vst [vmem:[#allocation8_spill] sm:$0xff] %v9840_v63  ;;  %14191 = vst [vmem:[#allocation9_spill] sm:$0xff] %v9845_v0 }
  0x1a   :  { %182 = vperm.xlu1 %9290, %v9564_v13   ;;  %177 = vperm.xlu0 %9289, %v9569_v14  }
  0x1e   :  { %192 = vperm.xlu1 %9290, %v9576_v15   ;;  %187 = vperm.xlu0 %9289, %v9581_v16  }
  0x22   :  { %202 = vperm.xlu1 %9290, %v9588_v17   ;;  %197 = vperm.xlu0 %9289, %v9593_v18  }
  0x26   :  { %212 = vperm.xlu1 %9290, %v9600_v19   ;;  %207 = vperm.xlu0 %9289, %v9605_v20  }
  0x2a   :  { %222 = vperm.xlu1 %9290, %v48_v21   ;;  %217 = vperm.xlu0 %9289, %v9615_v22   ;;  %v9852_v21 = vld [vmem:[%s14094_s0 + $0x208] sm:$0xff] }
  0x2e   :  { %232 = vperm.xlu1 %9290, %v9621_v23   ;;  %227 = vperm.xlu0 %9289, %v49_v24   ;;  %v9857_v24 = vld [vmem:[%s14094_s0 + $0x200] sm:$0xff] }
  0x32   :  { %242 = vperm.xlu1 %9290, %v9630_v25   ;;  %237 = vperm.xlu0 %9289, %v9635_v26   ;;  %v14117_v26 = vmov 1  }
  0x36   :  { %252 = vperm.xlu1 %9290, %v9642_v27   ;;  %247 = vperm.xlu0 %9289, %v53_v28  }
  0x3a   :  { %262 = vperm.xlu1 %9290, %v56_v29   ;;  %257 = vperm.xlu0 %9289, %v9654_v30  }
  0x3e   :  { %272 = vperm.xlu1 %9290, %v9660_v31   ;;  %267 = vperm.xlu0 %9289, %v57_v32   ;;  %v9868_v32 = vld [vmem:[%s14094_s0 + $0x218] sm:$0xff] }
  0x42   :  { %282 = vperm.xlu1 %9290, %v9669_v33   ;;  %277 = vperm.xlu0 %9289, %v9674_v34  }
  0x46   :  { %292 = vperm.xlu1 %9290, %v9681_v35   ;;  %287 = vperm.xlu0 %9289, %v61_v36   ;;  %v9873_v36 = vld [vmem:[%s14094_s0 + $0x210] sm:$0xff] }
  0x4a   :  { %302 = vperm.xlu1 %9290, %v64_v37   ;;  %297 = vperm.xlu0 %9289, %v9693_v38  }
  0x4e   :  { %312 = vperm.xlu1 %9290, %v9699_v39   ;;  %307 = vperm.xlu0 %9289, %v65_v40  }
  0x52   :  { %322 = vperm.xlu1 %9290, %v9708_v41   ;;  %317 = vperm.xlu0 %9289, %v9713_v42  }
  0x56   :  { %332 = vperm.xlu1 %9290, %v9720_v43   ;;  %327 = vperm.xlu0 %9289, %v9725_v44  }
  0x5a   :  { %342 = vperm.xlu1 %9290, %v9732_v45   ;;  %337 = vperm.xlu0 %9289, %v9737_v46  }
  0x5e   :  { %352 = vperm.xlu1 %9290, %v9744_v47   ;;  %347 = vperm.xlu0 %9289, %v9749_v48  }
  0x62   :  { %362 = vperm.xlu1 %9290, %v9756_v49   ;;  %357 = vperm.xlu0 %9289, %v9761_v50  }
  0x66   :  { %372 = vperm.xlu1 %9290, %v9768_v51   ;;  %367 = vperm.xlu0 %9289, %v9773_v52  }
  0x6a   :  { %382 = vperm.xlu1 %9290, %v9780_v53   ;;  %377 = vperm.xlu0 %9289, %v9785_v54  }
  0x6e   :  { %392 = vperm.xlu1 %9290, %v9792_v55   ;;  %387 = vperm.xlu0 %9289, %v9797_v56  }
  0x72   :  { %402 = vperm.xlu1 %9290, %v9804_v57   ;;  %397 = vperm.xlu0 %9289, %v9809_v58  }
  0x76   :  { %412 = vperm.xlu1 %9290, %v9816_v59   ;;  %407 = vperm.xlu0 %9289, %v9821_v60  }
  0x7a   :  { %422 = vperm.xlu1 %9290, %v9828_v61   ;;  %417 = vperm.xlu0 %9289, %v9833_v62  }
  0x7e   :  { %432 = vperm.xlu1 %9290, %v9840_v63   ;;  %427 = vperm.xlu0 %9289, %v9845_v0  }
  0x81   :  { %v9859_v28 = vpop.permute.xlu1 %127  ;;  %v9861_v29 = vpop.permute.xlu0 %117 }
  0x82   :  { %14192 = vst [vmem:[#allocation10_spill] sm:$0xff] %v9859_v28  ;;  %14193 = vst [vmem:[#allocation11_spill] sm:$0xff] %v9861_v29  ;;  %442 = vperm.xlu1 %9290, %v9852_v21   ;;  %437 = vperm.xlu0 %9289, %v9857_v24   ;;  %v9884_v29 = vld [vmem:[%s14094_s0 + $0x228] sm:$0xff]  ;;  %v9889_v28 = vld [vmem:[%s14094_s0 + $0x220] sm:$0xff] }
  0x83   :  { %14196 = vst [vmem:[#allocation14_spill] sm:$0xff] %v9889_v28 }
  0x85   :  { %v9875_v37 = vpop.permute.xlu1 %132  ;;  %v9877_v40 = vpop.permute.xlu0 %122 }
  0x86   :  { %14194 = vst [vmem:[#allocation12_spill] sm:$0xff] %v9875_v37  ;;  %14195 = vst [vmem:[#allocation13_spill] sm:$0xff] %v9877_v40  ;;  %452 = vperm.xlu1 %9290, %v9868_v32   ;;  %447 = vperm.xlu0 %9289, %v9873_v36   ;;  %v98_v40 = vld [vmem:[%s14094_s0 + $0x238] sm:$0xff]  ;;  %v9903_v37 = vld [vmem:[%s14094_s0 + $0x230] sm:$0xff] }
  0x87   :  { %14199 = vst [vmem:[#allocation17_spill] sm:$0xff] %v9903_v37 }
  0x89   :  { %v9891_v63 = vpop.permute.xlu1 %142  ;;  %v9893_v0 = vpop.permute.xlu0 %137 }
  0x8a   :  { %14197 = vst [vmem:[#allocation15_spill] sm:$0xff] %v9891_v63  ;;  %14198 = vst [vmem:[#allocation16_spill] sm:$0xff] %v9893_v0  ;;  %462 = vperm.xlu1 %9290, %v9884_v29   ;;  %457 = vperm.xlu0 %9289, %v9889_v28   ;;  %v9913_v0 = vld [vmem:[%s14094_s0 + $0x248] sm:$0xff]  ;;  %v9918_v63 = vld [vmem:[%s14094_s0 + $0x240] sm:$0xff] }
  0x8b   :  { %14202 = vst [vmem:[#allocation20_spill] sm:$0xff] %v9913_v0 }
  0x8d   :  { %v9905_v20 = vpop.permute.xlu1 %152  ;;  %v9907_v35 = vpop.permute.xlu0 %147 }
  0x8e   :  { %14200 = vst [vmem:[#allocation18_spill] sm:$0xff] %v9905_v20  ;;  %14201 = vst [vmem:[#allocation19_spill] sm:$0xff] %v9907_v35  ;;  %472 = vperm.xlu1 %9290, %v98_v40   ;;  %467 = vperm.xlu0 %9289, %v9903_v37   ;;  %v9929_v40 = vld [vmem:[%s14094_s0 + $0x258] sm:$0xff]  ;;  %v9934_v37 = vld [vmem:[%s14094_s0 + $0x250] sm:$0xff] }
  0x8f   :  { %14205 = vst [vmem:[#allocation23_spill] sm:$0xff] %v9934_v37 }
  0x91   :  { %v9920_v34 = vpop.permute.xlu1 %162  ;;  %v9922_v28 = vpop.permute.xlu0 %157 }
  0x92   :  { %14203 = vst [vmem:[#allocation21_spill] sm:$0xff] %v9920_v34  ;;  %14204 = vst [vmem:[#allocation22_spill] sm:$0xff] %v9922_v28  ;;  %482 = vperm.xlu1 %9290, %v9913_v0   ;;  %477 = vperm.xlu0 %9289, %v9918_v63   ;;  %v9945_v28 = vld [vmem:[%s14094_s0 + $0x268] sm:$0xff]  ;;  %v9950_v34 = vld [vmem:[%s14094_s0 + $0x260] sm:$0xff] }
  0x93   :  { %14208 = vst [vmem:[#allocation26_spill] sm:$0xff] %v9950_v34 }
  0x95   :  { %v9936_v35 = vpop.permute.xlu1 %172  ;;  %v9938_v20 = vpop.permute.xlu0 %167 }
  0x96   :  { %14206 = vst [vmem:[#allocation24_spill] sm:$0xff] %v9936_v35  ;;  %14207 = vst [vmem:[#allocation25_spill] sm:$0xff] %v9938_v20  ;;  %492 = vperm.xlu1 %9290, %v9929_v40   ;;  %487 = vperm.xlu0 %9289, %v9934_v37   ;;  %v106_v20 = vld [vmem:[%s14094_s0 + $0x278] sm:$0xff]  ;;  %v105_v35 = vld [vmem:[%s14094_s0 + $0x270] sm:$0xff] }
  0x99   :  { %v9952_v0 = vpop.permute.xlu1 %182  ;;  %v9954_v27 = vpop.permute.xlu0 %177 }
  0x9a   :  { %14209 = vst [vmem:[#allocation27_spill] sm:$0xff] %v9952_v0  ;;  %14210 = vst [vmem:[#allocation28_spill] sm:$0xff] %v9954_v27  ;;  %502 = vperm.xlu1 %9290, %v9945_v28   ;;  %497 = vperm.xlu0 %9289, %v9950_v34  }
  0x9d   :  { %v9964_v37 = vpop.permute.xlu1 %192  ;;  %v9966_v16 = vpop.permute.xlu0 %187 }
  0x9e   :  { %14211 = vst [vmem:[#allocation29_spill] sm:$0xff] %v9964_v37  ;;  %14212 = vst [vmem:[#allocation30_spill] sm:$0xff] %v9966_v16  ;;  %512 = vperm.xlu1 %9290, %v106_v20   ;;  %507 = vperm.xlu0 %9289, %v105_v35  }
  0xa1   :  { %v9968_v0 = vpop.permute.xlu1 %202  ;;  %v9970_v27 = vpop.permute.xlu0 %197 }
  0xa2   :  { %14213 = vst [vmem:[#allocation31_spill] sm:$0xff] %v9968_v0  ;;  %14214 = vst [vmem:[#allocation32_spill] sm:$0xff] %v9970_v27  ;;  %9292 = vset.pattern.permute.xlu1 %v14117_v26  ;;  %9291 = vset.pattern.permute.xlu0 %v14117_v26  ;;  %v14119_v0 = vmov 2  }
  0xa3   :  { %684 = vperm.xlu1 %9292, %v9509_v4   ;;  %680 = vperm.xlu0 %9291, %v9497_v2  }
  0xa5   :  { %v9976_v34 = vpop.permute.xlu1 %212  ;;  %v9978_v37 = vpop.permute.xlu0 %207 }
  0xa6   :  { %14215 = vst [vmem:[#allocation33_spill] sm:$0xff] %v9976_v34  ;;  %14216 = vst [vmem:[#allocation34_spill] sm:$0xff] %v9978_v37 }
  0xa7   :  { %688 = vperm.xlu1 %9292, %v9492_v1   ;;  %692 = vperm.xlu0 %9291, %v9504_v3  }
  0xa9   :  { %v9982_v20 = vpop.permute.xlu1 %222  ;;  %v9984_v35 = vpop.permute.xlu0 %217 }
  0xaa   :  { %14217 = vst [vmem:[#allocation35_spill] sm:$0xff] %v9982_v20  ;;  %14218 = vst [vmem:[#allocation36_spill] sm:$0xff] %v9984_v35 }
  0xab   :  { %696 = vperm.xlu1 %9292, %v9521_v6   ;;  %700 = vperm.xlu0 %9291, %v9516_v5  }
  0xad   :  { %v9988_v26 = vpop.permute.xlu1 %232  ;;  %v9990_v27 = vpop.permute.xlu0 %227 }
  0xae   :  { %14219 = vst [vmem:[#allocation37_spill] sm:$0xff] %v9988_v26  ;;  %14220 = vst [vmem:[#allocation38_spill] sm:$0xff] %v9990_v27 }
  0xaf   :  { %704 = vperm.xlu1 %9292, %v9533_v8   ;;  %708 = vperm.xlu0 %9291, %v9528_v7  }
  0xb1   :  { %v9994_v37 = vpop.permute.xlu1 %242  ;;  %v9996_v34 = vpop.permute.xlu0 %237 }
  0xb2   :  { %14221 = vst [vmem:[#allocation39_spill] sm:$0xff] %v9994_v37  ;;  %14222 = vst [vmem:[#allocation40_spill] sm:$0xff] %v9996_v34  ;;  %v14238_v34 = vmov 2  }
  0xb3   :  { %840 = vperm.xlu1 %9292, %v9713_v42   ;;  %844 = vperm.xlu0 %9291, %v9708_v41  }
  0xb5   :  { %v10000_v20 = vpop.permute.xlu1 %252  ;;  %v10002_v35 = vpop.permute.xlu0 %247 }
  0xb6   :  { %14223 = vst [vmem:[#allocation41_spill] sm:$0xff] %v10000_v20  ;;  %14224 = vst [vmem:[#allocation42_spill] sm:$0xff] %v10002_v35 }
  0xb7   :  { %848 = vperm.xlu1 %9292, %v9725_v44   ;;  %852 = vperm.xlu0 %9291, %v9720_v43  }
  0xb9   :  { %v10006_v26 = vpop.permute.xlu1 %262  ;;  %v10008_v27 = vpop.permute.xlu0 %257 }
  0xba   :  { %14225 = vst [vmem:[#allocation43_spill] sm:$0xff] %v10006_v26  ;;  %14226 = vst [vmem:[#allocation44_spill] sm:$0xff] %v10008_v27 }
  0xbb   :  { %9293 = vset.pattern.permute.xlu1 %v14119_v0  ;;  %860 = vperm.xlu0 %9291, %v9732_v45  }
  0xbc   :  { %1324 = vperm.xlu1 %9293, %v9713_v42  }
  0xbd   :  { %v10013_v37 = vpop.permute.xlu1 %272  ;;  %v10015_v20 = vpop.permute.xlu0 %267 }
  0xbe   :  { %14227 = vst [vmem:[#allocation45_spill] sm:$0xff] %v10013_v37  ;;  %14228 = vst [vmem:[#allocation46_spill] sm:$0xff] %v10015_v20 }
  0xbf   :  { %872 = vperm.xlu0 %9291, %v9761_v50  }
  0xc0   :  { %1332 = vperm.xlu1 %9293, %v9725_v44  }
  0xc1   :  { %v10019_v35 = vpop.permute.xlu1 %282  ;;  %v10021_v26 = vpop.permute.xlu0 %277 }
  0xc2   :  { %14229 = vst [vmem:[#allocation47_spill] sm:$0xff] %v10019_v35  ;;  %14230 = vst [vmem:[#allocation48_spill] sm:$0xff] %v10021_v26  ;;  %v14121_v35 = vmov 3  }
  0xc3   :  { %884 = vperm.xlu0 %9291, %v9768_v51  }
  0xc4   :  { %1336 = vperm.xlu1 %9293, %v9720_v43  }
  0xc5   :  { %v10025_v0 = vpop.permute.xlu1 %292  ;;  %v10027_v27 = vpop.permute.xlu0 %287 }
  0xc6   :  { %14231 = vst [vmem:[#allocation49_spill] sm:$0xff] %v10025_v0  ;;  %14232 = vst [vmem:[#allocation50_spill] sm:$0xff] %v10027_v27 }
  0xc7   :  { %716 = vperm.xlu0 %9291, %v9540_v9  }
  0xc8   :  { %1168 = vperm.xlu1 %9293, %v9509_v4  }
  0xc9   :  { %v10031_v37 = vpop.permute.xlu1 %302  ;;  %v10033_v20 = vpop.permute.xlu0 %297 }
  0xca   :  { %14233 = vst [vmem:[#allocation51_spill] sm:$0xff] %v10031_v37  ;;  %14234 = vst [vmem:[#allocation52_spill] sm:$0xff] %v10033_v20 }
  0xcb   :  { %892 = vperm.xlu0 %9291, %v9780_v53  }
  0xcc   :  { %9294 = vset.pattern.permute.xlu1 %v14121_v35 }
  0xcd   :  { %v10037_v26 = vpop.permute.xlu1 %312  ;;  %1812 = vperm.xlu1 %9294, %v9708_v41   ;;  %v10040_v0 = vpop.permute.xlu0 %307 }
  0xce   :  { %14235 = vst [vmem:[#allocation53_spill] sm:$0xff] %v10037_v26  ;;  %14236 = vst [vmem:[#allocation54_spill] sm:$0xff] %v10040_v0  ;;  %v14241_v26 = vmov 3  }
  0xcf   :  { %728 = vperm.xlu0 %9291, %v9569_v14  }
  0xd1   :  { %v10043_v27 = vpop.permute.xlu1 %322  ;;  %9295 = vset.pattern.permute.xlu1 %v14238_v34  ;;  %v10046_v37 = vpop.permute.xlu0 %317 }
  0xd2   :  { %14237 = vst [vmem:[#allocation55_spill] sm:$0xff] %v10043_v27  ;;  %14239 = vst [vmem:[#allocation56_spill] sm:$0xff] %v10046_v37  ;;  %1172 = vperm.xlu1 %9295, %v9492_v1  }
  0xd3   :  { %740 = vperm.xlu0 %9291, %v9576_v15  }
  0xd5   :  { %v10050_v20 = vpop.permute.xlu1 %332  ;;  %v10052_v35 = vpop.permute.xlu0 %327 }
  0xd6   :  { %14240 = vst [vmem:[#allocation57_spill] sm:$0xff] %v10052_v35  ;;  %9296 = vset.pattern.permute.xlu1 %v14241_v26 }
  0xd7   :  { %1816 = vperm.xlu1 %9296, %v9725_v44   ;;  %904 = vperm.xlu0 %9291, %v9809_v58  }
  0xd9   :  { %v10057_v0 = vpop.permute.xlu1 %342  ;;  %v10059_v27 = vpop.permute.xlu0 %337 }
  0xda   :  { %14242 = vst [vmem:[#allocation58_spill] sm:$0xff] %v10057_v0  ;;  %14243 = vst [vmem:[#allocation59_spill] sm:$0xff] %v10059_v27  ;;  %v14247_v0 = vmov 1  }
  0xdb   :  { %1820 = vperm.xlu1 %9296, %v9720_v43   ;;  %916 = vperm.xlu0 %9291, %v9816_v59  }
  0xdd   :  { %v10063_v37 = vpop.permute.xlu1 %352  ;;  %v10065_v16 = vpop.permute.xlu0 %347 }
  0xdf   :  { %1652 = vperm.xlu1 %9296, %v9509_v4   ;;  %748 = vperm.xlu0 %9291, %v9588_v17  }
  0xe1   :  { %v10069_v35 = vpop.permute.xlu1 %362  ;;  %v10071_v44 = vpop.permute.xlu0 %357 }
  0xe2   :  { %14244 = vst [vmem:[#allocation60_spill] sm:$0xff] %v10071_v44 }
  0xe3   :  { %1656 = vperm.xlu1 %9296, %v9492_v1   ;;  %924 = vperm.xlu0 %9291, %v9828_v61  }
  0xe5   :  { %v10075_v27 = vpop.permute.xlu1 %372  ;;  %v10077_v43 = vpop.permute.xlu0 %367 }
  0xe6   :  { %14245 = vst [vmem:[#allocation61_spill] sm:$0xff] %v10075_v27  ;;  %14246 = vst [vmem:[#allocation62_spill] sm:$0xff] %v10077_v43 }
  0xe7   :  { %9297 = vset.pattern.permute.xlu1 %v14247_v0  ;;  %760 = vperm.xlu0 %9291, %v9615_v22  }
  0xe8   :  { %856 = vperm.xlu1 %9297, %v9737_v46  }
  0xe9   :  { %v10082_v4 = vpop.permute.xlu1 %382  ;;  %v10084_v17 = vpop.permute.xlu0 %377 }
  0xea   :  { %14248 = vst [vmem:[#allocation63_spill] sm:$0xff] %v10084_v17 }
  0xeb   :  { %772 = vperm.xlu0 %9291, %v9621_v23  }
  0xec   :  { %864 = vperm.xlu1 %9297, %v9749_v48  }
  0xed   :  { %v10088_v1 = vpop.permute.xlu1 %392  ;;  %v10090_v44 = vpop.permute.xlu0 %387 }
  0xee   :  { %14249 = vst [vmem:[#allocation64_spill] sm:$0xff] %v10088_v1  ;;  %14250 = vst [vmem:[#allocation65_spill] sm:$0xff] %v10090_v44 }
  0xef   :  { %936 = vperm.xlu0 %9291, %v9857_v24  }
  0xf0   :  { %868 = vperm.xlu1 %9297, %v9744_v47  }
  0xf1   :  { %v10094_v43 = vpop.permute.xlu1 %402  ;;  %v10096_v27 = vpop.permute.xlu0 %397 }
  0xf2   :  { %14251 = vst [vmem:[#allocation66_spill] sm:$0xff] %v10096_v27 }
  0xf3   :  { %948 = vperm.xlu0 %9291, %v9868_v32  }
  0xf4   :  { %9298 = vset.pattern.permute.xlu1 %v14238_v34 }
  0xf5   :  { %v10100_v17 = vpop.permute.xlu1 %412  ;;  %1344 = vperm.xlu1 %9298, %v9732_v45   ;;  %v10103_v23 = vpop.permute.xlu0 %407 }
  0xf6   :  { %14252 = vst [vmem:[#allocation67_spill] sm:$0xff] %v10100_v17 }
  0xf7   :  { %780 = vperm.xlu0 %9291, %v9630_v25  }
  0xf9   :  { %v10106_v44 = vpop.permute.xlu1 %422  ;;  %1348 = vperm.xlu1 %9298, %v9749_v48   ;;  %v10109_v1 = vpop.permute.xlu0 %417 }
  0xfa   :  { %14253 = vst [vmem:[#allocation68_spill] sm:$0xff] %v10106_v44  ;;  %14254 = vst [vmem:[#allocation69_spill] sm:$0xff] %v10109_v1 }
  0xfb   :  { %956 = vperm.xlu0 %9291, %v9884_v29  }
  0xfd   :  { %v10112_v27 = vpop.permute.xlu1 %432  ;;  %1180 = vperm.xlu1 %9298, %v9521_v6   ;;  %v10115_v32 = vpop.permute.xlu0 %427 }
  0xfe   :  { %14255 = vst [vmem:[#allocation70_spill] sm:$0xff] %v10112_v27  ;;  %14256 = vst [vmem:[#allocation71_spill] sm:$0xff] %v10115_v32 }
  0xff   :  { %792 = vperm.xlu0 %9291, %v9654_v30  }
 0x101   :  { %v10118_v17 = vpop.permute.xlu1 %442  ;;  %9299 = vset.pattern.permute.xlu1 %v14241_v26  ;;  %v10121_v25 = vpop.permute.xlu0 %437 }
 0x102   :  { %14257 = vst [vmem:[#allocation72_spill] sm:$0xff] %v10118_v17  ;;  %14258 = vst [vmem:[#allocation73_spill] sm:$0xff] %v10121_v25  ;;  %1824 = vperm.xlu1 %9299, %v9737_v46  }
 0x103   :  { %804 = vperm.xlu0 %9291, %v9660_v31  }
 0x105   :  { %v10125_v1 = vpop.permute.xlu1 %452  ;;  %v10127_v44 = vpop.permute.xlu0 %447 }
 0x106   :  { %14259 = vst [vmem:[#allocation74_spill] sm:$0xff] %v10125_v1  ;;  %14260 = vst [vmem:[#allocation75_spill] sm:$0xff] %v10127_v44  ;;  %9300 = vset.pattern.permute.xlu1 %v14238_v34 }
 0x107   :  { %1188 = vperm.xlu1 %9300, %v9533_v8   ;;  %968 = vperm.xlu0 %9291, %v9918_v63  }
 0x109   :  { %v10132_v6 = vpop.permute.xlu1 %462  ;;  %v10134_v17 = vpop.permute.xlu0 %457 }
 0x10a   :  { %14261 = vst [vmem:[#allocation76_spill] sm:$0xff] %v10132_v6  ;;  %14262 = vst [vmem:[#allocation77_spill] sm:$0xff] %v10134_v17 }
 0x10b   :  { %1192 = vperm.xlu1 %9300, %v9528_v7   ;;  %980 = vperm.xlu0 %9291, %v9929_v40  }
 0x10d   :  { %v10138_v25 = vpop.permute.xlu1 %472  ;;  %v10140_v31 = vpop.permute.xlu0 %467 }
 0x10e   :  { %14263 = vst [vmem:[#allocation78_spill] sm:$0xff] %v10138_v25  ;;  %14264 = vst [vmem:[#allocation79_spill] sm:$0xff] %v10140_v31 }
 0x10f   :  { %9301 = vset.pattern.permute.xlu1 %v14241_v26  ;;  %812 = vperm.xlu0 %9291, %v9669_v33  }
 0x110   :  { %1836 = vperm.xlu1 %9301, %v9744_v47  }
 0x111   :  { %v10145_v8 = vpop.permute.xlu1 %482  ;;  %v10147_v63 = vpop.permute.xlu0 %477 }
 0x112   :  { %14265 = vst [vmem:[#allocation80_spill] sm:$0xff] %v10145_v8  ;;  %14266 = vst [vmem:[#allocation81_spill] sm:$0xff] %v10147_v63 }
 0x113   :  { %988 = vperm.xlu0 %9291, %v9945_v28  }
 0x114   :  { %1668 = vperm.xlu1 %9301, %v9516_v5  }
 0x115   :  { %v10151_v17 = vpop.permute.xlu1 %492  ;;  %v10153_v40 = vpop.permute.xlu0 %487 }
 0x116   :  { %14267 = vst [vmem:[#allocation82_spill] sm:$0xff] %v10151_v17  ;;  %14268 = vst [vmem:[#allocation83_spill] sm:$0xff] %v10153_v40 }
 0x117   :  { %824 = vperm.xlu0 %9291, %v9693_v38  }
 0x118   :  { %1676 = vperm.xlu1 %9301, %v9528_v7  }
 0x119   :  { %v10157_v25 = vpop.permute.xlu1 %502  ;;  %v10159_v33 = vpop.permute.xlu0 %497 }
 0x11a   :  { %14269 = vst [vmem:[#allocation84_spill] sm:$0xff] %v10157_v25  ;;  %14270 = vst [vmem:[#allocation85_spill] sm:$0xff] %v10159_v33 }
 0x11b   :  { %836 = vperm.xlu0 %9291, %v9699_v39  }
 0x11c   :  { %9302 = vset.pattern.permute.xlu1 %v14247_v0 }
 0x11d   :  { %v10163_v8 = vpop.permute.xlu1 %512  ;;  %876 = vperm.xlu1 %9302, %v9756_v49   ;;  %v10166_v28 = vpop.permute.xlu0 %507 }
 0x11e   :  { %14271 = vst [vmem:[#allocation86_spill] sm:$0xff] %v10163_v8  ;;  %14272 = vst [vmem:[#allocation87_spill] sm:$0xff] %v10166_v28 }
 0x11f   :  { %9354 = vset.pattern.permute.xlu0 %v14238_v34 }
 0x120   :  { %1328 = vperm.xlu0 %9354, %v9708_v41  }
 0x121   :  { %880 = vperm.xlu1 %9302, %v9773_v52  }
 0x122   :  { %v10171_v7 = vpop.permute.xlu1 %684  ;;  %v10173_v25 = vpop.permute.xlu0 %680 }
 0x124   :  { %1164 = vperm.xlu0 %9354, %v9497_v2  }
 0x125   :  { %712 = vperm.xlu1 %9302, %v9545_v10  }
 0x126   :  { %v10177_v39 = vpop.permute.xlu1 %688  ;;  %v10179_v8 = vpop.permute.xlu0 %692 }
 0x128   :  { %1176 = vperm.xlu0 %9354, %v9504_v3  }
 0x129   :  { %9303 = vset.pattern.permute.xlu1 %v14238_v34 }
 0x12a   :  { %1356 = vperm.xlu1 %9303, %v9761_v50   ;;  %v10184_v41 = vpop.permute.xlu1 %696  ;;  %v10186_v28 = vpop.permute.xlu0 %700 }
 0x12c   :  { %1340 = vperm.xlu0 %9354, %v9737_v46  }
 0x12e   :  { %9304 = vset.pattern.permute.xlu1 %v14247_v0  ;;  %v10190_v33 = vpop.permute.xlu1 %704  ;;  %v10192_v17 = vpop.permute.xlu0 %708 }
 0x12f   :  { %720 = vperm.xlu1 %9304, %v9557_v12  }
 0x130   :  { %1352 = vperm.xlu0 %9354, %v9744_v47  }
 0x132   :  { %v10196_v40 = vpop.permute.xlu1 %840  ;;  %v10198_v63 = vpop.permute.xlu0 %844 }
 0x133   :  { %724 = vperm.xlu1 %9304, %v9552_v11  }
 0x134   :  { %1184 = vperm.xlu0 %9354, %v9516_v5  }
 0x136   :  { %v10202_v31 = vpop.permute.xlu1 %848  ;;  %v10204_v46 = vpop.permute.xlu0 %852 }
 0x137   :  { %9305 = vset.pattern.permute.xlu1 %v14238_v34 }
 0x138   :  { %1368 = vperm.xlu1 %9305, %v9768_v51   ;;  %1360 = vperm.xlu0 %9354, %v9756_v49  }
 0x13a   :  { %v10209_v6 = vpop.permute.xlu0 %860 }
 0x13b   :  { %v10211_v47 = vpop.permute.xlu1 %1324 }
 0x13c   :  { %1200 = vperm.xlu1 %9305, %v9540_v9   ;;  %1364 = vperm.xlu0 %9354, %v9773_v52  }
 0x13e   :  { %v10215_v1 = vpop.permute.xlu0 %872 }
 0x13f   :  { %14273 = vst [vmem:[#allocation88_spill] sm:$0xff] %v10215_v1  ;;  %v10217_v5 = vpop.permute.xlu1 %1332 }
 0x140   :  { %9306 = vset.pattern.permute.xlu1 %v14241_v26  ;;  %1196 = vperm.xlu0 %9354, %v9545_v10  }
 0x141   :  { %1844 = vperm.xlu1 %9306, %v9756_v49  }
 0x142   :  { %v10222_v44 = vpop.permute.xlu0 %884 }
 0x143   :  { %14274 = vst [vmem:[#allocation89_spill] sm:$0xff] %v10222_v44  ;;  %v10224_v27 = vpop.permute.xlu1 %1336 }
 0x144   :  { %1208 = vperm.xlu0 %9354, %v9552_v11  }
 0x145   :  { %9307 = vset.pattern.permute.xlu1 %v14238_v34 }
 0x146   :  { %1204 = vperm.xlu1 %9307, %v9557_v12   ;;  %v10229_v32 = vpop.permute.xlu0 %716 }
 0x147   :  { %14275 = vst [vmem:[#allocation90_spill] sm:$0xff] %v10229_v32  ;;  %v10231_v1 = vpop.permute.xlu1 %1168 }
 0x148   :  { %1372 = vperm.xlu0 %9354, %v9785_v54  }
 0x14a   :  { %9308 = vset.pattern.permute.xlu1 %v14241_v26  ;;  %v10235_v10 = vpop.permute.xlu0 %892 }
 0x14b   :  { %14276 = vst [vmem:[#allocation91_spill] sm:$0xff] %v10235_v10  ;;  %1848 = vperm.xlu1 %9308, %v9773_v52  }
 0x14c   :  { %v10238_v49 = vpop.permute.xlu1 %1812  ;;  %1212 = vperm.xlu0 %9354, %v9569_v14  }
 0x14e   :  { %v10241_v11 = vpop.permute.xlu0 %728 }
 0x14f   :  { %14277 = vst [vmem:[#allocation92_spill] sm:$0xff] %v10241_v11  ;;  %1852 = vperm.xlu1 %9308, %v9768_v51  }
 0x150   :  { %1392 = vperm.xlu0 %9354, %v9804_v57  }
 0x151   :  { %v10245_v32 = vpop.permute.xlu1 %1172 }
 0x152   :  { %14278 = vst [vmem:[#allocation93_spill] sm:$0xff] %v10245_v32  ;;  %v10247_v44 = vpop.permute.xlu0 %740 }
 0x153   :  { %14279 = vst [vmem:[#allocation94_spill] sm:$0xff] %v10247_v44  ;;  %1684 = vperm.xlu1 %9308, %v9540_v9  }
 0x154   :  { %1396 = vperm.xlu0 %9354, %v9821_v60  }
 0x156   :  { %v10251_v10 = vpop.permute.xlu1 %1816  ;;  %v10253_v52 = vpop.permute.xlu0 %904 }
 0x157   :  { %14280 = vst [vmem:[#allocation95_spill] sm:$0xff] %v10253_v52  ;;  %1688 = vperm.xlu1 %9308, %v9557_v12  }
 0x158   :  { %1228 = vperm.xlu0 %9354, %v9593_v18  }
 0x15a   :  { %v10257_v14 = vpop.permute.xlu1 %1820  ;;  %v10259_v51 = vpop.permute.xlu0 %916 }
 0x15b   :  { %14281 = vst [vmem:[#allocation96_spill] sm:$0xff] %v10259_v51  ;;  %9309 = vset.pattern.permute.xlu1 %v14247_v0 }
 0x15c   :  { %888 = vperm.xlu1 %9309, %v9785_v54   ;;  %1240 = vperm.xlu0 %9354, %v9600_v19  }
 0x15e   :  { %v10264_v9 = vpop.permute.xlu1 %1652  ;;  %v10266_v44 = vpop.permute.xlu0 %748 }
 0x15f   :  { %14282 = vst [vmem:[#allocation97_spill] sm:$0xff] %v10264_v9  ;;  %14283 = vst [vmem:[#allocation98_spill] sm:$0xff] %v10266_v44 }
 0x160   :  { %896 = vperm.xlu1 %9309, %v9797_v56   ;;  %1404 = vperm.xlu0 %9354, %v9833_v62  }
 0x162   :  { %v10270_v12 = vpop.permute.xlu1 %1656  ;;  %v10272_v52 = vpop.permute.xlu0 %924 }
 0x163   :  { %14284 = vst [vmem:[#allocation99_spill] sm:$0xff] %v10270_v12  ;;  %14285 = vst [vmem:[#allocation100_spill] sm:$0xff] %v10272_v52  ;;  %v14293_v12 = vld [vmem:[#allocation2_spill] sm:$0xff] }
 0x164   :  { %900 = vperm.xlu1 %9309, %v9792_v55   ;;  %1244 = vperm.xlu0 %9354, %v9615_v22  }
 0x166   :  { %v10276_v51 = vpop.permute.xlu0 %760 }
 0x167   :  { %14286 = vst [vmem:[#allocation101_spill] sm:$0xff] %v10276_v51  ;;  %v10278_v11 = vpop.permute.xlu1 %856  ;;  %v14292_v51 = vld [vmem:[#allocation4_spill] sm:$0xff] }
 0x168   :  { %14287 = vst [vmem:[#allocation102_spill] sm:$0xff] %v10278_v11  ;;  %732 = vperm.xlu1 %9309, %v9564_v13   ;;  %1424 = vperm.xlu0 %9354, %v9852_v21  }
 0x16a   :  { %v10282_v44 = vpop.permute.xlu0 %772 }
 0x16b   :  { %14288 = vst [vmem:[#allocation103_spill] sm:$0xff] %v10282_v44  ;;  %v10284_v9 = vpop.permute.xlu1 %864 }
 0x16c   :  { %14289 = vst [vmem:[#allocation104_spill] sm:$0xff] %v10284_v9  ;;  %9310 = vset.pattern.permute.xlu1 %v14238_v34  ;;  %1428 = vperm.xlu0 %9354, %v9873_v36   ;;  %v14296_v9 = vld [vmem:[#allocation5_spill] sm:$0xff] }
 0x16d   :  { %1376 = vperm.xlu1 %9310, %v9780_v53  }
 0x16e   :  { %v10289_v52 = vpop.permute.xlu0 %936 }
 0x16f   :  { %14290 = vst [vmem:[#allocation105_spill] sm:$0xff] %v10289_v52  ;;  %v10291_v22 = vpop.permute.xlu1 %868 }
 0x170   :  { %14291 = vst [vmem:[#allocation106_spill] sm:$0xff] %v10291_v22  ;;  %1260 = vperm.xlu0 %9354, %v14292_v51   ;;  %v14299_v22 = vld [vmem:[#allocation14_spill] sm:$0xff] }
 0x171   :  { %9311 = vset.pattern.permute.xlu1 %v14247_v0 }
 0x172   :  { %736 = vperm.xlu1 %9311, %v14293_v12   ;;  %v10296_v21 = vpop.permute.xlu0 %948 }
 0x173   :  { %14294 = vst [vmem:[#allocation4_spill] sm:$0xff] %v10296_v21 }
 0x174   :  { %v10298_v44 = vpop.permute.xlu1 %1344  ;;  %1272 = vperm.xlu0 %9354, %v14296_v9   ;;  %v14303_v9 = vld [vmem:[#allocation20_spill] sm:$0xff] }
 0x175   :  { %14295 = vst [vmem:[#allocation2_spill] sm:$0xff] %v10298_v44 }
 0x176   :  { %9312 = vset.pattern.permute.xlu1 %v14238_v34  ;;  %v10302_v36 = vpop.permute.xlu0 %780 }
 0x177   :  { %14297 = vst [vmem:[#allocation5_spill] sm:$0xff] %v10302_v36  ;;  %1380 = vperm.xlu1 %9312, %v9797_v56  }
 0x178   :  { %v10305_v52 = vpop.permute.xlu1 %1348  ;;  %1436 = vperm.xlu0 %9354, %v14299_v22   ;;  %v14306_v22 = vld [vmem:[#allocation23_spill] sm:$0xff] }
 0x179   :  { %14298 = vst [vmem:[#allocation107_spill] sm:$0xff] %v10305_v52  ;;  %v14385_v52 = vld [vmem:[#allocation28_spill] sm:$0xff] }
 0x17a   :  { %v10308_v51 = vpop.permute.xlu0 %956 }
 0x17b   :  { %14300 = vst [vmem:[#allocation14_spill] sm:$0xff] %v10308_v51  ;;  %1384 = vperm.xlu1 %9312, %v9792_v55  }
 0x17c   :  { %v10311_v11 = vpop.permute.xlu1 %1180  ;;  %1276 = vperm.xlu0 %9354, %v9654_v30   ;;  %v14309_v30 = vld [vmem:[#allocation6_spill] sm:$0xff] }
 0x17d   :  { %14301 = vst [vmem:[#allocation108_spill] sm:$0xff] %v10311_v11 }
 0x17e   :  { %v10314_v21 = vpop.permute.xlu0 %792 }
 0x17f   :  { %14302 = vst [vmem:[#allocation109_spill] sm:$0xff] %v10314_v21  ;;  %1216 = vperm.xlu1 %9312, %v9564_v13  }
 0x180   :  { %1456 = vperm.xlu0 %9354, %v14303_v9  }
 0x181   :  { %v10318_v36 = vpop.permute.xlu1 %1824 }
 0x182   :  { %14304 = vst [vmem:[#allocation20_spill] sm:$0xff] %v10318_v36  ;;  %v10320_v44 = vpop.permute.xlu0 %804  ;;  %v14389_v36 = vld [vmem:[#allocation30_spill] sm:$0xff] }
 0x183   :  { %14305 = vst [vmem:[#allocation110_spill] sm:$0xff] %v10320_v44  ;;  %9313 = vset.pattern.permute.xlu1 %v14241_v26  ;;  %v14312_v44 = vld [vmem:[#allocation7_spill] sm:$0xff] }
 0x184   :  { %1856 = vperm.xlu1 %9313, %v9785_v54   ;;  %1460 = vperm.xlu0 %9354, %v14306_v22  }
 0x186   :  { %v10325_v51 = vpop.permute.xlu1 %1188  ;;  %v10327_v11 = vpop.permute.xlu0 %968 }
 0x187   :  { %14307 = vst [vmem:[#allocation23_spill] sm:$0xff] %v10325_v51  ;;  %14308 = vst [vmem:[#allocation111_spill] sm:$0xff] %v10327_v11  ;;  %v14315_v51 = vld [vmem:[#allocation26_spill] sm:$0xff] }
 0x188   :  { %9314 = vset.pattern.permute.xlu1 %v14238_v34  ;;  %1292 = vperm.xlu0 %9354, %v14309_v30   ;;  %v9360_v30 = vld [vmem:[%s14095_s3 + $0x20] sm:$0xff]  }
 0x189   :  { %1220 = vperm.xlu1 %9314, %v14293_v12   ;;  %9277 = vmatprep.subr.bf16.mxu1 %v9360_v30 }
 0x18a   :  { %v10332_v9 = vpop.permute.xlu1 %1192  ;;  %v10334_v21 = vpop.permute.xlu0 %980  ;;  %9281 = vmatpush3.bf16.msra.mxu1 %v9360_v30  ;;  %8661 = vmatprep.subr.bf16.mxu0 %v9360_v30 }
 0x18b   :  { %14310 = vst [vmem:[#allocation6_spill] sm:$0xff] %v10332_v9  ;;  %14311 = vst [vmem:[#allocation112_spill] sm:$0xff] %v10334_v21  ;;  %8662 = vmatpush3.bf16.msra.mxu0 %v9360_v30  ;;  %v14384_v9 = vld [vmem:[#allocation27_spill] sm:$0xff] }
 0x18c   :  { %1304 = vperm.xlu0 %9354, %v14312_v44  }
 0x18d   :  { %1224 = vperm.xlu1 %9314, %v9576_v15  }
 0x18e   :  { %v10338_v54 = vpop.permute.xlu0 %812 }
 0x18f   :  { %14313 = vst [vmem:[#allocation7_spill] sm:$0xff] %v10338_v54  ;;  %v10340_v22 = vpop.permute.xlu1 %1836 }
 0x190   :  { %14314 = vst [vmem:[#allocation113_spill] sm:$0xff] %v10340_v22  ;;  %1468 = vperm.xlu0 %9354, %v14315_v51   ;;  %v9361_v51 = vld [vmem:[%s14095_s3 + $0x28] sm:$0xff]  }
 0x191   :  { %9315 = vset.pattern.permute.xlu1 %v14241_v26  ;;  %9278 = vmatprep.subr.bf16.mxu1 %v9361_v51 }
 0x192   :  { %1868 = vperm.xlu1 %9315, %v9792_v55   ;;  %v10348_v12 = vpop.permute.xlu0 %988  ;;  %9282 = vmatpush3.bf16.msra.mxu1 %v9361_v51 }
 0x193   :  { %14316 = vst [vmem:[#allocation26_spill] sm:$0xff] %v10348_v12  ;;  %v10350_v44 = vpop.permute.xlu1 %1668  ;;  %8663 = vmatprep.subr.bf16.mxu0 %v9361_v51  ;;  %v14330_v12 = vld [vmem:[#allocation3_spill] sm:$0xff] }
 0x194   :  { %14317 = vst [vmem:[#allocation114_spill] sm:$0xff] %v10350_v44  ;;  %1308 = vperm.xlu0 %9354, %v9693_v38   ;;  %v9362_v38 = vld [vmem:[%s14095_s3 + $0x30] sm:$0xff]   ;;  %8664 = vmatpush3.bf16.msra.mxu0 %v9361_v51 }
 0x195   :  { %9279 = vmatprep.subr.bf16.mxu1 %v9362_v38  ;;  %8665 = vmatprep.subr.bf16.mxu0 %v9362_v38 }
 0x196   :  { %1700 = vperm.xlu1 %9315, %v9564_v13   ;;  %v10357_v54 = vpop.permute.xlu0 %824  ;;  %9283 = vmatpush3.bf16.msra.mxu1 %v9362_v38 }
 0x197   :  { %14318 = vst [vmem:[#allocation115_spill] sm:$0xff] %v10357_v54  ;;  %v10359_v55 = vpop.permute.xlu1 %1676  ;;  %v9363_v54 = vld [vmem:[%s14095_s3 + $0x38] sm:$0xff]  }
 0x198   :  { %14319 = vst [vmem:[#allocation116_spill] sm:$0xff] %v10359_v55  ;;  %9356 = vset.pattern.permute.xlu0 %v14241_v26  ;;  %8666 = vmatpush3.bf16.msra.mxu0 %v9362_v38  ;;  %v14382_v55 = vld [vmem:[#allocation24_spill] sm:$0xff] }
 0x199   :  { %1808 = vperm.xlu0 %9356, %v9713_v42   ;;  %9280 = vmatprep.subr.bf16.mxu1 %v9363_v54 }
 0x19a   :  { %1708 = vperm.xlu1 %9315, %v9576_v15   ;;  %v10367_v30 = vpop.permute.xlu0 %836  ;;  %9284 = vmatpush3.bf16.msra.mxu1 %v9363_v54 }
 0x19b   :  { %14320 = vst [vmem:[#allocation117_spill] sm:$0xff] %v10367_v30  ;;  %8667 = vmatprep.subr.bf16.mxu0 %v9363_v54 }
 0x19c   :  { %v10369_v13 = vpop.permute.xlu1 %876  ;;  %8668 = vmatpush3.bf16.msra.mxu0 %v9363_v54  ;;  %v9388_v54 = vld [vmem:[%s14094_s0 + $0x20] sm:$0xff] }
 0x19d   :  { %14321 = vst [vmem:[#allocation118_spill] sm:$0xff] %v10369_v13  ;;  %1648 = vperm.xlu0 %9356, %v9497_v2   ;;  %v14375_v13 = vld [vmem:[#allocation16_spill] sm:$0xff] }
 0x19e   :  { %9316 = vset.pattern.permute.xlu1 %v14247_v0 }
 0x19f   :  { %908 = vperm.xlu1 %9316, %v9804_v57   ;;  %v10377_v15 = vpop.permute.xlu0 %1328 }
 0x1a0   :  { %v10379_v42 = vpop.permute.xlu1 %880 }
 0x1a1   :  { %14322 = vst [vmem:[#allocation119_spill] sm:$0xff] %v10379_v42  ;;  %1660 = vperm.xlu0 %9356, %v9504_v3   ;;  %v14374_v42 = vld [vmem:[#allocation15_spill] sm:$0xff] }
 0x1a3   :  { %912 = vperm.xlu1 %9316, %v9821_v60   ;;  %v10383_v51 = vpop.permute.xlu0 %1164 }
 0x1a4   :  { %14323 = vst [vmem:[#allocation120_spill] sm:$0xff] %v10383_v51  ;;  %v10385_v38 = vpop.permute.xlu1 %712 }
 0x1a5   :  { %14324 = vst [vmem:[#allocation121_spill] sm:$0xff] %v10385_v38  ;;  %1828 = vperm.xlu0 %9356, %v9732_v45  }
 0x1a7   :  { %744 = vperm.xlu1 %9316, %v9593_v18   ;;  %v10389_v2 = vpop.permute.xlu0 %1176 }
 0x1a8   :  { %14325 = vst [vmem:[#allocation122_spill] sm:$0xff] %v10389_v2 }
 0x1a9   :  { %v10391_v30 = vpop.permute.xlu1 %1356  ;;  %1832 = vperm.xlu0 %9356, %v9749_v48   ;;  %v9389_v48 = vld [vmem:[%s14094_s0 + $0x30] sm:$0xff] }
 0x1aa   :  { %14326 = vst [vmem:[#allocation123_spill] sm:$0xff] %v10391_v30 }
 0x1ab   :  { %9317 = vset.pattern.permute.xlu1 %v14238_v34  ;;  %v10395_v3 = vpop.permute.xlu0 %1340 }
 0x1ac   :  { %14327 = vst [vmem:[#allocation124_spill] sm:$0xff] %v10395_v3  ;;  %1388 = vperm.xlu1 %9317, %v9809_v58   ;;  %v14393_v3 = vld [vmem:[#allocation32_spill] sm:$0xff] }
 0x1ad   :  { %1664 = vperm.xlu0 %9356, %v9388_v54  }
 0x1ae   :  { %v10401_v45 = vpop.permute.xlu1 %720 }
 0x1af   :  { %14328 = vst [vmem:[#allocation125_spill] sm:$0xff] %v10401_v45  ;;  %v10403_v18 = vpop.permute.xlu0 %1352 }
 0x1b0   :  { %14329 = vst [vmem:[#allocation126_spill] sm:$0xff] %v10403_v18  ;;  %9318 = vset.pattern.permute.xlu1 %v14247_v0 }
 0x1b1   :  { %752 = vperm.xlu1 %9318, %v14330_v12   ;;  %1672 = vperm.xlu0 %9356, %v9389_v48   ;;  %v9390_v12 = vld [vmem:[%s14094_s0 + $0x40] sm:$0xff] }
 0x1b2   :  { %v10410_v21 = vpop.permute.xlu1 %724 }
 0x1b3   :  { %14331 = vst [vmem:[#allocation3_spill] sm:$0xff] %v10410_v21  ;;  %v10412_v11 = vpop.permute.xlu0 %1184 }
 0x1b4   :  { %14332 = vst [vmem:[#allocation127_spill] sm:$0xff] %v10412_v11  ;;  %v14383_v11 = vld [vmem:[#allocation25_spill] sm:$0xff] }
 0x1b5   :  { %756 = vperm.xlu1 %9318, %v9600_v19   ;;  %1840 = vperm.xlu0 %9356, %v9761_v50   ;;  %v9391_v19 = vld [vmem:[%s14094_s0 + $0x58] sm:$0xff]  ;;  %v9392_v50 = vld [vmem:[%s14094_s0 + $0x88] sm:$0xff] }
 0x1b7   :  { %v10416_v54 = vpop.permute.xlu1 %1368  ;;  %v10418_v45 = vpop.permute.xlu0 %1360 }
 0x1b8   :  { %14333 = vst [vmem:[#allocation128_spill] sm:$0xff] %v10416_v54  ;;  %14334 = vst [vmem:[#allocation129_spill] sm:$0xff] %v10418_v45  ;;  %v14372_v54 = vld [vmem:[#allocation13_spill] sm:$0xff] }
 0x1b9   :  { %9319 = vset.pattern.permute.xlu1 %v14238_v34  ;;  %1680 = vperm.xlu0 %9356, %v9390_v12  }
 0x1ba   :  { %1400 = vperm.xlu1 %9319, %v9816_v59  }
 0x1bb   :  { %v10425_v48 = vpop.permute.xlu1 %1200  ;;  %v10427_v21 = vpop.permute.xlu0 %1364 }
 0x1bc   :  { %14335 = vst [vmem:[#allocation130_spill] sm:$0xff] %v10425_v48  ;;  %14336 = vst [vmem:[#allocation131_spill] sm:$0xff] %v10427_v21 }
 0x1bd   :  { %1692 = vperm.xlu0 %9356, %v9391_v19  }
 0x1be   :  { %1232 = vperm.xlu1 %9319, %v9392_v50  }
 0x1bf   :  { %v10435_v30 = vpop.permute.xlu0 %1196 }
 0x1c0   :  { %14337 = vst [vmem:[#allocation132_spill] sm:$0xff] %v10435_v30  ;;  %v10437_v45 = vpop.permute.xlu1 %1844  ;;  %v9393_v30 = vld [vmem:[%s14094_s0 + $0x90] sm:$0xff] }
 0x1c1   :  { %14338 = vst [vmem:[#allocation133_spill] sm:$0xff] %v10437_v45  ;;  %1860 = vperm.xlu0 %9356, %v9780_v53   ;;  %v9394_v53 = vld [vmem:[%s14094_s0 + $0x60] sm:$0xff]  ;;  %v14371_v45 = vld [vmem:[#allocation12_spill] sm:$0xff] }
 0x1c2   :  { %9320 = vset.pattern.permute.xlu1 %v14241_v26 }
 0x1c3   :  { %1876 = vperm.xlu1 %9320, %v9804_v57   ;;  %v10442_v12 = vpop.permute.xlu0 %1208 }
 0x1c4   :  { %14339 = vst [vmem:[#allocation134_spill] sm:$0xff] %v10442_v12 }
 0x1c5   :  { %v10444_v48 = vpop.permute.xlu1 %1204  ;;  %1864 = vperm.xlu0 %9356, %v9797_v56   ;;  %v9395_v56 = vld [vmem:[%s14094_s0 + $0x70] sm:$0xff] }
 0x1c6   :  { %14340 = vst [vmem:[#allocation135_spill] sm:$0xff] %v10444_v48 }
 0x1c7   :  { %9321 = vset.pattern.permute.xlu1 %v14238_v34  ;;  %v10448_v19 = vpop.permute.xlu0 %1372 }
 0x1c8   :  { %14341 = vst [vmem:[#allocation136_spill] sm:$0xff] %v10448_v19  ;;  %1236 = vperm.xlu1 %9321, %v9393_v30  }
 0x1c9   :  { %1696 = vperm.xlu0 %9356, %v9394_v53  }
 0x1ca   :  { %v10456_v57 = vpop.permute.xlu1 %1848 }
 0x1cb   :  { %14342 = vst [vmem:[#allocation137_spill] sm:$0xff] %v10456_v57  ;;  %v10458_v12 = vpop.permute.xlu0 %1212 }
 0x1cc   :  { %14343 = vst [vmem:[#allocation138_spill] sm:$0xff] %v10458_v12  ;;  %9322 = vset.pattern.permute.xlu1 %v14241_v26 }
 0x1cd   :  { %1880 = vperm.xlu1 %9322, %v9821_v60   ;;  %1704 = vperm.xlu0 %9356, %v9395_v56   ;;  %v9396_v60 = vld [vmem:[%s14094_s0 + $0x80] sm:$0xff] }
 0x1ce   :  { %v10465_v19 = vpop.permute.xlu1 %1852 }
 0x1cf   :  { %14344 = vst [vmem:[#allocation139_spill] sm:$0xff] %v10465_v19  ;;  %v10467_v48 = vpop.permute.xlu0 %1392 }
 0x1d0   :  { %14345 = vst [vmem:[#allocation140_spill] sm:$0xff] %v10467_v48 }
 0x1d1   :  { %1884 = vperm.xlu1 %9322, %v9816_v59   ;;  %1872 = vperm.xlu0 %9356, %v9809_v58   ;;  %v9397_v59 = vld [vmem:[%s14094_s0 + $0x98] sm:$0xff] }
 0x1d2   :  { %v10471_v53 = vpop.permute.xlu1 %1684 }
 0x1d3   :  { %14346 = vst [vmem:[#allocation141_spill] sm:$0xff] %v10471_v53  ;;  %v10473_v12 = vpop.permute.xlu0 %1396  ;;  %v14369_v53 = vld [vmem:[#allocation11_spill] sm:$0xff] }
 0x1d4   :  { %14347 = vst [vmem:[#allocation142_spill] sm:$0xff] %v10473_v12  ;;  %v515_v12 = vlaneseq }
 0x1d5   :  { %1716 = vperm.xlu1 %9322, %v9392_v50   ;;  %1712 = vperm.xlu0 %9356, %v9396_v60  }
 0x1d6   :  { %v10478_v57 = vpop.permute.xlu1 %1688 }
 0x1d7   :  { %14348 = vst [vmem:[#allocation143_spill] sm:$0xff] %v10478_v57  ;;  %v10480_v56 = vpop.permute.xlu0 %1228  ;;  %v14357_v57 = vld [vmem:[#allocation8_spill] sm:$0xff] }
 0x1d8   :  { %14349 = vst [vmem:[#allocation144_spill] sm:$0xff] %v10480_v56 }
 0x1d9   :  { %1720 = vperm.xlu1 %9322, %v9393_v30   ;;  %1724 = vperm.xlu0 %9356, %v9397_v59   ;;  %v14354_v30 = vld [vmem:[#allocation9_spill] sm:$0xff] }
 0x1db   :  { %v10485_v58 = vpop.permute.xlu1 %888  ;;  %v10487_v48 = vpop.permute.xlu0 %1240 }
 0x1dc   :  { %14350 = vst [vmem:[#allocation145_spill] sm:$0xff] %v10485_v58  ;;  %14351 = vst [vmem:[#allocation146_spill] sm:$0xff] %v10487_v48  ;;  %v9398_v48 = vld [vmem:[%s14094_s0 + $0xa0] sm:$0xff] }
 0x1dd   :  { %9323 = vset.pattern.permute.xlu1 %v14247_v0  ;;  %1892 = vperm.xlu0 %9356, %v9828_v61  }
 0x1de   :  { %920 = vperm.xlu1 %9323, %v9833_v62  }
 0x1df   :  { %v10492_v50 = vpop.permute.xlu1 %896  ;;  %v10494_v60 = vpop.permute.xlu0 %1404 }
 0x1e0   :  { %14352 = vst [vmem:[#allocation147_spill] sm:$0xff] %v10492_v50  ;;  %14353 = vst [vmem:[#allocation148_spill] sm:$0xff] %v10494_v60  ;;  %v10513_v60 = vld [vmem:[%s14094_s0 + $0xb0] sm:$0xff] }
 0x1e1   :  { %1896 = vperm.xlu0 %9356, %v14354_v30  }
 0x1e2   :  { %928 = vperm.xlu1 %9323, %v14354_v30  }
 0x1e3   :  { %v10498_v56 = vpop.permute.xlu1 %900  ;;  %v10500_v59 = vpop.permute.xlu0 %1244 }
 0x1e4   :  { %14355 = vst [vmem:[#allocation9_spill] sm:$0xff] %v10498_v56  ;;  %14356 = vst [vmem:[#allocation149_spill] sm:$0xff] %v10500_v59  ;;  %v10516_v59 = vshrl.u32 %v515_v12, 7  ;;  %v10534_v12 = vld [vmem:[%s14096_s1] sm:$0xf] }
 0x1e5   :  { %1728 = vperm.xlu0 %9356, %v9398_v48   ;;  %v10521_v48 = vld [vmem:[%s14094_s0 + $0xa8] sm:$0xff] }
 0x1e6   :  { %932 = vperm.xlu1 %9323, %v14357_v57  }
 0x1e7   :  { %v10506_v62 = vpop.permute.xlu1 %732  ;;  %v10508_v50 = vpop.permute.xlu0 %1424 }
 0x1e8   :  { %14358 = vst [vmem:[#allocation8_spill] sm:$0xff] %v10506_v62  ;;  %14359 = vst [vmem:[#allocation150_spill] sm:$0xff] %v10508_v50  ;;  %v517_v50 = vsub.s32 0, %v10516_v59 }
 0x1e9   :  { %1736 = vperm.xlu0 %9356, %v10513_v60  }
 0x1ea   :  { %764 = vperm.xlu1 %9323, %v10521_v48  }
 0x1eb   :  { %v10524_v57 = vpop.permute.xlu0 %1428 }
 0x1ec   :  { %14360 = vst [vmem:[#allocation151_spill] sm:$0xff] %v10524_v57  ;;  %v10526_v62 = vpop.permute.xlu1 %1376  ;;  %v10544_v57 = vld [vmem:[%s14094_s0 + $0xc0] sm:$0xff] }
 0x1ed   :  { %14361 = vst [vmem:[#allocation152_spill] sm:$0xff] %v10526_v62  ;;  %1904 = vperm.xlu0 %9356, %v9857_v24   ;;  %14364 = vst [vmem:[#allocation155_spill] sm:$0xff] %v10544_v57  ;;  %v10548_v24 = vrot.slane %v10534_v12, %v517_v50 }
 0x1ee   :  { %9324 = vset.pattern.permute.xlu1 %v14238_v34 }
 0x1ef   :  { %1408 = vperm.xlu1 %9324, %v9828_v61   ;;  %v10537_v56 = vpop.permute.xlu0 %1260  ;;  %14365 = vst [vmem:[#allocation156_spill] sm:$0xff] %v10548_v24  ;;  %v10557_v61 = vld [vmem:[%s14094_s0 + $0xd8] sm:$0xff]  ;;  %v519_v50 = vmul.f32 %v10548_v24, %v14369_v53  ;;  %v522_v21 = vmul.f32 %v10548_v24, %v14371_v45  ;;  %v520_v38 = vmul.f32 %v10548_v24, %v14372_v54  ;;  %v14376_v54 = vld [vmem:[#allocation18_spill] sm:$0xff] }
 0x1f0   :  { %14362 = vst [vmem:[#allocation153_spill] sm:$0xff] %v10537_v56  ;;  %14367 = vst [vmem:[#allocation158_spill] sm:$0xff] %v10557_v61  ;;  %v14368_v56 = vld [vmem:[#allocation10_spill] sm:$0xff]  ;;  %v523_v53 = vmul.f32 %v10548_v24, %v14375_v13  ;;  %v535_v51 = vmul.f32 %v10548_v24, %v14393_v3 }
 0x1f1   :  { %v10539_v58 = vpop.permute.xlu1 %736  ;;  %1744 = vperm.xlu0 %9356, %v10544_v57   ;;  %v14379_v57 = vld [vmem:[#allocation21_spill] sm:$0xff] }
 0x1f2   :  { %14363 = vst [vmem:[#allocation154_spill] sm:$0xff] %v10539_v58  ;;  %v521_v58 = vmul.f32 %v10548_v24, %v14368_v56  ;;  %v524_v56 = vmul.f32 %v10548_v24, %v14374_v42 }
 0x1f3   :  { %9325 = vset.pattern.permute.xlu1 %v14247_v0  ;;  %v10551_v62 = vpop.permute.xlu0 %1272 }
 0x1f4   :  { %14366 = vst [vmem:[#allocation157_spill] sm:$0xff] %v10551_v62  ;;  %768 = vperm.xlu1 %9325, %v10513_v60   ;;  %v10569_v62 = vld [vmem:[%s14097_s2] ss:$0 sm:$0xff] }
 0x1f5   :  { %1756 = vperm.xlu0 %9356, %v10557_v61   ;;  %v10588_v45 = vadd.f32 %v10569_v62, %v519_v50  ;;  %v10595_v42 = vadd.f32 %v10569_v62, %v522_v21  ;;  %v10598_v13 = vadd.f32 %v10569_v62, %v520_v38  ;;  %v10607_v50 = vadd.f32 %v10569_v62, %v524_v56  ;;  %v10625_v56 = vld [vmem:[%s14094_s0 + $0x1f8] sm:$0xff] }
 0x1f6   :  { %v10564_v19 = vpop.permute.xlu1 %1380  ;;  %v530_v38 = vmul.f32 %v10548_v24, %v14382_v55 }
 0x1f7   :  { %14370 = vst [vmem:[#allocation10_spill] sm:$0xff] %v10564_v19  ;;  %v10575_v61 = vpop.permute.xlu0 %1436  ;;  %v10585_v19 = vadd.f32 %v10569_v62, %v521_v58  ;;  %v528_v58 = vmul.f32 %v10548_v24, %v14379_v57  ;;  %v532_v57 = vmul.f32 %v10548_v24, %v14384_v9  ;;  %v533_v9 = vmul.f32 %v10548_v24, %v14389_v36 }
 0x1f8   :  { %14373 = vst [vmem:[#allocation11_spill] sm:$0xff] %v10575_v61  ;;  %9326 = vset.pattern.permute.xlu1 %v14238_v34  ;;  %v526_v61 = vmul.f32 %v10548_v24, %v14376_v54  ;;  %v10610_v54 = vadd.f32 %v10569_v62, %v523_v53  ;;  %v14388_v53 = vld [vmem:[#allocation29_spill] sm:$0xff]  ;;  %v10655_v32 = vadd.f32 %v10569_v62, %v530_v38 }
 0x1f9   :  { %1412 = vperm.xlu1 %9326, %v14354_v30   ;;  %1924 = vperm.xlu0 %9356, %v9884_v29   ;;  %v14378_v30 = vld [vmem:[#allocation19_spill] sm:$0xff]  ;;  %v10643_v2 = vadd.f32 %v10569_v62, %v528_v58 }
 0x1fa   :  { %v10592_v44 = vpop.permute.xlu1 %1384  ;;  %v525_v29 = vmul.f32 %v10548_v24, %v14378_v30  ;;  %v529_v30 = vmul.f32 %v10548_v24, %v14383_v11  ;;  %v10630_v55 = vadd.f32 %v10569_v62, %v526_v61  ;;  %v534_v11 = vmul.f32 %v10548_v24, %v14388_v53 }
 0x1fb   :  { %14377 = vst [vmem:[#allocation12_spill] sm:$0xff] %v10592_v44  ;;  %v10604_v22 = vpop.permute.xlu0 %1276  ;;  %v14381_v44 = vld [vmem:[#allocation22_spill] sm:$0xff]  ;;  %14391 = vst [vmem:[#allocation18_spill] sm:$0xff] %v10643_v2 }
 0x1fc   :  { %14380 = vst [vmem:[#allocation13_spill] sm:$0xff] %v10604_v22  ;;  %v527_v21 = vmul.f32 %v10548_v24, %v14381_v44  ;;  %v531_v22 = vmul.f32 %v10548_v24, %v14385_v52  ;;  %v14386_v44 = vld [vmem:[#allocation17_spill] sm:$0xff]  ;;  %14387 = vst [vmem:[#allocation15_spill] sm:$0xff] %v10630_v55  ;;  %v1001_v52 = vsub.s32 1, %v10516_v59  ;;  %v10640_v0 = vadd.f32 %v10569_v62, %v525_v29  ;;  %v14398_v55 = vld [vmem:[#allocation34_spill] sm:$0xff] }
 0x1fd   :  { %1416 = vperm.xlu1 %9326, %v10625_v56   ;;  %1928 = vperm.xlu0 %9356, %v14386_v44   ;;  %v14392_v44 = vld [vmem:[#allocation31_spill] sm:$0xff]  ;;  %14396 = vst [vmem:[#allocation22_spill] sm:$0xff] %v10655_v32  ;;  %v537_v58 = vmul.f32 %v10548_v24, %v14398_v55  ;;  %v10662_v2 = vadd.f32 %v10569_v62, %v529_v30  ;;  %v14406_v32 = vld [vmem:[#allocation56_spill] sm:$0xff] }
 0x1fe   :  { %v10637_v18 = vpop.permute.xlu1 %1216  ;;  %v536_v61 = vmul.f32 %v10548_v24, %v14392_v44  ;;  %v10652_v36 = vadd.f32 %v10569_v62, %v527_v21  ;;  %v10665_v44 = vadd.f32 %v10569_v62, %v532_v57  ;;  %v10668_v3 = vadd.f32 %v10569_v62, %v531_v22 }
 0x1ff   :  { %14390 = vst [vmem:[#allocation16_spill] sm:$0xff] %v10637_v18  ;;  %v10649_v53 = vpop.permute.xlu0 %1456  ;;  %v14397_v18 = vld [vmem:[#allocation33_spill] sm:$0xff]  ;;  %14399 = vst [vmem:[#allocation24_spill] sm:$0xff] %v10662_v2  ;;  %v1485_v21 = vsub.s32 2, %v10516_v59  ;;  %v10676_v38 = vadd.f32 %v10569_v62, %v534_v11  ;;  %v10679_v30 = vadd.f32 %v10569_v62, %v533_v9  ;;  %v10682_v57 = vrot.slane %v10534_v12, %v1001_v52  ;;  %v14421_v2 = vld [vmem:[#allocation64_spill] sm:$0xff] }
 0x200   :  { %14394 = vst [vmem:[#allocation19_spill] sm:$0xff] %v10649_v53  ;;  %14395 = vst [vmem:[#allocation21_spill] sm:$0xff] %v10652_v36  ;;  %v538_v29 = vmul.f32 %v10548_v24, %v14397_v18  ;;  %v9404_v18 = vld [vmem:[%s14094_s0 + $0xe0] sm:$0xff]  ;;  %v1969_v22 = vsub.s32 3, %v10516_v59  ;;  %v10686_v55 = vadd.f32 %v10569_v62, %v536_v61  ;;  %v10689_v53 = vadd.f32 %v10569_v62, %v535_v51  ;;  %v14411_v61 = vld [vmem:[#allocation57_spill] sm:$0xff] }
 0x201   :  { %14400 = vst [vmem:[#allocation25_spill] sm:$0xff] %v10665_v44  ;;  %1248 = vperm.xlu1 %9326, %v10521_v48   ;;  %1760 = vperm.xlu0 %9356, %v9404_v18   ;;  %14401 = vst [vmem:[#allocation27_spill] sm:$0xff] %v10676_v38  ;;  %v14405_v44 = vld [vmem:[#allocation55_spill] sm:$0xff]  ;;  %v559_v11 = vmul.f32 %v10548_v24, %v14406_v32  ;;  %v10703_v59 = vadd.f32 %v10569_v62, %v537_v58 }
 0x202   :  { %14402 = vst [vmem:[#allocation28_spill] sm:$0xff] %v10679_v30  ;;  %14403 = vst [vmem:[#allocation17_spill] sm:$0xff] %v10686_v55  ;;  %v560_v18 = vmul.f32 %v10548_v24, %v14405_v44  ;;  %v10700_v52 = vadd.f32 %v10569_v62, %v538_v29  ;;  %v562_v51 = vmul.f32 %v10548_v24, %v10050_v20  ;;  %v14412_v44 = vld [vmem:[#allocation58_spill] sm:$0xff]  ;;  %v14413_v32 = vld [vmem:[#allocation59_spill] sm:$0xff] }
 0x203   :  { %14404 = vst [vmem:[#allocation29_spill] sm:$0xff] %v10689_v53  ;;  %v10695_v38 = vpop.permute.xlu1 %1856  ;;  %v10697_v9 = vpop.permute.xlu0 %1460  ;;  %14410 = vst [vmem:[#allocation33_spill] sm:$0xff] %v10703_v59  ;;  %v561_v55 = vmul.f32 %v10548_v24, %v14411_v61  ;;  %v564_v53 = vmul.f32 %v10548_v24, %v14412_v44  ;;  %v563_v30 = vmul.f32 %v10548_v24, %v14413_v32  ;;  %v10720_v29 = vld [vmem:[%s14094_s0 + $0xf0] sm:$0xff]  ;;  %v9406_v44 = vld [vmem:[%s14094_s0 + $0x1e0] sm:$0xff] }
 0x204   :  { %14407 = vst [vmem:[#allocation30_spill] sm:$0xff] %v10695_v38  ;;  %14408 = vst [vmem:[#allocation31_spill] sm:$0xff] %v10697_v9  ;;  %v10714_v9 = vrot.slane %v10534_v12, %v1485_v21  ;;  %v566_v20 = vmul.f32 %v10548_v24, %v10063_v37  ;;  %v565_v58 = vmul.f32 %v10548_v24, %v10065_v16  ;;  %v14415_v37 = vld [vmem:[#allocation60_spill] sm:$0xff]  ;;  %v14416_v16 = vld [vmem:[#allocation61_spill] sm:$0xff] }
 0x205   :  { %14409 = vst [vmem:[#allocation32_spill] sm:$0xff] %v10700_v52  ;;  %9327 = vset.pattern.permute.xlu1 %v14241_v26  ;;  %14414 = vst [vmem:[#allocation34_spill] sm:$0xff] %v10720_v29  ;;  %1768 = vperm.xlu0 %9356, %v10720_v29   ;;  %v568_v61 = vmul.f32 %v10548_v24, %v10069_v35  ;;  %v10730_v21 = vrot.slane %v10534_v12, %v1969_v22 }
 0x206   :  { %1888 = vperm.xlu1 %9327, %v9406_v44   ;;  %v640_v32 = vadd.f32 %v10569_v62, %v560_v18  ;;  %v10737_v29 = vadd.f32 %v10569_v62, %v559_v11  ;;  %v567_v59 = vmul.f32 %v10548_v24, %v14415_v37  ;;  %v570_v52 = vmul.f32 %v10548_v24, %v14416_v16  ;;  %v14418_v44 = vld [vmem:[#allocation62_spill] sm:$0xff] }
 0x207   :  { %v10743_v35 = vpop.permute.xlu0 %1292  ;;  %v10746_v12 = vadd.f32 %v10569_v62, %v562_v51  ;;  %v10749_v22 = vadd.f32 %v10569_v62, %v561_v55  ;;  %v569_v18 = vmul.f32 %v10548_v24, %v14418_v44  ;;  %v572_v11 = vmul.f32 %v10548_v24, %v10082_v4  ;;  %v9407_v44 = vld [vmem:[%s14094_s0 + $0x240] sm:$0xff] }
 0x208   :  { %14417 = vst [vmem:[#allocation55_spill] sm:$0xff] %v10743_v35  ;;  %v10755_v38 = vpop.permute.xlu1 %1220  ;;  %v10758_v37 = vadd.f32 %v10569_v62, %v564_v53  ;;  %v10761_v16 = vadd.f32 %v10569_v62, %v563_v30  ;;  %v14420_v35 = vld [vmem:[#allocation63_spill] sm:$0xff]  ;;  %v574_v55 = vmul.f32 %v10548_v24, %v14421_v2  ;;  %v10771_v4 = vadd.f32 %v10569_v62, %v566_v20 }
 0x209   :  { %14419 = vst [vmem:[#allocation56_spill] sm:$0xff] %v10755_v38  ;;  %v571_v51 = vmul.f32 %v10548_v24, %v14420_v35  ;;  %1936 = vperm.xlu0 %9356, %v9407_v44   ;;  %v10774_v53 = vadd.f32 %v10569_v62, %v565_v58  ;;  %v10777_v30 = vadd.f32 %v10569_v62, %v568_v61  ;;  %v14423_v38 = vld [vmem:[#allocation65_spill] sm:$0xff]  ;;  %v14424_v44 = vld [vmem:[#allocation66_spill] sm:$0xff] }
 0x20a   :  { %v573_v35 = vmul.f32 %v10548_v24, %v14423_v38  ;;  %9328 = vset.pattern.permute.xlu1 %v14238_v34  ;;  %v10783_v2 = vadd.f32 %v10569_v62, %v567_v59  ;;  %v10786_v36 = vadd.f32 %v10569_v62, %v570_v52  ;;  %v576_v20 = vmul.f32 %v10548_v24, %v10094_v43  ;;  %v14426_v59 = vld [vmem:[#allocation67_spill] sm:$0xff] }
 0x20b   :  { %14422 = vst [vmem:[#allocation57_spill] sm:$0xff] %v10777_v30  ;;  %v575_v58 = vmul.f32 %v10548_v24, %v14424_v44  ;;  %1252 = vperm.xlu1 %9328, %v10513_v60   ;;  %v10793_v61 = vpop.permute.xlu0 %1304  ;;  %v10796_v38 = vadd.f32 %v10569_v62, %v569_v18  ;;  %v10799_v30 = vadd.f32 %v10569_v62, %v572_v11 }
 0x20c   :  { %14425 = vst [vmem:[#allocation58_spill] sm:$0xff] %v10793_v61  ;;  %v578_v52 = vmul.f32 %v10548_v24, %v14426_v59  ;;  %v577_v34 = vmul.f32 %v10548_v24, %v10103_v23  ;;  %v10805_v43 = vpop.permute.xlu1 %1224  ;;  %v10808_v44 = vadd.f32 %v10569_v62, %v571_v51  ;;  %v10811_v60 = vadd.f32 %v10569_v62, %v574_v55  ;;  %v9408_v59 = vld [vmem:[%s14094_s0 + $0x100] sm:$0xff] }
 0x20d   :  { %v1004_v18 = vmul.f32 %v10682_v57, %v10171_v7  ;;  %v1003_v11 = vmul.f32 %v10682_v57, %v10173_v25  ;;  %1776 = vperm.xlu0 %9356, %v9408_v59   ;;  %v10821_v23 = vadd.f32 %v10569_v62, %v573_v35  ;;  %v1005_v51 = vmul.f32 %v10682_v57, %v10177_v39  ;;  %v10842_v39 = vld [vmem:[%s14094_s0 + $0xb8] sm:$0xff] }
 0x20e   :  { %v1006_v55 = vmul.f32 %v10682_v57, %v10179_v8  ;;  %v1044_v7 = vmul.f32 %v10682_v57, %v10198_v63  ;;  %v10830_v61 = vadd.f32 %v10569_v62, %v576_v20  ;;  %v10833_v25 = vadd.f32 %v10569_v62, %v575_v58 }
 0x20f   :  { %v1007_v59 = vmul.f32 %v10682_v57, %v10184_v41  ;;  %v1008_v35 = vmul.f32 %v10682_v57, %v10186_v28  ;;  %1256 = vperm.xlu1 %9328, %v10842_v39   ;;  %v10845_v8 = vpop.permute.xlu0 %1468  ;;  %v10848_v63 = vadd.f32 %v10569_v62, %v578_v52  ;;  %v10851_v20 = vadd.f32 %v10569_v62, %v577_v34  ;;  %v10870_v34 = vld [vmem:[%s14094_s0 + $0x118] sm:$0xff] }
 0x210   :  { %14427 = vst [vmem:[#allocation59_spill] sm:$0xff] %v10830_v61  ;;  %14428 = vst [vmem:[#allocation60_spill] sm:$0xff] %v10845_v8  ;;  %v1046_v41 = vmul.f32 %v10682_v57, %v10204_v46  ;;  %v1528_v28 = vmul.f32 %v10714_v9, %v10377_v15  ;;  %v1084_v58 = vadd.f32 %v1004_v18, %v10598_v13 }
 0x211   :  { %v10859_v24 = vadd.f32 %v1003_v11, %v10588_v45  ;;  %v1009_v8 = vmul.f32 %v10682_v57, %v10190_v33  ;;  %v1045_v52 = vmul.f32 %v10682_v57, %v10202_v31  ;;  %v10865_v61 = vpop.permute.xlu1 %1868  ;;  %1788 = vperm.xlu0 %9356, %v10870_v34   ;;  %v1085_v46 = vadd.f32 %v1005_v51, %v10585_v19 }
 0x212   :  { %v10875_v15 = vadd.f32 %v1006_v55, %v10595_v42  ;;  %v1124_v62 = vadd.f32 %v1044_v7, %v640_v32  ;;  %v1530_v33 = vmul.f32 %v10714_v9, %v10224_v27  ;;  %v10880_v31 = vadd.f32 %v1007_v59, %v10610_v54  ;;  %v14430_v55 = vld [vmem:[#allocation88_spill] sm:$0xff]  ;;  %v14431_v59 = vld [vmem:[#allocation93_spill] sm:$0xff] }
 0x213   :  { %v10883_v45 = vadd.f32 %v1008_v35, %v10607_v50  ;;  %v1010_v13 = vmul.f32 %v10682_v57, %v10192_v17  ;;  %v1043_v18 = vmul.f32 %v10682_v57, %v10196_v40  ;;  %9329 = vset.pattern.permute.xlu1 %v14241_v26  ;;  %v10890_v19 = vpop.permute.xlu0 %1308  ;;  %v1126_v42 = vadd.f32 %v1046_v41, %v10746_v12 }
 0x214   :  { %v1529_v27 = vmul.f32 %v10714_v9, %v10217_v5  ;;  %v2014_v54 = vmul.f32 %v10730_v21, %v10257_v14  ;;  %v1608_v50 = vadd.f32 %v1528_v28, %v1124_v62  ;;  %1900 = vperm.xlu1 %9329, %v10625_v56   ;;  %v10899_v17 = vadd.f32 %v1009_v8, %v10640_v0  ;;  %v9411_v5 = vld [vmem:[%s14094_s0 + $0x268] sm:$0xff] }
 0x215   :  { %v1125_v40 = vadd.f32 %v1045_v52, %v10749_v22  ;;  %v1048_v32 = vmul.f32 %v10682_v57, %v10209_v6  ;;  %v1527_v12 = vmul.f32 %v10714_v9, %v10211_v47  ;;  %v10906_v11 = vpop.permute.xlu1 %1700  ;;  %1956 = vperm.xlu0 %9356, %v9411_v5   ;;  %v1610_v14 = vadd.f32 %v1530_v33, %v1126_v42  ;;  %v14429_v22 = vld [vmem:[#allocation15_spill] sm:$0xff]  ;;  %v14433_v33 = vld [vmem:[#allocation120_spill] sm:$0xff] }
 0x216   :  { %v1488_v0 = vmul.f32 %v10714_v9, %v10231_v1  ;;  %v2012_v56 = vmul.f32 %v10730_v21, %v10238_v49  ;;  %v2013_v6 = vmul.f32 %v10730_v21, %v10251_v10  ;;  %v10918_v51 = vadd.f32 %v1010_v13, %v14429_v22  ;;  %v14432_v1 = vld [vmem:[#allocation97_spill] sm:$0xff]  ;;  %v9412_v42 = vld [vmem:[%s14094_s0 + $0x270] sm:$0xff]  ;;  %v14436_v5 = vld [vmem:[#allocation99_spill] sm:$0xff] }
 0x217   :  { %v1123_v47 = vadd.f32 %v1043_v18, %v10737_v29  ;;  %v1051_v7 = vmul.f32 %v10682_v57, %v14430_v55  ;;  %v1489_v35 = vmul.f32 %v10714_v9, %v14431_v59  ;;  %v1609_v8 = vadd.f32 %v1529_v27, %v1125_v40  ;;  %v14434_v27 = vld [vmem:[#allocation89_spill] sm:$0xff]  ;;  %v14435_v40 = vld [vmem:[#allocation102_spill] sm:$0xff]  ;;  %v14437_v59 = vld [vmem:[#allocation124_spill] sm:$0xff] }
 0x218   :  { %v2094_v41 = vadd.f32 %v2014_v54, %v1610_v14  ;;  %v1972_v28 = vmul.f32 %v10730_v21, %v14432_v1  ;;  %v2092_v49 = vadd.f32 %v2012_v56, %v1608_v50  ;;  %1732 = vperm.xlu1 %9329, %v10521_v48   ;;  %v1809_v10 = vpop.permute.xlu0 %1808  ;;  %v1128_v52 = vadd.f32 %v1048_v32, %v10758_v37 }
 0x219   :  { %v1607_v62 = vadd.f32 %v1527_v12, %v1123_v47  ;;  %v1487_v29 = vmul.f32 %v10714_v9, %v14433_v33  ;;  %v2011_v13 = vmul.f32 %v10730_v21, %v1809_v10  ;;  %v10932_v18 = vpop.permute.xlu1 %1708  ;;  %1960 = vperm.xlu0 %9356, %v9412_v42   ;;  %v1054_v54 = vmul.f32 %v10682_v57, %v14434_v27  ;;  %v14442_v42 = vld [vmem:[#allocation2_spill] sm:$0xff] }
 0x21a   :  { %v1568_v48 = vadd.f32 %v1488_v0, %v1084_v58  ;;  %v2093_v50 = vadd.f32 %v2013_v6, %v1609_v8  ;;  %v1047_v37 = vmul.f32 %v10682_v57, %v14435_v40  ;;  %v10942_v32 = vadd.f32 %v1051_v7, %v10783_v2  ;;  %v14438_v6 = vld [vmem:[#allocation122_spill] sm:$0xff] }
 0x21b   :  { %v1569_v12 = vadd.f32 %v1489_v35, %v1085_v46  ;;  %v1973_v14 = vmul.f32 %v10730_v21, %v14436_v5  ;;  %v2091_v56 = vadd.f32 %v2011_v13, %v1607_v62  ;;  %v2174_v22 = vmax.f32 %v2094_v41, 0.0  ;;  %v9413_v35 = vld [vmem:[%s14094_s0 + $0x120] sm:$0xff]  ;;  %v10978_v5 = vld [vmem:[%s14094_s0 + $0x208] sm:$0xff] }
 0x21c   :  { %v2052_v47 = vadd.f32 %v1972_v28, %v1568_v48  ;;  %v2172_v55 = vmax.f32 %v2092_v49, 0.0  ;;  %v1531_v1 = vmul.f32 %v10714_v9, %v14437_v59  ;;  %1740 = vperm.xlu1 %9329, %v10842_v39   ;;  %v1649_v58 = vpop.permute.xlu0 %1648  ;;  %v1567_v0 = vadd.f32 %v1487_v29, %v10859_v24  ;;  %v14439_v49 = vld [vmem:[#allocation106_spill] sm:$0xff] }
 0x21d   :  { %v1490_v2 = vmul.f32 %v10714_v9, %v14438_v6  ;;  %v2171_v7 = vmax.f32 %v2091_v56, 0.0  ;;  %v1971_v46 = vmul.f32 %v10730_v21, %v1649_v58  ;;  %1792 = vperm.xlu0 %9356, %v9413_v35   ;;  %v10957_v8 = vadd.f32 %v1054_v54, %v10786_v36 }
 0x21e   :  { %v2173_v41 = vmax.f32 %v2093_v50, 0.0  ;;  %v1127_v39 = vadd.f32 %v1047_v37, %v10761_v16  ;;  %v10960_v28 = vpop.permute.xlu1 %908  ;;  %v2053_v24 = vadd.f32 %v1973_v14, %v1569_v12  ;;  %v1050_v10 = vmul.f32 %v10682_v57, %v14439_v49  ;;  %v14444_v50 = vld [vmem:[#allocation126_spill] sm:$0xff] }
 0x21f   :  { %v10964_v62 = vpack.c.bf16 %v2172_v55, %v2171_v7  ;;  %v2051_v33 = vadd.f32 %v1971_v46, %v1567_v0  ;;  %v2132_v13 = vmax.f32 %v2052_v47, 0.0  ;;  %v1532_v36 = vmul.f32 %v10714_v9, %v14442_v42  ;;  %v14445_v14 = vld [vmem:[#allocation90_spill] sm:$0xff]  ;;  %v14447_v47 = vld [vmem:[#allocation20_spill] sm:$0xff]  ;;  %v14448_v46 = vld [vmem:[#allocation107_spill] sm:$0xff] }
 0x220   :  { %v10966_v29 = vpack.c.bf16 %v2174_v22, %v2173_v41  ;;  %v1611_v27 = vadd.f32 %v1531_v1, %v1127_v39  ;;  %v14443_v54 = vmov 1   ;;  %v1661_v16 = vpop.permute.xlu0 %1660  ;;  %v1570_v48 = vadd.f32 %v1490_v2, %v10875_v15  ;;  %v14446_v15 = vld [vmem:[#allocation104_spill] sm:$0xff]  ;;  %v14449_v41 = vld [vmem:[#allocation6_spill] sm:$0xff] }
 0x221   :  { %14440 = vst [vmem:[#allocation61_spill] sm:$0xff] %v10964_v62  ;;  %9330 = vset.pattern.permute.xlu1 %v14443_v54  ;;  %v1534_v40 = vmul.f32 %v10714_v9, %v14444_v50  ;;  %v2131_v37 = vmax.f32 %v2051_v33, 0.0  ;;  %v1974_v12 = vmul.f32 %v10730_v21, %v1661_v16  ;;  %8709 = vmatprep.mubr.msk.bf16.mxu1 %vm2292_vm0, %v10964_v62  ;;  %v9415_v1 = vld [vmem:[%s14094_s0 + $0x130] sm:$0xff]  ;;  %v2133_v58 = vmax.f32 %v2053_v24, 0.0  ;;  %v14450_v16 = vld [vmem:[#allocation127_spill] sm:$0xff] }
 0x222   :  { %14441 = vst [vmem:[#allocation62_spill] sm:$0xff] %v10966_v29  ;;  %940 = vperm.xlu1 %9330, %v10978_v5   ;;  %v1012_v56 = vmul.f32 %v10682_v57, %v14445_v14  ;;  %v1049_v22 = vmul.f32 %v10682_v57, %v14446_v15  ;;  %v2015_v55 = vmul.f32 %v10730_v21, %v14447_v47  ;;  %v10989_v59 = vpop.permute.xlu1 %912  ;;  %v14455_v47 = vld [vmem:[#allocation113_spill] sm:$0xff] }
 0x223   :  { %8710 = vmatmul.mubr.msk.bf16.vlgmr.msra.gmra.mrb[0].mxu1 %vm2292_vm0, %v10966_v29  ;;  %1800 = vperm.xlu0 %9356, %v9415_v1   ;;  %v1130_v0 = vadd.f32 %v1050_v10, %v10771_v4  ;;  %v10997_v6 = vpack.c.bf16 %v2132_v13, %v2131_v37  ;;  %v2054_v2 = vadd.f32 %v1974_v12, %v1570_v48  ;;  %v11009_v4 = vld [vmem:[%s14094_s0 + $0x210] sm:$0xff]  ;;  %v14454_v12 = vld [vmem:[#allocation18_spill] sm:$0xff] }
 0x224   :  { %v1612_v7 = vadd.f32 %v1532_v36, %v1128_v52  ;;  %v1533_v35 = vmul.f32 %v10714_v9, %v14448_v46  ;;  %v1494_v39 = vmul.f32 %v10714_v9, %v14449_v41  ;;  %v2095_v49 = vadd.f32 %v2015_v55, %v1611_v27  ;;  %v1829_v33 = vpop.permute.xlu0 %1828  ;;  %v14451_v52 = vld [vmem:[#allocation91_spill] sm:$0xff]  ;;  %v14452_v13 = vld [vmem:[#allocation92_spill] sm:$0xff] }
 0x225   :  { %v1614_v42 = vadd.f32 %v1534_v40, %v1130_v0  ;;  %v1492_v50 = vmul.f32 %v10714_v9, %v14450_v16  ;;  %v2134_v14 = vmax.f32 %v2054_v2, 0.0  ;;  %v2016_v24 = vmul.f32 %v10730_v21, %v1829_v33  ;;  %8669 = vmatprep.mubr.msk.bf16.mxu0 %vm2292_vm0, %v10997_v6  ;;  %v14453_v48 = vld [vmem:[#allocation116_spill] sm:$0xff] }
 0x226   :  { %944 = vperm.xlu1 %9330, %v11009_v4   ;;  %v1056_v10 = vmul.f32 %v10682_v57, %v14451_v52  ;;  %v1015_v36 = vmul.f32 %v10682_v57, %v14452_v13  ;;  %v1129_v27 = vadd.f32 %v1049_v22, %v10774_v53  ;;  %v1978_v40 = vmul.f32 %v10730_v21, %v14453_v48  ;;  %v11021_v37 = vpop.permute.xlu1 %744  ;;  %v14456_v46 = vld [vmem:[#allocation108_spill] sm:$0xff]  ;;  %v14457_v48 = vld [vmem:[#allocation155_spill] sm:$0xff] }
 0x227   :  { %v11024_v15 = vadd.f32 %v1012_v56, %v14454_v12  ;;  %v2018_v55 = vmul.f32 %v10730_v21, %v14455_v47  ;;  %v11028_v1 = vpack.c.bf16 %v2134_v14, %v2133_v58  ;;  %v2096_v0 = vadd.f32 %v2016_v24, %v1612_v7  ;;  %v14464_v12 = vld [vmem:[#allocation121_spill] sm:$0xff] }
 0x228   :  { %v1613_v2 = vadd.f32 %v1533_v35, %v1129_v27  ;;  %v1491_v41 = vmul.f32 %v10714_v9, %v14456_v46  ;;  %v1574_v53 = vadd.f32 %v1494_v39, %v10918_v51  ;;  %v2175_v22 = vmax.f32 %v2095_v49, 0.0  ;;  %v1833_v33 = vpop.permute.xlu0 %1832  ;;  %v14458_v51 = vld [vmem:[#allocation23_spill] sm:$0xff] }
 0x229   :  { %v2098_v16 = vadd.f32 %v2018_v55, %v1614_v42  ;;  %v1572_v52 = vadd.f32 %v1492_v50, %v10883_v45  ;;  %v2176_v13 = vmax.f32 %v2096_v0, 0.0  ;;  %v2017_v56 = vmul.f32 %v10730_v21, %v1833_v33  ;;  %8670 = vmatmul.mubr.msk.bf16.vlgmr.msra.gmra.mrb[0].mxu0 %vm2292_vm0, %v11028_v1  ;;  %v14459_v45 = vld [vmem:[#allocation114_spill] sm:$0xff] }
 0x22a   :  { %776 = vperm.xlu1 %9330, %v14457_v48   ;;  %v11039_v58 = vadd.f32 %v1056_v10, %v10799_v30  ;;  %v11042_v7 = vadd.f32 %v1015_v36, %v10668_v3  ;;  %v1493_v35 = vmul.f32 %v10714_v9, %v14458_v51  ;;  %v11046_v39 = vadd.f32 %v1978_v40, %v1574_v53  ;;  %v14460_v42 = vld [vmem:[#allocation118_spill] sm:$0xff]  ;;  %v14463_v36 = vld [vmem:[#allocation119_spill] sm:$0xff] }
 0x22b   :  { %v1976_v49 = vmul.f32 %v10730_v21, %v14459_v45  ;;  %v1052_v50 = vmul.f32 %v10682_v57, %v14460_v42  ;;  %v11052_v14 = vpack.c.bf16 %v2176_v13, %v2175_v22  ;;  %v2097_v24 = vadd.f32 %v2017_v56, %v1613_v2  ;;  %v11054_v27 = vpop.permute.xlu1 %1388  ;;  %v14462_v30 = vld [vmem:[#allocation94_spill] sm:$0xff]  ;;  %v14467_v56 = vld [vmem:[#allocation129_spill] sm:$0xff]  ;;  %v14469_v45 = vld [vmem:[#allocation123_spill] sm:$0xff] }
 0x22c   :  { %v11058_v3 = vmul.f32 %v10682_v57, %v14462_v30  ;;  %v1571_v10 = vadd.f32 %v1491_v41, %v10880_v31  ;;  %v1053_v40 = vmul.f32 %v10682_v57, %v14463_v36  ;;  %v1011_v47 = vmul.f32 %v10682_v57, %v14464_v12  ;;  %v1665_v55 = vpop.permute.xlu0 %1664  ;;  %v14466_v41 = vld [vmem:[#allocation128_spill] sm:$0xff]  ;;  %v14472_v30 = vld [vmem:[#allocation133_spill] sm:$0xff]  ;;  %v14473_v12 = vld [vmem:[#allocation139_spill] sm:$0xff] }
 0x22d   :  { %14461 = vst [vmem:[#allocation63_spill] sm:$0xff] %v11052_v14  ;;  %v2178_v0 = vmax.f32 %v2098_v16, 0.0  ;;  %v2056_v46 = vadd.f32 %v1976_v49, %v1572_v52  ;;  %v2177_v53 = vmax.f32 %v2097_v24, 0.0  ;;  %v1975_v2 = vmul.f32 %v10730_v21, %v1665_v55  ;;  %8713 = vmatprep.mubr.msk.bf16.mxu1 %vm2292_vm0, %v11052_v14  ;;  %v9417_v16 = vld [vmem:[%s14094_s0 + $0x200] sm:$0xff]  ;;  %v14468_v52 = vld [vmem:[#allocation57_spill] sm:$0xff] }
 0x22e   :  { %v14465_v22 = vmov 2   ;;  %v1573_v33 = vadd.f32 %v1493_v35, %v10899_v17  ;;  %v2138_v31 = vmax.f32 %v11046_v39, 0.0  ;;  %v1538_v13 = vmul.f32 %v10714_v9, %v14466_v41  ;;  %v14471_v39 = vld [vmem:[#allocation131_spill] sm:$0xff] }
 0x22f   :  { %9331 = vset.pattern.permute.xlu1 %v14465_v22  ;;  %v1536_v48 = vmul.f32 %v10714_v9, %v14467_v56  ;;  %v1132_v51 = vadd.f32 %v1052_v50, %v14468_v52  ;;  %v1535_v49 = vmul.f32 %v10714_v9, %v14469_v45  ;;  %v11081_v42 = vpack.c.bf16 %v2178_v0, %v2177_v53  ;;  %v14474_v56 = vld [vmem:[#allocation21_spill] sm:$0xff] }
 0x230   :  { %1420 = vperm.xlu1 %9331, %v9417_v16   ;;  %v2055_v17 = vadd.f32 %v1975_v2, %v1571_v10  ;;  %v1133_v35 = vadd.f32 %v1053_v40, %v10796_v38  ;;  %v1537_v24 = vmul.f32 %v10714_v9, %v14471_v39  ;;  %v2020_v36 = vmul.f32 %v10730_v21, %v14472_v30  ;;  %v11090_v41 = vpop.permute.xlu1 %752  ;;  %v1673_v50 = vpop.permute.xlu0 %1672  ;;  %v14475_v38 = vld [vmem:[#allocation125_spill] sm:$0xff] }
 0x231   :  { %14470 = vst [vmem:[#allocation64_spill] sm:$0xff] %v11081_v42  ;;  %v2022_v55 = vmul.f32 %v10730_v21, %v14473_v12  ;;  %v1091_v16 = vadd.f32 %v1011_v47, %v14474_v56  ;;  %v2136_v52 = vmax.f32 %v2056_v46, 0.0  ;;  %v1977_v10 = vmul.f32 %v10730_v21, %v1673_v50  ;;  %8714 = vmatmul.mubr.msk.bf16.gmra.mrb[4].mxu1 %vm2292_vm0, %v11081_v42  ;;  %v14476_v45 = vld [vmem:[#allocation137_spill] sm:$0xff]  ;;  %v14477_v46 = vld [vmem:[#allocation130_spill] sm:$0xff]  ;;  %v11110_v50 = vld [vmem:[%s14094_s0 + $0xd0] sm:$0xff] }
 0x232   :  { %v2135_v0 = vmax.f32 %v2055_v17, 0.0  ;;  %v1013_v40 = vmul.f32 %v10682_v57, %v14475_v38  ;;  %v1618_v53 = vadd.f32 %v1538_v13, %v10957_v8  ;;  %v1616_v2 = vadd.f32 %v1536_v48, %v1132_v51  ;;  %v14478_v13 = vld [vmem:[#allocation132_spill] sm:$0xff]  ;;  %v14479_v38 = vld [vmem:[#allocation135_spill] sm:$0xff]  ;;  %v14485_v42 = vld [vmem:[#allocation158_spill] sm:$0xff] }
 0x233   :  { %v2021_v39 = vmul.f32 %v10730_v21, %v14476_v45  ;;  %v1615_v47 = vadd.f32 %v1535_v49, %v10942_v32  ;;  %v1496_v17 = vmul.f32 %v10714_v9, %v14477_v46  ;;  %v2057_v12 = vadd.f32 %v1977_v10, %v1573_v33  ;;  %v14480_v33 = vld [vmem:[#allocation141_spill] sm:$0xff]  ;;  %v14482_v46 = vld [vmem:[#allocation3_spill] sm:$0xff] }
 0x234   :  { %9332 = vset.pattern.permute.xlu1 %v14443_v54  ;;  %v11105_v30 = vpack.c.bf16 %v2136_v52, %v2135_v0  ;;  %v1617_v8 = vadd.f32 %v1537_v24, %v1133_v35  ;;  %v1495_v48 = vmul.f32 %v10714_v9, %v14478_v13  ;;  %v2100_v51 = vadd.f32 %v2020_v36, %v1616_v2  ;;  %v11115_v32 = vpop.permute.xlu1 %756  ;;  %v1841_v49 = vpop.permute.xlu0 %1840  ;;  %v14481_v35 = vld [vmem:[#allocation24_spill] sm:$0xff] }
 0x235   :  { %784 = vperm.xlu1 %9332, %v11110_v50   ;;  %v2102_v56 = vadd.f32 %v2022_v55, %v1618_v53  ;;  %v1497_v52 = vmul.f32 %v10714_v9, %v14479_v38  ;;  %v1980_v0 = vmul.f32 %v10730_v21, %v14480_v33  ;;  %v2137_v10 = vmax.f32 %v2057_v12, 0.0  ;;  %v14483_v53 = vld [vmem:[#allocation145_spill] sm:$0xff]  ;;  %v14484_v38 = vld [vmem:[#allocation143_spill] sm:$0xff] }
 0x236   :  { %v2019_v45 = vmul.f32 %v10730_v21, %v1841_v49  ;;  %8673 = vmatprep.mubr.msk.bf16.mxu0 %vm2292_vm0, %v11105_v30  ;;  %v1093_v24 = vadd.f32 %v1013_v40, %v14481_v35  ;;  %v1014_v36 = vmul.f32 %v10682_v57, %v14482_v46  ;;  %v2101_v55 = vadd.f32 %v2021_v39, %v1617_v8  ;;  %v14486_v40 = vld [vmem:[#allocation134_spill] sm:$0xff] }
 0x237   :  { %v1055_v2 = vmul.f32 %v10682_v57, %v14483_v53  ;;  %v1576_v13 = vadd.f32 %v1496_v17, %v11024_v15  ;;  %v1981_v33 = vmul.f32 %v10730_v21, %v14484_v38  ;;  %v11132_v12 = vpack.c.bf16 %v2138_v31, %v2137_v10  ;;  %v14487_v31 = vld [vmem:[#allocation22_spill] sm:$0xff] }
 0x238   :  { %v2099_v49 = vadd.f32 %v2019_v45, %v1615_v47  ;;  %v1575_v14 = vadd.f32 %v1495_v48, %v1091_v16  ;;  %v2180_v29 = vmax.f32 %v2100_v51, 0.0  ;;  %v1498_v35 = vmul.f32 %v10714_v9, %v14486_v40  ;;  %v1681_v39 = vpop.permute.xlu0 %1680 }
 0x239   :  { %788 = vperm.xlu1 %9332, %v14485_v42   ;;  %v2182_v46 = vmax.f32 %v2102_v56, 0.0  ;;  %v1577_v8 = vadd.f32 %v1497_v52, %v1093_v24  ;;  %v2060_v62 = vadd.f32 %v1980_v0, %v1576_v13  ;;  %v1979_v15 = vmul.f32 %v10730_v21, %v1681_v39  ;;  %v11138_v17 = vpop.permute.xlu1 %1400  ;;  %8674 = vmatmul.mubr.msk.bf16.gmra.mrb[4].mxu0 %vm2292_vm0, %v11132_v12  ;;  %v14488_v42 = vld [vmem:[#allocation136_spill] sm:$0xff]  ;;  %v14489_v56 = vld [vmem:[#allocation27_spill] sm:$0xff] }
 0x23a   :  { %v2179_v53 = vmax.f32 %v2099_v49, 0.0  ;;  %v1094_v47 = vadd.f32 %v1014_v36, %v14487_v31  ;;  %v1539_v16 = vmul.f32 %v10714_v9, %v14488_v42  ;;  %v2181_v48 = vmax.f32 %v2101_v55, 0.0  ;;  %v14490_v36 = vld [vmem:[#allocation9_spill] sm:$0xff]  ;;  %v14491_v49 = vld [vmem:[#allocation30_spill] sm:$0xff]  ;;  %v14496_v42 = vld [vmem:[#allocation12_spill] sm:$0xff] }
 0x23b   :  { %v1135_v51 = vadd.f32 %v1055_v2, %v10808_v44  ;;  %v11148_v52 = vadd.f32 %v11058_v3, %v14489_v56  ;;  %v2061_v0 = vadd.f32 %v1981_v33, %v1577_v8  ;;  %v2059_v45 = vadd.f32 %v1979_v15, %v1575_v14  ;;  %v11162_v44 = vld [vmem:[%s14094_s0 + $0x218] sm:$0xff]  ;;  %v14492_v3 = vld [vmem:[#allocation152_spill] sm:$0xff]  ;;  %v14495_v15 = vld [vmem:[#allocation147_spill] sm:$0xff] }
 0x23c   :  { %v11150_v10 = vpack.c.bf16 %v2180_v29, %v2179_v53  ;;  %v1578_v24 = vadd.f32 %v1498_v35, %v1094_v47  ;;  %v11153_v13 = vpack.c.bf16 %v2182_v46, %v2181_v48  ;;  %v1058_v38 = vmul.f32 %v10682_v57, %v14490_v36  ;;  %v1693_v29 = vpop.permute.xlu0 %1692  ;;  %v14493_v46 = vld [vmem:[#allocation95_spill] sm:$0xff]  ;;  %v14494_v8 = vld [vmem:[#allocation96_spill] sm:$0xff] }
 0x23d   :  { %9333 = vset.pattern.permute.xlu1 %v14465_v22  ;;  %v2023_v55 = vmul.f32 %v10730_v21, %v14491_v49  ;;  %v2140_v14 = vmax.f32 %v2060_v62, 0.0  ;;  %v1540_v2 = vmul.f32 %v10714_v9, %v14492_v3  ;;  %v2139_v33 = vmax.f32 %v2059_v45, 0.0  ;;  %v11168_v35 = vpop.permute.xlu1 %1232  ;;  %v14497_v49 = vld [vmem:[#allocation8_spill] sm:$0xff]  ;;  %v14498_v3 = vld [vmem:[#allocation10_spill] sm:$0xff] }
 0x23e   :  { %1432 = vperm.xlu1 %9333, %v11162_v44   ;;  %v1982_v40 = vmul.f32 %v10730_v21, %v1693_v29  ;;  %8717 = vmatprep.mubr.msk.bf16.mxu1 %vm2292_vm0, %v11150_v10  ;;  %v1059_v39 = vmul.f32 %v10682_v57, %v14493_v46  ;;  %v1062_v53 = vmul.f32 %v10682_v57, %v14494_v8  ;;  %v2141_v47 = vmax.f32 %v2061_v0, 0.0 }
 0x23f   :  { %v1057_v62 = vmul.f32 %v10682_v57, %v14495_v15  ;;  %v1619_v31 = vadd.f32 %v1539_v16, %v1135_v51  ;;  %8718 = vmatmul.mubr.msk.bf16.gmra.mrb[8].mxu1 %vm2292_vm0, %v11153_v13  ;;  %v1542_v48 = vmul.f32 %v10714_v9, %v14496_v42  ;;  %v11182_v56 = vpack.c.bf16 %v2140_v14, %v2139_v33  ;;  %v11192_v16 = vld [vmem:[%s14094_s0 + $0xc8] sm:$0xff]  ;;  %v14500_v15 = vld [vmem:[#allocation138_spill] sm:$0xff] }
 0x240   :  { %v2062_v45 = vadd.f32 %v1982_v40, %v1578_v24  ;;  %v1138_v36 = vadd.f32 %v1058_v38, %v10811_v60  ;;  %v1016_v29 = vmul.f32 %v10682_v57, %v14497_v49  ;;  %v1541_v46 = vmul.f32 %v10714_v9, %v14498_v3  ;;  %v1861_v51 = vpop.permute.xlu0 %1860  ;;  %v14499_v40 = vld [vmem:[#allocation16_spill] sm:$0xff]  ;;  %v14501_v49 = vld [vmem:[#allocation25_spill] sm:$0xff] }
 0x241   :  { %v2103_v8 = vadd.f32 %v2023_v55, %v1619_v31  ;;  %v1620_v0 = vadd.f32 %v1540_v2, %v11039_v58  ;;  %v2026_v60 = vmul.f32 %v10730_v21, %v10865_v61  ;;  %v2024_v38 = vmul.f32 %v10730_v21, %v1861_v51  ;;  %8677 = vmatprep.mubr.msk.bf16.mxu0 %vm2292_vm0, %v11182_v56 }
 0x242   :  { %1264 = vperm.xlu1 %9333, %v11192_v16   ;;  %v2142_v24 = vmax.f32 %v2062_v45, 0.0  ;;  %v11202_v55 = vadd.f32 %v1059_v39, %v10833_v25  ;;  %v11205_v14 = vadd.f32 %v1062_v53, %v10848_v63  ;;  %v1137_v33 = vadd.f32 %v1057_v62, %v10821_v23  ;;  %v1877_v2 = vpop.permute.xlu1 %1876 }
 0x243   :  { %v1500_v58 = vmul.f32 %v10714_v9, %v14499_v40  ;;  %v1499_v61 = vmul.f32 %v10714_v9, %v14500_v15  ;;  %v1622_v31 = vadd.f32 %v1542_v48, %v1138_v36  ;;  %v2104_v45 = vadd.f32 %v2024_v38, %v1620_v0 }
 0x244   :  { %v11212_v42 = vpack.c.bf16 %v2142_v24, %v2141_v47  ;;  %v1096_v3 = vadd.f32 %v1016_v29, %v14501_v49  ;;  %v1621_v25 = vadd.f32 %v1541_v46, %v1137_v33  ;;  %v2183_v39 = vmax.f32 %v2103_v8, 0.0  ;;  %v1865_v23 = vpop.permute.xlu0 %1864  ;;  %v14502_v47 = vld [vmem:[#allocation154_spill] sm:$0xff]  ;;  %v14503_v24 = vld [vmem:[#allocation140_spill] sm:$0xff] }
 0x245   :  { %v1984_v63 = vmul.f32 %v10730_v21, %v10906_v11  ;;  %v1502_v53 = vmul.f32 %v10714_v9, %v10805_v43  ;;  %v2106_v62 = vadd.f32 %v2026_v60, %v1622_v31  ;;  %v2184_v51 = vmax.f32 %v2104_v45, 0.0  ;;  %v14504_v33 = vld [vmem:[#allocation142_spill] sm:$0xff]  ;;  %v14506_v45 = vld [vmem:[#allocation28_spill] sm:$0xff] }
 0x246   :  { %9334 = vset.pattern.permute.xlu1 %v14241_v26  ;;  %v2025_v48 = vmul.f32 %v10730_v21, %v1865_v23  ;;  %8678 = vmatmul.mubr.msk.bf16.gmra.mrb[8].mxu0 %vm2292_vm0, %v11212_v42  ;;  %v1017_v36 = vmul.f32 %v10682_v57, %v14502_v47  ;;  %v1580_v29 = vadd.f32 %v1500_v58, %v1096_v3  ;;  %v14507_v3 = vld [vmem:[#allocation59_spill] sm:$0xff] }
 0x247   :  { %1908 = vperm.xlu1 %9334, %v10978_v5   ;;  %v1060_v11 = vmul.f32 %v10682_v57, %v10960_v28  ;;  %v1061_v46 = vmul.f32 %v10682_v57, %v10989_v59  ;;  %v1579_v43 = vadd.f32 %v1499_v61, %v11042_v7  ;;  %v1986_v8 = vmul.f32 %v10730_v21, %v10932_v18  ;;  %v11235_v60 = vpop.permute.xlu1 %1236  ;;  %v14505_v28 = vld [vmem:[#allocation56_spill] sm:$0xff] }
 0x248   :  { %v11233_v0 = vpack.c.bf16 %v2184_v51, %v2183_v39  ;;  %v2105_v5 = vadd.f32 %v2025_v48, %v1621_v25  ;;  %v1544_v38 = vmul.f32 %v10714_v9, %v14503_v24  ;;  %v1545_v40 = vmul.f32 %v10714_v9, %v14504_v33  ;;  %v1697_v15 = vpop.permute.xlu0 %1696  ;;  %v14510_v33 = vld [vmem:[#allocation29_spill] sm:$0xff] }
 0x249   :  { %v1501_v58 = vmul.f32 %v10714_v9, %v14505_v28  ;;  %v2064_v59 = vadd.f32 %v1984_v63, %v1580_v29  ;;  %v1582_v7 = vadd.f32 %v1502_v53, %v11148_v52  ;;  %v2186_v61 = vmax.f32 %v2106_v62, 0.0  ;;  %v14508_v52 = vld [vmem:[#allocation98_spill] sm:$0xff] }
 0x24a   :  { %v2185_v18 = vmax.f32 %v2105_v5, 0.0  ;;  %v1983_v31 = vmul.f32 %v10730_v21, %v1697_v15  ;;  %8721 = vmatprep.mubr.msk.bf16.mxu1 %vm2292_vm0, %v11233_v0  ;;  %v1097_v49 = vadd.f32 %v1017_v36, %v14506_v45  ;;  %v1140_v25 = vadd.f32 %v1060_v11, %v14507_v3 }
 0x24b   :  { %9335 = vset.pattern.permute.xlu1 %v14465_v22  ;;  %v1141_v39 = vadd.f32 %v1061_v46, %v10851_v20  ;;  %v1019_v63 = vmul.f32 %v10682_v57, %v11021_v37  ;;  %v1020_v23 = vmul.f32 %v10682_v57, %v14508_v52  ;;  %v2066_v53 = vadd.f32 %v1986_v8, %v1582_v7  ;;  %v14513_v52 = vld [vmem:[#allocation32_spill] sm:$0xff] }
 0x24c   :  { %1268 = vperm.xlu1 %9335, %v11110_v50   ;;  %v11256_v62 = vpack.c.bf16 %v2186_v61, %v2185_v18  ;;  %v2063_v51 = vadd.f32 %v1983_v31, %v1579_v43  ;;  %v1581_v48 = vadd.f32 %v1501_v58, %v1097_v49  ;;  %v2144_v47 = vmax.f32 %v2064_v59, 0.0  ;;  %v1881_v20 = vpop.permute.xlu1 %1880  ;;  %v1705_v11 = vpop.permute.xlu0 %1704  ;;  %v14509_v43 = vld [vmem:[#allocation144_spill] sm:$0xff] }
 0x24d   :  { %v1543_v36 = vmul.f32 %v10714_v9, %v11054_v27  ;;  %v2028_v29 = vmul.f32 %v10730_v21, %v1877_v2  ;;  %v1546_v37 = vmul.f32 %v10714_v9, %v11138_v17  ;;  %v2029_v5 = vmul.f32 %v10730_v21, %v1881_v20 }
 0x24e   :  { %v2143_v46 = vmax.f32 %v2063_v51, 0.0  ;;  %v1985_v8 = vmul.f32 %v10730_v21, %v1705_v11  ;;  %8722 = vmatmul.mubr.msk.bf16.gmra.mrb[12].mxu1 %vm2292_vm0, %v11256_v62  ;;  %v1503_v24 = vmul.f32 %v10714_v9, %v14509_v43  ;;  %v1099_v27 = vadd.f32 %v1019_v63, %v14510_v33 }
 0x24f   :  { %v1624_v28 = vadd.f32 %v1544_v38, %v1140_v25  ;;  %v1625_v2 = vadd.f32 %v1545_v40, %v1141_v39  ;;  %v2146_v58 = vmax.f32 %v2066_v53, 0.0  ;;  %v1022_v17 = vmul.f32 %v10682_v57, %v11115_v32 }
 0x250   :  { %9336 = vset.pattern.permute.xlu1 %v14241_v26  ;;  %v11273_v59 = vpack.c.bf16 %v2144_v47, %v2143_v46  ;;  %v2065_v15 = vadd.f32 %v1985_v8, %v1581_v48  ;;  %v1623_v7 = vadd.f32 %v1543_v36, %v11202_v55  ;;  %v1504_v61 = vmul.f32 %v10714_v9, %v11168_v35  ;;  %v1885_v38 = vpop.permute.xlu1 %1884  ;;  %v1873_v40 = vpop.permute.xlu0 %1872  ;;  %v14512_v55 = vld [vmem:[#allocation146_spill] sm:$0xff]  ;;  %v14514_v8 = vld [vmem:[#allocation33_spill] sm:$0xff] }
 0x251   :  { %1912 = vperm.xlu1 %9336, %v11009_v4   ;;  %v2108_v18 = vadd.f32 %v2028_v29, %v1624_v28  ;;  %v2109_v31 = vadd.f32 %v2029_v5, %v1625_v2  ;;  %v1626_v45 = vadd.f32 %v1546_v37, %v11205_v14  ;;  %v2030_v3 = vmul.f32 %v10730_v21, %v1885_v38  ;;  %v14511_v4 = vld [vmem:[#allocation17_spill] sm:$0xff] }
 0x252   :  { %v2145_v49 = vmax.f32 %v2065_v15, 0.0  ;;  %v2027_v32 = vmul.f32 %v10730_v21, %v1873_v40  ;;  %8681 = vmatprep.mubr.msk.bf16.mxu0 %vm2292_vm0, %v11273_v59  ;;  %v1100_v25 = vadd.f32 %v1020_v23, %v14511_v4  ;;  %v1506_v39 = vmul.f32 %v10714_v9, %v14512_v55 }
 0x253   :  { %v1021_v35 = vmul.f32 %v10682_v57, %v11090_v41  ;;  %v1583_v63 = vadd.f32 %v1503_v24, %v1099_v27  ;;  %v1102_v53 = vadd.f32 %v1022_v17, %v14513_v52  ;;  %v2110_v51 = vadd.f32 %v2030_v3, %v1626_v45  ;;  %v9421_v3 = vld [vmem:[%s14094_s0 + $0x220] sm:$0xff] }
 0x254   :  { %v11290_v14 = vpack.c.bf16 %v2146_v58, %v2145_v49  ;;  %v2107_v48 = vadd.f32 %v2027_v32, %v1623_v7  ;;  %v1584_v47 = vadd.f32 %v1504_v61, %v1100_v25  ;;  %v2188_v36 = vmax.f32 %v2108_v18, 0.0  ;;  %v1717_v20 = vpop.permute.xlu1 %1716  ;;  %v1713_v11 = vpop.permute.xlu0 %1712  ;;  %v11330_v25 = vld [vmem:[%s14094_s0 + $0x238] sm:$0xff] }
 0x255   :  { %1916 = vperm.xlu1 %9336, %v11162_v44   ;;  %v1505_v23 = vmul.f32 %v10714_v9, %v11235_v60  ;;  %v2189_v29 = vmax.f32 %v2109_v31, 0.0  ;;  %v2190_v37 = vmax.f32 %v2110_v51, 0.0  ;;  %v1988_v41 = vmul.f32 %v10730_v21, %v1717_v20  ;;  %v14519_v20 = vld [vmem:[#allocation100_spill] sm:$0xff] }
 0x256   :  { %v2187_v46 = vmax.f32 %v2107_v48, 0.0  ;;  %v1987_v5 = vmul.f32 %v10730_v21, %v1713_v11  ;;  %8682 = vmatmul.mubr.msk.bf16.gmra.mrb[12].mxu0 %vm2292_vm0, %v11290_v14  ;;  %v1101_v43 = vadd.f32 %v1021_v35, %v14514_v8  ;;  %v1586_v2 = vadd.f32 %v1506_v39, %v1102_v53  ;;  %v11338_v39 = vld [vmem:[%s14094_s0 + $0xe8] sm:$0xff]  ;;  %v14515_v53 = vld [vmem:[#allocation34_spill] sm:$0xff]  ;;  %v14516_v48 = vld [vmem:[#allocation68_spill] sm:$0xff] }
 0x257   :  { %v11300_v44 = vpack.c.bf16 %v2190_v37, %v2189_v29  ;;  %v2068_v33 = vadd.f32 %v1988_v41, %v1584_v47  ;;  %v14517_v47 = vld [vmem:[#allocation156_spill] sm:$0xff]  ;;  %v1064_v11 = vmul.f32 %v10682_v57, %v14519_v20 }
 0x258   :  { %v11302_v24 = vpack.c.bf16 %v2188_v36, %v2187_v46  ;;  %v2067_v60 = vadd.f32 %v1987_v5, %v1583_v63  ;;  %v1585_v27 = vadd.f32 %v1505_v23, %v1101_v43  ;;  %v1721_v28 = vpop.permute.xlu1 %1720  ;;  %v1725_v58 = vpop.permute.xlu0 %1724  ;;  %v9425_v63 = vld [vmem:[%s14094_s0 + $0x228] sm:$0xff]  ;;  %v580_v36 = vmul.f32 %v14517_v47, %v14516_v48  ;;  %v14518_v23 = vld [vmem:[#allocation69_spill] sm:$0xff]  ;;  %v11359_v46 = vld [vmem:[%s14097_s2] ss:$0 sm:$0xff] }
 0x259   :  { %1748 = vperm.xlu1 %9336, %v11192_v16   ;;  %v2148_v17 = vmax.f32 %v2068_v33, 0.0  ;;  %v1989_v7 = vmul.f32 %v10730_v21, %v1721_v28  ;;  %v1990_v61 = vmul.f32 %v10730_v21, %v1725_v58  ;;  %v579_v29 = vmul.f32 %v14517_v47, %v14518_v23  ;;  %v14520_v28 = vld [vmem:[#allocation148_spill] sm:$0xff] }
 0x25a   :  { %v2147_v15 = vmax.f32 %v2067_v60, 0.0  ;;  %8725 = vmatprep.mubr.msk.bf16.mxu1 %vm2292_vm0, %v11302_v24  ;;  %v660_v41 = vadd.f32 %v11359_v46, %v580_v36  ;;  %v14522_v23 = vld [vmem:[#allocation36_spill] sm:$0xff] }
 0x25b   :  { %8726 = vmatmul.mubr.msk.bf16.gmra.mrb[16].mxu1 %vm2292_vm0, %v11300_v44  ;;  %v2069_v31 = vadd.f32 %v1989_v7, %v1585_v27  ;;  %v2070_v16 = vadd.f32 %v1990_v61, %v1586_v2  ;;  %v659_v43 = vadd.f32 %v11359_v46, %v579_v29  ;;  %v1547_v2 = vmul.f32 %v10714_v9, %v14520_v28  ;;  %v14526_v28 = vld [vmem:[#allocation101_spill] sm:$0xff] }
 0x25c   :  { %v11311_v18 = vpack.c.bf16 %v2148_v17, %v2147_v15  ;;  %v1144_v33 = vadd.f32 %v1064_v11, %v660_v41  ;;  %v1893_v27 = vpop.permute.xlu0 %1892  ;;  %v539_v29 = vmul.f32 %v14517_v47, %v14522_v23  ;;  %v14523_v41 = vld [vmem:[#allocation70_spill] sm:$0xff] }
 0x25d   :  { %1752 = vperm.xlu1 %9336, %v11110_v50   ;;  %v2149_v38 = vmax.f32 %v2069_v31, 0.0  ;;  %v2150_v40 = vmax.f32 %v2070_v16, 0.0  ;;  %v921_v45 = vpop.permute.xlu1 %920  ;;  %v9422_v50 = vld [vmem:[%s14094_s0 + $0x230] sm:$0xff]  ;;  %v2032_v58 = vmul.f32 %v10730_v21, %v1893_v27 }
 0x25e   :  { %8685 = vmatprep.mubr.msk.bf16.mxu0 %vm2292_vm0, %v11311_v18  ;;  %v1063_v5 = vmul.f32 %v10682_v57, %v921_v45 }
 0x25f   :  { %v11316_v49 = vpack.c.bf16 %v2150_v40, %v2149_v38  ;;  %v14521_v38 = vld [vmem:[#allocation71_spill] sm:$0xff] }
 0x260   :  { %v1143_v17 = vadd.f32 %v1063_v5, %v659_v43  ;;  %v581_v40 = vmul.f32 %v14517_v47, %v14521_v38  ;;  %v582_v5 = vmul.f32 %v14517_v47, %v14523_v41 }
 0x261   :  { %9337 = vset.pattern.permute.xlu1 %v14443_v54  ;;  %v929_v32 = vpop.permute.xlu1 %928  ;;  %8686 = vmatmul.mubr.msk.bf16.gmra.mrb[16].mxu0 %vm2292_vm0, %v11316_v49 }
 0x262   :  { %952 = vperm.xlu1 %9337, %v9421_v3   ;;  %v1627_v31 = vadd.f32 %v1547_v2, %v1143_v17  ;;  %v661_v20 = vadd.f32 %v11359_v46, %v581_v40  ;;  %v1023_v2 = vmul.f32 %v10682_v57, %v14526_v28  ;;  %v9427_v40 = vld [vmem:[%s14094_s0 + $0xf8] sm:$0xff] }
 0x265   :  { %v933_v4 = vpop.permute.xlu1 %932 }
 0x266   :  { %960 = vperm.xlu1 %9337, %v9422_v50  }
 0x269   :  { %v11333_v55 = vpop.permute.xlu1 %764 }
 0x26a   :  { %964 = vperm.xlu1 %9337, %v11330_v25   ;;  %v1024_v38 = vmul.f32 %v10682_v57, %v11333_v55 }
 0x26e   :  { %796 = vperm.xlu1 %9337, %v11338_v39   ;;  %v1409_v35 = vpop.permute.xlu1 %1408 }
 0x26f   :  { %v1548_v8 = vmul.f32 %v10714_v9, %v1409_v35  ;;  %v1897_v35 = vpop.permute.xlu0 %1896 }
 0x271   :  { %v1628_v15 = vadd.f32 %v1548_v8, %v1144_v33  ;;  %v1066_v33 = vmul.f32 %v10682_v57, %v933_v4 }
 0x272   :  { %9338 = vset.pattern.permute.xlu1 %v14465_v22 }
 0x273   :  { %1440 = vperm.xlu1 %9338, %v9425_v63   ;;  %v11345_v52 = vpop.permute.xlu1 %768  ;;  %v2112_v61 = vadd.f32 %v2032_v58, %v1628_v15  ;;  %v2033_v58 = vmul.f32 %v10730_v21, %v1897_v35  ;;  %v14527_v15 = vld [vmem:[#allocation38_spill] sm:$0xff] }
 0x275   :  { %v2192_v63 = vmax.f32 %v2112_v61, 0.0  ;;  %v1729_v61 = vpop.permute.xlu0 %1728 }
 0x276   :  { %v1991_v23 = vmul.f32 %v10730_v21, %v1729_v61 }
 0x277   :  { %9339 = vset.pattern.permute.xlu1 %v14443_v54 }
 0x278   :  { %800 = vperm.xlu1 %9339, %v14515_v53   ;;  %v1413_v51 = vpop.permute.xlu1 %1412 }
 0x279   :  { %v1549_v11 = vmul.f32 %v10714_v9, %v1413_v51  ;;  %v619_v51 = vadd.f32 %v11359_v46, %v539_v29  ;;  %v1737_v28 = vpop.permute.xlu0 %1736 }
 0x27c   :  { %9340 = vset.pattern.permute.xlu1 %v14465_v22  ;;  %v1417_v37 = vpop.permute.xlu1 %1416 }
 0x27d   :  { %1444 = vperm.xlu1 %9340, %v9422_v50   ;;  %v1065_v50 = vmul.f32 %v10682_v57, %v929_v32  ;;  %v14525_v32 = vld [vmem:[#allocation35_spill] sm:$0xff]  ;;  %v1550_v4 = vmul.f32 %v10714_v9, %v1417_v37  ;;  %v1025_v37 = vmul.f32 %v10682_v57, %v11345_v52 }
 0x27e   :  { %v540_v43 = vmul.f32 %v14517_v47, %v14525_v32 }
 0x280   :  { %v1249_v60 = vpop.permute.xlu1 %1248 }
 0x281   :  { %1448 = vperm.xlu1 %9340, %v11330_v25   ;;  %v1508_v55 = vmul.f32 %v10714_v9, %v1249_v60 }
 0x285   :  { %1280 = vperm.xlu1 %9340, %v11338_v39   ;;  %v1889_v7 = vpop.permute.xlu1 %1888 }
 0x286   :  { %v2031_v16 = vmul.f32 %v10730_v21, %v1889_v7  ;;  %v662_v7 = vadd.f32 %v11359_v46, %v582_v5 }
 0x288   :  { %v2111_v45 = vadd.f32 %v2031_v16, %v1627_v31  ;;  %v14528_v31 = vld [vmem:[#allocation149_spill] sm:$0xff] }
 0x289   :  { %9341 = vset.pattern.permute.xlu1 %v14241_v26  ;;  %v1507_v16 = vmul.f32 %v10714_v9, %v14528_v31 }
 0x28a   :  { %1920 = vperm.xlu1 %9341, %v9421_v3   ;;  %v2191_v48 = vmax.f32 %v2111_v45, 0.0  ;;  %v1253_v36 = vpop.permute.xlu1 %1252  ;;  %v1145_v3 = vadd.f32 %v1065_v50, %v661_v20  ;;  %v620_v45 = vadd.f32 %v11359_v46, %v540_v43  ;;  %v14529_v50 = vld [vmem:[#allocation37_spill] sm:$0xff] }
 0x28b   :  { %v542_v35 = vmul.f32 %v14517_v47, %v14529_v50  ;;  %v1509_v5 = vmul.f32 %v10714_v9, %v1253_v36 }
 0x28c   :  { %v11381_v8 = vpack.c.bf16 %v2192_v63, %v2191_v48  ;;  %v1629_v17 = vadd.f32 %v1549_v11, %v1145_v3  ;;  %v1146_v63 = vadd.f32 %v1066_v33, %v662_v7  ;;  %v1103_v48 = vadd.f32 %v1023_v2, %v619_v51  ;;  %v14530_v33 = vld [vmem:[#allocation103_spill] sm:$0xff] }
 0x28d   :  { %v1104_v43 = vadd.f32 %v1024_v38, %v620_v45  ;;  %v622_v52 = vadd.f32 %v11359_v46, %v542_v35  ;;  %v1026_v51 = vmul.f32 %v10682_v57, %v14530_v33  ;;  %v11460_v33 = vld [vmem:[%s14094_s0 + $0x110] sm:$0xff] }
 0x28e   :  { %14524 = vst [vmem:[#allocation65_spill] sm:$0xff] %v11381_v8  ;;  %9342 = vset.pattern.permute.xlu1 %v14465_v22  ;;  %v1257_v27 = vpop.permute.xlu1 %1256  ;;  %8729 = vmatprep.mubr.msk.bf16.mxu1 %vm2292_vm0, %v11381_v8  ;;  %v2113_v29 = vadd.f32 %v2033_v58, %v1629_v17  ;;  %v1630_v41 = vadd.f32 %v1550_v4, %v1146_v63 }
 0x28f   :  { %1284 = vperm.xlu1 %9342, %v14515_v53   ;;  %v541_v53 = vmul.f32 %v14517_v47, %v14527_v15  ;;  %v1587_v32 = vadd.f32 %v1507_v16, %v1103_v48  ;;  %v1993_v17 = vmul.f32 %v10730_v21, %v1737_v28  ;;  %v1588_v15 = vadd.f32 %v1508_v55, %v1104_v43  ;;  %v9431_v43 = vld [vmem:[%s14094_s0 + $0x240] sm:$0xff]  ;;  %v14532_v28 = vld [vmem:[#allocation73_spill] sm:$0xff] }
 0x290   :  { %v2193_v36 = vmax.f32 %v2113_v29, 0.0  ;;  %v1510_v61 = vmul.f32 %v10714_v9, %v1257_v27  ;;  %v1106_v16 = vadd.f32 %v1026_v51, %v622_v52 }
 0x291   :  { %v621_v11 = vadd.f32 %v11359_v46, %v541_v53  ;;  %v2071_v58 = vadd.f32 %v1991_v23, %v1587_v32 }
 0x292   :  { %v1590_v63 = vadd.f32 %v1510_v61, %v1106_v16 }
 0x293   :  { %1288 = vperm.xlu1 %9342, %v9427_v40   ;;  %v1901_v20 = vpop.permute.xlu1 %1900  ;;  %v1105_v2 = vadd.f32 %v1025_v37, %v621_v11  ;;  %v2151_v50 = vmax.f32 %v2071_v58, 0.0  ;;  %v9428_v11 = vld [vmem:[%s14094_s0 + $0x248] sm:$0xff] }
 0x294   :  { %v2034_v3 = vmul.f32 %v10730_v21, %v1901_v20 }
 0x295   :  { %v1589_v7 = vadd.f32 %v1509_v5, %v1105_v2  ;;  %v583_v2 = vmul.f32 %v14517_v47, %v14532_v28  ;;  %v14537_v28 = vld [vmem:[#allocation40_spill] sm:$0xff] }
 0x296   :  { %v2114_v60 = vadd.f32 %v2034_v3, %v1630_v41  ;;  %v9430_v3 = vld [vmem:[%s14094_s0 + $0x100] sm:$0xff] }
 0x297   :  { %9343 = vset.pattern.permute.xlu1 %v14241_v26  ;;  %v1733_v53 = vpop.permute.xlu1 %1732  ;;  %v2073_v35 = vadd.f32 %v1993_v17, %v1589_v7  ;;  %v663_v17 = vadd.f32 %v11359_v46, %v583_v2  ;;  %v543_v2 = vmul.f32 %v14517_v47, %v14537_v28 }
 0x298   :  { %1932 = vperm.xlu1 %9343, %v11330_v25   ;;  %v2194_v4 = vmax.f32 %v2114_v60, 0.0  ;;  %v1992_v31 = vmul.f32 %v10730_v21, %v1733_v53  ;;  %v14533_v60 = vld [vmem:[#allocation72_spill] sm:$0xff] }
 0x299   :  { %v2153_v29 = vmax.f32 %v2073_v35, 0.0  ;;  %v584_v58 = vmul.f32 %v14517_v47, %v14533_v60 }
 0x29a   :  { %v11423_v38 = vpack.c.bf16 %v2194_v4, %v2193_v36  ;;  %v2072_v45 = vadd.f32 %v1992_v31, %v1588_v15  ;;  %v14534_v36 = vld [vmem:[#allocation105_spill] sm:$0xff] }
 0x29b   :  { %v1741_v25 = vpop.permute.xlu1 %1740  ;;  %v1067_v15 = vmul.f32 %v10682_v57, %v14534_v36  ;;  %v11477_v4 = vld [vmem:[%s14094_s0 + $0x258] sm:$0xff] }
 0x29c   :  { %14531 = vst [vmem:[#allocation66_spill] sm:$0xff] %v11423_v38  ;;  %1764 = vperm.xlu1 %9343, %v11338_v39   ;;  %v2152_v37 = vmax.f32 %v2072_v45, 0.0  ;;  %v1994_v48 = vmul.f32 %v10730_v21, %v1741_v25  ;;  %8730 = vmatmul.mubr.msk.bf16.gmra.mrb[20].mxu1 %vm2292_vm0, %v11423_v38  ;;  %v1905_v45 = vpop.permute.xlu0 %1904 }
 0x29d   :  { %v1147_v31 = vadd.f32 %v1067_v15, %v663_v17 }
 0x29e   :  { %v11429_v27 = vpack.c.bf16 %v2152_v37, %v2151_v50  ;;  %v2074_v23 = vadd.f32 %v1994_v48, %v1590_v63  ;;  %v2035_v50 = vmul.f32 %v10730_v21, %v1905_v45  ;;  %v11485_v63 = vld [vmem:[%s14094_s0 + $0x108] sm:$0xff]  ;;  %v14535_v37 = vld [vmem:[#allocation150_spill] sm:$0xff]  ;;  %v14540_v45 = vld [vmem:[#allocation41_spill] sm:$0xff] }
 0x29f   :  { %v1552_v48 = vmul.f32 %v10714_v9, %v14535_v37 }
 0x2a0   :  { %1772 = vperm.xlu1 %9343, %v9427_v40   ;;  %v2154_v55 = vmax.f32 %v2074_v23, 0.0  ;;  %8689 = vmatprep.mubr.msk.bf16.mxu0 %vm2292_vm0, %v11429_v27  ;;  %v11444_v40 = vld [vmem:[%s14094_s0 + $0x250] sm:$0xff] }
 0x2a1   :  { %v941_v20 = vpop.permute.xlu1 %940 }
 0x2a2   :  { %v11433_v39 = vpack.c.bf16 %v2154_v55, %v2153_v29  ;;  %v1068_v7 = vmul.f32 %v10682_v57, %v941_v20 }
 0x2a4   :  { %9344 = vset.pattern.permute.xlu1 %v14443_v54  ;;  %8690 = vmatmul.mubr.msk.bf16.gmra.mrb[20].mxu0 %vm2292_vm0, %v11433_v39 }
 0x2a5   :  { %972 = vperm.xlu1 %9344, %v9428_v11   ;;  %v945_v41 = vpop.permute.xlu1 %944 }
 0x2a6   :  { %v1069_v60 = vmul.f32 %v10682_v57, %v945_v41  ;;  %v14541_v41 = vld [vmem:[#allocation39_spill] sm:$0xff] }
 0x2a9   :  { %976 = vperm.xlu1 %9344, %v11444_v40   ;;  %v777_v5 = vpop.permute.xlu1 %776 }
 0x2aa   :  { %v1027_v15 = vmul.f32 %v10682_v57, %v777_v5  ;;  %v14542_v5 = vld [vmem:[#allocation4_spill] sm:$0xff] }
 0x2ad   :  { %808 = vperm.xlu1 %9344, %v9430_v3   ;;  %v14536_v3 = vld [vmem:[#allocation75_spill] sm:$0xff] }
 0x2af   :  { %v1421_v32 = vpop.permute.xlu1 %1420 }
 0x2b0   :  { %v1551_v61 = vmul.f32 %v10714_v9, %v1421_v32  ;;  %v585_v32 = vmul.f32 %v14517_v47, %v14536_v3 }
 0x2b1   :  { %9345 = vset.pattern.permute.xlu1 %v14465_v22 }
 0x2b2   :  { %1452 = vperm.xlu1 %9345, %v9431_v43   ;;  %v1631_v35 = vadd.f32 %v1551_v61, %v1147_v31 }
 0x2b4   :  { %v11454_v52 = vpop.permute.xlu1 %784  ;;  %v2115_v29 = vadd.f32 %v2035_v50, %v1631_v35  ;;  %v546_v50 = vmul.f32 %v14517_v47, %v14540_v45  ;;  %v1070_v35 = vmul.f32 %v10682_v57, %v14542_v5 }
 0x2b6   :  { %9346 = vset.pattern.permute.xlu1 %v14443_v54 }
 0x2b7   :  { %816 = vperm.xlu1 %9346, %v11460_v33  }
 0x2b8   :  { %v789_v51 = vpop.permute.xlu1 %788 }
 0x2bb   :  { %820 = vperm.xlu1 %9346, %v10870_v34   ;;  %v664_v34 = vadd.f32 %v11359_v46, %v584_v58  ;;  %v2195_v58 = vmax.f32 %v2115_v29, 0.0 }
 0x2bd   :  { %v1433_v53 = vpop.permute.xlu1 %1432  ;;  %v1148_v25 = vadd.f32 %v1068_v7, %v664_v34  ;;  %v14538_v7 = vld [vmem:[#allocation74_spill] sm:$0xff]  ;;  %v665_v34 = vadd.f32 %v11359_v46, %v585_v32  ;;  %v1745_v32 = vpop.permute.xlu0 %1744 }
 0x2be   :  { %v586_v61 = vmul.f32 %v14517_v47, %v14538_v7  ;;  %v14546_v7 = vld [vmem:[#allocation42_spill] sm:$0xff] }
 0x2bf   :  { %9347 = vset.pattern.permute.xlu1 %v14465_v22  ;;  %v1632_v55 = vadd.f32 %v1552_v48, %v1148_v25  ;;  %v544_v25 = vmul.f32 %v14517_v47, %v14541_v41  ;;  %v1149_v37 = vadd.f32 %v1069_v60, %v665_v34  ;;  %v14544_v60 = vld [vmem:[#allocation5_spill] sm:$0xff] }
 0x2c0   :  { %1464 = vperm.xlu1 %9347, %v11477_v4  }
 0x2c1   :  { %v1265_v16 = vpop.permute.xlu1 %1264 }
 0x2c2   :  { %v1512_v41 = vmul.f32 %v10714_v9, %v1265_v16 }
 0x2c4   :  { %1296 = vperm.xlu1 %9347, %v11485_v63  }
 0x2c6   :  { %v1909_v23 = vpop.permute.xlu1 %1908 }
 0x2c7   :  { %v2036_v20 = vmul.f32 %v10730_v21, %v1909_v23  ;;  %v1030_v23 = vmul.f32 %v10682_v57, %v789_v51  ;;  %v624_v51 = vadd.f32 %v11359_v46, %v544_v25  ;;  %v14547_v25 = vld [vmem:[#allocation157_spill] sm:$0xff] }
 0x2c8   :  { %9348 = vset.pattern.permute.xlu1 %v14241_v26 }
 0x2c9   :  { %v2116_v43 = vadd.f32 %v2036_v20, %v1632_v55  ;;  %1940 = vperm.xlu1 %9348, %v9428_v11   ;;  %v623_v11 = vadd.f32 %v11359_v46, %v543_v2  ;;  %v666_v55 = vadd.f32 %v11359_v46, %v586_v61  ;;  %v14543_v20 = vld [vmem:[#allocation151_spill] sm:$0xff]  ;;  %v626_v2 = vadd.f32 %v11359_v46, %v546_v50 }
 0x2ca   :  { %v1553_v3 = vmul.f32 %v10714_v9, %v14543_v20  ;;  %v545_v61 = vmul.f32 %v14517_v47, %v14546_v7 }
 0x2cb   :  { %v2196_v17 = vmax.f32 %v2116_v43, 0.0  ;;  %v1269_v36 = vpop.permute.xlu1 %1268  ;;  %v1107_v48 = vadd.f32 %v1027_v15, %v623_v11  ;;  %v1554_v43 = vmul.f32 %v10714_v9, %v1433_v53  ;;  %v1150_v34 = vadd.f32 %v1070_v35, %v666_v55 }
 0x2cc   :  { %v1633_v11 = vadd.f32 %v1553_v3, %v1149_v37  ;;  %v1995_v53 = vmul.f32 %v10730_v21, %v1745_v32  ;;  %v1110_v50 = vadd.f32 %v1030_v23, %v626_v2  ;;  %v625_v35 = vadd.f32 %v11359_v46, %v545_v61  ;;  %v1757_v37 = vpop.permute.xlu0 %1756 }
 0x2cd   :  { %v11501_v31 = vpack.c.bf16 %v2196_v17, %v2195_v58  ;;  %9349 = vset.pattern.permute.xlu1 %v14465_v22  ;;  %v1028_v58 = vmul.f32 %v10682_v57, %v14544_v60  ;;  %v14545_v17 = vld [vmem:[#allocation153_spill] sm:$0xff]  ;;  %v1998_v16 = vmul.f32 %v10730_v21, %v1757_v37  ;;  %v11588_v37 = vld [vmem:[%s14094_s0 + $0x128] sm:$0xff] }
 0x2ce   :  { %1300 = vperm.xlu1 %9349, %v11460_v33   ;;  %v1511_v15 = vmul.f32 %v10714_v9, %v14545_v17 }
 0x2cf   :  { %14539 = vst [vmem:[#allocation67_spill] sm:$0xff] %v11501_v31  ;;  %8733 = vmatprep.mubr.msk.bf16.mxu1 %vm2292_vm0, %v11501_v31  ;;  %v1108_v17 = vadd.f32 %v1028_v58, %v624_v51  ;;  %v1514_v31 = vmul.f32 %v10714_v9, %v14547_v25  ;;  %v11580_v25 = vld [vmem:[%s14094_s0 + $0x278] sm:$0xff] }
 0x2d0   :  { %v1913_v29 = vpop.permute.xlu1 %1912  ;;  %v1591_v45 = vadd.f32 %v1511_v15, %v1107_v48 }
 0x2d1   :  { %v2037_v28 = vmul.f32 %v10730_v21, %v1913_v29  ;;  %v1634_v29 = vadd.f32 %v1554_v43, %v1150_v34  ;;  %v1594_v48 = vadd.f32 %v1514_v31, %v1110_v50  ;;  %v1592_v23 = vadd.f32 %v1512_v41, %v1108_v17 }
 0x2d2   :  { %9350 = vset.pattern.permute.xlu1 %v14241_v26  ;;  %v2075_v32 = vadd.f32 %v1995_v53, %v1591_v45  ;;  %v1513_v43 = vmul.f32 %v10714_v9, %v1269_v36 }
 0x2d3   :  { %1944 = vperm.xlu1 %9350, %v11444_v40   ;;  %v2117_v20 = vadd.f32 %v2037_v28, %v1633_v11  ;;  %v1029_v40 = vmul.f32 %v10682_v57, %v11454_v52  ;;  %v2078_v11 = vadd.f32 %v1998_v16, %v1594_v48  ;;  %v9439_v16 = vld [vmem:[%s14094_s0 + $0x268] sm:$0xff] }
 0x2d4   :  { %v1917_v5 = vpop.permute.xlu1 %1916  ;;  %v2155_v52 = vmax.f32 %v2075_v32, 0.0 }
 0x2d5   :  { %v2038_v60 = vmul.f32 %v10730_v21, %v1917_v5  ;;  %v2197_v28 = vmax.f32 %v2117_v20, 0.0  ;;  %v1109_v15 = vadd.f32 %v1029_v40, %v625_v35  ;;  %v2158_v50 = vmax.f32 %v2078_v11, 0.0  ;;  %v11559_v5 = vld [vmem:[%s14094_s0 + $0x260] sm:$0xff] }
 0x2d6   :  { %v9365_v20 = vld [vmem:[%s14095_s3 + $0x40] sm:$0xff]  }
 0x2d7   :  { %v2118_v55 = vadd.f32 %v2038_v60, %v1634_v29  ;;  %1948 = vperm.xlu1 %9350, %v11477_v4   ;;  %v1593_v61 = vadd.f32 %v1513_v43, %v1109_v15  ;;  %8837 = vmatprep.subr.bf16.mxu0 %v9365_v20  ;;  %v9436_v60 = vld [vmem:[%s14094_s0 + $0x270] sm:$0xff] }
 0x2d8   :  { %v1749_v3 = vpop.permute.xlu1 %1748  ;;  %8838 = vmatpush3.bf16.msra.mxu0 %v9365_v20  ;;  %v14556_v20 = vld [vmem:[#allocation14_spill] sm:$0xff] }
 0x2d9   :  { %v2198_v2 = vmax.f32 %v2118_v55, 0.0  ;;  %v1996_v58 = vmul.f32 %v10730_v21, %v1749_v3  ;;  %v9366_v55 = vld [vmem:[%s14095_s3 + $0x8] sm:$0xff]  }
 0x2db   :  { %v11542_v51 = vpack.c.bf16 %v2198_v2, %v2197_v28  ;;  %v2076_v7 = vadd.f32 %v1996_v58, %v1592_v23  ;;  %1780 = vperm.xlu1 %9350, %v11485_v63   ;;  %v11606_v2 = vld [vmem:[%s14094_s0 + $0x130] sm:$0xff] }
 0x2dc   :  { %v1753_v4 = vpop.permute.xlu1 %1752 }
 0x2dd   :  { %14548 = vst [vmem:[#allocation15_spill] sm:$0xff] %v11542_v51  ;;  %v2156_v34 = vmax.f32 %v2076_v7, 0.0  ;;  %v1997_v31 = vmul.f32 %v10730_v21, %v1753_v4  ;;  %8734 = vmatmul.mubr.msk.bf16.gmra.mrb[24].mxu1 %vm2292_vm0, %v11542_v51 }
 0x2df   :  { %v11548_v36 = vpack.c.bf16 %v2156_v34, %v2155_v52  ;;  %v2077_v53 = vadd.f32 %v1997_v31, %v1593_v61  ;;  %1784 = vperm.xlu1 %9350, %v11460_v33   ;;  %v9364_v33 = vld [vmem:[%s14095_s3] sm:$0xff]   ;;  %v9367_v52 = vld [vmem:[%s14095_s3 + $0x48] sm:$0xff]   ;;  %v14553_v31 = vld [vmem:[#allocation76_spill] sm:$0xff] }
 0x2e0   :  { %8749 = vmatprep.subr.bf16.mxu1 %v9364_v33  ;;  %8839 = vmatprep.subr.bf16.mxu0 %v9367_v52  ;;  %v588_v11 = vmul.f32 %v14517_v47, %v14553_v31 }
 0x2e1   :  { %v2157_v45 = vmax.f32 %v2077_v53, 0.0  ;;  %v953_v41 = vpop.permute.xlu1 %952  ;;  %8693 = vmatprep.mubr.msk.bf16.mxu0 %vm2292_vm0, %v11548_v36  ;;  %8750 = vmatpush3.bf16.msra.mxu1 %v9364_v33 }
 0x2e2   :  { %8751 = vmatprep.subr.bf16.mxu1 %v9366_v55  ;;  %8840 = vmatpush3.bf16.msra.mxu0 %v9367_v52  ;;  %v668_v52 = vadd.f32 %v11359_v46, %v588_v11 }
 0x2e3   :  { %v11553_v63 = vpack.c.bf16 %v2158_v50, %v2157_v45  ;;  %9351 = vset.pattern.permute.xlu1 %v14443_v54  ;;  %v14554_v45 = vld [vmem:[#allocation77_spill] sm:$0xff] }
 0x2e4   :  { %984 = vperm.xlu1 %9351, %v11559_v5   ;;  %v587_v50 = vmul.f32 %v14517_v47, %v14554_v45 }
 0x2e5   :  { %v11562_v29 = vpop.permute.xlu1 %960  ;;  %8694 = vmatmul.mubr.msk.bf16.gmra.mrb[24].mxu0 %vm2292_vm0, %v11553_v63  ;;  %8752 = vmatpush3.bf16.msra.mxu1 %v9366_v55  ;;  %v1072_v55 = vmul.f32 %v10682_v57, %v14556_v20 }
 0x2e6   :  { %v667_v45 = vadd.f32 %v11359_v46, %v587_v50 }
 0x2e8   :  { %992 = vperm.xlu1 %9351, %v9436_v60  }
 0x2e9   :  { %v11575_v17 = vpop.permute.xlu1 %964 }
 0x2ec   :  { %996 = vperm.xlu1 %9351, %v11580_v25  }
 0x2ed   :  { %v11583_v35 = vpop.permute.xlu1 %796 }
 0x2f0   :  { %828 = vperm.xlu1 %9351, %v11588_v37  }
 0x2f2   :  { %v1441_v40 = vpop.permute.xlu1 %1440 }
 0x2f4   :  { %9352 = vset.pattern.permute.xlu1 %v14465_v22 }
 0x2f5   :  { %1472 = vperm.xlu1 %9352, %v9439_v16  }
 0x2f6   :  { %v8711_v23 = vpop.f32.mrb[0].mxu1 }
 0x2f7   :  { %v11598_v48 = vpop.permute.xlu1 %800  ;;  %v11600_v3 = vpop.f32.mrb[1].mxu1  ;;  %v2930_v43 = vrot.slane %v8711_v23, 1 }
 0x2f8   :  { %14549 = vst [vmem:[#allocation88_spill] sm:$0xff] %v11600_v3  ;;  %v8712_v32 = vpop.f32.mrb[2].mxu1  ;;  %v14141_v15 = vrot.slane %v11600_v3, 1 }
 0x2f9   :  { %9353 = vset.pattern.permute.xlu1 %v14443_v54  ;;  %v2932_v28 = vrot.slane %v8712_v32, 1  ;;  %v2610_v58 = vpop.f32.mrb[3].mxu1  ;;  %v1071_v32 = vmul.f32 %v10682_v57, %v953_v41  ;;  %v1152_v41 = vadd.f32 %v1072_v55, %v668_v52 }
 0x2fa   :  { %832 = vperm.xlu1 %9353, %v11606_v2   ;;  %v2928_v7 = vrot.slane %v2610_v58, 1 }
 0x2fb   :  { %v11616_v4 = vsel %vm2846_vm1, %v2930_v43, %v2932_v28 }
 0x2fc   :  { %v11613_v54 = vpop.permute.xlu1 %1444  ;;  %14550 = vst [vmem:[#allocation93_spill] sm:$0xff] %v11616_v4  ;;  %v11621_v61 = vsel %vm2846_vm1, %v14141_v15, %v2928_v7  ;;  %v11624_v34 = vsel %vm2846_vm1, %v2928_v7, %v2930_v43  ;;  %v8671_v53 = vpop.f32.mrb[0].mxu0  ;;  %v1151_v15 = vadd.f32 %v1071_v32, %v667_v45  ;;  %v14560_v4 = vld [vmem:[#allocation11_spill] sm:$0xff] }
 0x2fd   :  { %14551 = vst [vmem:[#allocation97_spill] sm:$0xff] %v11621_v61  ;;  %14552 = vst [vmem:[#allocation120_spill] sm:$0xff] %v11624_v34  ;;  %v11631_v33 = vpop.f32.mrb[1].mxu0  ;;  %v2850_v43 = vrot.slane %v8671_v53, 1  ;;  %v1555_v3 = vmul.f32 %v10714_v9, %v14560_v4  ;;  %v9369_v4 = vld [vmem:[%s14095_s3 + $0x50] sm:$0xff]  }
 0x2fe   :  { %9355 = vset.pattern.permute.xlu1 %v14465_v22  ;;  %14555 = vst [vmem:[#allocation89_spill] sm:$0xff] %v11631_v33  ;;  %v11637_v23 = vpop.f32.mrb[2].mxu0  ;;  %8841 = vmatprep.subr.bf16.mxu0 %v9369_v4 }
 0x2ff   :  { %1476 = vperm.xlu1 %9355, %v9436_v60   ;;  %v14143_v58 = vrot.slane %v11637_v23, 1  ;;  %v11641_v7 = vpop.f32.mrb[3].mxu0  ;;  %v1556_v60 = vmul.f32 %v10714_v9, %v1441_v40  ;;  %v1925_v40 = vpop.permute.xlu0 %1924  ;;  %v1635_v45 = vadd.f32 %v1555_v3, %v1151_v15  ;;  %v14564_v3 = vld [vmem:[#allocation79_spill] sm:$0xff]  ;;  %8842 = vmatpush3.bf16.msra.mxu0 %v9369_v4 }
 0x300   :  { %v11635_v16 = vpop.permute.xlu1 %1448  ;;  %14557 = vst [vmem:[#allocation102_spill] sm:$0xff] %v11641_v7  ;;  %v14145_v31 = vrot.slane %v11641_v7, 1  ;;  %v2040_v34 = vmul.f32 %v10730_v21, %v1925_v40  ;;  %v589_v15 = vmul.f32 %v14517_v47, %v14564_v3 }
 0x301   :  { %v11651_v20 = vsel %vm2846_vm1, %v2850_v43, %v14143_v58  ;;  %v1636_v50 = vadd.f32 %v1556_v60, %v1152_v41  ;;  %v9368_v60 = vld [vmem:[%s14095_s3 + $0x10] sm:$0xff]  }
 0x302   :  { %14558 = vst [vmem:[#allocation99_spill] sm:$0xff] %v11651_v20  ;;  %v11658_v11 = vsel %vm2846_vm1, %v14145_v31, %v2850_v43  ;;  %v14561_v20 = vld [vmem:[#allocation43_spill] sm:$0xff]  ;;  %8753 = vmatprep.subr.bf16.mxu1 %v9368_v60 }
 0x303   :  { %1480 = vperm.xlu1 %9355, %v11580_v25   ;;  %14559 = vst [vmem:[#allocation124_spill] sm:$0xff] %v11658_v11  ;;  %v548_v7 = vmul.f32 %v14517_v47, %v14561_v20  ;;  %8754 = vmatpush3.bf16.msra.mxu1 %v9368_v60 }
 0x304   :  { %v11653_v53 = vpop.permute.xlu1 %1280  ;;  %v8715_v61 = vpop.f32.mrb[4].mxu1 }
 0x305   :  { %v2623_v58 = vpop.f32.mrb[5].mxu1  ;;  %v2938_v43 = vrot.slane %v8715_v61, 1  ;;  %v14563_v61 = vld [vmem:[#allocation44_spill] sm:$0xff] }
 0x306   :  { %v2934_v55 = vrot.slane %v2623_v58, 1  ;;  %v11664_v52 = vpop.f32.mrb[6].mxu1  ;;  %v2120_v58 = vadd.f32 %v2040_v34, %v1636_v50  ;;  %v547_v31 = vmul.f32 %v14517_v47, %v14563_v61  ;;  %v1929_v34 = vpop.permute.xlu0 %1928  ;;  %v11699_v61 = vadd.f32 %v11359_v46, %v548_v7 }
 0x307   :  { %1312 = vperm.xlu1 %9355, %v11588_v37   ;;  %v2626_v40 = vpop.f32.mrb[7].mxu1  ;;  %v14565_v33 = vrot.slane %v11664_v52, 1 }
 0x308   :  { %v2936_v11 = vrot.slane %v2626_v40, 1  ;;  %v11677_v20 = vsel %vm2846_vm1, %v2932_v28, %v2934_v55  ;;  %v1073_v40 = vmul.f32 %v10682_v57, %v11562_v29  ;;  %v1557_v29 = vmul.f32 %v10714_v9, %v11613_v54 }
 0x309   :  { %v1921_v32 = vpop.permute.xlu1 %1920  ;;  %14562 = vst [vmem:[#allocation122_spill] sm:$0xff] %v11677_v20  ;;  %v11687_v51 = vsel %vm2846_vm1, %v2938_v43, %v14565_v33  ;;  %v14569_v33 = vld [vmem:[#allocation46_spill] sm:$0xff] }
 0x30a   :  { %v2039_v41 = vmul.f32 %v10730_v21, %v1921_v32  ;;  %14566 = vst [vmem:[#allocation106_spill] sm:$0xff] %v11687_v51  ;;  %v11691_v28 = vsel %vm2846_vm1, %v2934_v55, %v2936_v11  ;;  %v11694_v32 = vsel %vm2846_vm1, %v2936_v11, %v2938_v43  ;;  %v549_v3 = vmul.f32 %v14517_v47, %v14569_v33  ;;  %v14570_v43 = vld [vmem:[#allocation109_spill] sm:$0xff]  ;;  %v14572_v33 = vld [vmem:[#allocation78_spill] sm:$0xff] }
 0x30b   :  { %9357 = vset.pattern.permute.xlu1 %v14241_v26  ;;  %14567 = vst [vmem:[#allocation2_spill] sm:$0xff] %v11691_v28  ;;  %14568 = vst [vmem:[#allocation126_spill] sm:$0xff] %v11694_v32  ;;  %v627_v55 = vadd.f32 %v11359_v46, %v547_v31  ;;  %v669_v11 = vadd.f32 %v11359_v46, %v589_v15  ;;  %v1031_v32 = vmul.f32 %v10682_v57, %v14570_v43  ;;  %v14571_v28 = vld [vmem:[#allocation45_spill] sm:$0xff] }
 0x30c   :  { %v2119_v50 = vadd.f32 %v2039_v41, %v1635_v45  ;;  %1952 = vperm.xlu1 %9357, %v11559_v5   ;;  %v2200_v45 = vmax.f32 %v2120_v58, 0.0  ;;  %v8675_v60 = vpop.f32.mrb[4].mxu0  ;;  %v550_v51 = vmul.f32 %v14517_v47, %v14571_v28  ;;  %v590_v58 = vmul.f32 %v14517_v47, %v14572_v33  ;;  %v14574_v15 = vld [vmem:[#allocation13_spill] sm:$0xff]  ;;  %v1761_v33 = vpop.permute.xlu0 %1760 }
 0x30d   :  { %v2463_v7 = vpop.f32.mrb[5].mxu0  ;;  %v1515_v43 = vmul.f32 %v10714_v9, %v14574_v15  ;;  %v1153_v20 = vadd.f32 %v1073_v40, %v669_v11  ;;  %v2858_v38 = vrot.slane %v8675_v60, 1  ;;  %v629_v8 = vadd.f32 %v11359_v46, %v549_v3 }
 0x30e   :  { %v2199_v41 = vmax.f32 %v2119_v50, 0.0  ;;  %v1285_v5 = vpop.permute.xlu1 %1284  ;;  %v2854_v4 = vrot.slane %v2463_v7, 1  ;;  %v11716_v31 = vpop.f32.mrb[6].mxu0  ;;  %v14575_v7 = vrot.slane %v11637_v23, 1  ;;  %v1111_v60 = vadd.f32 %v1031_v32, %v627_v55 }
 0x30f   :  { %v14155_v54 = vrot.slane %v11716_v31, 1  ;;  %v2466_v28 = vpop.f32.mrb[7].mxu0  ;;  %v1637_v11 = vadd.f32 %v1557_v29, %v1153_v20  ;;  %v1999_v20 = vmul.f32 %v10730_v21, %v1761_v33  ;;  %v1033_v55 = vmul.f32 %v10682_v57, %v11598_v48 }
 0x310   :  { %v11713_v50 = vpack.c.bf16 %v2200_v45, %v2199_v41  ;;  %9358 = vset.pattern.permute.xlu1 %v14465_v22  ;;  %v1074_v45 = vmul.f32 %v10682_v57, %v11575_v17  ;;  %v2856_v41 = vrot.slane %v2466_v28, 1  ;;  %v11730_v40 = vsel %vm2846_vm1, %v14575_v7, %v2854_v4 }
 0x311   :  { %1316 = vperm.xlu1 %9358, %v11606_v2   ;;  %14576 = vst [vmem:[#allocation104_spill] sm:$0xff] %v11730_v40  ;;  %v2041_v2 = vmul.f32 %v10730_v21, %v1929_v34  ;;  %v11736_v3 = vsel %vm2846_vm1, %v2858_v38, %v14155_v54  ;;  %v670_v17 = vadd.f32 %v11359_v46, %v590_v58  ;;  %v9441_v58 = vld [vmem:[%s14094_s0 + $0x138] sm:$0xff]  ;;  %v14580_v54 = vrot.slane %v11664_v52, 1 }
 0x312   :  { %14573 = vst [vmem:[#allocation90_spill] sm:$0xff] %v11713_v50  ;;  %v1289_v22 = vpop.permute.xlu1 %1288  ;;  %8737 = vmatprep.mubr.msk.bf16.mxu1 %vm2292_vm0, %v11713_v50  ;;  %v8719_v15 = vpop.f32.mrb[8].mxu1  ;;  %14577 = vst [vmem:[#allocation20_spill] sm:$0xff] %v11736_v3  ;;  %v1558_v28 = vmul.f32 %v10714_v9, %v11635_v16  ;;  %v11742_v23 = vsel %vm2846_vm1, %v2854_v4, %v2856_v41  ;;  %v11745_v32 = vsel %vm2846_vm1, %v2856_v41, %v2858_v38 }
 0x313   :  { %v2639_v50 = vpop.f32.mrb[9].mxu1  ;;  %14578 = vst [vmem:[#allocation107_spill] sm:$0xff] %v11742_v23  ;;  %14579 = vst [vmem:[#allocation6_spill] sm:$0xff] %v11745_v32  ;;  %v1595_v34 = vadd.f32 %v1515_v43, %v1111_v60  ;;  %v1154_v7 = vadd.f32 %v1074_v45, %v670_v17  ;;  %v1032_v4 = vmul.f32 %v10682_v57, %v11583_v35  ;;  %v2946_v38 = vrot.slane %v8719_v15, 1 }
 0x314   :  { %v2942_v29 = vrot.slane %v2639_v50, 1  ;;  %v11753_v16 = vpop.f32.mrb[10].mxu1  ;;  %v2121_v33 = vadd.f32 %v2041_v2, %v1637_v11  ;;  %v1517_v60 = vmul.f32 %v10714_v9, %v1285_v5  ;;  %v1516_v45 = vmul.f32 %v10714_v9, %v11653_v53  ;;  %v14583_v2 = vld [vmem:[#allocation110_spill] sm:$0xff] }
 0x315   :  { %1320 = vperm.xlu1 %9358, %v9441_v58   ;;  %v14156_v43 = vrot.slane %v11753_v16, 1  ;;  %v2642_v41 = vpop.f32.mrb[11].mxu1  ;;  %v1638_v23 = vadd.f32 %v1558_v28, %v1154_v7  ;;  %v1034_v5 = vmul.f32 %v10682_v57, %v14583_v2  ;;  %v1113_v11 = vadd.f32 %v1033_v55, %v629_v8  ;;  %v1769_v28 = vpop.permute.xlu0 %1768 }
 0x316   :  { %v2944_v48 = vrot.slane %v2642_v41, 1  ;;  %v11762_v32 = vsel %vm2846_vm1, %v14580_v54, %v2942_v29  ;;  %v630_v53 = vadd.f32 %v11359_v46, %v550_v51  ;;  %v2079_v17 = vadd.f32 %v1999_v20, %v1595_v34 }
 0x317   :  { %v1933_v50 = vpop.permute.xlu1 %1932  ;;  %14581 = vst [vmem:[#allocation127_spill] sm:$0xff] %v11762_v32  ;;  %v11770_v15 = vsel %vm2846_vm1, %v2946_v38, %v14156_v43  ;;  %v1112_v7 = vadd.f32 %v1032_v4, %v11699_v61  ;;  %v2001_v8 = vmul.f32 %v10730_v21, %v1769_v28  ;;  %v2201_v55 = vmax.f32 %v2121_v33, 0.0 }
 0x318   :  { %v2042_v35 = vmul.f32 %v10730_v21, %v1933_v50  ;;  %14582 = vst [vmem:[#allocation91_spill] sm:$0xff] %v11770_v15  ;;  %v11776_v52 = vsel %vm2846_vm1, %v2942_v29, %v2944_v48  ;;  %v11779_v54 = vsel %vm2846_vm1, %v2944_v48, %v2946_v38  ;;  %v1518_v29 = vmul.f32 %v10714_v9, %v1289_v22 }
 0x319   :  { %9359 = vset.pattern.permute.xlu1 %v14241_v26  ;;  %14584 = vst [vmem:[#allocation92_spill] sm:$0xff] %v11776_v52  ;;  %14585 = vst [vmem:[#allocation116_spill] sm:$0xff] %v11779_v54  ;;  %v8679_v50 = vpop.f32.mrb[8].mxu0  ;;  %v1597_v26 = vadd.f32 %v1517_v60, %v1113_v11  ;;  %v1596_v38 = vadd.f32 %v1516_v45, %v1112_v7  ;;  %v1114_v54 = vadd.f32 %v1034_v5, %v630_v53 }
 0x31a   :  { %v2122_v41 = vadd.f32 %v2042_v35, %v1638_v23  ;;  %1964 = vperm.xlu1 %9359, %v11580_v25   ;;  %v2479_v43 = vpop.f32.mrb[9].mxu0  ;;  %v2866_v61 = vrot.slane %v8679_v50, 1  ;;  %v14586_v22 = vrot.slane %v11716_v31, 1  ;;  %v2159_v60 = vmax.f32 %v2079_v17, 0.0 }
 0x31b   :  { %v1765_v2 = vpop.permute.xlu1 %1764  ;;  %v2862_v34 = vrot.slane %v2479_v43, 1  ;;  %v8680_v20 = vpop.f32.mrb[10].mxu0  ;;  %v2081_v45 = vadd.f32 %v2001_v8, %v1597_v26  ;;  %v1598_v11 = vadd.f32 %v1518_v29, %v1114_v54 }
 0x31c   :  { %v2202_v48 = vmax.f32 %v2122_v41, 0.0  ;;  %v2000_v51 = vmul.f32 %v10730_v21, %v1765_v2  ;;  %v2868_v23 = vrot.slane %v8680_v20, 1  ;;  %v2482_v4 = vpop.f32.mrb[11].mxu0 }
 0x31d   :  { %v2864_v28 = vrot.slane %v2482_v4, 1  ;;  %v11793_v33 = vsel %vm2846_vm1, %v14586_v22, %v2862_v34  ;;  %v14591_v4 = vrot.slane %v11753_v16, 1 }
 0x31e   :  { %v11787_v25 = vpack.c.bf16 %v2202_v48, %v2201_v55  ;;  %v2080_v35 = vadd.f32 %v2000_v51, %v1596_v38  ;;  %1796 = vperm.xlu1 %9359, %v11588_v37   ;;  %14587 = vst [vmem:[#allocation18_spill] sm:$0xff] %v11793_v33  ;;  %v11796_v5 = vsel %vm2846_vm1, %v2866_v61, %v2868_v23  ;;  %v9370_v37 = vld [vmem:[%s14095_s3 + $0x18] sm:$0xff]   ;;  %v2161_v55 = vmax.f32 %v2081_v45, 0.0 }
 0x31f   :  { %v1773_v43 = vpop.permute.xlu1 %1772  ;;  %14588 = vst [vmem:[#allocation113_spill] sm:$0xff] %v11796_v5  ;;  %v11805_v31 = vsel %vm2846_vm1, %v2862_v34, %v2864_v28  ;;  %v11808_v17 = vsel %vm2846_vm1, %v2864_v28, %v2866_v61  ;;  %8755 = vmatprep.subr.bf16.mxu1 %v9370_v37  ;;  %v9371_v48 = vld [vmem:[%s14095_s3 + $0x58] sm:$0xff]  }
 0x320   :  { %v2160_v53 = vmax.f32 %v2080_v35, 0.0  ;;  %v2002_v7 = vmul.f32 %v10730_v21, %v1773_v43  ;;  %8738 = vmatmul.mubr.msk.bf16.gmra.mrb[28].mxu1 %vm2292_vm0, %v11787_v25  ;;  %14589 = vst [vmem:[#allocation108_spill] sm:$0xff] %v11805_v31  ;;  %14590 = vst [vmem:[#allocation155_spill] sm:$0xff] %v11808_v17  ;;  %8843 = vmatprep.subr.bf16.mxu0 %v9371_v48  ;;  %v11842_v43 = vld [vmem:[%s14095_s3 + $0x60] sm:$0xff]  }
 0x321   :  { %v8723_v50 = vpop.f32.mrb[12].mxu1  ;;  %8756 = vmatpush3.bf16.msra.mxu1 %v9370_v37  ;;  %8844 = vmatpush3.bf16.msra.mxu0 %v9371_v48 }
 0x322   :  { %v11810_v54 = vpack.c.bf16 %v2160_v53, %v2159_v60  ;;  %v2082_v41 = vadd.f32 %v2002_v7, %v1598_v11  ;;  %1804 = vperm.xlu1 %9359, %v9441_v58   ;;  %v2655_v8 = vpop.f32.mrb[13].mxu1  ;;  %v2954_v51 = vrot.slane %v8723_v50, 1  ;;  %8925 = vmatprep.subr.bf16.mxu1 %v11842_v43 }
 0x323   :  { %v2950_v29 = vrot.slane %v2655_v8, 1  ;;  %v8724_v38 = vpop.f32.mrb[14].mxu1 }
 0x324   :  { %v2162_v26 = vmax.f32 %v2082_v41, 0.0  ;;  %v11812_v2 = vpop.permute.xlu1 %972  ;;  %8697 = vmatprep.mubr.msk.bf16.mxu0 %vm2292_vm0, %v11810_v54  ;;  %v2956_v34 = vrot.slane %v8724_v38, 1  ;;  %v2658_v58 = vpop.f32.mrb[15].mxu1 }
 0x325   :  { %v2952_v61 = vrot.slane %v2658_v58, 1  ;;  %v11824_v35 = vsel %vm2846_vm1, %v14591_v4, %v2950_v29 }
 0x326   :  { %v11819_v20 = vpack.c.bf16 %v2162_v26, %v2161_v55  ;;  %14592 = vst [vmem:[#allocation23_spill] sm:$0xff] %v11824_v35  ;;  %v11827_v28 = vsel %vm2846_vm1, %v2954_v51, %v2956_v34 }
 0x327   :  { %14593 = vst [vmem:[#allocation114_spill] sm:$0xff] %v11827_v28  ;;  %v11834_v60 = vsel %vm2846_vm1, %v2950_v29, %v2952_v61  ;;  %v11837_v45 = vsel %vm2846_vm1, %v2952_v61, %v2954_v51 }
 0x328   :  { %v11829_v22 = vpop.permute.xlu1 %976  ;;  %8698 = vmatmul.mubr.msk.bf16.gmra.mrb[28].mxu0 %vm2292_vm0, %v11819_v20  ;;  %14594 = vst [vmem:[#allocation118_spill] sm:$0xff] %v11834_v60  ;;  %14595 = vst [vmem:[#allocation94_spill] sm:$0xff] %v11837_v45 }
 0x329   :  { %v8683_v11 = vpop.f32.mrb[12].mxu0 }
 0x32a   :  { %v2495_v16 = vpop.f32.mrb[13].mxu0  ;;  %v2874_v41 = vrot.slane %v8683_v11, 1 }
 0x32b   :  { %v2870_v53 = vrot.slane %v2495_v16, 1  ;;  %v8684_v37 = vpop.f32.mrb[14].mxu0 }
 0x32c   :  { %v11844_v7 = vpop.permute.xlu1 %808  ;;  %v2876_v50 = vrot.slane %v8684_v37, 1  ;;  %v2498_v8 = vpop.f32.mrb[15].mxu0 }
 0x32d   :  { %v2872_v55 = vrot.slane %v2498_v8, 1  ;;  %v11848_v26 = vsel %vm2846_vm1, %v2868_v23, %v2870_v53  ;;  %v11865_v8 = vld [vmem:[%s14095_s3 + $0x80] sm:$0xff]  }
 0x32e   :  { %14596 = vst [vmem:[#allocation119_spill] sm:$0xff] %v11848_v26  ;;  %v8727_v29 = vpop.f32.mrb[16].mxu1  ;;  %v11851_v38 = vsel %vm2846_vm1, %v2874_v41, %v2876_v50  ;;  %9013 = vmatprep.subr.bf16.mxu0 %v11865_v8 }
 0x32f   :  { %14597 = vst [vmem:[#allocation121_spill] sm:$0xff] %v11851_v38  ;;  %v2671_v48 = vpop.f32.mrb[17].mxu1  ;;  %v11854_v51 = vsel %vm2846_vm1, %v2870_v53, %v2872_v55  ;;  %v11857_v58 = vsel %vm2846_vm1, %v2872_v55, %v2874_v41  ;;  %v2962_v16 = vrot.slane %v8727_v29, 1 }
 0x330   :  { %14598 = vst [vmem:[#allocation128_spill] sm:$0xff] %v11854_v51  ;;  %14599 = vst [vmem:[#allocation129_spill] sm:$0xff] %v11857_v58  ;;  %v2958_v61 = vrot.slane %v2671_v48, 1  ;;  %v11859_v11 = vpop.f32.mrb[18].mxu1 }
 0x331   :  { %v1453_v4 = vpop.permute.xlu1 %1452  ;;  %v14157_v37 = vrot.slane %v11859_v11, 1  ;;  %v2674_v23 = vpop.f32.mrb[19].mxu1 }
 0x332   :  { %v2960_v45 = vrot.slane %v2674_v23, 1  ;;  %v11868_v53 = vsel %vm2846_vm1, %v2956_v34, %v2958_v61 }
 0x333   :  { %14600 = vst [vmem:[#allocation57_spill] sm:$0xff] %v11868_v53  ;;  %v11874_v41 = vsel %vm2846_vm1, %v2962_v16, %v14157_v37 }
 0x334   :  { %14601 = vst [vmem:[#allocation123_spill] sm:$0xff] %v11874_v41  ;;  %v11877_v55 = vsel %vm2846_vm1, %v2958_v61, %v2960_v45  ;;  %v11880_v29 = vsel %vm2846_vm1, %v2960_v45, %v2962_v16  ;;  %v8687_v60 = vpop.f32.mrb[16].mxu0 }
 0x335   :  { %14602 = vst [vmem:[#allocation131_spill] sm:$0xff] %v11877_v55  ;;  %14603 = vst [vmem:[#allocation133_spill] sm:$0xff] %v11880_v29  ;;  %v2511_v23 = vpop.f32.mrb[17].mxu0  ;;  %v2882_v53 = vrot.slane %v8687_v60, 1  ;;  %v14608_v60 = vld [vmem:[#allocation81_spill] sm:$0xff]  ;;  %v14609_v29 = vld [vmem:[#allocation80_spill] sm:$0xff] }
 0x336   :  { %v11882_v48 = vpop.permute.xlu1 %816  ;;  %v2878_v28 = vrot.slane %v2511_v23, 1  ;;  %v11884_v34 = vpop.f32.mrb[18].mxu0  ;;  %v591_v23 = vmul.f32 %v14517_v47, %v14608_v60  ;;  %v14610_v55 = vld [vmem:[#allocation111_spill] sm:$0xff] }
 0x337   :  { %v14158_v35 = vrot.slane %v11884_v34, 1  ;;  %v2514_v52 = vpop.f32.mrb[19].mxu0 }
 0x338   :  { %v2880_v15 = vrot.slane %v2514_v52, 1  ;;  %v11888_v41 = vsel %vm2846_vm1, %v2876_v50, %v2878_v28  ;;  %v592_v52 = vmul.f32 %v14517_v47, %v14609_v29  ;;  %v1075_v50 = vmul.f32 %v10682_v57, %v14610_v55 }
 0x339   :  { %14604 = vst [vmem:[#allocation139_spill] sm:$0xff] %v11888_v41  ;;  %v11893_v45 = vsel %vm2846_vm1, %v2882_v53, %v14158_v35  ;;  %v671_v58 = vadd.f32 %v11359_v46, %v591_v23  ;;  %v1076_v35 = vmul.f32 %v10682_v57, %v11812_v2  ;;  %v14611_v41 = vld [vmem:[#allocation19_spill] sm:$0xff] }
 0x33a   :  { %v821_v37 = vpop.permute.xlu1 %820  ;;  %14605 = vst [vmem:[#allocation21_spill] sm:$0xff] %v11893_v45  ;;  %v11896_v61 = vsel %vm2846_vm1, %v2878_v28, %v2880_v15  ;;  %v11899_v16 = vsel %vm2846_vm1, %v2880_v15, %v2882_v53  ;;  %v1559_v28 = vmul.f32 %v10714_v9, %v1453_v4  ;;  %v672_v15 = vadd.f32 %v11359_v46, %v592_v52  ;;  %v1937_v45 = vpop.permute.xlu0 %1936  ;;  %v14612_v2 = vld [vmem:[#allocation83_spill] sm:$0xff]  ;;  %v14613_v46 = vld [vmem:[#allocation48_spill] sm:$0xff] }
 0x33b   :  { %14606 = vst [vmem:[#allocation125_spill] sm:$0xff] %v11896_v61  ;;  %14607 = vst [vmem:[#allocation137_spill] sm:$0xff] %v11899_v16  ;;  %v1155_v53 = vadd.f32 %v1075_v50, %v671_v58  ;;  %v1560_v29 = vmul.f32 %v10714_v9, %v14611_v41  ;;  %v2043_v55 = vmul.f32 %v10730_v21, %v1937_v45 }
 0x33c   :  { %v1156_v61 = vadd.f32 %v1076_v35, %v672_v15  ;;  %v593_v4 = vmul.f32 %v14517_v47, %v14612_v2  ;;  %v551_v58 = vmul.f32 %v14517_v47, %v14613_v46  ;;  %v1077_v35 = vmul.f32 %v10682_v57, %v11829_v22 }
 0x33d   :  { %v1639_v60 = vadd.f32 %v1559_v28, %v1155_v53  ;;  %v1035_v45 = vmul.f32 %v10682_v57, %v11844_v7  ;;  %v14614_v28 = vld [vmem:[#allocation82_spill] sm:$0xff]  ;;  %v14617_v53 = vld [vmem:[#allocation47_spill] sm:$0xff]  ;;  %v1038_v2 = vmul.f32 %v10682_v57, %v821_v37 }
 0x33e   :  { %v1640_v23 = vadd.f32 %v1560_v29, %v1156_v61  ;;  %v594_v61 = vmul.f32 %v14517_v47, %v14614_v28  ;;  %v552_v7 = vmul.f32 %v14517_v47, %v14617_v53  ;;  %v14620_v53 = vld [vmem:[#allocation7_spill] sm:$0xff] }
 0x33f   :  { %v1465_v32 = vpop.permute.xlu1 %1464  ;;  %v2123_v38 = vadd.f32 %v2043_v55, %v1639_v60  ;;  %v14618_v60 = vld [vmem:[#allocation112_spill] sm:$0xff] }
 0x340   :  { %v1078_v29 = vmul.f32 %v10682_v57, %v14618_v60 }
 0x341   :  { %v2203_v52 = vmax.f32 %v2123_v38, 0.0  ;;  %v14616_v38 = vld [vmem:[#allocation49_spill] sm:$0xff] }
 0x343   :  { %v1297_v16 = vpop.permute.xlu1 %1296 }
 0x348   :  { %v1941_v51 = vpop.permute.xlu1 %1940 }
 0x349   :  { %v2044_v17 = vmul.f32 %v10730_v21, %v1941_v51  ;;  %v11929_v51 = vld [vmem:[%s14097_s2] ss:$0 sm:$0xff] }
 0x34a   :  { %v631_v22 = vadd.f32 %v11929_v51, %v551_v58  ;;  %v674_v46 = vadd.f32 %v11929_v51, %v594_v61  ;;  %v14619_v58 = vld [vmem:[#allocation31_spill] sm:$0xff]  ;;  %v632_v37 = vadd.f32 %v11929_v51, %v552_v7  ;;  %v14622_v61 = vld [vmem:[#allocation50_spill] sm:$0xff] }
 0x34b   :  { %v2124_v26 = vadd.f32 %v2044_v17, %v1640_v23  ;;  %v673_v17 = vadd.f32 %v11929_v51, %v593_v4  ;;  %v553_v31 = vmul.f32 %v14517_v47, %v14622_v61 }
 0x34c   :  { %v1115_v23 = vadd.f32 %v1035_v45, %v631_v22  ;;  %v1158_v22 = vadd.f32 %v1078_v29, %v674_v46  ;;  %v1037_v29 = vmul.f32 %v10682_v57, %v11882_v48 }
 0x34d   :  { %v2204_v50 = vmax.f32 %v2124_v26, 0.0  ;;  %v1301_v41 = vpop.permute.xlu1 %1300  ;;  %v554_v26 = vmul.f32 %v14517_v47, %v14616_v38  ;;  %v1157_v55 = vadd.f32 %v1077_v35, %v673_v17  ;;  %v1036_v35 = vmul.f32 %v10682_v57, %v14620_v53  ;;  %v14621_v17 = vld [vmem:[#allocation55_spill] sm:$0xff] }
 0x34e   :  { %v1519_v45 = vmul.f32 %v10714_v9, %v14621_v17 }
 0x34f   :  { %v11932_v15 = vpack.c.bf16 %v2204_v50, %v2203_v52  ;;  %v1561_v52 = vmul.f32 %v10714_v9, %v14619_v58  ;;  %v1562_v50 = vmul.f32 %v10714_v9, %v1465_v32  ;;  %v634_v38 = vadd.f32 %v11929_v51, %v554_v26  ;;  %v1777_v58 = vpop.permute.xlu0 %1776 }
 0x350   :  { %v1599_v5 = vadd.f32 %v1519_v45, %v1115_v23  ;;  %v1116_v40 = vadd.f32 %v1036_v35, %v632_v37  ;;  %v2003_v7 = vmul.f32 %v10730_v21, %v1777_v58  ;;  %v633_v23 = vadd.f32 %v11929_v51, %v553_v31 }
 0x351   :  { %14615 = vst [vmem:[#allocation130_spill] sm:$0xff] %v11932_v15  ;;  %8741 = vmatprep.mubr.msk.bf16.mxu1 %vm2292_vm0, %v11932_v15  ;;  %v1641_v60 = vadd.f32 %v1561_v52, %v1157_v55  ;;  %v1118_v32 = vadd.f32 %v1038_v2, %v634_v38  ;;  %v1642_v26 = vadd.f32 %v1562_v50, %v1158_v22  ;;  %v14623_v15 = vld [vmem:[#allocation58_spill] sm:$0xff] }
 0x352   :  { %v1945_v4 = vpop.permute.xlu1 %1944  ;;  %v1522_v17 = vmul.f32 %v10714_v9, %v14623_v15  ;;  %v2083_v2 = vadd.f32 %v2003_v7, %v1599_v5  ;;  %v1521_v50 = vmul.f32 %v10714_v9, %v1301_v41  ;;  %v1117_v45 = vadd.f32 %v1037_v29, %v633_v23 }
 0x353   :  { %v2045_v28 = vmul.f32 %v10730_v21, %v1945_v4  ;;  %v1520_v4 = vmul.f32 %v10714_v9, %v1297_v16  ;;  %v1789_v35 = vpop.permute.xlu0 %1788 }
 0x354   :  { %v1602_v46 = vadd.f32 %v1522_v17, %v1118_v32  ;;  %v2006_v15 = vmul.f32 %v10730_v21, %v1789_v35  ;;  %v2163_v22 = vmax.f32 %v2083_v2, 0.0  ;;  %v1601_v5 = vadd.f32 %v1521_v50, %v1117_v45 }
 0x355   :  { %v2125_v3 = vadd.f32 %v2045_v28, %v1641_v60  ;;  %v1600_v16 = vadd.f32 %v1520_v4, %v1116_v40 }
 0x356   :  { %v1949_v33 = vpop.permute.xlu1 %1948  ;;  %v2086_v31 = vadd.f32 %v2006_v15, %v1602_v46 }
 0x357   :  { %v2046_v53 = vmul.f32 %v10730_v21, %v1949_v33  ;;  %v2205_v28 = vmax.f32 %v2125_v3, 0.0 }
 0x358   :  { %v2166_v32 = vmax.f32 %v2086_v31, 0.0 }
 0x359   :  { %v2126_v55 = vadd.f32 %v2046_v53, %v1642_v26 }
 0x35a   :  { %v1781_v52 = vpop.permute.xlu1 %1780 }
 0x35b   :  { %v2206_v33 = vmax.f32 %v2126_v55, 0.0  ;;  %v2004_v38 = vmul.f32 %v10730_v21, %v1781_v52 }
 0x35d   :  { %v11968_v37 = vpack.c.bf16 %v2206_v33, %v2205_v28  ;;  %v2084_v48 = vadd.f32 %v2004_v38, %v1600_v16  ;;  %v14625_v33 = vrot.slane %v11859_v11, 1 }
 0x35e   :  { %v1785_v60 = vpop.permute.xlu1 %1784 }
 0x35f   :  { %14624 = vst [vmem:[#allocation132_spill] sm:$0xff] %v11968_v37  ;;  %v2164_v61 = vmax.f32 %v2084_v48, 0.0  ;;  %v2005_v40 = vmul.f32 %v10730_v21, %v1785_v60  ;;  %8742 = vmatmul.mubr.msk.bf16.gmra.mrb[32].mxu1 %vm2292_vm0, %v11968_v37 }
 0x361   :  { %v11973_v3 = vpack.c.bf16 %v2164_v61, %v2163_v22  ;;  %v2085_v41 = vadd.f32 %v2005_v40, %v1601_v5 }
 0x363   :  { %v2165_v58 = vmax.f32 %v2085_v41, 0.0  ;;  %v985_v4 = vpop.permute.xlu1 %984  ;;  %8701 = vmatprep.mubr.msk.bf16.mxu0 %vm2292_vm0, %v11973_v3 }
 0x365   :  { %v11977_v26 = vpack.c.bf16 %v2166_v32, %v2165_v58  ;;  %v14630_v58 = vrot.slane %v11884_v34, 1 }
 0x367   :  { %v993_v53 = vpop.permute.xlu1 %992  ;;  %8702 = vmatmul.mubr.msk.bf16.gmra.mrb[32].mxu0 %vm2292_vm0, %v11977_v26 }
 0x36b   :  { %v997_v17 = vpop.permute.xlu1 %996 }
 0x36f   :  { %v11981_v7 = vpop.permute.xlu1 %828  ;;  %v8731_v29 = vpop.f32.mrb[20].mxu1 }
 0x370   :  { %v2687_v55 = vpop.f32.mrb[21].mxu1  ;;  %v2970_v46 = vrot.slane %v8731_v29, 1 }
 0x371   :  { %v2966_v23 = vrot.slane %v2687_v55, 1  ;;  %v11983_v2 = vpop.f32.mrb[22].mxu1 }
 0x372   :  { %v14162_v16 = vrot.slane %v11983_v2, 1  ;;  %v2690_v50 = vpop.f32.mrb[23].mxu1 }
 0x373   :  { %v2968_v28 = vrot.slane %v2690_v50, 1  ;;  %v11989_v38 = vsel %vm2846_vm1, %v14625_v33, %v2966_v23  ;;  %v14635_v50 = vld [vmem:[#allocation84_spill] sm:$0xff]  ;;  %v14636_v33 = vld [vmem:[#allocation85_spill] sm:$0xff] }
 0x374   :  { %v1473_v52 = vpop.permute.xlu1 %1472  ;;  %14626 = vst [vmem:[#allocation135_spill] sm:$0xff] %v11989_v38  ;;  %v11994_v35 = vsel %vm2846_vm1, %v2970_v46, %v14162_v16  ;;  %v595_v34 = vmul.f32 %v14517_v47, %v14636_v33 }
 0x375   :  { %14627 = vst [vmem:[#allocation141_spill] sm:$0xff] %v11994_v35  ;;  %v11997_v15 = vsel %vm2846_vm1, %v2966_v23, %v2968_v28  ;;  %v12000_v45 = vsel %vm2846_vm1, %v2968_v28, %v2970_v46  ;;  %v596_v28 = vmul.f32 %v14517_v47, %v14635_v50  ;;  %v1957_v50 = vpop.permute.xlu0 %1956  ;;  %v14638_v35 = vld [vmem:[#allocation60_spill] sm:$0xff] }
 0x376   :  { %14628 = vst [vmem:[#allocation24_spill] sm:$0xff] %v11997_v15  ;;  %14629 = vst [vmem:[#allocation3_spill] sm:$0xff] %v12000_v45  ;;  %v675_v16 = vadd.f32 %v11929_v51, %v595_v34  ;;  %v1563_v33 = vmul.f32 %v10714_v9, %v14638_v35  ;;  %v2048_v38 = vmul.f32 %v10730_v21, %v1957_v50 }
 0x377   :  { %v8691_v22 = vpop.f32.mrb[20].mxu0  ;;  %v1081_v34 = vmul.f32 %v10682_v57, %v993_v53 }
 0x378   :  { %v2527_v60 = vpop.f32.mrb[21].mxu0  ;;  %v2890_v5 = vrot.slane %v8691_v22, 1  ;;  %v14637_v22 = vld [vmem:[#allocation26_spill] sm:$0xff] }
 0x379   :  { %v12002_v48 = vpop.permute.xlu1 %832  ;;  %v2886_v31 = vrot.slane %v2527_v60, 1  ;;  %v12004_v11 = vpop.f32.mrb[22].mxu0  ;;  %v1080_v60 = vmul.f32 %v10682_v57, %v14637_v22 }
 0x37a   :  { %v14161_v61 = vrot.slane %v12004_v11, 1  ;;  %v2530_v40 = vpop.f32.mrb[23].mxu0 }
 0x37b   :  { %v2888_v41 = vrot.slane %v2530_v40, 1  ;;  %v12010_v32 = vsel %vm2846_vm1, %v14630_v58, %v2886_v31  ;;  %v676_v58 = vadd.f32 %v11929_v51, %v596_v28 }
 0x37c   :  { %14631 = vst [vmem:[#allocation145_spill] sm:$0xff] %v12010_v32  ;;  %v12015_v55 = vsel %vm2846_vm1, %v2890_v5, %v14161_v61  ;;  %v1079_v61 = vmul.f32 %v10682_v57, %v985_v4  ;;  %v14639_v4 = vld [vmem:[#allocation87_spill] sm:$0xff] }
 0x37d   :  { %14632 = vst [vmem:[#allocation143_spill] sm:$0xff] %v12015_v55  ;;  %v12018_v23 = vsel %vm2846_vm1, %v2886_v31, %v2888_v41  ;;  %v12021_v46 = vsel %vm2846_vm1, %v2888_v41, %v2890_v5  ;;  %v1564_v31 = vmul.f32 %v10714_v9, %v1473_v52  ;;  %v1160_v5 = vadd.f32 %v1080_v60, %v676_v58  ;;  %v1961_v60 = vpop.permute.xlu0 %1960 }
 0x37e   :  { %v1477_v29 = vpop.permute.xlu1 %1476  ;;  %14633 = vst [vmem:[#allocation158_spill] sm:$0xff] %v12018_v23  ;;  %14634 = vst [vmem:[#allocation134_spill] sm:$0xff] %v12021_v46  ;;  %v1159_v45 = vadd.f32 %v1079_v61, %v675_v16  ;;  %v597_v52 = vmul.f32 %v14517_v47, %v14639_v4  ;;  %v14645_v4 = vld [vmem:[#allocation54_spill] sm:$0xff] }
 0x37f   :  { %v1644_v15 = vadd.f32 %v1564_v31, %v1160_v5  ;;  %v1565_v35 = vmul.f32 %v10714_v9, %v1477_v29  ;;  %v14640_v5 = vld [vmem:[#allocation86_spill] sm:$0xff] }
 0x380   :  { %v1643_v23 = vadd.f32 %v1563_v33, %v1159_v45  ;;  %v677_v31 = vadd.f32 %v11929_v51, %v597_v52  ;;  %v14642_v45 = vld [vmem:[#allocation52_spill] sm:$0xff]  ;;  %v557_v52 = vmul.f32 %v14517_v47, %v14645_v4 }
 0x381   :  { %v2128_v46 = vadd.f32 %v2048_v38, %v1644_v15  ;;  %v598_v38 = vmul.f32 %v14517_v47, %v14640_v5  ;;  %v555_v50 = vmul.f32 %v14517_v47, %v14642_v45  ;;  %v2049_v5 = vmul.f32 %v10730_v21, %v1961_v60 }
 0x382   :  { %v1481_v40 = vpop.permute.xlu1 %1480  ;;  %v1161_v33 = vadd.f32 %v1081_v34, %v677_v31  ;;  %v1040_v45 = vmul.f32 %v10682_v57, %v11981_v7  ;;  %v637_v60 = vadd.f32 %v11929_v51, %v557_v52 }
 0x383   :  { %v2208_v16 = vmax.f32 %v2128_v46, 0.0  ;;  %v1082_v46 = vmul.f32 %v10682_v57, %v997_v17  ;;  %v1566_v34 = vmul.f32 %v10714_v9, %v1481_v40  ;;  %v635_v31 = vadd.f32 %v11929_v51, %v555_v50 }
 0x384   :  { %v1523_v17 = vmul.f32 %v10714_v9, %v10890_v19 }
 0x386   :  { %v1313_v41 = vpop.permute.xlu1 %1312 }
 0x387   :  { %v1524_v19 = vmul.f32 %v10714_v9, %v1313_v41 }
 0x38b   :  { %v1953_v22 = vpop.permute.xlu1 %1952 }
 0x38c   :  { %v2047_v28 = vmul.f32 %v10730_v21, %v1953_v22  ;;  %v14644_v22 = vld [vmem:[#allocation115_spill] sm:$0xff] }
 0x38d   :  { %v1039_v29 = vmul.f32 %v10682_v57, %v14644_v22 }
 0x38e   :  { %v2127_v55 = vadd.f32 %v2047_v28, %v1643_v23  ;;  %v14643_v23 = vld [vmem:[#allocation51_spill] sm:$0xff]  ;;  %v1645_v28 = vadd.f32 %v1565_v35, %v1161_v33  ;;  %v14646_v33 = vld [vmem:[#allocation53_spill] sm:$0xff] }
 0x38f   :  { %v556_v53 = vmul.f32 %v14517_v47, %v14643_v23  ;;  %v558_v23 = vmul.f32 %v14517_v47, %v14646_v33  ;;  %v1119_v40 = vadd.f32 %v1039_v29, %v635_v31 }
 0x390   :  { %v2207_v61 = vmax.f32 %v2127_v55, 0.0  ;;  %v1317_v58 = vpop.permute.xlu1 %1316  ;;  %v2129_v4 = vadd.f32 %v2049_v5, %v1645_v28 }
 0x391   :  { %v636_v35 = vadd.f32 %v11929_v51, %v556_v53  ;;  %v1525_v7 = vmul.f32 %v10714_v9, %v1317_v58  ;;  %v1603_v37 = vadd.f32 %v1523_v17, %v1119_v40 }
 0x392   :  { %v12044_v15 = vpack.c.bf16 %v2208_v16, %v2207_v61  ;;  %v678_v16 = vadd.f32 %v11929_v51, %v598_v38  ;;  %v1793_v61 = vpop.permute.xlu0 %1792  ;;  %v1041_v38 = vmul.f32 %v10682_v57, %v12002_v48  ;;  %v2209_v41 = vmax.f32 %v2129_v4, 0.0 }
 0x393   :  { %v2007_v50 = vmul.f32 %v10730_v21, %v1793_v61  ;;  %v1120_v47 = vadd.f32 %v1040_v45, %v636_v35  ;;  %v638_v61 = vadd.f32 %v11929_v51, %v558_v23 }
 0x394   :  { %14641 = vst [vmem:[#allocation22_spill] sm:$0xff] %v12044_v15  ;;  %v1321_v55 = vpop.permute.xlu1 %1320  ;;  %8745 = vmatprep.mubr.msk.bf16.mxu1 %vm2292_vm0, %v12044_v15  ;;  %v1162_v22 = vadd.f32 %v1082_v46, %v678_v16  ;;  %v14647_v46 = vld [vmem:[#allocation117_spill] sm:$0xff]  ;;  %v1121_v48 = vadd.f32 %v1041_v38, %v637_v60 }
 0x395   :  { %v1042_v16 = vmul.f32 %v10682_v57, %v14647_v46  ;;  %v2087_v28 = vadd.f32 %v2007_v50, %v1603_v37  ;;  %v1604_v5 = vadd.f32 %v1524_v19, %v1120_v47  ;;  %v9376_v19 = vld [vmem:[%s14095_s3 + $0x70] sm:$0xff]  }
 0x396   :  { %v1646_v15 = vadd.f32 %v1566_v34, %v1162_v22  ;;  %v1801_v31 = vpop.permute.xlu0 %1800  ;;  %v1605_v52 = vadd.f32 %v1525_v7, %v1121_v48  ;;  %v1526_v34 = vmul.f32 %v10714_v9, %v1321_v55  ;;  %v9375_v7 = vld [vmem:[%s14095_s3 + $0x88] sm:$0xff]  }
 0x397   :  { %v1122_v17 = vadd.f32 %v1042_v16, %v638_v61  ;;  %v2009_v45 = vmul.f32 %v10730_v21, %v1801_v31  ;;  %v14649_v31 = vrot.slane %v11983_v2, 1 }
 0x399   :  { %v1965_v32 = vpop.permute.xlu1 %1964  ;;  %v2089_v51 = vadd.f32 %v2009_v45, %v1605_v52  ;;  %v1606_v37 = vadd.f32 %v1526_v34, %v1122_v17  ;;  %v9379_v34 = vld [vmem:[%s14095_s3 + $0x98] sm:$0xff]  }
 0x39a   :  { %v2050_v53 = vmul.f32 %v10730_v21, %v1965_v32 }
 0x39b   :  { %v2169_v40 = vmax.f32 %v2089_v51, 0.0 }
 0x39c   :  { %v2130_v29 = vadd.f32 %v2050_v53, %v1646_v15  ;;  %v2167_v15 = vmax.f32 %v2087_v28, 0.0  ;;  %v9377_v28 = vld [vmem:[%s14095_s3 + $0x90] sm:$0xff]  }
 0x39d   :  { %v1797_v33 = vpop.permute.xlu1 %1796 }
 0x39e   :  { %v2210_v58 = vmax.f32 %v2130_v29, 0.0  ;;  %v2008_v32 = vmul.f32 %v10730_v21, %v1797_v33 }
 0x3a0   :  { %v12081_v35 = vpack.c.bf16 %v2210_v58, %v2209_v41  ;;  %v2088_v57 = vadd.f32 %v2008_v32, %v1604_v5 }
 0x3a1   :  { %v1805_v22 = vpop.permute.xlu1 %1804 }
 0x3a2   :  { %14648 = vst [vmem:[#allocation136_spill] sm:$0xff] %v12081_v35  ;;  %v2168_v23 = vmax.f32 %v2088_v57, 0.0  ;;  %v2010_v38 = vmul.f32 %v10730_v21, %v1805_v22  ;;  %8746 = vmatmul.mubr.msk.bf16.gmra.mrb[36].mxu1 %vm2292_vm0, %v12081_v35  ;;  %v9374_v21 = vld [vmem:[%s14095_s3 + $0x68] sm:$0xff]   ;;  %v14654_v22 = vrot.slane %v12004_v11, 1 }
 0x3a3   :  { %8757 = vmatprep.mubr.msk.bf16.mxu1 %vm2292_vm0, %v10997_v6 }
 0x3a4   :  { %v12088_v9 = vpack.c.bf16 %v2168_v23, %v2167_v15  ;;  %v2090_v55 = vadd.f32 %v2010_v38, %v1606_v37 }
 0x3a6   :  { %v2170_v50 = vmax.f32 %v2090_v55, 0.0  ;;  %8705 = vmatprep.mubr.msk.bf16.mxu0 %vm2292_vm0, %v12088_v9  ;;  %v14655_v55 = vld [vmem:[#allocation61_spill] sm:$0xff] }
 0x3a8   :  { %v12092_v4 = vpack.c.bf16 %v2170_v50, %v2169_v40 }
 0x3aa   :  { %8706 = vmatmul.mubr.msk.bf16.gmra.mrb[36].mxu0 %vm2292_vm0, %v12092_v4  ;;  %8758 = vmatmul.mubr.msk.bf16.vlgmr.msra.gmra.mrb[40].mxu1 %vm2292_vm0, %v11028_v1 }
 0x3ab   :  { %8761 = vmatprep.mubr.msk.bf16.mxu1 %vm2292_vm0, %v11105_v30  ;;  %8845 = vmatprep.mubr.msk.bf16.mxu0 %vm2292_vm0, %v10997_v6 }
 0x3ac   :  { %8926 = vmatpush3.bf16.msra.mxu1 %v11842_v43  ;;  %v9378_v43 = vld [vmem:[%s14095_s3 + $0x78] sm:$0xff]  }
 0x3ad   :  { %8927 = vmatprep.subr.bf16.mxu1 %v9374_v21 }
 0x3b0   :  { %v8735_v60 = vpop.f32.mrb[24].mxu1  ;;  %8928 = vmatpush3.bf16.msra.mxu1 %v9374_v21 }
 0x3b1   :  { %v2703_v53 = vpop.f32.mrb[25].mxu1  ;;  %8929 = vmatprep.subr.bf16.mxu1 %v9376_v19  ;;  %v2978_v16 = vrot.slane %v8735_v60, 1 }
 0x3b2   :  { %v2974_v47 = vrot.slane %v2703_v53, 1  ;;  %v12112_v46 = vpop.f32.mrb[26].mxu1  ;;  %8762 = vmatmul.mubr.msk.bf16.gmra.mrb[44].mxu1 %vm2292_vm0, %v11132_v12  ;;  %8846 = vmatmul.mubr.msk.bf16.vlgmr.msra.gmra.mrb[40].mxu0 %vm2292_vm0, %v11028_v1 }
 0x3b3   :  { %v2980_v48 = vrot.slane %v12112_v46, 1  ;;  %9014 = vmatpush3.bf16.msra.mxu0 %v11865_v8  ;;  %v2706_v29 = vpop.f32.mrb[27].mxu1  ;;  %8765 = vmatprep.mubr.msk.bf16.mxu1 %vm2292_vm0, %v11182_v56 }
 0x3b4   :  { %v2976_v61 = vrot.slane %v2706_v29, 1  ;;  %8849 = vmatprep.mubr.msk.bf16.mxu0 %vm2292_vm0, %v11105_v30  ;;  %9015 = vmatprep.subr.bf16.mxu0 %v9375_v7  ;;  %v12133_v41 = vsel %vm2846_vm1, %v14649_v31, %v2974_v47 }
 0x3b5   :  { %14650 = vst [vmem:[#allocation27_spill] sm:$0xff] %v12133_v41  ;;  %8930 = vmatpush3.bf16.msra.mxu1 %v9376_v19  ;;  %v12138_v8 = vsel %vm2846_vm1, %v2978_v16, %v2980_v48 }
 0x3b6   :  { %14651 = vst [vmem:[#allocation9_spill] sm:$0xff] %v12138_v8  ;;  %8931 = vmatprep.subr.bf16.mxu1 %v9378_v43  ;;  %v12141_v5 = vsel %vm2846_vm1, %v2974_v47, %v2976_v61  ;;  %v12144_v33 = vsel %vm2846_vm1, %v2976_v61, %v2978_v16  ;;  %v14660_v61 = vld [vmem:[#allocation62_spill] sm:$0xff]  ;;  %v14674_v8 = vld [vmem:[#allocation132_spill] sm:$0xff] }
 0x3b7   :  { %14652 = vst [vmem:[#allocation30_spill] sm:$0xff] %v12141_v5  ;;  %14653 = vst [vmem:[#allocation152_spill] sm:$0xff] %v12144_v33  ;;  %9016 = vmatpush3.bf16.msra.mxu0 %v9375_v7 }
 0x3b8   :  { %v8695_v52 = vpop.f32.mrb[24].mxu0  ;;  %9017 = vmatprep.subr.bf16.mxu0 %v9377_v28 }
 0x3b9   :  { %v2543_v2 = vpop.f32.mrb[25].mxu0  ;;  %8932 = vmatpush3.bf16.msra.mxu1 %v9378_v43  ;;  %v2898_v17 = vrot.slane %v8695_v52, 1 }
 0x3ba   :  { %v2894_v58 = vrot.slane %v2543_v2, 1  ;;  %v12149_v32 = vpop.f32.mrb[26].mxu0  ;;  %8766 = vmatmul.mubr.msk.bf16.gmra.mrb[48].mxu1 %vm2292_vm0, %v11212_v42  ;;  %8850 = vmatmul.mubr.msk.bf16.gmra.mrb[44].mxu0 %vm2292_vm0, %v11132_v12 }
 0x3bb   :  { %v2900_v45 = vrot.slane %v12149_v32, 1  ;;  %v2546_v57 = vpop.f32.mrb[27].mxu0  ;;  %8769 = vmatprep.mubr.msk.bf16.mxu1 %vm2292_vm0, %v11273_v59  ;;  %8853 = vmatprep.mubr.msk.bf16.mxu0 %vm2292_vm0, %v11182_v56  ;;  %v14663_v32 = vld [vmem:[#allocation65_spill] sm:$0xff] }
 0x3bc   :  { %v2896_v15 = vrot.slane %v2546_v57, 1  ;;  %9018 = vmatpush3.bf16.msra.mxu0 %v9377_v28  ;;  %v12163_v51 = vsel %vm2846_vm1, %v14654_v22, %v2894_v58 }
 0x3bd   :  { %9019 = vmatprep.subr.bf16.mxu0 %v9379_v34  ;;  %v12168_v37 = vsel %vm2846_vm1, %v2898_v17, %v2900_v45 }
 0x3be   :  { %v12171_v23 = vsel %vm2846_vm1, %v2894_v58, %v2896_v15  ;;  %v12174_v38 = vsel %vm2846_vm1, %v2896_v15, %v2898_v17 }
 0x3c0   :  { %9020 = vmatpush3.bf16.msra.mxu0 %v9379_v34 }
 0x3c2   :  { %8770 = vmatmul.mubr.msk.bf16.gmra.mrb[52].mxu1 %vm2292_vm0, %v11290_v14  ;;  %8854 = vmatmul.mubr.msk.bf16.gmra.mrb[48].mxu0 %vm2292_vm0, %v11212_v42 }
 0x3c3   :  { %8773 = vmatprep.mubr.msk.bf16.mxu1 %vm2292_vm0, %v11311_v18  ;;  %8857 = vmatprep.mubr.msk.bf16.mxu0 %vm2292_vm0, %v11273_v59 }
 0x3ca   :  { %8774 = vmatmul.mubr.msk.bf16.gmra.mrb[56].mxu1 %vm2292_vm0, %v11316_v49  ;;  %8858 = vmatmul.mubr.msk.bf16.gmra.mrb[52].mxu0 %vm2292_vm0, %v11290_v14 }
 0x3cb   :  { %8777 = vmatprep.mubr.msk.bf16.mxu1 %vm2292_vm0, %v11429_v27  ;;  %8861 = vmatprep.mubr.msk.bf16.mxu0 %vm2292_vm0, %v11311_v18 }
 0x3d2   :  { %8778 = vmatmul.mubr.msk.bf16.gmra.mrb[60].mxu1 %vm2292_vm0, %v11433_v39  ;;  %8862 = vmatmul.mubr.msk.bf16.gmra.mrb[56].mxu0 %vm2292_vm0, %v11316_v49 }
 0x3d3   :  { %8781 = vmatprep.mubr.msk.bf16.mxu1 %vm2292_vm0, %v11548_v36  ;;  %8865 = vmatprep.mubr.msk.bf16.mxu0 %vm2292_vm0, %v11429_v27 }
 0x3da   :  { %8782 = vmatmul.mubr.msk.bf16.gmra.mrb[64].mxu1 %vm2292_vm0, %v11553_v63  ;;  %8866 = vmatmul.mubr.msk.bf16.gmra.mrb[60].mxu0 %vm2292_vm0, %v11433_v39 }
 0x3db   :  { %8785 = vmatprep.mubr.msk.bf16.mxu1 %vm2292_vm0, %v11810_v54  ;;  %8869 = vmatprep.mubr.msk.bf16.mxu0 %vm2292_vm0, %v11548_v36 }
 0x3e2   :  { %8786 = vmatmul.mubr.msk.bf16.gmra.mrb[68].mxu1 %vm2292_vm0, %v11819_v20  ;;  %8870 = vmatmul.mubr.msk.bf16.gmra.mrb[64].mxu0 %vm2292_vm0, %v11553_v63 }
 0x3e3   :  { %8789 = vmatprep.mubr.msk.bf16.mxu1 %vm2292_vm0, %v11973_v3  ;;  %8873 = vmatprep.mubr.msk.bf16.mxu0 %vm2292_vm0, %v11810_v54 }
 0x3ea   :  { %8790 = vmatmul.mubr.msk.bf16.gmra.mrb[72].mxu1 %vm2292_vm0, %v11977_v26  ;;  %8874 = vmatmul.mubr.msk.bf16.gmra.mrb[68].mxu0 %vm2292_vm0, %v11819_v20 }
 0x3eb   :  { %8793 = vmatprep.mubr.msk.bf16.mxu1 %vm2292_vm0, %v12088_v9  ;;  %8877 = vmatprep.mubr.msk.bf16.mxu0 %vm2292_vm0, %v11973_v3 }
 0x3f2   :  { %8794 = vmatmul.mubr.msk.bf16.gmra.mrb[76].mxu1 %vm2292_vm0, %v12092_v4  ;;  %8878 = vmatmul.mubr.msk.bf16.gmra.mrb[72].mxu0 %vm2292_vm0, %v11977_v26 }
 0x3f3   :  { %v8739_v11 = vpop.f32.mrb[28].mxu1  ;;  %8797 = vmatprep.mubr.msk.bf16.mxu1 %vm2292_vm0, %v14655_v55  ;;  %8881 = vmatprep.mubr.msk.bf16.mxu0 %vm2292_vm0, %v12088_v9 }
 0x3f4   :  { %v2719_v40 = vpop.f32.mrb[29].mxu1  ;;  %v2986_v19 = vrot.slane %v8739_v11, 1 }
 0x3f5   :  { %v2982_v50 = vrot.slane %v2719_v40, 1  ;;  %v12232_v21 = vpop.f32.mrb[30].mxu1  ;;  %v14662_v40 = vld [vmem:[#allocation64_spill] sm:$0xff] }
 0x3f6   :  { %v14168_v60 = vrot.slane %v12232_v21, 1  ;;  %v2722_v7 = vpop.f32.mrb[31].mxu1 }
 0x3f7   :  { %v2984_v53 = vrot.slane %v2722_v7, 1  ;;  %v12238_v47 = vsel %vm2846_vm1, %v2980_v48, %v2982_v50  ;;  %v14661_v48 = vld [vmem:[#allocation63_spill] sm:$0xff] }
 0x3f8   :  { %14656 = vst [vmem:[#allocation95_spill] sm:$0xff] %v12238_v47  ;;  %v12243_v43 = vsel %vm2846_vm1, %v2986_v19, %v14168_v60  ;;  %v14665_v7 = vld [vmem:[#allocation67_spill] sm:$0xff] }
 0x3f9   :  { %14657 = vst [vmem:[#allocation96_spill] sm:$0xff] %v12243_v43  ;;  %v12246_v16 = vsel %vm2846_vm1, %v2982_v50, %v2984_v53  ;;  %v12249_v29 = vsel %vm2846_vm1, %v2984_v53, %v2986_v19  ;;  %v9381_v50 = vld [vmem:[%s14098_s5] sm:$0xff]   ;;  %v14666_v53 = vld [vmem:[#allocation15_spill] sm:$0xff]  ;;  %v14669_v43 = vrot.slane %v12232_v21, 1 }
 0x3fa   :  { %14658 = vst [vmem:[#allocation147_spill] sm:$0xff] %v12246_v16  ;;  %14659 = vst [vmem:[#allocation12_spill] sm:$0xff] %v12249_v29  ;;  %8798 = vmatmul.mubr.msk.bf16.gmra.mrb[80].mxu1 %vm2292_vm0, %v14660_v61  ;;  %8882 = vmatmul.mubr.msk.bf16.gmra.mrb[76].mxu0 %vm2292_vm0, %v12092_v4  ;;  %v14664_v19 = vld [vmem:[#allocation66_spill] sm:$0xff] }
 0x3fb   :  { %v8699_v46 = vpop.f32.mrb[28].mxu0  ;;  %8801 = vmatprep.mubr.msk.bf16.mxu1 %vm2292_vm0, %v14661_v48  ;;  %8885 = vmatprep.mubr.msk.bf16.mxu0 %vm2292_vm0, %v14655_v55 }
 0x3fc   :  { %v2559_v28 = vpop.f32.mrb[29].mxu0  ;;  %v2906_v2 = vrot.slane %v8699_v46, 1  ;;  %9189 = vmatprep.subr.bf16.mxu0 %v9381_v50  ;;  %v14667_v46 = vld [vmem:[#allocation90_spill] sm:$0xff] }
 0x3fd   :  { %v2902_v31 = vrot.slane %v2559_v28, 1  ;;  %v12259_v52 = vpop.f32.mrb[30].mxu0 }
 0x3fe   :  { %v14167_v34 = vrot.slane %v12259_v52, 1  ;;  %v2562_v58 = vpop.f32.mrb[31].mxu0 }
 0x3ff   :  { %v2904_v17 = vrot.slane %v2562_v58, 1  ;;  %v12265_v57 = vsel %vm2846_vm1, %v2900_v45, %v2902_v31  ;;  %v9380_v45 = vld [vmem:[%s14098_s5 + $0x20] sm:$0xff]  }
 0x400   :  { %v12270_v15 = vsel %vm2846_vm1, %v2906_v2, %v14167_v34  ;;  %9101 = vmatprep.subr.bf16.mxu1 %v9380_v45 }
 0x401   :  { %v12273_v22 = vsel %vm2846_vm1, %v2902_v31, %v2904_v17  ;;  %v12276_v11 = vsel %vm2846_vm1, %v2904_v17, %v2906_v2  ;;  %v14668_v2 = vld [vmem:[#allocation130_spill] sm:$0xff] }
 0x402   :  { %8802 = vmatmul.mubr.msk.bf16.gmra.mrb[84].mxu1 %vm2292_vm0, %v14662_v40  ;;  %8886 = vmatmul.mubr.msk.bf16.gmra.mrb[80].mxu0 %vm2292_vm0, %v14660_v61 }
 0x403   :  { %8805 = vmatprep.mubr.msk.bf16.mxu1 %vm2292_vm0, %v11150_v10  ;;  %8889 = vmatprep.mubr.msk.bf16.mxu0 %vm2292_vm0, %v14661_v48 }
 0x40a   :  { %8806 = vmatmul.mubr.msk.bf16.gmra.mrb[88].mxu1 %vm2292_vm0, %v11153_v13  ;;  %8890 = vmatmul.mubr.msk.bf16.gmra.mrb[84].mxu0 %vm2292_vm0, %v14662_v40 }
 0x40b   :  { %8809 = vmatprep.mubr.msk.bf16.mxu1 %vm2292_vm0, %v11233_v0  ;;  %8893 = vmatprep.mubr.msk.bf16.mxu0 %vm2292_vm0, %v11150_v10 }
 0x412   :  { %8810 = vmatmul.mubr.msk.bf16.gmra.mrb[92].mxu1 %vm2292_vm0, %v11256_v62  ;;  %8894 = vmatmul.mubr.msk.bf16.gmra.mrb[88].mxu0 %vm2292_vm0, %v11153_v13 }
 0x413   :  { %8813 = vmatprep.mubr.msk.bf16.mxu1 %vm2292_vm0, %v11302_v24  ;;  %8897 = vmatprep.mubr.msk.bf16.mxu0 %vm2292_vm0, %v11233_v0 }
 0x41a   :  { %8814 = vmatmul.mubr.msk.bf16.gmra.mrb[96].mxu1 %vm2292_vm0, %v11300_v44  ;;  %8898 = vmatmul.mubr.msk.bf16.gmra.mrb[92].mxu0 %vm2292_vm0, %v11256_v62 }
 0x41b   :  { %8817 = vmatprep.mubr.msk.bf16.mxu1 %vm2292_vm0, %v14663_v32  ;;  %8901 = vmatprep.mubr.msk.bf16.mxu0 %vm2292_vm0, %v11302_v24 }
 0x422   :  { %8818 = vmatmul.mubr.msk.bf16.gmra.mrb[100].mxu1 %vm2292_vm0, %v14664_v19  ;;  %8902 = vmatmul.mubr.msk.bf16.gmra.mrb[96].mxu0 %vm2292_vm0, %v11300_v44 }
 0x423   :  { %8821 = vmatprep.mubr.msk.bf16.mxu1 %vm2292_vm0, %v14665_v7  ;;  %8905 = vmatprep.mubr.msk.bf16.mxu0 %vm2292_vm0, %v14663_v32 }
 0x42a   :  { %8822 = vmatmul.mubr.msk.bf16.gmra.mrb[104].mxu1 %vm2292_vm0, %v14666_v53  ;;  %8906 = vmatmul.mubr.msk.bf16.gmra.mrb[100].mxu0 %vm2292_vm0, %v14664_v19 }
 0x42b   :  { %8825 = vmatprep.mubr.msk.bf16.mxu1 %vm2292_vm0, %v14667_v46  ;;  %8909 = vmatprep.mubr.msk.bf16.mxu0 %vm2292_vm0, %v14665_v7 }
 0x432   :  { %v8743_v28 = vpop.f32.mrb[32].mxu1  ;;  %8826 = vmatmul.mubr.msk.bf16.gmra.mrb[108].mxu1 %vm2292_vm0, %v11787_v25  ;;  %8910 = vmatmul.mubr.msk.bf16.gmra.mrb[104].mxu0 %vm2292_vm0, %v14666_v53 }
 0x433   :  { %v2735_v31 = vpop.f32.mrb[33].mxu1  ;;  %8829 = vmatprep.mubr.msk.bf16.mxu1 %vm2292_vm0, %v14668_v2  ;;  %8913 = vmatprep.mubr.msk.bf16.mxu0 %vm2292_vm0, %v14667_v46  ;;  %v2994_v34 = vrot.slane %v8743_v28, 1 }
 0x434   :  { %v2990_v58 = vrot.slane %v2735_v31, 1  ;;  %v12340_v17 = vpop.f32.mrb[34].mxu1 }
 0x435   :  { %v14169_v60 = vrot.slane %v12340_v17, 1  ;;  %v2738_v29 = vpop.f32.mrb[35].mxu1 }
 0x436   :  { %v2992_v16 = vrot.slane %v2738_v29, 1  ;;  %v12346_v33 = vsel %vm2846_vm1, %v14669_v43, %v2990_v58  ;;  %v14675_v43 = vld [vmem:[#allocation22_spill] sm:$0xff] }
 0x437   :  { %14670 = vst [vmem:[#allocation8_spill] sm:$0xff] %v12346_v33  ;;  %v12351_v47 = vsel %vm2846_vm1, %v2994_v34, %v14169_v60 }
 0x438   :  { %14671 = vst [vmem:[#allocation10_spill] sm:$0xff] %v12351_v47  ;;  %v12354_v5 = vsel %vm2846_vm1, %v2990_v58, %v2992_v16  ;;  %v12357_v31 = vsel %vm2846_vm1, %v2992_v16, %v2994_v34 }
 0x439   :  { %14672 = vst [vmem:[#allocation16_spill] sm:$0xff] %v12354_v5  ;;  %14673 = vst [vmem:[#allocation138_spill] sm:$0xff] %v12357_v31  ;;  %v14676_v5 = vrot.slane %v12259_v52, 1 }
 0x43a   :  { %v8703_v28 = vpop.f32.mrb[32].mxu0  ;;  %8830 = vmatmul.mubr.msk.bf16.gmra.mrb[112].mxu1 %vm2292_vm0, %v14674_v8  ;;  %8914 = vmatmul.mubr.msk.bf16.gmra.mrb[108].mxu0 %vm2292_vm0, %v11787_v25 }
 0x43b   :  { %v2575_v21 = vpop.f32.mrb[33].mxu0  ;;  %8833 = vmatprep.mubr.msk.bf16.mxu1 %vm2292_vm0, %v14675_v43  ;;  %8917 = vmatprep.mubr.msk.bf16.mxu0 %vm2292_vm0, %v14668_v2  ;;  %v2914_v60 = vrot.slane %v8703_v28, 1 }
 0x43c   :  { %v2910_v29 = vrot.slane %v2575_v21, 1  ;;  %v12367_v58 = vpop.f32.mrb[34].mxu0 }
 0x43d   :  { %v14171_v16 = vrot.slane %v12367_v58, 1  ;;  %v2578_v34 = vpop.f32.mrb[35].mxu0 }
 0x43e   :  { %v2912_v31 = vrot.slane %v2578_v34, 1  ;;  %v12373_v47 = vsel %vm2846_vm1, %v14676_v5, %v2910_v29  ;;  %v9382_v5 = vld [vmem:[%s14098_s5 + $0x28] sm:$0xff]  }
 0x43f   :  { %v12378_v33 = vsel %vm2846_vm1, %v2914_v60, %v14171_v16  ;;  %v14684_v34 = vld [vmem:[#allocation99_spill] sm:$0xff] }
 0x440   :  { %v12381_v41 = vsel %vm2846_vm1, %v2910_v29, %v2912_v31  ;;  %v12384_v21 = vsel %vm2846_vm1, %v2912_v31, %v2914_v60  ;;  %v9383_v60 = vld [vmem:[%s14098_s5 + $0x8] sm:$0xff]   ;;  %v14683_v31 = vld [vmem:[#allocation89_spill] sm:$0xff] }
 0x441   :  { %v14174_v28 = vrot.slane %v14683_v31, 1 }
 0x442   :  { %8834 = vmatmul.mubr.msk.bf16.gmra.mrb[116].mxu1 %vm2292_vm0, %v12081_v35  ;;  %8918 = vmatmul.mubr.msk.bf16.gmra.mrb[112].mxu0 %vm2292_vm0, %v14674_v8 }
 0x443   :  { %8921 = vmatprep.mubr.msk.bf16.mxu0 %vm2292_vm0, %v14675_v43  ;;  %8933 = vmatprep.mubr.msk.bf16.mxu1 %vm2292_vm0, %v10997_v6  ;;  %v14702_v43 = vld [vmem:[#allocation119_spill] sm:$0xff] }
 0x44a   :  { %8922 = vmatmul.mubr.msk.bf16.gmra.mrb[116].mxu0 %vm2292_vm0, %v12081_v35  ;;  %8934 = vmatmul.mubr.msk.bf16.vlgmr.msra.gmra.mrb[120].mxu1 %vm2292_vm0, %v11028_v1 }
 0x44b   :  { %8937 = vmatprep.mubr.msk.bf16.mxu1 %vm2292_vm0, %v11105_v30  ;;  %9021 = vmatprep.mubr.msk.bf16.mxu0 %vm2292_vm0, %v10997_v6  ;;  %v9384_v6 = vld [vmem:[%s14098_s5 + $0x30] sm:$0xff]  }
 0x44c   :  { %9102 = vmatpush3.bf16.msra.mxu1 %v9380_v45  ;;  %v14678_v45 = vrot.slane %v12340_v17, 1 }
 0x44d   :  { %9103 = vmatprep.subr.bf16.mxu1 %v9382_v5 }
 0x450   :  { %9104 = vmatpush3.bf16.msra.mxu1 %v9382_v5 }
 0x451   :  { %9105 = vmatprep.subr.bf16.mxu1 %v9384_v6 }
 0x452   :  { %8938 = vmatmul.mubr.msk.bf16.gmra.mrb[124].mxu1 %vm2292_vm0, %v11132_v12  ;;  %9022 = vmatmul.mubr.msk.bf16.vlgmr.msra.gmra.mrb[120].mxu0 %vm2292_vm0, %v11028_v1  ;;  %v9385_v1 = vld [vmem:[%s14098_s5 + $0x10] sm:$0xff]  }
 0x453   :  { %8941 = vmatprep.mubr.msk.bf16.mxu1 %vm2292_vm0, %v11182_v56  ;;  %9025 = vmatprep.mubr.msk.bf16.mxu0 %vm2292_vm0, %v11105_v30 }
 0x454   :  { %9190 = vmatpush3.bf16.msra.mxu0 %v9381_v50  ;;  %9106 = vmatpush3.bf16.msra.mxu1 %v9384_v6  ;;  %v14685_v6 = vld [vmem:[#allocation102_spill] sm:$0xff] }
 0x455   :  { %9191 = vmatprep.subr.bf16.mxu0 %v9383_v60 }
 0x458   :  { %9192 = vmatpush3.bf16.msra.mxu0 %v9383_v60 }
 0x459   :  { %9193 = vmatprep.subr.bf16.mxu0 %v9385_v1 }
 0x45a   :  { %8942 = vmatmul.mubr.msk.bf16.gmra.mrb[128].mxu1 %vm2292_vm0, %v11212_v42  ;;  %9026 = vmatmul.mubr.msk.bf16.gmra.mrb[124].mxu0 %vm2292_vm0, %v11132_v12 }
 0x45b   :  { %8945 = vmatprep.mubr.msk.bf16.mxu1 %vm2292_vm0, %v11273_v59  ;;  %9029 = vmatprep.mubr.msk.bf16.mxu0 %vm2292_vm0, %v11182_v56 }
 0x45c   :  { %9194 = vmatpush3.bf16.msra.mxu0 %v9385_v1  ;;  %v14686_v1 = vrot.slane %v14685_v6, 1  ;;  %v14689_v6 = vrot.slane %v12367_v58, 1 }
 0x462   :  { %8946 = vmatmul.mubr.msk.bf16.gmra.mrb[132].mxu1 %vm2292_vm0, %v11290_v14  ;;  %9030 = vmatmul.mubr.msk.bf16.gmra.mrb[128].mxu0 %vm2292_vm0, %v11212_v42 }
 0x463   :  { %8949 = vmatprep.mubr.msk.bf16.mxu1 %vm2292_vm0, %v11311_v18  ;;  %9033 = vmatprep.mubr.msk.bf16.mxu0 %vm2292_vm0, %v11273_v59 }
 0x46a   :  { %8950 = vmatmul.mubr.msk.bf16.gmra.mrb[136].mxu1 %vm2292_vm0, %v11316_v49  ;;  %9034 = vmatmul.mubr.msk.bf16.gmra.mrb[132].mxu0 %vm2292_vm0, %v11290_v14 }
 0x46b   :  { %8953 = vmatprep.mubr.msk.bf16.mxu1 %vm2292_vm0, %v11429_v27  ;;  %9037 = vmatprep.mubr.msk.bf16.mxu0 %vm2292_vm0, %v11311_v18 }
 0x472   :  { %8954 = vmatmul.mubr.msk.bf16.gmra.mrb[140].mxu1 %vm2292_vm0, %v11433_v39  ;;  %9038 = vmatmul.mubr.msk.bf16.gmra.mrb[136].mxu0 %vm2292_vm0, %v11316_v49 }
 0x473   :  { %8957 = vmatprep.mubr.msk.bf16.mxu1 %vm2292_vm0, %v11548_v36  ;;  %9041 = vmatprep.mubr.msk.bf16.mxu0 %vm2292_vm0, %v11429_v27 }
 0x475   :  { %v8747_v30 = vpop.f32.mrb[36].mxu1 }
 0x476   :  { %v2751_v12 = vpop.f32.mrb[37].mxu1  ;;  %v3002_v59 = vrot.slane %v8747_v30, 1  ;;  %v2849_v30 = vsel %vm2846_vm1, %v14174_v28, %v14686_v1 }
 0x477   :  { %v2998_v56 = vrot.slane %v2751_v12, 1  ;;  %v12454_v42 = vpop.f32.mrb[38].mxu1 }
 0x478   :  { %14677 = vst [vmem:[#allocation25_spill] sm:$0xff] %v12454_v42  ;;  %v14170_v14 = vrot.slane %v12454_v42, 1  ;;  %v2754_v18 = vpop.f32.mrb[39].mxu1 }
 0x479   :  { %v3000_v52 = vrot.slane %v2754_v18, 1  ;;  %v12460_v49 = vsel %vm2846_vm1, %v14678_v45, %v2998_v56 }
 0x47a   :  { %14679 = vst [vmem:[#allocation154_spill] sm:$0xff] %v12460_v49  ;;  %8958 = vmatmul.mubr.msk.bf16.gmra.mrb[144].mxu1 %vm2292_vm0, %v11553_v63  ;;  %9042 = vmatmul.mubr.msk.bf16.gmra.mrb[140].mxu0 %vm2292_vm0, %v11433_v39  ;;  %v12469_v27 = vsel %vm2846_vm1, %v3002_v59, %v14170_v14  ;;  %v14687_v14 = vld [vmem:[#allocation104_spill] sm:$0xff]  ;;  %v14696_v49 = vld [vmem:[#allocation6_spill] sm:$0xff] }
 0x47b   :  { %14680 = vst [vmem:[#allocation140_spill] sm:$0xff] %v12469_v27  ;;  %8961 = vmatprep.mubr.msk.bf16.mxu1 %vm2292_vm0, %v11810_v54  ;;  %9045 = vmatprep.mubr.msk.bf16.mxu0 %vm2292_vm0, %v11548_v36  ;;  %v12476_v50 = vsel %vm2846_vm1, %v2998_v56, %v3000_v52  ;;  %v12479_v17 = vsel %vm2846_vm1, %v3000_v52, %v3002_v59 }
 0x47c   :  { %14681 = vst [vmem:[#allocation142_spill] sm:$0xff] %v12476_v50  ;;  %14682 = vst [vmem:[#allocation56_spill] sm:$0xff] %v12479_v17 }
 0x47d   :  { %v8707_v39 = vpop.f32.mrb[36].mxu0  ;;  %v8759_v29 = vpop.f32.mrb[40].mxu1 }
 0x47e   :  { %v3155_v5 = vadd.f32 %v8759_v29, %v14684_v34  ;;  %v2591_v60 = vpop.f32.mrb[37].mxu0  ;;  %v3146_v36 = vpop.f32.mrb[41].mxu1  ;;  %v2922_v59 = vrot.slane %v8707_v39, 1  ;;  %v14688_v29 = vld [vmem:[#allocation124_spill] sm:$0xff] }
 0x47f   :  { %v2918_v12 = vrot.slane %v2591_v60, 1  ;;  %v3147_v56 = vadd.f32 %v3146_v36, %v2849_v30  ;;  %v8708_v18 = vpop.f32.mrb[38].mxu0  ;;  %v8760_v45 = vpop.f32.mrb[42].mxu1  ;;  %v14692_v30 = vld [vmem:[#allocation20_spill] sm:$0xff] }
 0x480   :  { %v2924_v52 = vrot.slane %v8708_v18, 1  ;;  %v3158_v16 = vadd.f32 %v8760_v45, %v14687_v14  ;;  %v2594_v17 = vpop.f32.mrb[39].mxu0  ;;  %v3149_v42 = vpop.f32.mrb[43].mxu1  ;;  %v14690_v14 = vld [vmem:[#allocation88_spill] sm:$0xff] }
 0x481   :  { %v2920_v50 = vrot.slane %v2594_v17, 1  ;;  %v3150_v34 = vadd.f32 %v3149_v42, %v14688_v29  ;;  %v12493_v31 = vsel %vm2846_vm1, %v14689_v6, %v2918_v12  ;;  %v14691_v60 = vrot.slane %v14690_v14, 1 }
 0x482   :  { %8962 = vmatmul.mubr.msk.bf16.gmra.mrb[148].mxu1 %vm2292_vm0, %v11819_v20  ;;  %9046 = vmatmul.mubr.msk.bf16.gmra.mrb[144].mxu0 %vm2292_vm0, %v11553_v63  ;;  %v12500_v39 = vsel %vm2846_vm1, %v2922_v59, %v2924_v52 }
 0x483   :  { %v12505_v17 = vsel %vm2846_vm1, %v2924_v52, %v14691_v60  ;;  %8965 = vmatprep.mubr.msk.bf16.mxu1 %vm2292_vm0, %v11973_v3  ;;  %9049 = vmatprep.mubr.msk.bf16.mxu0 %vm2292_vm0, %v11810_v54  ;;  %v12512_v58 = vsel %vm2846_vm1, %v2918_v12, %v2920_v50  ;;  %v12515_v42 = vsel %vm2846_vm1, %v2920_v50, %v2922_v59  ;;  %v14694_v52 = vld [vmem:[#allocation107_spill] sm:$0xff]  ;;  %v14695_v54 = vld [vmem:[#allocation18_spill] sm:$0xff] }
 0x485   :  { %v8763_v63 = vpop.f32.mrb[44].mxu1  ;;  %v8847_v1 = vpop.f32.mrb[40].mxu0 }
 0x486   :  { %v3171_v36 = vadd.f32 %v8763_v63, %v14692_v30  ;;  %v3162_v18 = vpop.f32.mrb[45].mxu1  ;;  %v12518_v45 = vpop.f32.mrb[41].mxu0  ;;  %v3935_v60 = vrot.slane %v8847_v1, 2 }
 0x487   :  { %14693 = vst [vmem:[#allocation28_spill] sm:$0xff] %v12518_v45  ;;  %v3163_v29 = vadd.f32 %v3162_v18, %v14694_v52  ;;  %v8764_v6 = vpop.f32.mrb[46].mxu1  ;;  %v8848_v14 = vpop.f32.mrb[42].mxu0  ;;  %v14177_v59 = vrot.slane %v12518_v45, 2 }
 0x488   :  { %v12522_v28 = vadd.f32 %v8764_v6, %v14695_v54  ;;  %v3937_v12 = vrot.slane %v8848_v14, 2  ;;  %v3165_v27 = vpop.f32.mrb[47].mxu1  ;;  %v3535_v50 = vpop.f32.mrb[43].mxu0 }
 0x489   :  { %v3166_v35 = vadd.f32 %v3165_v27, %v14696_v49  ;;  %v3933_v63 = vrot.slane %v3535_v50, 2 }
 0x48a   :  { %v3938_v30 = vsel %vm3931_vm2, %v3935_v60, %v3937_v12  ;;  %8966 = vmatmul.mubr.msk.bf16.gmra.mrb[152].mxu1 %vm2292_vm0, %v11977_v26  ;;  %9050 = vmatmul.mubr.msk.bf16.gmra.mrb[148].mxu0 %vm2292_vm0, %v11819_v20 }
 0x48b   :  { %v12531_v1 = vadd.f32 %v3938_v30, %v3155_v5  ;;  %v3934_v18 = vsel %vm3931_vm2, %v14177_v59, %v3933_v63  ;;  %v3936_v52 = vsel %vm3931_vm2, %v3933_v63, %v3935_v60  ;;  %8969 = vmatprep.mubr.msk.bf16.mxu1 %vm2292_vm0, %v12088_v9  ;;  %9053 = vmatprep.mubr.msk.bf16.mxu0 %vm2292_vm0, %v11973_v3  ;;  %v14700_v5 = vld [vmem:[#allocation113_spill] sm:$0xff]  ;;  %v14701_v30 = vld [vmem:[#allocation108_spill] sm:$0xff] }
 0x48c   :  { %v12541_v49 = vadd.f32 %v3934_v18, %v3147_v56  ;;  %v12543_v27 = vadd.f32 %v3936_v52, %v3150_v34  ;;  %v14703_v52 = vld [vmem:[#allocation155_spill] sm:$0xff] }
 0x48d   :  { %14697 = vst [vmem:[#allocation59_spill] sm:$0xff] %v12531_v1  ;;  %v8767_v6 = vpop.f32.mrb[48].mxu1  ;;  %v8851_v20 = vpop.f32.mrb[44].mxu0 }
 0x48e   :  { %14698 = vst [vmem:[#allocation98_spill] sm:$0xff] %v12541_v49  ;;  %14699 = vst [vmem:[#allocation144_spill] sm:$0xff] %v12543_v27  ;;  %v3187_v14 = vadd.f32 %v8767_v6, %v14700_v5  ;;  %v3178_v54 = vpop.f32.mrb[49].mxu1  ;;  %v3548_v50 = vpop.f32.mrb[45].mxu0  ;;  %v3943_v45 = vrot.slane %v8851_v20, 2 }
 0x48f   :  { %v3179_v59 = vadd.f32 %v3178_v54, %v14701_v30  ;;  %v3939_v1 = vrot.slane %v3548_v50, 2  ;;  %v8768_v60 = vpop.f32.mrb[50].mxu1  ;;  %v8852_v63 = vpop.f32.mrb[46].mxu0 }
 0x490   :  { %v12548_v8 = vadd.f32 %v8768_v60, %v14702_v43  ;;  %v3945_v3 = vrot.slane %v8852_v63, 2  ;;  %v3181_v56 = vpop.f32.mrb[51].mxu1  ;;  %v3551_v18 = vpop.f32.mrb[47].mxu0 }
 0x491   :  { %v3940_v34 = vsel %vm3931_vm2, %v3937_v12, %v3939_v1  ;;  %v3182_v27 = vadd.f32 %v3181_v56, %v14703_v52  ;;  %v3941_v49 = vrot.slane %v3551_v18, 2 }
 0x492   :  { %v12552_v6 = vadd.f32 %v3940_v34, %v3158_v16  ;;  %v3946_v5 = vsel %vm3931_vm2, %v3943_v45, %v3945_v3  ;;  %8970 = vmatmul.mubr.msk.bf16.gmra.mrb[156].mxu1 %vm2292_vm0, %v12092_v4  ;;  %9054 = vmatmul.mubr.msk.bf16.gmra.mrb[152].mxu0 %vm2292_vm0, %v11977_v26  ;;  %v9386_v26 = vld [vmem:[%s14098_s5 + $0x38] sm:$0xff]   ;;  %v14709_v34 = vld [vmem:[#allocation139_spill] sm:$0xff] }
 0x493   :  { %v12559_v43 = vadd.f32 %v3946_v5, %v3171_v36  ;;  %v3942_v20 = vsel %vm3931_vm2, %v3939_v1, %v3941_v49  ;;  %v3944_v54 = vsel %vm3931_vm2, %v3941_v49, %v3943_v45  ;;  %8973 = vmatprep.mubr.msk.bf16.mxu1 %vm2292_vm0, %v14655_v55  ;;  %9057 = vmatprep.mubr.msk.bf16.mxu0 %vm2292_vm0, %v12088_v9  ;;  %v9387_v36 = vld [vmem:[%s14098_s5 + $0x18] sm:$0xff]   ;;  %v14708_v9 = vld [vmem:[#allocation128_spill] sm:$0xff] }
 0x494   :  { %v12567_v16 = vadd.f32 %v3942_v20, %v3163_v29  ;;  %v12569_v12 = vadd.f32 %v3944_v54, %v3166_v35  ;;  %v14707_v49 = vld [vmem:[#allocation121_spill] sm:$0xff]  ;;  %9107 = vmatprep.subr.bf16.mxu1 %v9386_v26  ;;  %9195 = vmatprep.subr.bf16.mxu0 %v9387_v36 }
 0x495   :  { %14704 = vst [vmem:[#allocation29_spill] sm:$0xff] %v12559_v43  ;;  %v8771_v1 = vpop.f32.mrb[52].mxu1  ;;  %v8855_v45 = vpop.f32.mrb[48].mxu0  ;;  %9108 = vmatpush3.bf16.msra.mxu1 %v9386_v26  ;;  %9196 = vmatpush3.bf16.msra.mxu0 %v9387_v36 }
 0x496   :  { %14705 = vst [vmem:[#allocation17_spill] sm:$0xff] %v12567_v16  ;;  %14706 = vst [vmem:[#allocation146_spill] sm:$0xff] %v12569_v12  ;;  %v3203_v50 = vadd.f32 %v8771_v1, %v14707_v49  ;;  %v3194_v30 = vpop.f32.mrb[53].mxu1  ;;  %v3564_v60 = vpop.f32.mrb[49].mxu0  ;;  %v3951_v18 = vrot.slane %v8855_v45, 2  ;;  %v14710_v49 = vld [vmem:[#allocation129_spill] sm:$0xff] }
 0x497   :  { %v3195_v29 = vadd.f32 %v3194_v30, %v14708_v9  ;;  %v3947_v35 = vrot.slane %v3564_v60, 2  ;;  %v8772_v63 = vpop.f32.mrb[54].mxu1  ;;  %v8856_v56 = vpop.f32.mrb[50].mxu0 }
 0x498   :  { %v12580_v52 = vadd.f32 %v8772_v63, %v14709_v34  ;;  %v3953_v5 = vrot.slane %v8856_v56, 2  ;;  %v3197_v20 = vpop.f32.mrb[55].mxu1  ;;  %v3567_v54 = vpop.f32.mrb[51].mxu0  ;;  %v14712_v63 = vld [vmem:[#allocation21_spill] sm:$0xff] }
 0x499   :  { %v3948_v1 = vsel %vm3931_vm2, %v3945_v3, %v3947_v35  ;;  %v3198_v12 = vadd.f32 %v3197_v20, %v14710_v49  ;;  %v3949_v16 = vrot.slane %v3567_v54, 2  ;;  %v14713_v34 = vld [vmem:[#allocation125_spill] sm:$0xff] }
 0x49a   :  { %v12585_v43 = vadd.f32 %v3948_v1, %v12522_v28  ;;  %v3954_v30 = vsel %vm3931_vm2, %v3951_v18, %v3953_v5  ;;  %8974 = vmatmul.mubr.msk.bf16.gmra.mrb[160].mxu1 %vm2292_vm0, %v14660_v61  ;;  %9058 = vmatmul.mubr.msk.bf16.gmra.mrb[156].mxu0 %vm2292_vm0, %v12092_v4  ;;  %v14714_v1 = vld [vmem:[#allocation145_spill] sm:$0xff] }
 0x49b   :  { %v12592_v26 = vadd.f32 %v3954_v30, %v3187_v14  ;;  %v3950_v36 = vsel %vm3931_vm2, %v3947_v35, %v3949_v16  ;;  %v3952_v3 = vsel %vm3931_vm2, %v3949_v16, %v3951_v18  ;;  %8977 = vmatprep.mubr.msk.bf16.mxu1 %vm2292_vm0, %v14661_v48  ;;  %9061 = vmatprep.mubr.msk.bf16.mxu0 %vm2292_vm0, %v14655_v55 }
 0x49c   :  { %v12600_v28 = vadd.f32 %v3950_v36, %v3179_v59  ;;  %v12602_v45 = vadd.f32 %v3952_v3, %v3182_v27  ;;  %v14715_v36 = vld [vmem:[#allocation137_spill] sm:$0xff] }
 0x49d   :  { %v8775_v60 = vpop.f32.mrb[56].mxu1  ;;  %v8859_v9 = vpop.f32.mrb[52].mxu0 }
 0x49e   :  { %14711 = vst [vmem:[#allocation32_spill] sm:$0xff] %v12602_v45  ;;  %v3219_v4 = vadd.f32 %v8775_v60, %v14712_v63  ;;  %v3210_v14 = vpop.f32.mrb[57].mxu1  ;;  %v3580_v56 = vpop.f32.mrb[53].mxu0  ;;  %v3959_v54 = vrot.slane %v8859_v9, 2 }
 0x49f   :  { %v3211_v35 = vadd.f32 %v3210_v14, %v14713_v34  ;;  %v3955_v20 = vrot.slane %v3580_v56, 2  ;;  %v8776_v16 = vpop.f32.mrb[58].mxu1  ;;  %v8860_v18 = vpop.f32.mrb[54].mxu0 }
 0x4a0   :  { %v12607_v49 = vadd.f32 %v8776_v16, %v14714_v1  ;;  %v3961_v55 = vrot.slane %v8860_v18, 2  ;;  %v3213_v59 = vpop.f32.mrb[59].mxu1  ;;  %v3583_v30 = vpop.f32.mrb[55].mxu0  ;;  %v14717_v18 = vld [vmem:[#allocation143_spill] sm:$0xff] }
 0x4a1   :  { %v3956_v27 = vsel %vm3931_vm2, %v3953_v5, %v3955_v20  ;;  %v3214_v3 = vadd.f32 %v3213_v59, %v14715_v36  ;;  %v3957_v45 = vrot.slane %v3583_v30, 2  ;;  %v14718_v59 = vld [vmem:[#allocation158_spill] sm:$0xff] }
 0x4a2   :  { %v12612_v60 = vadd.f32 %v3956_v27, %v12548_v8  ;;  %v3962_v63 = vsel %vm3931_vm2, %v3959_v54, %v3961_v55  ;;  %8978 = vmatmul.mubr.msk.bf16.gmra.mrb[164].mxu1 %vm2292_vm0, %v14662_v40  ;;  %9062 = vmatmul.mubr.msk.bf16.gmra.mrb[160].mxu0 %vm2292_vm0, %v14660_v61 }
 0x4a3   :  { %v12619_v9 = vadd.f32 %v3962_v63, %v3203_v50  ;;  %v3958_v14 = vsel %vm3931_vm2, %v3955_v20, %v3957_v45  ;;  %v3960_v5 = vsel %vm3931_vm2, %v3957_v45, %v3959_v54  ;;  %8981 = vmatprep.mubr.msk.bf16.mxu1 %vm2292_vm0, %v11150_v10  ;;  %9065 = vmatprep.mubr.msk.bf16.mxu0 %vm2292_vm0, %v14661_v48 }
 0x4a4   :  { %v12627_v8 = vadd.f32 %v3958_v14, %v3195_v29  ;;  %v12629_v56 = vadd.f32 %v3960_v5, %v3198_v12  ;;  %v14719_v14 = vld [vmem:[#allocation134_spill] sm:$0xff] }
 0x4a5   :  { %v8779_v34 = vpop.f32.mrb[60].mxu1  ;;  %v8863_v16 = vpop.f32.mrb[56].mxu0 }
 0x4a6   :  { %14716 = vst [vmem:[#allocation33_spill] sm:$0xff] %v12629_v56  ;;  %v3235_v61 = vadd.f32 %v8779_v34, %v14717_v18  ;;  %v3226_v50 = vpop.f32.mrb[61].mxu1  ;;  %v3596_v1 = vpop.f32.mrb[57].mxu0  ;;  %v3967_v27 = vrot.slane %v8863_v16, 2 }
 0x4a7   :  { %v3227_v20 = vadd.f32 %v3226_v50, %v14718_v59  ;;  %v3963_v30 = vrot.slane %v3596_v1, 2  ;;  %v8780_v45 = vpop.f32.mrb[62].mxu1  ;;  %v8864_v54 = vpop.f32.mrb[58].mxu0 }
 0x4a8   :  { %v12634_v36 = vadd.f32 %v8780_v45, %v12163_v51  ;;  %v3969_v48 = vrot.slane %v8864_v54, 2  ;;  %v3229_v29 = vpop.f32.mrb[63].mxu1  ;;  %v3599_v63 = vpop.f32.mrb[59].mxu0 }
 0x4a9   :  { %v3964_v12 = vsel %vm3931_vm2, %v3961_v55, %v3963_v30  ;;  %v3230_v5 = vadd.f32 %v3229_v29, %v14719_v14  ;;  %v3965_v56 = vrot.slane %v3599_v63, 2 }
 0x4aa   :  { %v12639_v34 = vadd.f32 %v3964_v12, %v12580_v52  ;;  %v3970_v18 = vsel %vm3931_vm2, %v3967_v27, %v3969_v48  ;;  %8982 = vmatmul.mubr.msk.bf16.gmra.mrb[168].mxu1 %vm2292_vm0, %v11153_v13  ;;  %9066 = vmatmul.mubr.msk.bf16.gmra.mrb[164].mxu0 %vm2292_vm0, %v14662_v40 }
 0x4ab   :  { %v12646_v51 = vadd.f32 %v3970_v18, %v3219_v4  ;;  %v3966_v16 = vsel %vm3931_vm2, %v3963_v30, %v3965_v56  ;;  %v3968_v55 = vsel %vm3931_vm2, %v3965_v56, %v3967_v27  ;;  %8985 = vmatprep.mubr.msk.bf16.mxu1 %vm2292_vm0, %v11233_v0  ;;  %9069 = vmatprep.mubr.msk.bf16.mxu0 %vm2292_vm0, %v11150_v10 }
 0x4ac   :  { %v12654_v52 = vadd.f32 %v3966_v16, %v3211_v35  ;;  %v12656_v50 = vadd.f32 %v3968_v55, %v3214_v3 }
 0x4ad   :  { %v8783_v1 = vpop.f32.mrb[64].mxu1  ;;  %v8867_v59 = vpop.f32.mrb[60].mxu0 }
 0x4ae   :  { %v3251_v40 = vadd.f32 %v8783_v1, %v12168_v37  ;;  %v3242_v4 = vpop.f32.mrb[65].mxu1  ;;  %v3612_v45 = vpop.f32.mrb[61].mxu0  ;;  %v3975_v29 = vrot.slane %v8867_v59, 2 }
 0x4af   :  { %v3243_v30 = vadd.f32 %v3242_v4, %v12171_v23  ;;  %v3971_v54 = vrot.slane %v3612_v45, 2  ;;  %v8784_v56 = vpop.f32.mrb[66].mxu1  ;;  %v8868_v27 = vpop.f32.mrb[62].mxu0 }
 0x4b0   :  { %v12661_v63 = vadd.f32 %v8784_v56, %v12265_v57  ;;  %v3977_v10 = vrot.slane %v8868_v27, 2  ;;  %v3245_v35 = vpop.f32.mrb[67].mxu1  ;;  %v3615_v12 = vpop.f32.mrb[63].mxu0 }
 0x4b1   :  { %v3972_v3 = vsel %vm3931_vm2, %v3969_v48, %v3971_v54  ;;  %v3246_v14 = vadd.f32 %v3245_v35, %v12174_v38  ;;  %v3973_v18 = vrot.slane %v3615_v12, 2 }
 0x4b2   :  { %v12666_v37 = vadd.f32 %v3972_v3, %v12607_v49  ;;  %v3978_v23 = vsel %vm3931_vm2, %v3975_v29, %v3977_v10  ;;  %8986 = vmatmul.mubr.msk.bf16.gmra.mrb[172].mxu1 %vm2292_vm0, %v11256_v62  ;;  %9070 = vmatmul.mubr.msk.bf16.gmra.mrb[168].mxu0 %vm2292_vm0, %v11153_v13 }
 0x4b3   :  { %v12673_v57 = vadd.f32 %v3978_v23, %v3235_v61  ;;  %v3974_v16 = vsel %vm3931_vm2, %v3971_v54, %v3973_v18  ;;  %v3976_v48 = vsel %vm3931_vm2, %v3973_v18, %v3975_v29  ;;  %8989 = vmatprep.mubr.msk.bf16.mxu1 %vm2292_vm0, %v11302_v24  ;;  %9073 = vmatprep.mubr.msk.bf16.mxu0 %vm2292_vm0, %v11233_v0 }
 0x4b4   :  { %v12681_v38 = vadd.f32 %v3974_v16, %v3227_v20  ;;  %v12683_v49 = vadd.f32 %v3976_v48, %v3230_v5 }
 0x4b5   :  { %v8787_v55 = vpop.f32.mrb[68].mxu1  ;;  %v8871_v1 = vpop.f32.mrb[64].mxu0 }
 0x4b6   :  { %v3267_v13 = vadd.f32 %v8787_v55, %v12270_v15  ;;  %v3258_v61 = vpop.f32.mrb[69].mxu1  ;;  %v3628_v59 = vpop.f32.mrb[65].mxu0  ;;  %v3983_v27 = vrot.slane %v8871_v1, 2 }
 0x4b7   :  { %v3259_v4 = vadd.f32 %v3258_v61, %v12273_v22  ;;  %v3979_v45 = vrot.slane %v3628_v59, 2  ;;  %v8788_v54 = vpop.f32.mrb[70].mxu1  ;;  %v8872_v56 = vpop.f32.mrb[66].mxu0 }
 0x4b8   :  { %v12688_v29 = vadd.f32 %v8788_v54, %v12373_v47  ;;  %v3985_v0 = vrot.slane %v8872_v56, 2  ;;  %v3261_v20 = vpop.f32.mrb[71].mxu1  ;;  %v3631_v35 = vpop.f32.mrb[67].mxu0 }
 0x4b9   :  { %v3980_v5 = vsel %vm3931_vm2, %v3977_v10, %v3979_v45  ;;  %v3262_v12 = vadd.f32 %v3261_v20, %v12276_v11  ;;  %v3981_v3 = vrot.slane %v3631_v35, 2 }
 0x4ba   :  { %v12693_v15 = vadd.f32 %v3980_v5, %v12634_v36  ;;  %v3986_v22 = vsel %vm3931_vm2, %v3983_v27, %v3985_v0  ;;  %8990 = vmatmul.mubr.msk.bf16.gmra.mrb[176].mxu1 %vm2292_vm0, %v11300_v44  ;;  %9074 = vmatmul.mubr.msk.bf16.gmra.mrb[172].mxu0 %vm2292_vm0, %v11256_v62 }
 0x4bb   :  { %v12700_v47 = vadd.f32 %v3986_v22, %v3251_v40  ;;  %v3982_v18 = vsel %vm3931_vm2, %v3979_v45, %v3981_v3  ;;  %v3984_v10 = vsel %vm3931_vm2, %v3981_v3, %v3983_v27  ;;  %8993 = vmatprep.mubr.msk.bf16.mxu1 %vm2292_vm0, %v14663_v32  ;;  %9077 = vmatprep.mubr.msk.bf16.mxu0 %vm2292_vm0, %v11302_v24 }
 0x4bc   :  { %v12708_v11 = vadd.f32 %v3982_v18, %v3243_v30  ;;  %v12710_v36 = vadd.f32 %v3984_v10, %v3246_v14 }
 0x4bd   :  { %v8791_v23 = vpop.f32.mrb[72].mxu1  ;;  %v8875_v16 = vpop.f32.mrb[68].mxu0 }
 0x4be   :  { %v3283_v62 = vadd.f32 %v8791_v23, %v12378_v33  ;;  %v3274_v40 = vpop.f32.mrb[73].mxu1  ;;  %v3644_v48 = vpop.f32.mrb[69].mxu0  ;;  %v3991_v45 = vrot.slane %v8875_v16, 2 }
 0x4bf   :  { %v3275_v55 = vadd.f32 %v3274_v40, %v12381_v41  ;;  %v3987_v1 = vrot.slane %v3644_v48, 2  ;;  %v8792_v61 = vpop.f32.mrb[74].mxu1  ;;  %v8876_v59 = vpop.f32.mrb[70].mxu0 }
 0x4c0   :  { %v12715_v54 = vadd.f32 %v8792_v61, %v12493_v31  ;;  %v3993_v24 = vrot.slane %v8876_v59, 2  ;;  %v3277_v30 = vpop.f32.mrb[75].mxu1  ;;  %v3647_v56 = vpop.f32.mrb[71].mxu0 }
 0x4c1   :  { %v3988_v14 = vsel %vm3931_vm2, %v3985_v0, %v3987_v1  ;;  %v3278_v27 = vadd.f32 %v3277_v30, %v12384_v21  ;;  %v3989_v20 = vrot.slane %v3647_v56, 2 }
 0x4c2   :  { %v12720_v33 = vadd.f32 %v3988_v14, %v12661_v63  ;;  %v3994_v41 = vsel %vm3931_vm2, %v3991_v45, %v3993_v24  ;;  %8994 = vmatmul.mubr.msk.bf16.gmra.mrb[180].mxu1 %vm2292_vm0, %v14664_v19  ;;  %9078 = vmatmul.mubr.msk.bf16.gmra.mrb[176].mxu0 %vm2292_vm0, %v11300_v44  ;;  %v14720_v14 = vld [vmem:[#allocation93_spill] sm:$0xff] }
 0x4c3   :  { %v12727_v31 = vadd.f32 %v3994_v41, %v3267_v13  ;;  %v3990_v35 = vsel %vm3931_vm2, %v3987_v1, %v3989_v20  ;;  %v3992_v0 = vsel %vm3931_vm2, %v3989_v20, %v3991_v45  ;;  %8997 = vmatprep.mubr.msk.bf16.mxu1 %vm2292_vm0, %v14665_v7  ;;  %9081 = vmatprep.mubr.msk.bf16.mxu0 %vm2292_vm0, %v14663_v32  ;;  %v14721_v41 = vld [vmem:[#allocation97_spill] sm:$0xff] }
 0x4c4   :  { %v12735_v21 = vadd.f32 %v3990_v35, %v3259_v4  ;;  %v12737_v63 = vadd.f32 %v3992_v0, %v3262_v12 }
 0x4c5   :  { %v8795_v5 = vpop.f32.mrb[76].mxu1  ;;  %v8879_v3 = vpop.f32.mrb[72].mxu0 }
 0x4c6   :  { %v3299_v44 = vadd.f32 %v8795_v5, %v12500_v39  ;;  %v3290_v13 = vpop.f32.mrb[77].mxu1  ;;  %v3660_v22 = vpop.f32.mrb[73].mxu0  ;;  %v3999_v40 = vrot.slane %v8879_v3, 2 }
 0x4c7   :  { %v3291_v18 = vadd.f32 %v3290_v13, %v12512_v58  ;;  %v3995_v10 = vrot.slane %v3660_v22, 2  ;;  %v8796_v23 = vpop.f32.mrb[78].mxu1  ;;  %v8880_v16 = vpop.f32.mrb[74].mxu0  ;;  %v14722_v22 = vld [vmem:[#allocation122_spill] sm:$0xff] }
 0x4c8   :  { %v12742_v48 = vadd.f32 %v8796_v23, %v12505_v17  ;;  %v4001_v32 = vrot.slane %v8880_v16, 2  ;;  %v3293_v4 = vpop.f32.mrb[79].mxu1  ;;  %v3663_v1 = vpop.f32.mrb[75].mxu0  ;;  %v14723_v16 = vld [vmem:[#allocation120_spill] sm:$0xff] }
 0x4c9   :  { %v3996_v12 = vsel %vm3931_vm2, %v3993_v24, %v3995_v10  ;;  %v3294_v61 = vadd.f32 %v3293_v4, %v12515_v42  ;;  %v3997_v59 = vrot.slane %v3663_v1, 2 }
 0x4ca   :  { %v12747_v39 = vadd.f32 %v3996_v12, %v12688_v29  ;;  %v4002_v58 = vsel %vm3931_vm2, %v3999_v40, %v4001_v32  ;;  %8998 = vmatmul.mubr.msk.bf16.gmra.mrb[184].mxu1 %vm2292_vm0, %v14666_v53  ;;  %9082 = vmatmul.mubr.msk.bf16.gmra.mrb[180].mxu0 %vm2292_vm0, %v14664_v19 }
 0x4cb   :  { %v12754_v17 = vadd.f32 %v4002_v58, %v3283_v62  ;;  %v3998_v45 = vsel %vm3931_vm2, %v3995_v10, %v3997_v59  ;;  %v4000_v24 = vsel %vm3931_vm2, %v3997_v59, %v3999_v40  ;;  %9001 = vmatprep.mubr.msk.bf16.mxu1 %vm2292_vm0, %v14667_v46  ;;  %9085 = vmatprep.mubr.msk.bf16.mxu0 %vm2292_vm0, %v14665_v7 }
 0x4cc   :  { %v12762_v42 = vadd.f32 %v3998_v45, %v3275_v55  ;;  %v12764_v29 = vadd.f32 %v4000_v24, %v3278_v27 }
 0x4cd   :  { %v8799_v30 = vpop.f32.mrb[80].mxu1  ;;  %v8883_v56 = vpop.f32.mrb[76].mxu0 }
 0x4ce   :  { %v3315_v19 = vadd.f32 %v8799_v30, %v14720_v14  ;;  %v3306_v62 = vpop.f32.mrb[81].mxu1  ;;  %v3676_v20 = vpop.f32.mrb[77].mxu0  ;;  %v4007_v13 = vrot.slane %v8883_v56, 2  ;;  %v14724_v56 = vld [vmem:[#allocation106_spill] sm:$0xff] }
 0x4cf   :  { %v3307_v35 = vadd.f32 %v3306_v62, %v14721_v41  ;;  %v4003_v0 = vrot.slane %v3676_v20, 2  ;;  %v8800_v5 = vpop.f32.mrb[82].mxu1  ;;  %v8884_v3 = vpop.f32.mrb[78].mxu0  ;;  %v14725_v62 = vld [vmem:[#allocation2_spill] sm:$0xff] }
 0x4d0   :  { %v12769_v10 = vadd.f32 %v8800_v5, %v14722_v22  ;;  %v4009_v7 = vrot.slane %v8884_v3, 2  ;;  %v3309_v55 = vpop.f32.mrb[83].mxu1  ;;  %v3679_v23 = vpop.f32.mrb[79].mxu0 }
 0x4d1   :  { %v4004_v27 = vsel %vm3931_vm2, %v4001_v32, %v4003_v0  ;;  %v3310_v40 = vadd.f32 %v3309_v55, %v14723_v16  ;;  %v4005_v4 = vrot.slane %v3679_v23, 2  ;;  %v14727_v23 = vld [vmem:[#allocation126_spill] sm:$0xff] }
 0x4d2   :  { %v12774_v1 = vadd.f32 %v4004_v27, %v12715_v54  ;;  %v4010_v12 = vsel %vm3931_vm2, %v4007_v13, %v4009_v7  ;;  %9002 = vmatmul.mubr.msk.bf16.gmra.mrb[188].mxu1 %vm2292_vm0, %v11787_v25  ;;  %9086 = vmatmul.mubr.msk.bf16.gmra.mrb[184].mxu0 %vm2292_vm0, %v14666_v53 }
 0x4d3   :  { %v12781_v59 = vadd.f32 %v4010_v12, %v3299_v44  ;;  %v4006_v58 = vsel %vm3931_vm2, %v4003_v0, %v4005_v4  ;;  %v4008_v32 = vsel %vm3931_vm2, %v4005_v4, %v4007_v13  ;;  %9005 = vmatprep.mubr.msk.bf16.mxu1 %vm2292_vm0, %v14668_v2  ;;  %9089 = vmatprep.mubr.msk.bf16.mxu0 %vm2292_vm0, %v14667_v46  ;;  %v14726_v13 = vld [vmem:[#allocation127_spill] sm:$0xff] }
 0x4d4   :  { %v12789_v54 = vadd.f32 %v4006_v58, %v3291_v18  ;;  %v12791_v45 = vadd.f32 %v4008_v32, %v3294_v61  ;;  %v14728_v58 = vld [vmem:[#allocation132_spill] sm:$0xff] }
 0x4d5   :  { %v8803_v24 = vpop.f32.mrb[84].mxu1  ;;  %v8887_v30 = vpop.f32.mrb[80].mxu0 }
 0x4d6   :  { %v3331_v53 = vadd.f32 %v8803_v24, %v14724_v56  ;;  %v3322_v44 = vpop.f32.mrb[85].mxu1  ;;  %v3692_v14 = vpop.f32.mrb[81].mxu0  ;;  %v4015_v3 = vrot.slane %v8887_v30, 2  ;;  %v14730_v30 = vld [vmem:[#allocation22_spill] sm:$0xff] }
 0x4d7   :  { %v3323_v20 = vadd.f32 %v3322_v44, %v14725_v62  ;;  %v4011_v41 = vrot.slane %v3692_v14, 2  ;;  %v8804_v0 = vpop.f32.mrb[86].mxu1  ;;  %v8888_v5 = vpop.f32.mrb[82].mxu0  ;;  %v14733_v62 = vld [vmem:[#allocation91_spill] sm:$0xff] }
 0x4d8   :  { %v3334_v22 = vadd.f32 %v8804_v0, %v14726_v13  ;;  %v4017_v55 = vrot.slane %v8888_v5, 2  ;;  %v3325_v46 = vpop.f32.mrb[87].mxu1  ;;  %v3695_v18 = vpop.f32.mrb[83].mxu0  ;;  %v14734_v5 = vld [vmem:[#allocation92_spill] sm:$0xff] }
 0x4d9   :  { %v4012_v61 = vsel %vm3931_vm2, %v4009_v7, %v4011_v41  ;;  %v3326_v27 = vadd.f32 %v3325_v46, %v14727_v23  ;;  %v4013_v16 = vrot.slane %v3695_v18, 2 }
 0x4da   :  { %v12799_v4 = vadd.f32 %v4012_v61, %v12742_v48  ;;  %v4018_v12 = vsel %vm3931_vm2, %v4015_v3, %v4017_v55  ;;  %9006 = vmatmul.mubr.msk.bf16.gmra.mrb[192].mxu1 %vm2292_vm0, %v14728_v58  ;;  %9090 = vmatmul.mubr.msk.bf16.gmra.mrb[188].mxu0 %vm2292_vm0, %v11787_v25  ;;  %v14735_v61 = vld [vmem:[#allocation23_spill] sm:$0xff] }
 0x4db   :  { %v12806_v32 = vadd.f32 %v4018_v12, %v3315_v19  ;;  %v4014_v24 = vsel %vm3931_vm2, %v4011_v41, %v4013_v16  ;;  %v4016_v7 = vsel %vm3931_vm2, %v4013_v16, %v4015_v3  ;;  %9009 = vmatprep.mubr.msk.bf16.mxu1 %vm2292_vm0, %v14730_v30  ;;  %9093 = vmatprep.mubr.msk.bf16.mxu0 %vm2292_vm0, %v14668_v2  ;;  %v14736_v12 = vld [vmem:[#allocation116_spill] sm:$0xff] }
 0x4dc   :  { %v12814_v48 = vadd.f32 %v4014_v24, %v3307_v35  ;;  %v12816_v56 = vadd.f32 %v4016_v7, %v3310_v40 }
 0x4dd   :  { %14729 = vst [vmem:[#allocation34_spill] sm:$0xff] %v12806_v32  ;;  %v8807_v44 = vpop.f32.mrb[88].mxu1  ;;  %v8891_v14 = vpop.f32.mrb[84].mxu0 }
 0x4de   :  { %14731 = vst [vmem:[#allocation68_spill] sm:$0xff] %v12814_v48  ;;  %14732 = vst [vmem:[#allocation156_spill] sm:$0xff] %v12816_v56  ;;  %v3347_v25 = vadd.f32 %v8807_v44, %v14733_v62  ;;  %v3338_v19 = vpop.f32.mrb[89].mxu1  ;;  %v3708_v0 = vpop.f32.mrb[85].mxu0  ;;  %v4023_v18 = vrot.slane %v8891_v14, 2 }
 0x4df   :  { %v3339_v41 = vadd.f32 %v3338_v19, %v14734_v5  ;;  %v4019_v13 = vrot.slane %v3708_v0, 2  ;;  %v8808_v3 = vpop.f32.mrb[90].mxu1  ;;  %v8892_v46 = vpop.f32.mrb[86].mxu0  ;;  %v14738_v19 = vld [vmem:[#allocation136_spill] sm:$0xff] }
 0x4e0   :  { %v3350_v23 = vadd.f32 %v8808_v3, %v14735_v61  ;;  %v4025_v16 = vrot.slane %v8892_v46, 2  ;;  %v3341_v2 = vpop.f32.mrb[91].mxu1  ;;  %v3711_v35 = vpop.f32.mrb[87].mxu0  ;;  %v14742_v61 = vld [vmem:[#allocation114_spill] sm:$0xff] }
 0x4e1   :  { %v4020_v40 = vsel %vm3931_vm2, %v4017_v55, %v4019_v13  ;;  %v3342_v24 = vadd.f32 %v3341_v2, %v14736_v12  ;;  %v4021_v7 = vrot.slane %v3711_v35, 2 }
 0x4e2   :  { %v12824_v44 = vadd.f32 %v4020_v40, %v12769_v10  ;;  %v4026_v62 = vsel %vm3931_vm2, %v4023_v18, %v4025_v16  ;;  %9010 = vmatmul.mubr.msk.bf16.gmra.mrb[196].mxu1 %vm2292_vm0, %v14738_v19  ;;  %9094 = vmatmul.mubr.msk.bf16.gmra.mrb[192].mxu0 %vm2292_vm0, %v14728_v58  ;;  %v14743_v58 = vld [vmem:[#allocation118_spill] sm:$0xff] }
 0x4e3   :  { %v12831_v14 = vadd.f32 %v4026_v62, %v3331_v53  ;;  %v4022_v0 = vsel %vm3931_vm2, %v4019_v13, %v4021_v7  ;;  %v4024_v55 = vsel %vm3931_vm2, %v4021_v7, %v4023_v18  ;;  %9097 = vmatprep.mubr.msk.bf16.mxu0 %vm2292_vm0, %v14730_v30  ;;  %v14744_v18 = vld [vmem:[#allocation57_spill] sm:$0xff] }
 0x4e4   :  { %14737 = vst [vmem:[#allocation69_spill] sm:$0xff] %v12824_v44  ;;  %v12837_v5 = vadd.f32 %v4022_v0, %v3323_v20  ;;  %v12839_v10 = vadd.f32 %v4024_v55, %v3326_v27  ;;  %v14745_v0 = vld [vmem:[#allocation94_spill] sm:$0xff] }
 0x4e5   :  { %14739 = vst [vmem:[#allocation100_spill] sm:$0xff] %v12831_v14  ;;  %v8811_v3 = vpop.f32.mrb[92].mxu1  ;;  %v8895_v46 = vpop.f32.mrb[88].mxu0 }
 0x4e6   :  { %14740 = vst [vmem:[#allocation148_spill] sm:$0xff] %v12837_v5  ;;  %14741 = vst [vmem:[#allocation71_spill] sm:$0xff] %v12839_v10  ;;  %v3363_v2 = vadd.f32 %v8811_v3, %v14742_v61  ;;  %v3354_v35 = vpop.f32.mrb[93].mxu1  ;;  %v3724_v40 = vpop.f32.mrb[89].mxu0  ;;  %v4031_v14 = vrot.slane %v8895_v46, 2 }
 0x4e7   :  { %v3355_v53 = vadd.f32 %v3354_v35, %v14743_v58  ;;  %v4027_v12 = vrot.slane %v3724_v40, 2  ;;  %v8812_v62 = vpop.f32.mrb[94].mxu1  ;;  %v8896_v13 = vpop.f32.mrb[90].mxu0 }
 0x4e8   :  { %v3366_v7 = vadd.f32 %v8812_v62, %v14744_v18  ;;  %v4033_v44 = vrot.slane %v8896_v13, 2  ;;  %v3357_v30 = vpop.f32.mrb[95].mxu1  ;;  %v3727_v20 = vpop.f32.mrb[91].mxu0  ;;  %v14750_v13 = vld [vmem:[#allocation123_spill] sm:$0xff] }
 0x4e9   :  { %v4028_v27 = vsel %vm3931_vm2, %v4025_v16, %v4027_v12  ;;  %v3358_v55 = vadd.f32 %v3357_v30, %v14745_v0  ;;  %v4029_v10 = vrot.slane %v3727_v20, 2  ;;  %v14751_v20 = vld [vmem:[#allocation131_spill] sm:$0xff] }
 0x4ea   :  { %v12846_v5 = vadd.f32 %v4028_v27, %v3334_v22  ;;  %v4034_v3 = vsel %vm3931_vm2, %v4031_v14, %v4033_v44  ;;  %9098 = vmatmul.mubr.msk.bf16.gmra.mrb[196].mxu0 %vm2292_vm0, %v14738_v19 }
 0x4eb   :  { %v12851_v61 = vadd.f32 %v4034_v3, %v3347_v25  ;;  %v4030_v46 = vsel %vm3931_vm2, %v4027_v12, %v4029_v10  ;;  %v4032_v35 = vsel %vm3931_vm2, %v4029_v10, %v4031_v14  ;;  %v14753_v10 = vld [vmem:[#allocation133_spill] sm:$0xff] }
 0x4ec   :  { %14746 = vst [vmem:[#allocation36_spill] sm:$0xff] %v12846_v5  ;;  %v12855_v40 = vadd.f32 %v4030_v46, %v3339_v41  ;;  %v12857_v58 = vadd.f32 %v4032_v35, %v3342_v24 }
 0x4ed   :  { %14747 = vst [vmem:[#allocation70_spill] sm:$0xff] %v12851_v61  ;;  %v8815_v16 = vpop.f32.mrb[96].mxu1  ;;  %v8899_v62 = vpop.f32.mrb[92].mxu0  ;;  %v14752_v61 = vld [vmem:[#allocation135_spill] sm:$0xff] }
 0x4ee   :  { %14748 = vst [vmem:[#allocation35_spill] sm:$0xff] %v12855_v40  ;;  %14749 = vst [vmem:[#allocation101_spill] sm:$0xff] %v12857_v58  ;;  %v3379_v22 = vadd.f32 %v8815_v16, %v14750_v13  ;;  %v3370_v18 = vpop.f32.mrb[97].mxu1  ;;  %v3740_v30 = vpop.f32.mrb[93].mxu0  ;;  %v4039_v3 = vrot.slane %v8899_v62, 2 }
 0x4ef   :  { %v3371_v27 = vadd.f32 %v3370_v18, %v14751_v20  ;;  %v4035_v0 = vrot.slane %v3740_v30, 2  ;;  %v8816_v19 = vpop.f32.mrb[98].mxu1  ;;  %v8900_v25 = vpop.f32.mrb[94].mxu0 }
 0x4f0   :  { %v3382_v12 = vadd.f32 %v8816_v19, %v14752_v61  ;;  %v4041_v5 = vrot.slane %v8900_v25, 2  ;;  %v3373_v14 = vpop.f32.mrb[99].mxu1  ;;  %v3743_v41 = vpop.f32.mrb[95].mxu0 }
 0x4f1   :  { %v4036_v24 = vsel %vm3931_vm2, %v4033_v44, %v4035_v0  ;;  %v3374_v46 = vadd.f32 %v3373_v14, %v14753_v10  ;;  %v4037_v35 = vrot.slane %v3743_v41, 2  ;;  %v14758_v44 = vld [vmem:[#allocation141_spill] sm:$0xff] }
 0x4f2   :  { %v12864_v58 = vadd.f32 %v4036_v24, %v3350_v23  ;;  %v4042_v16 = vsel %vm3931_vm2, %v4039_v3, %v4041_v5  ;;  %v14759_v23 = vld [vmem:[#allocation24_spill] sm:$0xff] }
 0x4f3   :  { %v12867_v13 = vadd.f32 %v4042_v16, %v3363_v2  ;;  %v4038_v18 = vsel %vm3931_vm2, %v4035_v0, %v4037_v35  ;;  %v4040_v62 = vsel %vm3931_vm2, %v4037_v35, %v4039_v3  ;;  %v14761_v35 = vld [vmem:[#allocation3_spill] sm:$0xff] }
 0x4f4   :  { %14754 = vst [vmem:[#allocation38_spill] sm:$0xff] %v12864_v58  ;;  %v12871_v30 = vadd.f32 %v4038_v18, %v3355_v53  ;;  %v12873_v61 = vadd.f32 %v4040_v62, %v3358_v55 }
 0x4f5   :  { %14755 = vst [vmem:[#allocation149_spill] sm:$0xff] %v12867_v13  ;;  %v8819_v20 = vpop.f32.mrb[100].mxu1  ;;  %v8903_v19 = vpop.f32.mrb[96].mxu0  ;;  %v14760_v13 = vld [vmem:[#allocation27_spill] sm:$0xff] }
 0x4f6   :  { %14756 = vst [vmem:[#allocation37_spill] sm:$0xff] %v12871_v30  ;;  %14757 = vst [vmem:[#allocation103_spill] sm:$0xff] %v12873_v61  ;;  %v3395_v25 = vadd.f32 %v8819_v20, %v14758_v44  ;;  %v3386_v14 = vpop.f32.mrb[101].mxu1  ;;  %v3756_v41 = vpop.f32.mrb[97].mxu0  ;;  %v4047_v16 = vrot.slane %v8903_v19, 2 }
 0x4f7   :  { %v3387_v24 = vadd.f32 %v3386_v14, %v14759_v23  ;;  %v4043_v10 = vrot.slane %v3756_v41, 2  ;;  %v8820_v58 = vpop.f32.mrb[102].mxu1  ;;  %v8904_v2 = vpop.f32.mrb[98].mxu0 }
 0x4f8   :  { %v3398_v0 = vadd.f32 %v8820_v58, %v14760_v13  ;;  %v4049_v40 = vrot.slane %v8904_v2, 2  ;;  %v3389_v3 = vpop.f32.mrb[103].mxu1  ;;  %v3759_v53 = vpop.f32.mrb[99].mxu0 }
 0x4f9   :  { %v4044_v55 = vsel %vm3931_vm2, %v4041_v5, %v4043_v10  ;;  %v3390_v18 = vadd.f32 %v3389_v3, %v14761_v35  ;;  %v4045_v62 = vrot.slane %v3759_v53, 2  ;;  %v14766_v5 = vld [vmem:[#allocation9_spill] sm:$0xff] }
 0x4fa   :  { %v12880_v61 = vadd.f32 %v4044_v55, %v3366_v7  ;;  %v4050_v20 = vsel %vm3931_vm2, %v4047_v16, %v4049_v40  ;;  %v14767_v7 = vld [vmem:[#allocation30_spill] sm:$0xff] }
 0x4fb   :  { %v12883_v44 = vadd.f32 %v4050_v20, %v3379_v22  ;;  %v4046_v14 = vsel %vm3931_vm2, %v4043_v10, %v4045_v62  ;;  %v4048_v19 = vsel %vm3931_vm2, %v4045_v62, %v4047_v16  ;;  %v14769_v62 = vld [vmem:[#allocation152_spill] sm:$0xff] }
 0x4fc   :  { %14762 = vst [vmem:[#allocation73_spill] sm:$0xff] %v12880_v61  ;;  %v12887_v41 = vadd.f32 %v4046_v14, %v3371_v27  ;;  %v12889_v58 = vadd.f32 %v4048_v19, %v3374_v46 }
 0x4fd   :  { %14763 = vst [vmem:[#allocation72_spill] sm:$0xff] %v12883_v44  ;;  %v8823_v13 = vpop.f32.mrb[104].mxu1  ;;  %v8907_v23 = vpop.f32.mrb[100].mxu0  ;;  %v14768_v44 = vld [vmem:[#allocation95_spill] sm:$0xff] }
 0x4fe   :  { %14764 = vst [vmem:[#allocation105_spill] sm:$0xff] %v12887_v41  ;;  %14765 = vst [vmem:[#allocation150_spill] sm:$0xff] %v12889_v58  ;;  %v3411_v2 = vadd.f32 %v8823_v13, %v14766_v5  ;;  %v3402_v3 = vpop.f32.mrb[105].mxu1  ;;  %v3772_v53 = vpop.f32.mrb[101].mxu0  ;;  %v4055_v20 = vrot.slane %v8907_v23, 2 }
 0x4ff   :  { %v3403_v55 = vadd.f32 %v3402_v3, %v14767_v7  ;;  %v4051_v35 = vrot.slane %v3772_v53, 2  ;;  %v8824_v61 = vpop.f32.mrb[106].mxu1  ;;  %v8908_v22 = vpop.f32.mrb[102].mxu0 }
 0x500   :  { %v3414_v10 = vadd.f32 %v8824_v61, %v14768_v44  ;;  %v4057_v30 = vrot.slane %v8908_v22, 2  ;;  %v3405_v16 = vpop.f32.mrb[107].mxu1  ;;  %v3775_v27 = vpop.f32.mrb[103].mxu0 }
 0x501   :  { %v4052_v46 = vsel %vm3931_vm2, %v4049_v40, %v4051_v35  ;;  %v3406_v14 = vadd.f32 %v3405_v16, %v14769_v62  ;;  %v4053_v19 = vrot.slane %v3775_v27, 2  ;;  %v14774_v40 = vld [vmem:[#allocation96_spill] sm:$0xff] }
 0x502   :  { %v12896_v58 = vadd.f32 %v4052_v46, %v3382_v12  ;;  %v4058_v13 = vsel %vm3931_vm2, %v4055_v20, %v4057_v30  ;;  %v14775_v12 = vld [vmem:[#allocation147_spill] sm:$0xff] }
 0x503   :  { %v12899_v5 = vadd.f32 %v4058_v13, %v3395_v25  ;;  %v4054_v3 = vsel %vm3931_vm2, %v4051_v35, %v4053_v19  ;;  %v4056_v23 = vsel %vm3931_vm2, %v4053_v19, %v4055_v20  ;;  %v14777_v19 = vld [vmem:[#allocation12_spill] sm:$0xff] }
 0x504   :  { %14770 = vst [vmem:[#allocation75_spill] sm:$0xff] %v12896_v58  ;;  %v12903_v53 = vadd.f32 %v4054_v3, %v3387_v24  ;;  %v12905_v61 = vadd.f32 %v4056_v23, %v3390_v18 }
 0x505   :  { %14771 = vst [vmem:[#allocation40_spill] sm:$0xff] %v12899_v5  ;;  %v8827_v44 = vpop.f32.mrb[108].mxu1  ;;  %v8911_v7 = vpop.f32.mrb[104].mxu0  ;;  %v14776_v5 = vld [vmem:[#allocation8_spill] sm:$0xff] }
 0x506   :  { %14772 = vst [vmem:[#allocation74_spill] sm:$0xff] %v12903_v53  ;;  %14773 = vst [vmem:[#allocation41_spill] sm:$0xff] %v12905_v61  ;;  %v3427_v22 = vadd.f32 %v8827_v44, %v14774_v40  ;;  %v3418_v16 = vpop.f32.mrb[109].mxu1  ;;  %v3788_v27 = vpop.f32.mrb[105].mxu0  ;;  %v4063_v13 = vrot.slane %v8911_v7, 2 }
 0x507   :  { %v3419_v46 = vadd.f32 %v3418_v16, %v14775_v12  ;;  %v4059_v62 = vrot.slane %v3788_v27, 2  ;;  %v8828_v58 = vpop.f32.mrb[110].mxu1  ;;  %v8912_v25 = vpop.f32.mrb[106].mxu0 }
 0x508   :  { %v3430_v35 = vadd.f32 %v8828_v58, %v14776_v5  ;;  %v4065_v41 = vrot.slane %v8912_v25, 2  ;;  %v3421_v20 = vpop.f32.mrb[111].mxu1  ;;  %v3791_v24 = vpop.f32.mrb[107].mxu0 }
 0x509   :  { %v4060_v18 = vsel %vm3931_vm2, %v4057_v30, %v4059_v62  ;;  %v3422_v3 = vadd.f32 %v3421_v20, %v14777_v19  ;;  %v4061_v23 = vrot.slane %v3791_v24, 2  ;;  %v14782_v30 = vld [vmem:[#allocation10_spill] sm:$0xff] }
 0x50a   :  { %v12912_v61 = vadd.f32 %v4060_v18, %v3398_v0  ;;  %v4066_v44 = vsel %vm3931_vm2, %v4063_v13, %v4065_v41  ;;  %v14783_v0 = vld [vmem:[#allocation16_spill] sm:$0xff] }
 0x50b   :  { %v12915_v40 = vadd.f32 %v4066_v44, %v3411_v2  ;;  %v4062_v16 = vsel %vm3931_vm2, %v4059_v62, %v4061_v23  ;;  %v4064_v7 = vsel %vm3931_vm2, %v4061_v23, %v4063_v13  ;;  %v14785_v23 = vld [vmem:[#allocation138_spill] sm:$0xff] }
 0x50c   :  { %14778 = vst [vmem:[#allocation39_spill] sm:$0xff] %v12912_v61  ;;  %v12919_v27 = vadd.f32 %v4062_v16, %v3403_v55  ;;  %v12921_v58 = vadd.f32 %v4064_v7, %v3406_v14 }
 0x50d   :  { %14779 = vst [vmem:[#allocation4_spill] sm:$0xff] %v12915_v40  ;;  %v8831_v5 = vpop.f32.mrb[112].mxu1  ;;  %v8915_v12 = vpop.f32.mrb[108].mxu0  ;;  %v14784_v40 = vld [vmem:[#allocation154_spill] sm:$0xff] }
 0x50e   :  { %14780 = vst [vmem:[#allocation151_spill] sm:$0xff] %v12919_v27  ;;  %14781 = vst [vmem:[#allocation5_spill] sm:$0xff] %v12921_v58  ;;  %v3443_v25 = vadd.f32 %v8831_v5, %v14782_v30  ;;  %v3434_v20 = vpop.f32.mrb[113].mxu1  ;;  %v3804_v24 = vpop.f32.mrb[109].mxu0  ;;  %v4071_v44 = vrot.slane %v8915_v12, 2 }
 0x50f   :  { %v3435_v18 = vadd.f32 %v3434_v20, %v14783_v0  ;;  %v4067_v19 = vrot.slane %v3804_v24, 2  ;;  %v8832_v61 = vpop.f32.mrb[114].mxu1  ;;  %v8916_v2 = vpop.f32.mrb[110].mxu0 }
 0x510   :  { %v3446_v62 = vadd.f32 %v8832_v61, %v14784_v40  ;;  %v4073_v53 = vrot.slane %v8916_v2, 2  ;;  %v3437_v13 = vpop.f32.mrb[115].mxu1  ;;  %v3807_v55 = vpop.f32.mrb[111].mxu0 }
 0x511   :  { %v4068_v14 = vsel %vm3931_vm2, %v4065_v41, %v4067_v19  ;;  %v3438_v16 = vadd.f32 %v3437_v13, %v14785_v23  ;;  %v4069_v7 = vrot.slane %v3807_v55, 2  ;;  %v14790_v41 = vld [vmem:[#allocation140_spill] sm:$0xff] }
 0x512   :  { %v12928_v58 = vadd.f32 %v4068_v14, %v3414_v10  ;;  %v4074_v5 = vsel %vm3931_vm2, %v4071_v44, %v4073_v53  ;;  %v14791_v10 = vld [vmem:[#allocation142_spill] sm:$0xff] }
 0x513   :  { %v12931_v30 = vadd.f32 %v4074_v5, %v3427_v22  ;;  %v4070_v20 = vsel %vm3931_vm2, %v4067_v19, %v4069_v7  ;;  %v4072_v12 = vsel %vm3931_vm2, %v4069_v7, %v4071_v44  ;;  %v14794_v5 = vld [vmem:[#allocation25_spill] sm:$0xff] }
 0x514   :  { %14786 = vst [vmem:[#allocation153_spill] sm:$0xff] %v12928_v58  ;;  %v12935_v24 = vadd.f32 %v4070_v20, %v3419_v46  ;;  %v12937_v61 = vadd.f32 %v4072_v12, %v3422_v3  ;;  %v14792_v58 = vld [vmem:[#allocation89_spill] sm:$0xff] }
 0x515   :  { %14787 = vst [vmem:[#allocation42_spill] sm:$0xff] %v12931_v30  ;;  %v8835_v40 = vpop.f32.mrb[116].mxu1  ;;  %v8919_v0 = vpop.f32.mrb[112].mxu0  ;;  %v14793_v22 = vrot.slane %v14792_v58, 1  ;;  %v14795_v30 = vrot.slane %v14794_v5, 1 }
 0x516   :  { %14788 = vst [vmem:[#allocation157_spill] sm:$0xff] %v12935_v24  ;;  %14789 = vst [vmem:[#allocation76_spill] sm:$0xff] %v12937_v61  ;;  %v3459_v2 = vadd.f32 %v8835_v40, %v14790_v41  ;;  %v3450_v13 = vpop.f32.mrb[117].mxu1  ;;  %v3820_v55 = vpop.f32.mrb[113].mxu0  ;;  %v4079_v7 = vrot.slane %v8919_v0, 2  ;;  %v14796_v41 = vld [vmem:[#allocation56_spill] sm:$0xff] }
 0x517   :  { %v3451_v14 = vadd.f32 %v3450_v13, %v14791_v10  ;;  %v4075_v23 = vrot.slane %v3820_v55, 2  ;;  %v3087_v19 = vsel %vm2846_vm1, %v14795_v30, %v14793_v22  ;;  %v8836_v44 = vpop.f32.mrb[118].mxu1  ;;  %v8920_v46 = vpop.f32.mrb[114].mxu0 }
 0x518   :  { %v3462_v3 = vadd.f32 %v8836_v44, %v3087_v19  ;;  %v4081_v20 = vrot.slane %v8920_v46, 2  ;;  %v3453_v12 = vpop.f32.mrb[119].mxu1  ;;  %v3823_v61 = vpop.f32.mrb[115].mxu0 }
 0x519   :  { %v4076_v40 = vsel %vm3931_vm2, %v4073_v53, %v4075_v23  ;;  %v3454_v24 = vadd.f32 %v3453_v12, %v14796_v41  ;;  %v4077_v27 = vrot.slane %v3823_v61, 2 }
 0x51a   :  { %v12948_v13 = vadd.f32 %v4076_v40, %v3430_v35  ;;  %v4082_v58 = vsel %vm3931_vm2, %v4079_v7, %v4081_v20 }
 0x51b   :  { %v12951_v55 = vadd.f32 %v4082_v58, %v3443_v25  ;;  %v4078_v30 = vsel %vm3931_vm2, %v4075_v23, %v4077_v27  ;;  %v4080_v10 = vsel %vm3931_vm2, %v4077_v27, %v4079_v7 }
 0x51c   :  { %14797 = vst [vmem:[#allocation77_spill] sm:$0xff] %v12948_v13  ;;  %v12955_v0 = vadd.f32 %v4078_v30, %v3435_v18  ;;  %v12957_v22 = vadd.f32 %v4080_v10, %v3438_v16 }
 0x51d   :  { %14798 = vst [vmem:[#allocation14_spill] sm:$0xff] %v12951_v55  ;;  %v8923_v5 = vpop.f32.mrb[116].mxu0  ;;  %v8935_v19 = vpop.f32.mrb[120].mxu1 }
 0x51e   :  { %14799 = vst [vmem:[#allocation11_spill] sm:$0xff] %v12955_v0  ;;  %14800 = vst [vmem:[#allocation43_spill] sm:$0xff] %v12957_v22  ;;  %v3836_v53 = vpop.f32.mrb[117].mxu0  ;;  %v12959_v44 = vpop.f32.mrb[121].mxu1  ;;  %v4087_v12 = vrot.slane %v8923_v5, 2  ;;  %v4723_v25 = vrot.slane %v8935_v19, 3 }
 0x51f   :  { %14801 = vst [vmem:[#allocation44_spill] sm:$0xff] %v12959_v44  ;;  %v4083_v61 = vrot.slane %v3836_v53, 2  ;;  %v8924_v35 = vpop.f32.mrb[118].mxu0  ;;  %v8936_v46 = vpop.f32.mrb[122].mxu1  ;;  %v14803_v53 = vld [vmem:[#allocation28_spill] sm:$0xff] }
 0x520   :  { %v4089_v40 = vrot.slane %v8924_v35, 2  ;;  %v4725_v41 = vrot.slane %v8936_v46, 3  ;;  %v3839_v23 = vpop.f32.mrb[119].mxu0  ;;  %v4323_v58 = vpop.f32.mrb[123].mxu1  ;;  %v14804_v22 = vrot.slane %v14803_v53, 2  ;;  %v14807_v46 = vld [vmem:[#allocation59_spill] sm:$0xff] }
 0x521   :  { %v4084_v27 = vsel %vm3931_vm2, %v4081_v20, %v4083_v61  ;;  %v4085_v16 = vrot.slane %v3839_v23, 2  ;;  %v4721_v7 = vrot.slane %v4323_v58, 3  ;;  %v14809_v58 = vrot.slane %v12959_v44, 3 }
 0x522   :  { %v12963_v30 = vadd.f32 %v4084_v27, %v3446_v62  ;;  %v4090_v10 = vsel %vm3931_vm2, %v4087_v12, %v4089_v40  ;;  %v4172_v0 = vsel %vm3931_vm2, %v4089_v40, %v14804_v22  ;;  %v4726_v5 = vsel %vm4719_vm3, %v4723_v25, %v4725_v41 }
 0x523   :  { %v12970_v19 = vadd.f32 %v4090_v10, %v3459_v2  ;;  %v12972_v35 = vadd.f32 %v4172_v0, %v3462_v3  ;;  %v4963_v20 = vadd.f32 %v4726_v5, %v14807_v46  ;;  %v4086_v18 = vsel %vm3931_vm2, %v4083_v61, %v4085_v16  ;;  %v14811_v2 = vld [vmem:[#allocation98_spill] sm:$0xff]  ;;  %v14812_v3 = vld [vmem:[#allocation144_spill] sm:$0xff] }
 0x524   :  { %14802 = vst [vmem:[#allocation79_spill] sm:$0xff] %v12963_v30  ;;  %v4088_v23 = vsel %vm3931_vm2, %v4085_v16, %v4087_v12  ;;  %v12977_v62 = vadd.f32 %v4086_v18, %v3451_v14  ;;  %v4722_v27 = vsel %vm4719_vm3, %v14809_v58, %v4721_v7  ;;  %v4724_v22 = vsel %vm4719_vm3, %v4721_v7, %v4723_v25 }
 0x525   :  { %14805 = vst [vmem:[#allocation46_spill] sm:$0xff] %v12970_v19  ;;  %14806 = vst [vmem:[#allocation109_spill] sm:$0xff] %v12972_v35  ;;  %v12983_v40 = vadd.f32 %v4088_v23, %v3454_v24  ;;  %v4961_v10 = vadd.f32 %v4722_v27, %v14811_v2  ;;  %v4962_v0 = vadd.f32 %v4724_v22, %v14812_v3  ;;  %v8939_v53 = vpop.f32.mrb[124].mxu1  ;;  %v9023_v5 = vpop.f32.mrb[120].mxu0 }
 0x526   :  { %14808 = vst [vmem:[#allocation45_spill] sm:$0xff] %v12977_v62  ;;  %v4336_v46 = vpop.f32.mrb[125].mxu1  ;;  %v12987_v61 = vpop.f32.mrb[121].mxu0  ;;  %v4731_v16 = vrot.slane %v8939_v53, 3  ;;  %v5511_v62 = vrot.slane %v9023_v5, 4 }
 0x527   :  { %14810 = vst [vmem:[#allocation78_spill] sm:$0xff] %v12983_v40  ;;  %14813 = vst [vmem:[#allocation13_spill] sm:$0xff] %v12987_v61  ;;  %v4727_v12 = vrot.slane %v4336_v46, 3  ;;  %v8940_v14 = vpop.f32.mrb[126].mxu1  ;;  %v9024_v18 = vpop.f32.mrb[122].mxu0  ;;  %v14183_v2 = vrot.slane %v12987_v61, 4 }
 0x528   :  { %v4733_v58 = vrot.slane %v8940_v14, 3  ;;  %v5513_v35 = vrot.slane %v9024_v18, 4  ;;  %v4339_v25 = vpop.f32.mrb[127].mxu1  ;;  %v5111_v24 = vpop.f32.mrb[123].mxu0  ;;  %v14814_v40 = vld [vmem:[#allocation29_spill] sm:$0xff] }
 0x529   :  { %v4728_v7 = vsel %vm4719_vm3, %v4725_v41, %v4727_v12  ;;  %v4729_v23 = vrot.slane %v4339_v25, 3  ;;  %v5509_v27 = vrot.slane %v5111_v24, 4  ;;  %v12998_v5 = vld [vmem:[%s14099_s4] ss:$0 sm:$0xff]  ;;  %v14815_v18 = vld [vmem:[#allocation17_spill] sm:$0xff] }
 0x52a   :  { %v4964_v22 = vadd.f32 %v4728_v7, %v12552_v6  ;;  %v4734_v3 = vsel %vm4719_vm3, %v4731_v16, %v4733_v58  ;;  %v5514_v46 = vsel %vm5507_vm4, %v5511_v62, %v5513_v35  ;;  %v14816_v25 = vld [vmem:[#allocation146_spill] sm:$0xff] }
 0x52b   :  { %v4967_v19 = vadd.f32 %v4734_v3, %v14814_v40  ;;  %v5751_v53 = vadd.f32 %v5514_v46, %v4963_v20  ;;  %v4730_v41 = vsel %vm4719_vm3, %v4727_v12, %v4729_v23  ;;  %v4732_v14 = vsel %vm4719_vm3, %v4729_v23, %v4731_v16 }
 0x52c   :  { %v4965_v6 = vadd.f32 %v4730_v41, %v14815_v18  ;;  %v4966_v24 = vadd.f32 %v4732_v14, %v14816_v25  ;;  %v5510_v7 = vsel %vm5507_vm4, %v14183_v2, %v5509_v27  ;;  %v5512_v40 = vsel %vm5507_vm4, %v5509_v27, %v5511_v62 }
 0x52d   :  { %v5749_v20 = vadd.f32 %v5510_v7, %v4961_v10  ;;  %v5750_v3 = vadd.f32 %v5512_v40, %v4962_v0  ;;  %v8943_v46 = vpop.f32.mrb[128].mxu1  ;;  %v9027_v30 = vpop.f32.mrb[124].mxu0  ;;  %v5838_v44 = vadd.f32 %v12998_v5, %v5751_v53 }
 0x52e   :  { %v4352_v55 = vpop.f32.mrb[129].mxu1  ;;  %v5124_v12 = vpop.f32.mrb[125].mxu0  ;;  %v4739_v41 = vrot.slane %v8943_v46, 3  ;;  %v5519_v61 = vrot.slane %v9027_v30, 4 }
 0x52f   :  { %v5836_v16 = vadd.f32 %v12998_v5, %v5749_v20  ;;  %v5837_v23 = vadd.f32 %v12998_v5, %v5750_v3  ;;  %v4735_v14 = vrot.slane %v4352_v55, 3  ;;  %v8944_v18 = vpop.f32.mrb[130].mxu1  ;;  %v9028_v25 = vpop.f32.mrb[126].mxu0  ;;  %v5515_v2 = vrot.slane %v5124_v12, 4 }
 0x530   :  { %v4741_v13 = vrot.slane %v8944_v18, 3  ;;  %v5521_v62 = vrot.slane %v9028_v25, 4  ;;  %v4355_v10 = vpop.f32.mrb[131].mxu1  ;;  %v5127_v0 = vpop.f32.mrb[127].mxu0 }
 0x531   :  { %v5916_v27 = vmax.f32 %v5836_v16, 0.0  ;;  %v5917_v7 = vmax.f32 %v5837_v23, 0.0  ;;  %v4736_v53 = vsel %vm4719_vm3, %v4733_v58, %v4735_v14  ;;  %v4737_v40 = vrot.slane %v4355_v10, 3  ;;  %v14817_v10 = vld [vmem:[#allocation32_spill] sm:$0xff] }
 0x532   :  { %v4968_v56 = vadd.f32 %v4736_v53, %v12585_v43  ;;  %v5516_v20 = vsel %vm5507_vm4, %v5513_v35, %v5515_v2  ;;  %v4742_v3 = vsel %vm4719_vm3, %v4739_v41, %v4741_v13  ;;  %v5522_v55 = vsel %vm5507_vm4, %v5519_v61, %v5521_v62 }
 0x533   :  { %v5752_v46 = vadd.f32 %v5516_v20, %v4964_v22  ;;  %v4971_v30 = vadd.f32 %v4742_v3, %v12592_v26  ;;  %v5755_v12 = vadd.f32 %v5522_v55, %v4967_v19  ;;  %v4738_v18 = vsel %vm4719_vm3, %v4735_v14, %v4737_v40 }
 0x534   :  { %v4740_v16 = vsel %vm4719_vm3, %v4737_v40, %v4739_v41  ;;  %v13020_v23 = vadd.f32 %v4738_v18, %v12600_v28  ;;  %v5517_v58 = vrot.slane %v5127_v0, 4  ;;  %v5996_v25 = vpack.c.bf16 %v5917_v7, %v5916_v27 }
 0x535   :  { %v5918_v43 = vmax.f32 %v5838_v44, 0.0  ;;  %v5839_v35 = vadd.f32 %v12998_v5, %v5752_v46  ;;  %v4970_v53 = vadd.f32 %v4740_v16, %v14817_v10  ;;  %v8947_v48 = vpop.f32.mrb[132].mxu1  ;;  %v9031_v32 = vpop.f32.mrb[128].mxu0  ;;  %v13025_v22 = vadd.f32 %v12998_v5, %v5755_v12 }
 0x536   :  { %v5518_v26 = vsel %vm5507_vm4, %v5515_v2, %v5517_v58  ;;  %v5520_v19 = vsel %vm5507_vm4, %v5517_v58, %v5519_v61  ;;  %9109 = vmatprep.mubr.msk.bf16.mxu1 %vm2292_vm0, %v5996_v25  ;;  %9197 = vmatprep.mubr.msk.bf16.mxu0 %vm2292_vm0, %v5996_v25  ;;  %v4747_v28 = vrot.slane %v8947_v48, 3  ;;  %v4368_v41 = vpop.f32.mrb[133].mxu1  ;;  %v5140_v44 = vpop.f32.mrb[129].mxu0  ;;  %v5527_v7 = vrot.slane %v9031_v32, 4 }
 0x537   :  { %v5919_v14 = vmax.f32 %v5839_v35, 0.0  ;;  %v5753_v0 = vadd.f32 %v5518_v26, %v4965_v6  ;;  %v5754_v27 = vadd.f32 %v5520_v19, %v4966_v24  ;;  %v8948_v40 = vpop.f32.mrb[134].mxu1  ;;  %v9032_v20 = vpop.f32.mrb[130].mxu0  ;;  %v4743_v3 = vrot.slane %v4368_v41, 3 }
 0x538   :  { %v5523_v55 = vrot.slane %v5140_v44, 4  ;;  %v4749_v46 = vrot.slane %v8948_v40, 3  ;;  %v5529_v12 = vrot.slane %v9032_v20, 4  ;;  %v4371_v2 = vpop.f32.mrb[135].mxu1  ;;  %v5143_v18 = vpop.f32.mrb[131].mxu0  ;;  %v5922_v20 = vmax.f32 %v13025_v22, 0.0 }
 0x539   :  { %v5997_v61 = vpack.c.bf16 %v5919_v14, %v5918_v43  ;;  %v5840_v16 = vadd.f32 %v12998_v5, %v5753_v0  ;;  %v5841_v58 = vadd.f32 %v12998_v5, %v5754_v27  ;;  %v4745_v48 = vrot.slane %v4371_v2, 3  ;;  %v14818_v0 = vld [vmem:[#allocation33_spill] sm:$0xff] }
 0x53a   :  { %v4744_v25 = vsel %vm4719_vm3, %v4741_v13, %v4743_v3  ;;  %v5524_v6 = vsel %vm5507_vm4, %v5521_v62, %v5523_v55  ;;  %v4750_v32 = vsel %vm4719_vm3, %v4747_v28, %v4749_v46  ;;  %v5530_v24 = vsel %vm5507_vm4, %v5527_v7, %v5529_v12 }
 0x53b   :  { %v5920_v35 = vmax.f32 %v5840_v16, 0.0  ;;  %v5921_v10 = vmax.f32 %v5841_v58, 0.0  ;;  %v4972_v26 = vadd.f32 %v4744_v25, %v12612_v60  ;;  %v5756_v19 = vadd.f32 %v5524_v6, %v4968_v56  ;;  %9110 = vmatmul.mubr.msk.bf16.vlgmr.msra.gmra.mrb[200].mxu1 %vm2292_vm0, %v5997_v61  ;;  %9198 = vmatmul.mubr.msk.bf16.vlgmr.msra.gmra.mrb[200].mxu0 %vm2292_vm0, %v5997_v61 }
 0x53c   :  { %v4975_v43 = vadd.f32 %v4750_v32, %v12619_v9  ;;  %v5759_v41 = vadd.f32 %v5530_v24, %v4971_v30  ;;  %v4746_v13 = vsel %vm4719_vm3, %v4743_v3, %v4745_v48  ;;  %v4748_v62 = vsel %vm4719_vm3, %v4745_v48, %v4747_v28 }
 0x53d   :  { %v5843_v44 = vadd.f32 %v12998_v5, %v5756_v19  ;;  %v4973_v14 = vadd.f32 %v4746_v13, %v12627_v8  ;;  %v4974_v27 = vadd.f32 %v4748_v62, %v14818_v0  ;;  %v5525_v40 = vrot.slane %v5143_v18, 4  ;;  %v8951_v60 = vpop.f32.mrb[136].mxu1  ;;  %v9035_v56 = vpop.f32.mrb[132].mxu0 }
 0x53e   :  { %v13048_v2 = vadd.f32 %v12998_v5, %v5759_v41  ;;  %v5998_v9 = vpack.c.bf16 %v5921_v10, %v5920_v35  ;;  %v4755_v30 = vrot.slane %v8951_v60, 3  ;;  %v4384_v61 = vpop.f32.mrb[137].mxu1  ;;  %v5156_v3 = vpop.f32.mrb[133].mxu0  ;;  %v5535_v58 = vrot.slane %v9035_v56, 4 }
 0x53f   :  { %v5526_v28 = vsel %vm5507_vm4, %v5523_v55, %v5525_v40  ;;  %v5528_v16 = vsel %vm5507_vm4, %v5525_v40, %v5527_v7  ;;  %v4751_v8 = vrot.slane %v4384_v61, 3  ;;  %v13052_v48 = vpop.f32.mrb[138].mxu1  ;;  %v13054_v18 = vpop.f32.mrb[134].mxu0  ;;  %v5923_v25 = vmax.f32 %v5843_v44, 0.0 }
 0x540   :  { %v5757_v22 = vadd.f32 %v5526_v28, %v13020_v23  ;;  %v5758_v6 = vadd.f32 %v5528_v16, %v4970_v53  ;;  %9113 = vmatprep.mubr.msk.bf16.mxu1 %vm2292_vm0, %v5998_v9  ;;  %9201 = vmatprep.mubr.msk.bf16.mxu0 %vm2292_vm0, %v5998_v9  ;;  %v5531_v32 = vrot.slane %v5156_v3, 4  ;;  %v4387_v24 = vpop.f32.mrb[139].mxu1  ;;  %v5159_v35 = vpop.f32.mrb[135].mxu0  ;;  %v4757_v7 = vrot.slane %v13052_v48, 3 }
 0x541   :  { %v4752_v55 = vsel %vm4719_vm3, %v4749_v46, %v4751_v8  ;;  %v5537_v10 = vrot.slane %v13054_v18, 4  ;;  %v4753_v19 = vrot.slane %v4387_v24, 3  ;;  %v5533_v28 = vrot.slane %v5159_v35, 4 }
 0x542   :  { %v5844_v41 = vadd.f32 %v12998_v5, %v5757_v22  ;;  %v5845_v13 = vadd.f32 %v12998_v5, %v5758_v6  ;;  %v4976_v23 = vadd.f32 %v4752_v55, %v12639_v34  ;;  %v5532_v53 = vsel %vm5507_vm4, %v5529_v12, %v5531_v32 }
 0x543   :  { %v5760_v62 = vadd.f32 %v5532_v53, %v4972_v26  ;;  %v4758_v44 = vsel %vm4719_vm3, %v4755_v30, %v4757_v7  ;;  %v5538_v0 = vsel %vm5507_vm4, %v5535_v58, %v5537_v10  ;;  %v4754_v46 = vsel %vm4719_vm3, %v4751_v8, %v4753_v19 }
 0x544   :  { %v5924_v40 = vmax.f32 %v5844_v41, 0.0  ;;  %v5925_v60 = vmax.f32 %v5845_v13, 0.0  ;;  %v4979_v56 = vadd.f32 %v4758_v44, %v12646_v51  ;;  %v5763_v9 = vadd.f32 %v5538_v0, %v4975_v43 }
 0x545   :  { %v5847_v61 = vadd.f32 %v12998_v5, %v5760_v62  ;;  %v4756_v3 = vsel %vm4719_vm3, %v4753_v19, %v4755_v30  ;;  %v4977_v34 = vadd.f32 %v4754_v46, %v12654_v52  ;;  %v8955_v12 = vpop.f32.mrb[140].mxu1  ;;  %v9039_v26 = vpop.f32.mrb[136].mxu0  ;;  %v5926_v16 = vmax.f32 %v13048_v2, 0.0 }
 0x546   :  { %v4978_v48 = vadd.f32 %v4756_v3, %v12656_v50  ;;  %v5999_v18 = vpack.c.bf16 %v5923_v25, %v5922_v20  ;;  %v6000_v8 = vpack.c.bf16 %v5925_v60, %v5924_v40  ;;  %v4400_v22 = vpop.f32.mrb[141].mxu1  ;;  %v5172_v6 = vpop.f32.mrb[137].mxu0  ;;  %v13076_v51 = vadd.f32 %v12998_v5, %v5763_v9 }
 0x547   :  { %v5927_v24 = vmax.f32 %v5847_v61, 0.0  ;;  %v5534_v43 = vsel %vm5507_vm4, %v5531_v32, %v5533_v28  ;;  %v5536_v30 = vsel %vm5507_vm4, %v5533_v28, %v5535_v58  ;;  %v13080_v52 = vpop.f32.mrb[142].mxu1  ;;  %v13082_v35 = vpop.f32.mrb[138].mxu0  ;;  %v4763_v50 = vrot.slane %v8955_v12, 3 }
 0x548   :  { %v5761_v55 = vadd.f32 %v5534_v43, %v4973_v14  ;;  %v5762_v2 = vadd.f32 %v5536_v30, %v4974_v27  ;;  %9114 = vmatmul.mubr.msk.bf16.gmra.mrb[204].mxu1 %vm2292_vm0, %v5999_v18  ;;  %9202 = vmatmul.mubr.msk.bf16.gmra.mrb[204].mxu0 %vm2292_vm0, %v5999_v18  ;;  %v5543_v20 = vrot.slane %v9039_v26, 4  ;;  %v4403_v25 = vpop.f32.mrb[143].mxu1  ;;  %v5175_v19 = vpop.f32.mrb[139].mxu0  ;;  %v4759_v32 = vrot.slane %v4400_v22, 3 }
 0x549   :  { %9117 = vmatprep.mubr.msk.bf16.mxu1 %vm2292_vm0, %v6000_v8  ;;  %9205 = vmatprep.mubr.msk.bf16.mxu0 %vm2292_vm0, %v6000_v8  ;;  %v5539_v58 = vrot.slane %v5172_v6, 4  ;;  %v4765_v41 = vrot.slane %v13080_v52, 3  ;;  %v5545_v13 = vrot.slane %v13082_v35, 4  ;;  %v4761_v53 = vrot.slane %v4403_v25, 3 }
 0x54a   :  { %v5848_v14 = vadd.f32 %v12998_v5, %v5761_v55  ;;  %v5849_v27 = vadd.f32 %v12998_v5, %v5762_v2  ;;  %v5541_v62 = vrot.slane %v5175_v19, 4  ;;  %v4760_v44 = vsel %vm4719_vm3, %v4757_v7, %v4759_v32 }
 0x54b   :  { %v5540_v0 = vsel %vm5507_vm4, %v5537_v10, %v5539_v58  ;;  %v4766_v46 = vsel %vm4719_vm3, %v4763_v50, %v4765_v41  ;;  %v5546_v40 = vsel %vm5507_vm4, %v5543_v20, %v5545_v13  ;;  %v4980_v61 = vadd.f32 %v4760_v44, %v12666_v37 }
 0x54c   :  { %v5928_v60 = vmax.f32 %v5848_v14, 0.0  ;;  %v5929_v9 = vmax.f32 %v5849_v27, 0.0  ;;  %v5764_v3 = vadd.f32 %v5540_v0, %v4976_v23  ;;  %v4983_v28 = vadd.f32 %v4766_v46, %v12673_v57 }
 0x54d   :  { %v5767_v12 = vadd.f32 %v5546_v40, %v4979_v56  ;;  %v4762_v26 = vsel %vm4719_vm3, %v4759_v32, %v4761_v53  ;;  %v4764_v18 = vsel %vm4719_vm3, %v4761_v53, %v4763_v50  ;;  %v8959_v8 = vpop.f32.mrb[144].mxu1  ;;  %v9043_v7 = vpop.f32.mrb[140].mxu0  ;;  %v5542_v43 = vsel %vm5507_vm4, %v5539_v58, %v5541_v62 }
 0x54e   :  { %v5851_v10 = vadd.f32 %v12998_v5, %v5764_v3  ;;  %v4981_v22 = vadd.f32 %v4762_v26, %v12681_v38  ;;  %v4982_v6 = vadd.f32 %v4764_v18, %v12683_v49  ;;  %v4416_v30 = vpop.f32.mrb[145].mxu1  ;;  %v5188_v37 = vpop.f32.mrb[141].mxu0  ;;  %v5930_v23 = vmax.f32 %v13076_v51, 0.0 }
 0x54f   :  { %v5544_v57 = vsel %vm5507_vm4, %v5541_v62, %v5543_v20  ;;  %v5765_v56 = vadd.f32 %v5542_v43, %v4977_v34  ;;  %v6001_v52 = vpack.c.bf16 %v5927_v24, %v5926_v16  ;;  %v13106_v35 = vpop.f32.mrb[146].mxu1  ;;  %v13108_v55 = vpop.f32.mrb[142].mxu0  ;;  %v13111_v50 = vadd.f32 %v12998_v5, %v5767_v12 }
 0x550   :  { %v5931_v2 = vmax.f32 %v5851_v10, 0.0  ;;  %v5766_v38 = vadd.f32 %v5544_v57, %v4978_v48  ;;  %v6002_v49 = vpack.c.bf16 %v5929_v9, %v5928_v60  ;;  %v4419_v25 = vpop.f32.mrb[147].mxu1  ;;  %v5191_v19 = vpop.f32.mrb[143].mxu0  ;;  %v4771_v34 = vrot.slane %v8959_v8, 3 }
 0x551   :  { %v5852_v32 = vadd.f32 %v12998_v5, %v5765_v56  ;;  %9118 = vmatmul.mubr.msk.bf16.gmra.mrb[208].mxu1 %vm2292_vm0, %v6001_v52  ;;  %9206 = vmatmul.mubr.msk.bf16.gmra.mrb[208].mxu0 %vm2292_vm0, %v6001_v52  ;;  %v5551_v16 = vrot.slane %v9043_v7, 4  ;;  %v4767_v24 = vrot.slane %v4416_v30, 3  ;;  %v5547_v20 = vrot.slane %v5188_v37, 4 }
 0x552   :  { %v5853_v51 = vadd.f32 %v12998_v5, %v5766_v38  ;;  %9121 = vmatprep.mubr.msk.bf16.mxu1 %vm2292_vm0, %v6002_v49  ;;  %9209 = vmatprep.mubr.msk.bf16.mxu0 %vm2292_vm0, %v6002_v49  ;;  %v4773_v48 = vrot.slane %v13106_v35, 3  ;;  %v5553_v58 = vrot.slane %v13108_v55, 4  ;;  %v4769_v53 = vrot.slane %v4419_v25, 3 }
 0x553   :  { %v5932_v14 = vmax.f32 %v5852_v32, 0.0  ;;  %v4768_v27 = vsel %vm4719_vm3, %v4765_v41, %v4767_v24  ;;  %v5549_v62 = vrot.slane %v5191_v19, 4  ;;  %v5548_v46 = vsel %vm5507_vm4, %v5545_v13, %v5547_v20 }
 0x554   :  { %v5933_v44 = vmax.f32 %v5853_v51, 0.0  ;;  %v4984_v0 = vadd.f32 %v4768_v27, %v12693_v15  ;;  %v4774_v40 = vsel %vm4719_vm3, %v4771_v34, %v4773_v48  ;;  %v5768_v60 = vadd.f32 %v5548_v46, %v4980_v61 }
 0x555   :  { %v4987_v9 = vadd.f32 %v4774_v40, %v12700_v47  ;;  %v5554_v3 = vsel %vm5507_vm4, %v5551_v16, %v5553_v58  ;;  %v4770_v12 = vsel %vm4719_vm3, %v4767_v24, %v4769_v53  ;;  %v8963_v26 = vpop.f32.mrb[148].mxu1  ;;  %v9047_v18 = vpop.f32.mrb[144].mxu0  ;;  %v4772_v41 = vsel %vm4719_vm3, %v4769_v53, %v4771_v34 }
 0x556   :  { %v5771_v8 = vadd.f32 %v5554_v3, %v4983_v28  ;;  %v4985_v7 = vadd.f32 %v4770_v12, %v12708_v11  ;;  %v5550_v15 = vsel %vm5507_vm4, %v5547_v20, %v5549_v62  ;;  %v4432_v10 = vpop.f32.mrb[149].mxu1  ;;  %v5204_v13 = vpop.f32.mrb[145].mxu0  ;;  %v5855_v43 = vadd.f32 %v12998_v5, %v5768_v60 }
 0x557   :  { %v4986_v61 = vadd.f32 %v4772_v41, %v12710_v36  ;;  %v5552_v47 = vsel %vm5507_vm4, %v5549_v62, %v5551_v16  ;;  %v5769_v30 = vadd.f32 %v5550_v15, %v4981_v22  ;;  %v13134_v37 = vpop.f32.mrb[150].mxu1  ;;  %v13136_v57 = vpop.f32.mrb[146].mxu0  ;;  %v5934_v28 = vmax.f32 %v13111_v50, 0.0 }
 0x558   :  { %v5770_v56 = vadd.f32 %v5552_v47, %v4982_v6  ;;  %v6003_v52 = vpack.c.bf16 %v5931_v2, %v5930_v23  ;;  %v6004_v11 = vpack.c.bf16 %v5933_v44, %v5932_v14  ;;  %v4435_v35 = vpop.f32.mrb[151].mxu1  ;;  %v5207_v55 = vpop.f32.mrb[147].mxu0  ;;  %v5935_v38 = vmax.f32 %v5855_v43, 0.0 }
 0x559   :  { %v13140_v49 = vadd.f32 %v12998_v5, %v5771_v8  ;;  %v5856_v36 = vadd.f32 %v12998_v5, %v5769_v30  ;;  %v4779_v25 = vrot.slane %v8963_v26, 3  ;;  %v5559_v19 = vrot.slane %v9047_v18, 4 }
 0x55a   :  { %v5857_v22 = vadd.f32 %v12998_v5, %v5770_v56  ;;  %9122 = vmatmul.mubr.msk.bf16.gmra.mrb[212].mxu1 %vm2292_vm0, %v6003_v52  ;;  %9210 = vmatmul.mubr.msk.bf16.gmra.mrb[212].mxu0 %vm2292_vm0, %v6003_v52  ;;  %v4775_v50 = vrot.slane %v4432_v10, 3  ;;  %v5555_v6 = vrot.slane %v5204_v13, 4  ;;  %v4781_v2 = vrot.slane %v13134_v37, 3 }
 0x55b   :  { %v5936_v23 = vmax.f32 %v5856_v36, 0.0  ;;  %9125 = vmatprep.mubr.msk.bf16.mxu1 %vm2292_vm0, %v6004_v11  ;;  %9213 = vmatprep.mubr.msk.bf16.mxu0 %vm2292_vm0, %v6004_v11  ;;  %v5561_v32 = vrot.slane %v13136_v57, 4  ;;  %v4777_v34 = vrot.slane %v4435_v35, 3  ;;  %v5557_v20 = vrot.slane %v5207_v55, 4 }
 0x55c   :  { %v5937_v16 = vmax.f32 %v5857_v22, 0.0  ;;  %v4776_v24 = vsel %vm4719_vm3, %v4773_v48, %v4775_v50  ;;  %v5556_v51 = vsel %vm5507_vm4, %v5553_v58, %v5555_v6  ;;  %v4782_v53 = vsel %vm4719_vm3, %v4779_v25, %v4781_v2 }
 0x55d   :  { %v4988_v14 = vadd.f32 %v4776_v24, %v12720_v33  ;;  %v5772_v27 = vadd.f32 %v5556_v51, %v4984_v0  ;;  %v5562_v62 = vsel %vm5507_vm4, %v5559_v19, %v5561_v32  ;;  %v8967_v44 = vpop.f32.mrb[152].mxu1  ;;  %v9051_v46 = vpop.f32.mrb[148].mxu0  ;;  %v4991_v40 = vadd.f32 %v4782_v53, %v12727_v31 }
 0x55e   :  { %v5775_v60 = vadd.f32 %v5562_v62, %v4987_v9  ;;  %v4778_v3 = vsel %vm4719_vm3, %v4775_v50, %v4777_v34  ;;  %v4780_v12 = vsel %vm4719_vm3, %v4777_v34, %v4779_v25  ;;  %v4448_v48 = vpop.f32.mrb[153].mxu1  ;;  %v5220_v26 = vpop.f32.mrb[149].mxu0  ;;  %v5558_v18 = vsel %vm5507_vm4, %v5555_v6, %v5557_v20 }
 0x55f   :  { %v5859_v58 = vadd.f32 %v12998_v5, %v5772_v27  ;;  %v4989_v33 = vadd.f32 %v4778_v3, %v12735_v21  ;;  %v4990_v0 = vadd.f32 %v4780_v12, %v12737_v63  ;;  %v13162_v8 = vpop.f32.mrb[154].mxu1  ;;  %v13164_v41 = vpop.f32.mrb[150].mxu0  ;;  %v5938_v31 = vmax.f32 %v13140_v49, 0.0 }
 0x560   :  { %v5560_v9 = vsel %vm5507_vm4, %v5557_v20, %v5559_v19  ;;  %v5773_v15 = vadd.f32 %v5558_v18, %v4985_v7  ;;  %v6005_v10 = vpack.c.bf16 %v5935_v38, %v5934_v28  ;;  %v4451_v13 = vpop.f32.mrb[155].mxu1  ;;  %v5223_v43 = vpop.f32.mrb[151].mxu0  ;;  %v13169_v30 = vadd.f32 %v12998_v5, %v5775_v60 }
 0x561   :  { %v5939_v47 = vmax.f32 %v5859_v58, 0.0  ;;  %v5774_v21 = vadd.f32 %v5560_v9, %v4986_v61  ;;  %v6006_v63 = vpack.c.bf16 %v5937_v16, %v5936_v23  ;;  %v4787_v57 = vrot.slane %v8967_v44, 3 }
 0x562   :  { %v5860_v37 = vadd.f32 %v12998_v5, %v5773_v15  ;;  %9126 = vmatmul.mubr.msk.bf16.gmra.mrb[216].mxu1 %vm2292_vm0, %v6005_v10  ;;  %9214 = vmatmul.mubr.msk.bf16.gmra.mrb[216].mxu0 %vm2292_vm0, %v6005_v10  ;;  %v5567_v56 = vrot.slane %v9051_v46, 4  ;;  %v4783_v52 = vrot.slane %v4448_v48, 3  ;;  %v5563_v28 = vrot.slane %v5220_v26, 4 }
 0x563   :  { %v5861_v7 = vadd.f32 %v12998_v5, %v5774_v21  ;;  %9129 = vmatprep.mubr.msk.bf16.mxu1 %vm2292_vm0, %v6006_v63  ;;  %9217 = vmatprep.mubr.msk.bf16.mxu0 %vm2292_vm0, %v6006_v63  ;;  %v4789_v11 = vrot.slane %v13162_v8, 3  ;;  %v5569_v61 = vrot.slane %v13164_v41, 4  ;;  %v4785_v38 = vrot.slane %v4451_v13, 3 }
 0x564   :  { %v5940_v35 = vmax.f32 %v5860_v37, 0.0  ;;  %v4784_v55 = vsel %vm4719_vm3, %v4781_v2, %v4783_v52  ;;  %v5565_v49 = vrot.slane %v5223_v43, 4  ;;  %v5564_v22 = vsel %vm5507_vm4, %v5561_v32, %v5563_v28 }
 0x565   :  { %v5941_v36 = vmax.f32 %v5861_v7, 0.0  ;;  %v4992_v25 = vadd.f32 %v4784_v55, %v12747_v39  ;;  %v4790_v19 = vsel %vm4719_vm3, %v4787_v57, %v4789_v11  ;;  %v8971_v50 = vpop.f32.mrb[156].mxu1  ;;  %v13183_v6 = vpop.f32.mrb[152].mxu0  ;;  %v5776_v23 = vadd.f32 %v5564_v22, %v4988_v14 }
 0x566   :  { %v4995_v34 = vadd.f32 %v4790_v19, %v12754_v17  ;;  %v5570_v16 = vsel %vm5507_vm4, %v5567_v56, %v5569_v61  ;;  %v4786_v24 = vsel %vm4719_vm3, %v4783_v52, %v4785_v38  ;;  %v4464_v2 = vpop.f32.mrb[157].mxu1  ;;  %v5236_v51 = vpop.f32.mrb[153].mxu0  ;;  %v4788_v27 = vsel %vm4719_vm3, %v4785_v38, %v4787_v57 }
 0x567   :  { %v5779_v20 = vadd.f32 %v5570_v16, %v4991_v40  ;;  %v4993_v39 = vadd.f32 %v4786_v24, %v12762_v42  ;;  %v5566_v32 = vsel %vm5507_vm4, %v5563_v28, %v5565_v49  ;;  %v13191_v53 = vpop.f32.mrb[158].mxu1  ;;  %v13193_v62 = vpop.f32.mrb[154].mxu0  ;;  %v5863_v14 = vadd.f32 %v12998_v5, %v5776_v23 }
 0x568   :  { %v4994_v17 = vadd.f32 %v4788_v27, %v12764_v29  ;;  %v5568_v44 = vsel %vm5507_vm4, %v5565_v49, %v5567_v56  ;;  %v5777_v46 = vadd.f32 %v5566_v32, %v4989_v33  ;;  %v4467_v60 = vpop.f32.mrb[159].mxu1  ;;  %v5239_v3 = vpop.f32.mrb[155].mxu0  ;;  %v5942_v40 = vmax.f32 %v13169_v30, 0.0 }
 0x569   :  { %v5778_v12 = vadd.f32 %v5568_v44, %v4990_v0  ;;  %v6007_v48 = vpack.c.bf16 %v5939_v47, %v5938_v31  ;;  %v6008_v42 = vpack.c.bf16 %v5941_v36, %v5940_v35  ;;  %v5943_v26 = vmax.f32 %v5863_v14, 0.0 }
 0x56a   :  { %v13200_v58 = vadd.f32 %v12998_v5, %v5779_v20  ;;  %v5864_v18 = vadd.f32 %v12998_v5, %v5777_v46  ;;  %v4795_v8 = vrot.slane %v8971_v50, 3  ;;  %v5575_v29 = vrot.slane %v13183_v6, 4 }
 0x56b   :  { %v5865_v41 = vadd.f32 %v12998_v5, %v5778_v12  ;;  %9130 = vmatmul.mubr.msk.bf16.gmra.mrb[220].mxu1 %vm2292_vm0, %v6007_v48  ;;  %9218 = vmatmul.mubr.msk.bf16.gmra.mrb[220].mxu0 %vm2292_vm0, %v6007_v48  ;;  %v4791_v33 = vrot.slane %v4464_v2, 3  ;;  %v5571_v9 = vrot.slane %v5236_v51, 4  ;;  %v4797_v31 = vrot.slane %v13191_v53, 3 }
 0x56c   :  { %v5944_v0 = vmax.f32 %v5864_v18, 0.0  ;;  %9133 = vmatprep.mubr.msk.bf16.mxu1 %vm2292_vm0, %v6008_v42  ;;  %9221 = vmatprep.mubr.msk.bf16.mxu0 %vm2292_vm0, %v6008_v42  ;;  %v5577_v15 = vrot.slane %v13193_v62, 4  ;;  %v4793_v10 = vrot.slane %v4467_v60, 3  ;;  %v5573_v30 = vrot.slane %v5239_v3, 4 }
 0x56d   :  { %v5945_v13 = vmax.f32 %v5865_v41, 0.0  ;;  %v4792_v43 = vsel %vm4719_vm3, %v4789_v11, %v4791_v33  ;;  %v5572_v47 = vsel %vm5507_vm4, %v5569_v61, %v5571_v9  ;;  %v8975_v21 = vpop.f32.mrb[160].mxu1  ;;  %v13213_v63 = vpop.f32.mrb[156].mxu0  ;;  %v4798_v56 = vsel %vm4719_vm3, %v4795_v8, %v4797_v31 }
 0x56e   :  { %v4996_v37 = vadd.f32 %v4792_v43, %v12774_v1  ;;  %v5780_v57 = vadd.f32 %v5572_v47, %v4992_v25  ;;  %v5578_v52 = vsel %vm5507_vm4, %v5575_v29, %v5577_v15  ;;  %v4480_v7 = vpop.f32.mrb[161].mxu1  ;;  %v5252_v28 = vpop.f32.mrb[157].mxu0  ;;  %v4999_v35 = vadd.f32 %v4798_v56, %v12781_v59 }
 0x56f   :  { %v5783_v55 = vadd.f32 %v5578_v52, %v4995_v34  ;;  %v4794_v11 = vsel %vm4719_vm3, %v4791_v33, %v4793_v10  ;;  %v4796_v61 = vsel %vm4719_vm3, %v4793_v10, %v4795_v8  ;;  %v13221_v38 = vpop.f32.mrb[162].mxu1  ;;  %v13223_v49 = vpop.f32.mrb[158].mxu0  ;;  %v5574_v22 = vsel %vm5507_vm4, %v5571_v9, %v5573_v30  ;;  %v14819_v8 = vld [vmem:[#allocation34_spill] sm:$0xff]  ;;  %v14820_v10 = vld [vmem:[#allocation68_spill] sm:$0xff] }
 0x570   :  { %v5867_v1 = vadd.f32 %v12998_v5, %v5780_v57  ;;  %v4997_v36 = vadd.f32 %v4794_v11, %v12789_v54  ;;  %v4998_v25 = vadd.f32 %v4796_v61, %v12791_v45  ;;  %v4483_v19 = vpop.f32.mrb[163].mxu1  ;;  %v5255_v50 = vpop.f32.mrb[159].mxu0  ;;  %v5946_v59 = vmax.f32 %v13200_v58, 0.0 }
 0x571   :  { %v5576_v6 = vsel %vm5507_vm4, %v5573_v30, %v5575_v29  ;;  %v5781_v23 = vadd.f32 %v5574_v22, %v4993_v39  ;;  %v6009_v34 = vpack.c.bf16 %v5943_v26, %v5942_v40  ;;  %v13232_v24 = vadd.f32 %v12998_v5, %v5783_v55 }
 0x572   :  { %v5947_v16 = vmax.f32 %v5867_v1, 0.0  ;;  %v5782_v2 = vadd.f32 %v5576_v6, %v4994_v17  ;;  %v6010_v51 = vpack.c.bf16 %v5945_v13, %v5944_v0  ;;  %v4803_v45 = vrot.slane %v8975_v21, 3  ;;  %v14821_v21 = vld [vmem:[#allocation156_spill] sm:$0xff] }
 0x573   :  { %v5868_v54 = vadd.f32 %v12998_v5, %v5781_v23  ;;  %9134 = vmatmul.mubr.msk.bf16.gmra.mrb[224].mxu1 %vm2292_vm0, %v6009_v34  ;;  %9222 = vmatmul.mubr.msk.bf16.gmra.mrb[224].mxu0 %vm2292_vm0, %v6009_v34  ;;  %v5583_v20 = vrot.slane %v13213_v63, 4  ;;  %v4799_v27 = vrot.slane %v4480_v7, 3  ;;  %v5579_v39 = vrot.slane %v5252_v28, 4 }
 0x574   :  { %v5869_v32 = vadd.f32 %v12998_v5, %v5782_v2  ;;  %9137 = vmatprep.mubr.msk.bf16.mxu1 %vm2292_vm0, %v6010_v51  ;;  %9225 = vmatprep.mubr.msk.bf16.mxu0 %vm2292_vm0, %v6010_v51  ;;  %v4805_v53 = vrot.slane %v13221_v38, 3  ;;  %v5585_v62 = vrot.slane %v13223_v49, 4  ;;  %v4801_v44 = vrot.slane %v4483_v19, 3 }
 0x575   :  { %v5948_v14 = vmax.f32 %v5868_v54, 0.0  ;;  %v4800_v17 = vsel %vm4719_vm3, %v4797_v31, %v4799_v27  ;;  %v5581_v46 = vrot.slane %v5255_v50, 4  ;;  %v13244_v60 = vpop.f32.mrb[164].mxu1  ;;  %v13246_v3 = vpop.f32.mrb[160].mxu0  ;;  %v5580_v48 = vsel %vm5507_vm4, %v5577_v15, %v5579_v39  ;;  %v14822_v54 = vld [vmem:[#allocation69_spill] sm:$0xff] }
 0x576   :  { %v5949_v40 = vmax.f32 %v5869_v32, 0.0  ;;  %v5000_v12 = vadd.f32 %v4800_v17, %v12799_v4  ;;  %v4806_v42 = vsel %vm4719_vm3, %v4803_v45, %v4805_v53  ;;  %v4496_v26 = vpop.f32.mrb[165].mxu1  ;;  %v5268_v58 = vpop.f32.mrb[161].mxu0  ;;  %v5784_v18 = vadd.f32 %v5580_v48, %v4996_v37  ;;  %v14823_v17 = vld [vmem:[#allocation100_spill] sm:$0xff] }
 0x577   :  { %v5003_v41 = vadd.f32 %v4806_v42, %v14819_v8  ;;  %v5586_v29 = vsel %vm5507_vm4, %v5583_v20, %v5585_v62  ;;  %v4802_v33 = vsel %vm4719_vm3, %v4799_v27, %v4801_v44  ;;  %v13254_v9 = vpop.f32.mrb[166].mxu1  ;;  %v13256_v0 = vpop.f32.mrb[162].mxu0  ;;  %v4804_v4 = vsel %vm4719_vm3, %v4801_v44, %v4803_v45  ;;  %v14825_v42 = vld [vmem:[#allocation71_spill] sm:$0xff] }
 0x578   :  { %v5787_v31 = vadd.f32 %v5586_v29, %v4999_v35  ;;  %v5001_v15 = vadd.f32 %v4802_v33, %v14820_v10  ;;  %v5582_v13 = vsel %vm5507_vm4, %v5579_v39, %v5581_v46  ;;  %v4499_v43 = vpop.f32.mrb[167].mxu1  ;;  %v5271_v47 = vpop.f32.mrb[163].mxu0  ;;  %v5871_v30 = vadd.f32 %v12998_v5, %v5784_v18 }
 0x579   :  { %v5002_v63 = vadd.f32 %v4804_v4, %v14821_v21  ;;  %v5584_v37 = vsel %vm5507_vm4, %v5581_v46, %v5583_v20  ;;  %v5785_v57 = vadd.f32 %v5582_v13, %v4997_v36  ;;  %v5950_v56 = vmax.f32 %v13232_v24, 0.0 }
 0x57a   :  { %v5786_v52 = vadd.f32 %v5584_v37, %v4998_v25  ;;  %v6011_v7 = vpack.c.bf16 %v5947_v16, %v5946_v59  ;;  %v6012_v28 = vpack.c.bf16 %v5949_v40, %v5948_v14  ;;  %v5951_v35 = vmax.f32 %v5871_v30, 0.0 }
 0x57b   :  { %v13266_v55 = vadd.f32 %v12998_v5, %v5787_v31  ;;  %v5872_v11 = vadd.f32 %v12998_v5, %v5785_v57  ;;  %v4811_v61 = vrot.slane %v13244_v60, 3  ;;  %v5591_v49 = vrot.slane %v13246_v3, 4 }
 0x57c   :  { %v5873_v38 = vadd.f32 %v12998_v5, %v5786_v52  ;;  %9138 = vmatmul.mubr.msk.bf16.gmra.mrb[228].mxu1 %vm2292_vm0, %v6011_v7  ;;  %9226 = vmatmul.mubr.msk.bf16.gmra.mrb[228].mxu0 %vm2292_vm0, %v6011_v7  ;;  %v4807_v1 = vrot.slane %v4496_v26, 3  ;;  %v5587_v36 = vrot.slane %v5268_v58, 4  ;;  %v4813_v22 = vrot.slane %v13254_v9, 3 }
 0x57d   :  { %v5952_v25 = vmax.f32 %v5872_v11, 0.0  ;;  %9141 = vmatprep.mubr.msk.bf16.mxu1 %vm2292_vm0, %v6012_v28  ;;  %9229 = vmatprep.mubr.msk.bf16.mxu0 %vm2292_vm0, %v6012_v28  ;;  %v5593_v19 = vrot.slane %v13256_v0, 4  ;;  %v4809_v50 = vrot.slane %v4499_v43, 3  ;;  %v13278_v59 = vpop.f32.mrb[168].mxu1  ;;  %v13280_v6 = vpop.f32.mrb[164].mxu0  ;;  %v5589_v24 = vrot.slane %v5271_v47, 4 }
 0x57e   :  { %v5953_v23 = vmax.f32 %v5873_v38, 0.0  ;;  %v4808_v34 = vsel %vm4719_vm3, %v4805_v53, %v4807_v1  ;;  %v5588_v16 = vsel %vm5507_vm4, %v5585_v62, %v5587_v36  ;;  %v4512_v2 = vpop.f32.mrb[169].mxu1  ;;  %v5284_v51 = vpop.f32.mrb[165].mxu0  ;;  %v4814_v27 = vsel %vm4719_vm3, %v4811_v61, %v4813_v22  ;;  %v14826_v11 = vld [vmem:[#allocation36_spill] sm:$0xff] }
 0x57f   :  { %v5004_v45 = vadd.f32 %v4808_v34, %v14822_v54  ;;  %v5788_v20 = vadd.f32 %v5588_v16, %v5000_v12  ;;  %v5594_v32 = vsel %vm5507_vm4, %v5591_v49, %v5593_v19  ;;  %v13287_v39 = vpop.f32.mrb[170].mxu1  ;;  %v13289_v14 = vpop.f32.mrb[166].mxu0  ;;  %v5007_v44 = vadd.f32 %v4814_v27, %v14823_v17  ;;  %v14824_v12 = vld [vmem:[#allocation148_spill] sm:$0xff] }
 0x580   :  { %v5791_v46 = vadd.f32 %v5594_v32, %v5003_v41  ;;  %v4810_v53 = vsel %vm4719_vm3, %v4807_v1, %v4809_v50  ;;  %v4812_v62 = vsel %vm4719_vm3, %v4809_v50, %v4811_v61  ;;  %v4515_v60 = vpop.f32.mrb[171].mxu1  ;;  %v5287_v3 = vpop.f32.mrb[167].mxu0  ;;  %v5590_v58 = vsel %vm5507_vm4, %v5587_v36, %v5589_v24  ;;  %v14827_v50 = vld [vmem:[#allocation70_spill] sm:$0xff] }
 0x581   :  { %v5875_v40 = vadd.f32 %v12998_v5, %v5788_v20  ;;  %v5005_v48 = vadd.f32 %v4810_v53, %v14824_v12  ;;  %v5006_v26 = vadd.f32 %v4812_v62, %v14825_v42  ;;  %v5954_v18 = vmax.f32 %v13266_v55, 0.0  ;;  %v14829_v20 = vld [vmem:[#allocation101_spill] sm:$0xff] }
 0x582   :  { %v5592_v8 = vsel %vm5507_vm4, %v5589_v24, %v5591_v49  ;;  %v5789_v29 = vadd.f32 %v5590_v58, %v5001_v15  ;;  %v6013_v41 = vpack.c.bf16 %v5951_v35, %v5950_v56  ;;  %v13301_v9 = vadd.f32 %v12998_v5, %v5791_v46 }
 0x583   :  { %v5955_v33 = vmax.f32 %v5875_v40, 0.0  ;;  %v5790_v0 = vadd.f32 %v5592_v8, %v5002_v63  ;;  %v6014_v31 = vpack.c.bf16 %v5953_v23, %v5952_v25  ;;  %v4819_v10 = vrot.slane %v13278_v59, 3 }
 0x584   :  { %v5876_v4 = vadd.f32 %v12998_v5, %v5789_v29  ;;  %9142 = vmatmul.mubr.msk.bf16.gmra.mrb[232].mxu1 %vm2292_vm0, %v6013_v41  ;;  %9230 = vmatmul.mubr.msk.bf16.gmra.mrb[232].mxu0 %vm2292_vm0, %v6013_v41  ;;  %v5599_v13 = vrot.slane %v13280_v6, 4  ;;  %v4815_v43 = vrot.slane %v4512_v2, 3  ;;  %v5595_v47 = vrot.slane %v5284_v51, 4  ;;  %v14828_v2 = vld [vmem:[#allocation35_spill] sm:$0xff] }
 0x585   :  { %v5877_v15 = vadd.f32 %v12998_v5, %v5790_v0  ;;  %9145 = vmatprep.mubr.msk.bf16.mxu1 %vm2292_vm0, %v6014_v31  ;;  %9233 = vmatprep.mubr.msk.bf16.mxu0 %vm2292_vm0, %v6014_v31  ;;  %v4821_v30 = vrot.slane %v13287_v39, 3  ;;  %v5601_v21 = vrot.slane %v13289_v14, 4  ;;  %v13313_v63 = vpop.f32.mrb[172].mxu1  ;;  %v13315_v37 = vpop.f32.mrb[168].mxu0  ;;  %v4817_v52 = vrot.slane %v4515_v60, 3 }
 0x586   :  { %v5956_v57 = vmax.f32 %v5876_v4, 0.0  ;;  %v4816_v56 = vsel %vm4719_vm3, %v4813_v22, %v4815_v43  ;;  %v5597_v7 = vrot.slane %v5287_v3, 4  ;;  %v13318_v28 = vpop.f32.mrb[173].mxu1  ;;  %v13320_v35 = vpop.f32.mrb[169].mxu0  ;;  %v5596_v38 = vsel %vm5507_vm4, %v5593_v19, %v5595_v47 }
 0x587   :  { %v5957_v55 = vmax.f32 %v5877_v15, 0.0  ;;  %v5008_v61 = vadd.f32 %v4816_v56, %v14826_v11  ;;  %v4822_v49 = vsel %vm4719_vm3, %v4819_v10, %v4821_v30  ;;  %v13325_v1 = vpop.f32.mrb[174].mxu1  ;;  %v13327_v36 = vpop.f32.mrb[170].mxu0  ;;  %v5792_v25 = vadd.f32 %v5596_v38, %v5004_v45  ;;  %v14833_v38 = vld [vmem:[#allocation103_spill] sm:$0xff] }
 0x588   :  { %v5011_v22 = vadd.f32 %v4822_v49, %v14827_v50  ;;  %v5602_v59 = vsel %vm5507_vm4, %v5599_v13, %v5601_v21  ;;  %v4818_v6 = vsel %vm4719_vm3, %v4815_v43, %v4817_v52  ;;  %v4531_v23 = vpop.f32.mrb[175].mxu1  ;;  %v5303_v34 = vpop.f32.mrb[171].mxu0  ;;  %v4820_v24 = vsel %vm4719_vm3, %v4817_v52, %v4819_v10  ;;  %v14830_v43 = vld [vmem:[#allocation38_spill] sm:$0xff]  ;;  %v14831_v52 = vld [vmem:[#allocation149_spill] sm:$0xff] }
 0x589   :  { %v5795_v16 = vadd.f32 %v5602_v59, %v5007_v44  ;;  %v5009_v19 = vadd.f32 %v4818_v6, %v14828_v2  ;;  %v5598_v51 = vsel %vm5507_vm4, %v5595_v47, %v5597_v7  ;;  %v5879_v54 = vadd.f32 %v12998_v5, %v5792_v25  ;;  %v13342_v44 = vld [vmem:[%s14099_s4] ss:$0 sm:$0xff] }
 0x58a   :  { %v5010_v27 = vadd.f32 %v4820_v24, %v14829_v20  ;;  %v5600_v45 = vsel %vm5507_vm4, %v5597_v7, %v5599_v13  ;;  %v5793_v32 = vadd.f32 %v5598_v51, %v5005_v48  ;;  %v5958_v39 = vmax.f32 %v13301_v9, 0.0 }
 0x58b   :  { %v5794_v14 = vadd.f32 %v5600_v45, %v5006_v26  ;;  %v6015_v17 = vpack.c.bf16 %v5955_v33, %v5954_v18  ;;  %v6016_v46 = vpack.c.bf16 %v5957_v55, %v5956_v57  ;;  %v5959_v53 = vmax.f32 %v5879_v54, 0.0  ;;  %v14832_v55 = vld [vmem:[#allocation37_spill] sm:$0xff] }
 0x58c   :  { %v13345_v62 = vadd.f32 %v13342_v44, %v5795_v16  ;;  %v5880_v5 = vadd.f32 %v13342_v44, %v5793_v32  ;;  %v4827_v60 = vrot.slane %v13313_v63, 3  ;;  %v5607_v40 = vrot.slane %v13315_v37, 4 }
 0x58d   :  { %v5881_v3 = vadd.f32 %v13342_v44, %v5794_v14  ;;  %9146 = vmatmul.mubr.msk.bf16.gmra.mrb[236].mxu1 %vm2292_vm0, %v6015_v17  ;;  %9234 = vmatmul.mubr.msk.bf16.gmra.mrb[236].mxu0 %vm2292_vm0, %v6015_v17  ;;  %v4823_v12 = vrot.slane %v13318_v28, 3  ;;  %v5603_v48 = vrot.slane %v13320_v35, 4  ;;  %v13355_v42 = vpop.f32.mrb[176].mxu1  ;;  %v13357_v26 = vpop.f32.mrb[172].mxu0  ;;  %v4829_v18 = vrot.slane %v13325_v1, 3 }
 0x58e   :  { %v5960_v58 = vmax.f32 %v5880_v5, 0.0  ;;  %9149 = vmatprep.mubr.msk.bf16.mxu1 %vm2292_vm0, %v6016_v46  ;;  %9237 = vmatprep.mubr.msk.bf16.mxu0 %vm2292_vm0, %v6016_v46  ;;  %v5609_v8 = vrot.slane %v13327_v36, 4  ;;  %v4825_v29 = vrot.slane %v4531_v23, 3  ;;  %v13363_v41 = vpop.f32.mrb[177].mxu1  ;;  %v13365_v33 = vpop.f32.mrb[173].mxu0  ;;  %v5605_v4 = vrot.slane %v5303_v34, 4 }
 0x58f   :  { %v5961_v9 = vmax.f32 %v5881_v3, 0.0  ;;  %v4824_v0 = vsel %vm4719_vm3, %v4821_v30, %v4823_v12  ;;  %v5604_v31 = vsel %vm5507_vm4, %v5601_v21, %v5603_v48  ;;  %v13369_v10 = vpop.f32.mrb[178].mxu1  ;;  %v13371_v13 = vpop.f32.mrb[174].mxu0  ;;  %v4830_v63 = vsel %vm4719_vm3, %v4827_v60, %v4829_v18  ;;  %v14834_v3 = vld [vmem:[#allocation73_spill] sm:$0xff] }
 0x590   :  { %v5012_v15 = vadd.f32 %v4824_v0, %v14830_v43  ;;  %v5796_v47 = vadd.f32 %v5604_v31, %v5008_v61  ;;  %v5610_v37 = vsel %vm5507_vm4, %v5607_v40, %v5609_v8  ;;  %v4547_v57 = vpop.f32.mrb[179].mxu1  ;;  %v5319_v56 = vpop.f32.mrb[175].mxu0  ;;  %v5015_v7 = vadd.f32 %v4830_v63, %v14831_v52  ;;  %v14836_v31 = vld [vmem:[#allocation105_spill] sm:$0xff] }
 0x591   :  { %v5799_v28 = vadd.f32 %v5610_v37, %v5011_v22  ;;  %v4826_v30 = vsel %vm4719_vm3, %v4823_v12, %v4825_v29  ;;  %v4828_v21 = vsel %vm4719_vm3, %v4825_v29, %v4827_v60  ;;  %v5606_v61 = vsel %vm5507_vm4, %v5603_v48, %v5605_v4  ;;  %v14835_v29 = vld [vmem:[#allocation72_spill] sm:$0xff] }
 0x592   :  { %v5883_v35 = vadd.f32 %v13342_v44, %v5796_v47  ;;  %v5013_v11 = vadd.f32 %v4826_v30, %v14832_v55  ;;  %v5014_v49 = vadd.f32 %v4828_v21, %v14833_v38  ;;  %v5962_v1 = vmax.f32 %v13345_v62, 0.0 }
 0x593   :  { %v5608_v36 = vsel %vm5507_vm4, %v5605_v4, %v5607_v40  ;;  %v5797_v25 = vadd.f32 %v5606_v61, %v5009_v19  ;;  %v6017_v50 = vpack.c.bf16 %v5959_v53, %v5958_v39  ;;  %v13386_v22 = vadd.f32 %v13342_v44, %v5799_v28 }
 0x594   :  { %v5963_v59 = vmax.f32 %v5883_v35, 0.0  ;;  %v5798_v6 = vadd.f32 %v5608_v36, %v5010_v27  ;;  %v6018_v23 = vpack.c.bf16 %v5961_v9, %v5960_v58  ;;  %v4835_v16 = vrot.slane %v13355_v42, 3 }
 0x595   :  { %v5884_v34 = vadd.f32 %v13342_v44, %v5797_v25  ;;  %9150 = vmatmul.mubr.msk.bf16.gmra.mrb[240].mxu1 %vm2292_vm0, %v6017_v50  ;;  %9238 = vmatmul.mubr.msk.bf16.gmra.mrb[240].mxu0 %vm2292_vm0, %v6017_v50  ;;  %v5615_v24 = vrot.slane %v13357_v26, 4  ;;  %v4831_v2 = vrot.slane %v13363_v41, 3  ;;  %v13394_v19 = vpop.f32.mrb[180].mxu1  ;;  %v13396_v51 = vpop.f32.mrb[176].mxu0  ;;  %v5611_v20 = vrot.slane %v13365_v33, 4 }
 0x596   :  { %v5885_v54 = vadd.f32 %v13342_v44, %v5798_v6  ;;  %9153 = vmatprep.mubr.msk.bf16.mxu1 %vm2292_vm0, %v6018_v23  ;;  %9241 = vmatprep.mubr.msk.bf16.mxu0 %vm2292_vm0, %v6018_v23  ;;  %v4837_v27 = vrot.slane %v13369_v10, 3  ;;  %v5617_v45 = vrot.slane %v13371_v13, 4  ;;  %v13404_v32 = vpop.f32.mrb[181].mxu1  ;;  %v13406_v39 = vpop.f32.mrb[177].mxu0  ;;  %v4833_v46 = vrot.slane %v4547_v57, 3  ;;  %v14837_v13 = vld [vmem:[#allocation150_spill] sm:$0xff] }
 0x597   :  { %v5964_v14 = vmax.f32 %v5884_v34, 0.0  ;;  %v4832_v17 = vsel %vm4719_vm3, %v4829_v18, %v4831_v2  ;;  %v5613_v53 = vrot.slane %v5319_v56, 4  ;;  %v13409_v62 = vpop.f32.mrb[182].mxu1  ;;  %v13411_v5 = vpop.f32.mrb[178].mxu0  ;;  %v5612_v12 = vsel %vm5507_vm4, %v5609_v8, %v5611_v20 }
 0x598   :  { %v5965_v60 = vmax.f32 %v5885_v54, 0.0  ;;  %v5016_v40 = vadd.f32 %v4832_v17, %v14834_v3  ;;  %v4838_v48 = vsel %vm4719_vm3, %v4835_v16, %v4837_v27  ;;  %v4563_v42 = vpop.f32.mrb[183].mxu1  ;;  %v5335_v26 = vpop.f32.mrb[179].mxu0  ;;  %v5800_v58 = vadd.f32 %v5612_v12, %v5012_v15 }
 0x599   :  { %v5019_v41 = vadd.f32 %v4838_v48, %v14835_v29  ;;  %v5618_v18 = vsel %vm5507_vm4, %v5615_v24, %v5617_v45  ;;  %v4834_v33 = vsel %vm4719_vm3, %v4831_v2, %v4833_v46  ;;  %v4836_v0 = vsel %vm4719_vm3, %v4833_v46, %v4835_v16 }
 0x59a   :  { %v5803_v9 = vadd.f32 %v5618_v18, %v5015_v7  ;;  %v5017_v4 = vadd.f32 %v4834_v33, %v14836_v31  ;;  %v5614_v10 = vsel %vm5507_vm4, %v5611_v20, %v5613_v53  ;;  %v5887_v8 = vadd.f32 %v13342_v44, %v5800_v58 }
 0x59b   :  { %v5018_v43 = vadd.f32 %v4836_v0, %v14837_v13  ;;  %v5616_v47 = vsel %vm5507_vm4, %v5613_v53, %v5615_v24  ;;  %v5801_v15 = vadd.f32 %v5614_v10, %v5013_v11  ;;  %v5966_v63 = vmax.f32 %v13386_v22, 0.0 }
 0x59c   :  { %v5802_v37 = vadd.f32 %v5616_v47, %v5014_v49  ;;  %v6019_v57 = vpack.c.bf16 %v5963_v59, %v5962_v1  ;;  %v6020_v56 = vpack.c.bf16 %v5965_v60, %v5964_v14  ;;  %v5967_v52 = vmax.f32 %v5887_v8, 0.0  ;;  %v14839_v14 = vld [vmem:[#allocation40_spill] sm:$0xff]  ;;  %v14841_v60 = vld [vmem:[#allocation41_spill] sm:$0xff] }
 0x59d   :  { %v13427_v7 = vadd.f32 %v13342_v44, %v5803_v9  ;;  %v5888_v28 = vadd.f32 %v13342_v44, %v5801_v15  ;;  %v4843_v30 = vrot.slane %v13394_v19, 3  ;;  %v13431_v21 = vpop.f32.mrb[184].mxu1  ;;  %v13433_v35 = vpop.f32.mrb[180].mxu0  ;;  %v5623_v11 = vrot.slane %v13396_v51, 4  ;;  %v14838_v51 = vld [vmem:[#allocation75_spill] sm:$0xff] }
 0x59e   :  { %v5889_v55 = vadd.f32 %v13342_v44, %v5802_v37  ;;  %9154 = vmatmul.mubr.msk.bf16.gmra.mrb[244].mxu1 %vm2292_vm0, %v6019_v57  ;;  %9242 = vmatmul.mubr.msk.bf16.gmra.mrb[244].mxu0 %vm2292_vm0, %v6019_v57  ;;  %v4839_v38 = vrot.slane %v13404_v32, 3  ;;  %v5619_v49 = vrot.slane %v13406_v39, 4  ;;  %v13441_v61 = vpop.f32.mrb[185].mxu1  ;;  %v13443_v1 = vpop.f32.mrb[181].mxu0  ;;  %v4845_v25 = vrot.slane %v13409_v62, 3 }
 0x59f   :  { %v5968_v36 = vmax.f32 %v5888_v28, 0.0  ;;  %9157 = vmatprep.mubr.msk.bf16.mxu1 %vm2292_vm0, %v6020_v56  ;;  %9245 = vmatprep.mubr.msk.bf16.mxu0 %vm2292_vm0, %v6020_v56  ;;  %v5625_v50 = vrot.slane %v13411_v5, 4  ;;  %v4841_v59 = vrot.slane %v4563_v42, 3  ;;  %v13449_v22 = vpop.f32.mrb[186].mxu1  ;;  %v13451_v6 = vpop.f32.mrb[182].mxu0  ;;  %v5621_v24 = vrot.slane %v5335_v26, 4 }
 0x5a0   :  { %v5969_v23 = vmax.f32 %v5889_v55, 0.0  ;;  %v4840_v34 = vsel %vm4719_vm3, %v4837_v27, %v4839_v38  ;;  %v5620_v16 = vsel %vm5507_vm4, %v5617_v45, %v5619_v49  ;;  %v4579_v2 = vpop.f32.mrb[187].mxu1  ;;  %v5351_v19 = vpop.f32.mrb[183].mxu0  ;;  %v4846_v32 = vsel %vm4719_vm3, %v4843_v30, %v4845_v25  ;;  %v14840_v45 = vld [vmem:[#allocation74_spill] sm:$0xff]  ;;  %v14842_v55 = vld [vmem:[#allocation39_spill] sm:$0xff] }
 0x5a1   :  { %v5020_v54 = vadd.f32 %v4840_v34, %v14838_v51  ;;  %v5804_v20 = vadd.f32 %v5620_v16, %v5016_v40  ;;  %v5626_v39 = vsel %vm5507_vm4, %v5623_v11, %v5625_v50  ;;  %v5023_v17 = vadd.f32 %v4846_v32, %v14839_v14 }
 0x5a2   :  { %v5807_v46 = vadd.f32 %v5626_v39, %v5019_v41  ;;  %v4842_v53 = vsel %vm4719_vm3, %v4839_v38, %v4841_v59  ;;  %v4844_v62 = vsel %vm4719_vm3, %v4841_v59, %v4843_v30  ;;  %v5622_v12 = vsel %vm5507_vm4, %v5619_v49, %v5621_v24 }
 0x5a3   :  { %v5891_v27 = vadd.f32 %v13342_v44, %v5804_v20  ;;  %v5021_v5 = vadd.f32 %v4842_v53, %v14840_v45  ;;  %v5022_v3 = vadd.f32 %v4844_v62, %v14841_v60  ;;  %v5970_v40 = vmax.f32 %v13427_v7, 0.0 }
 0x5a4   :  { %v5624_v48 = vsel %vm5507_vm4, %v5621_v24, %v5623_v11  ;;  %v5805_v42 = vadd.f32 %v5622_v12, %v5017_v4  ;;  %v6021_v26 = vpack.c.bf16 %v5967_v52, %v5966_v63  ;;  %v13468_v29 = vadd.f32 %v13342_v44, %v5807_v46 }
 0x5a5   :  { %v5971_v58 = vmax.f32 %v5891_v27, 0.0  ;;  %v5806_v41 = vadd.f32 %v5624_v48, %v5018_v43  ;;  %v6022_v18 = vpack.c.bf16 %v5969_v23, %v5968_v36  ;;  %v13470_v33 = vpop.f32.mrb[188].mxu1  ;;  %v13472_v9 = vpop.f32.mrb[184].mxu0  ;;  %v4851_v31 = vrot.slane %v13431_v21, 3  ;;  %v14844_v23 = vld [vmem:[#allocation151_spill] sm:$0xff] }
 0x5a6   :  { %v5892_v0 = vadd.f32 %v13342_v44, %v5805_v42  ;;  %9158 = vmatmul.mubr.msk.bf16.gmra.mrb[248].mxu1 %vm2292_vm0, %v6021_v26  ;;  %9246 = vmatmul.mubr.msk.bf16.gmra.mrb[248].mxu0 %vm2292_vm0, %v6021_v26  ;;  %v5631_v4 = vrot.slane %v13433_v35, 4  ;;  %v4847_v10 = vrot.slane %v13441_v61, 3  ;;  %v13480_v8 = vpop.f32.mrb[189].mxu1  ;;  %v13482_v13 = vpop.f32.mrb[185].mxu0  ;;  %v5627_v47 = vrot.slane %v13443_v1, 4  ;;  %v14843_v1 = vld [vmem:[#allocation4_spill] sm:$0xff] }
 0x5a7   :  { %v5893_v43 = vadd.f32 %v13342_v44, %v5806_v41  ;;  %9161 = vmatprep.mubr.msk.bf16.mxu1 %vm2292_vm0, %v6022_v18  ;;  %9249 = vmatprep.mubr.msk.bf16.mxu0 %vm2292_vm0, %v6022_v18  ;;  %v4853_v15 = vrot.slane %v13449_v22, 3  ;;  %v5633_v63 = vrot.slane %v13451_v6, 4  ;;  %v13490_v37 = vpop.f32.mrb[190].mxu1  ;;  %v13492_v57 = vpop.f32.mrb[186].mxu0  ;;  %v4849_v7 = vrot.slane %v4579_v2, 3  ;;  %v14845_v2 = vld [vmem:[#allocation5_spill] sm:$0xff] }
 0x5a8   :  { %v5972_v56 = vmax.f32 %v5892_v0, 0.0  ;;  %v4848_v52 = vsel %vm4719_vm3, %v4845_v25, %v4847_v10  ;;  %v5629_v28 = vrot.slane %v5351_v19, 4  ;;  %v4595_v30 = vpop.f32.mrb[191].mxu1  ;;  %v13495_v21 = vpop.f32.mrb[187].mxu0  ;;  %v5628_v38 = vsel %vm5507_vm4, %v5625_v50, %v5627_v47 }
 0x5a9   :  { %v5973_v35 = vmax.f32 %v5893_v43, 0.0  ;;  %v5024_v11 = vadd.f32 %v4848_v52, %v14842_v55  ;;  %v4854_v49 = vsel %vm4719_vm3, %v4851_v31, %v4853_v15  ;;  %v5808_v61 = vadd.f32 %v5628_v38, %v5020_v54 }
 0x5aa   :  { %v5027_v36 = vadd.f32 %v4854_v49, %v14843_v1  ;;  %v5634_v59 = vsel %vm5507_vm4, %v5631_v4, %v5633_v63  ;;  %v4850_v22 = vsel %vm4719_vm3, %v4847_v10, %v4849_v7  ;;  %v4852_v6 = vsel %vm4719_vm3, %v4849_v7, %v4851_v31  ;;  %v14846_v10 = vld [vmem:[#allocation153_spill] sm:$0xff] }
 0x5ab   :  { %v5811_v25 = vadd.f32 %v5634_v59, %v5023_v17  ;;  %v5025_v34 = vadd.f32 %v4850_v22, %v14844_v23  ;;  %v5630_v16 = vsel %vm5507_vm4, %v5627_v47, %v5629_v28  ;;  %v5895_v24 = vadd.f32 %v13342_v44, %v5808_v61 }
 0x5ac   :  { %v5026_v50 = vadd.f32 %v4852_v6, %v14845_v2  ;;  %v5632_v19 = vsel %vm5507_vm4, %v5629_v28, %v5631_v4  ;;  %v5809_v51 = vadd.f32 %v5630_v16, %v5021_v5  ;;  %v5974_v54 = vmax.f32 %v13468_v29, 0.0 }
 0x5ad   :  { %v5810_v20 = vadd.f32 %v5632_v19, %v5022_v3  ;;  %v6023_v32 = vpack.c.bf16 %v5971_v58, %v5970_v40  ;;  %v6024_v39 = vpack.c.bf16 %v5973_v35, %v5972_v56  ;;  %v13510_v14 = vpop.f32.mrb[192].mxu1  ;;  %v13512_v17 = vpop.f32.mrb[188].mxu0  ;;  %v5975_v46 = vmax.f32 %v5895_v24, 0.0  ;;  %v14847_v56 = vld [vmem:[#allocation42_spill] sm:$0xff] }
 0x5ae   :  { %v5898_v53 = vadd.f32 %v13342_v44, %v5811_v25  ;;  %v5896_v62 = vadd.f32 %v13342_v44, %v5809_v51  ;;  %v4859_v27 = vrot.slane %v13470_v33, 3  ;;  %v13517_v45 = vpop.f32.mrb[193].mxu1  ;;  %v13519_v60 = vpop.f32.mrb[189].mxu0  ;;  %v5639_v3 = vrot.slane %v13472_v9, 4 }
 0x5af   :  { %v5897_v5 = vadd.f32 %v13342_v44, %v5810_v20  ;;  %9162 = vmatmul.mubr.msk.bf16.gmra.mrb[252].mxu1 %vm2292_vm0, %v6023_v32  ;;  %9250 = vmatmul.mubr.msk.bf16.gmra.mrb[252].mxu0 %vm2292_vm0, %v6023_v32  ;;  %v4855_v12 = vrot.slane %v13480_v8, 3  ;;  %v5635_v40 = vrot.slane %v13482_v13, 4  ;;  %v13527_v48 = vpop.f32.mrb[194].mxu1  ;;  %v13529_v42 = vpop.f32.mrb[190].mxu0  ;;  %v6025_v26 = vpack.c.bf16 %v5975_v46, %v5974_v54 }
 0x5b0   :  { %v5976_v58 = vmax.f32 %v5896_v62, 0.0  ;;  %9165 = vmatprep.mubr.msk.bf16.mxu1 %vm2292_vm0, %v6024_v39  ;;  %9253 = vmatprep.mubr.msk.bf16.mxu0 %vm2292_vm0, %v6024_v39  ;;  %v4861_v29 = vrot.slane %v13490_v37, 3  ;;  %v5641_v41 = vrot.slane %v13492_v57, 4  ;;  %v4611_v18 = vpop.f32.mrb[195].mxu1  ;;  %v13535_v33 = vpop.f32.mrb[191].mxu0  ;;  %v4857_v4 = vrot.slane %v4595_v30, 3 }
 0x5b1   :  { %v5977_v9 = vmax.f32 %v5897_v5, 0.0  ;;  %v4856_v0 = vsel %vm4719_vm3, %v4853_v15, %v4855_v12  ;;  %v5636_v31 = vsel %vm5507_vm4, %v5633_v63, %v5635_v40  ;;  %v14848_v15 = vld [vmem:[#allocation157_spill] sm:$0xff]  ;;  %v14849_v63 = vld [vmem:[#allocation76_spill] sm:$0xff]  ;;  %v5637_v55 = vrot.slane %v13495_v21, 4 }
 0x5b2   :  { %v5028_v8 = vadd.f32 %v4856_v0, %v14846_v10  ;;  %v5812_v13 = vadd.f32 %v5636_v31, %v5024_v11  ;;  %v4862_v43 = vsel %vm4719_vm3, %v4859_v27, %v4861_v29  ;;  %v5642_v47 = vsel %vm5507_vm4, %v5639_v3, %v5641_v41  ;;  %v14852_v31 = vld [vmem:[#allocation11_spill] sm:$0xff] }
 0x5b3   :  { %v5031_v37 = vadd.f32 %v4862_v43, %v14847_v56  ;;  %v5815_v52 = vadd.f32 %v5642_v47, %v5027_v36  ;;  %v4858_v57 = vsel %vm4719_vm3, %v4855_v12, %v4857_v4  ;;  %v4860_v7 = vsel %vm4719_vm3, %v4857_v4, %v4859_v27  ;;  %v14853_v10 = vld [vmem:[#allocation43_spill] sm:$0xff] }
 0x5b4   :  { %v5899_v28 = vadd.f32 %v13342_v44, %v5812_v13  ;;  %v5029_v35 = vadd.f32 %v4858_v57, %v14848_v15  ;;  %v5030_v30 = vadd.f32 %v4860_v7, %v14849_v63  ;;  %v5978_v11 = vmax.f32 %v5898_v53, 0.0  ;;  %v14850_v53 = vld [vmem:[#allocation77_spill] sm:$0xff] }
 0x5b5   :  { %v5902_v38 = vadd.f32 %v13342_v44, %v5815_v52  ;;  %v6026_v49 = vpack.c.bf16 %v5977_v9, %v5976_v58  ;;  %v4867_v61 = vrot.slane %v13510_v14, 3  ;;  %v13551_v1 = vpop.f32.mrb[196].mxu1  ;;  %v13553_v36 = vpop.f32.mrb[192].mxu0  ;;  %v5638_v22 = vsel %vm5507_vm4, %v5635_v40, %v5637_v55 }
 0x5b6   :  { %v5979_v59 = vmax.f32 %v5899_v28, 0.0  ;;  %v5640_v25 = vsel %vm5507_vm4, %v5637_v55, %v5639_v3  ;;  %v4863_v6 = vrot.slane %v13517_v45, 3  ;;  %v13558_v23 = vpop.f32.mrb[197].mxu1  ;;  %v13560_v21 = vpop.f32.mrb[193].mxu0  ;;  %v5813_v16 = vadd.f32 %v5638_v22, %v5025_v34 }
 0x5b7   :  { %v5814_v24 = vadd.f32 %v5640_v25, %v5026_v50  ;;  %9166 = vmatmul.mubr.msk.bf16.gmra.mrb[0].mxu1 %vm2292_vm0, %v6025_v26  ;;  %9254 = vmatmul.mubr.msk.bf16.gmra.mrb[0].mxu0 %vm2292_vm0, %v6025_v26  ;;  %v5647_v2 = vrot.slane %v13512_v17, 4  ;;  %v5643_v19 = vrot.slane %v13519_v60, 4  ;;  %v9012_v51 = vpop.f32.mrb[198].mxu1  ;;  %v13566_v54 = vpop.f32.mrb[194].mxu0  ;;  %v4869_v34 = vrot.slane %v13527_v48, 3  ;;  %v14851_v48 = vld [vmem:[#allocation14_spill] sm:$0xff] }
 0x5b8   :  { %v6027_v20 = vpack.c.bf16 %v5979_v59, %v5978_v11  ;;  %9169 = vmatprep.mubr.msk.bf16.mxu1 %vm2292_vm0, %v6026_v49  ;;  %9257 = vmatprep.mubr.msk.bf16.mxu0 %vm2292_vm0, %v6026_v49  ;;  %v4864_v32 = vsel %vm4719_vm3, %v4861_v29, %v4863_v6  ;;  %v5649_v50 = vrot.slane %v13529_v42, 4  ;;  %v4627_v39 = vpop.f32.mrb[199].mxu1  ;;  %v13573_v14 = vpop.f32.mrb[195].mxu0  ;;  %v5900_v17 = vadd.f32 %v13342_v44, %v5813_v16  ;;  %v14854_v25 = vld [vmem:[#allocation44_spill] sm:$0xff] }
 0x5b9   :  { %v5901_v46 = vadd.f32 %v13342_v44, %v5814_v24  ;;  %v5032_v62 = vadd.f32 %v4864_v32, %v14850_v53  ;;  %v5644_v27 = vsel %vm5507_vm4, %v5641_v41, %v5643_v19  ;;  %v4870_v60 = vsel %vm4719_vm3, %v4867_v61, %v4869_v34  ;;  %v14856_v24 = vld [vmem:[#allocation79_spill] sm:$0xff]  ;;  %v14858_v32 = vld [vmem:[#allocation109_spill] sm:$0xff] }
 0x5ba   :  { %v5816_v45 = vadd.f32 %v5644_v27, %v5028_v8  ;;  %v5650_v5 = vsel %vm5507_vm4, %v5647_v2, %v5649_v50  ;;  %v4865_v3 = vrot.slane %v4611_v18, 3  ;;  %v5980_v12 = vmax.f32 %v5900_v17, 0.0  ;;  %v14859_v53 = vld [vmem:[#allocation45_spill] sm:$0xff] }
 0x5bb   :  { %v5981_v40 = vmax.f32 %v5901_v46, 0.0  ;;  %v5035_v42 = vadd.f32 %v4870_v60, %v14851_v48  ;;  %v5819_v26 = vadd.f32 %v5650_v5, %v5031_v37  ;;  %v5645_v0 = vrot.slane %v13535_v33, 4 }
 0x5bc   :  { %v5903_v58 = vadd.f32 %v13342_v44, %v5816_v45  ;;  %v4866_v29 = vsel %vm4719_vm3, %v4863_v6, %v4865_v3  ;;  %v4868_v9 = vsel %vm4719_vm3, %v4865_v3, %v4867_v61  ;;  %v5982_v41 = vmax.f32 %v5902_v38, 0.0  ;;  %v14860_v45 = vld [vmem:[#allocation78_spill] sm:$0xff] }
 0x5bd   :  { %v5033_v4 = vadd.f32 %v4866_v29, %v14852_v31  ;;  %v5034_v8 = vadd.f32 %v4868_v9, %v14853_v10  ;;  %v6028_v13 = vpack.c.bf16 %v5981_v40, %v5980_v12  ;;  %v13588_v18 = vpop.f32.mrb[196].mxu0  ;;  %v5906_v47 = vadd.f32 %v13342_v44, %v5819_v26 }
 0x5be   :  { %v5983_v43 = vmax.f32 %v5903_v58, 0.0  ;;  %v5646_v56 = vsel %vm5507_vm4, %v5643_v19, %v5645_v0  ;;  %v5648_v37 = vsel %vm5507_vm4, %v5645_v0, %v5647_v2  ;;  %v5412_v52 = vpop.f32.mrb[197].mxu0  ;;  %v4875_v33 = vrot.slane %v13551_v1, 3 }
 0x5bf   :  { %v5817_v57 = vadd.f32 %v5646_v56, %v5029_v35  ;;  %v5818_v7 = vadd.f32 %v5648_v37, %v5030_v30  ;;  %9170 = vmatmul.mubr.msk.bf16.gmra.mrb[4].mxu1 %vm2292_vm0, %v6027_v20  ;;  %9258 = vmatmul.mubr.msk.bf16.gmra.mrb[4].mxu0 %vm2292_vm0, %v6027_v20  ;;  %v5655_v28 = vrot.slane %v13553_v36, 4  ;;  %v9100_v15 = vpop.f32.mrb[198].mxu0  ;;  %v4871_v55 = vrot.slane %v13558_v23, 3 }
 0x5c0   :  { %v6029_v63 = vpack.c.bf16 %v5983_v43, %v5982_v41  ;;  %9173 = vmatprep.mubr.msk.bf16.mxu1 %vm2292_vm0, %v6028_v13  ;;  %9261 = vmatprep.mubr.msk.bf16.mxu0 %vm2292_vm0, %v6028_v13  ;;  %v5651_v11 = vrot.slane %v13560_v21, 4  ;;  %v4877_v35 = vrot.slane %v9012_v51, 3  ;;  %v5415_v30 = vpop.f32.mrb[199].mxu0  ;;  %v5657_v61 = vrot.slane %v13566_v54, 4  ;;  %v14857_v51 = vld [vmem:[#allocation46_spill] sm:$0xff]  ;;  %v14861_v13 = vld [vmem:[#allocation13_spill] sm:$0xff] }
 0x5c1   :  { %v5904_v38 = vadd.f32 %v13342_v44, %v5817_v57  ;;  %v5905_v49 = vadd.f32 %v13342_v44, %v5818_v7  ;;  %v4873_v1 = vrot.slane %v4627_v39, 3  ;;  %v4872_v36 = vsel %vm4719_vm3, %v4869_v34, %v4871_v55 }
 0x5c2   :  { %v5652_v59 = vsel %vm5507_vm4, %v5649_v50, %v5651_v11  ;;  %v4878_v22 = vsel %vm4719_vm3, %v4875_v33, %v4877_v35  ;;  %v14855_v6 = vrot.slane %v14854_v25, 3  ;;  %v5036_v2 = vadd.f32 %v4872_v36, %v14856_v24 }
 0x5c3   :  { %v5984_v21 = vmax.f32 %v5904_v38, 0.0  ;;  %v5985_v16 = vmax.f32 %v5905_v49, 0.0  ;;  %v5820_v19 = vadd.f32 %v5652_v59, %v5032_v62  ;;  %v5039_v20 = vadd.f32 %v4878_v22, %v14857_v51 }
 0x5c4   :  { %v4960_v23 = vsel %vm4719_vm3, %v4877_v35, %v14855_v6  ;;  %v5658_v39 = vsel %vm5507_vm4, %v5655_v28, %v5657_v61  ;;  %v4874_v34 = vsel %vm4719_vm3, %v4871_v55, %v4873_v1  ;;  %v4876_v46 = vsel %vm4719_vm3, %v4873_v1, %v4875_v33 }
 0x5c5   :  { %v5040_v54 = vadd.f32 %v4960_v23, %v14858_v32  ;;  %v5907_v50 = vadd.f32 %v13342_v44, %v5820_v19  ;;  %v5823_v17 = vadd.f32 %v5658_v39, %v5035_v42  ;;  %v5037_v27 = vadd.f32 %v4874_v34, %v14859_v53 }
 0x5c6   :  { %v5038_v60 = vadd.f32 %v4876_v46, %v14860_v45  ;;  %v5653_v5 = vrot.slane %v13573_v14, 4  ;;  %v6030_v62 = vpack.c.bf16 %v5985_v16, %v5984_v21  ;;  %v5986_v3 = vmax.f32 %v5906_v47, 0.0 }
 0x5c7   :  { %v5987_v12 = vmax.f32 %v5907_v50, 0.0  ;;  %9174 = vmatmul.mubr.msk.bf16.gmra.mrb[8].mxu1 %vm2292_vm0, %v6029_v63  ;;  %9262 = vmatmul.mubr.msk.bf16.gmra.mrb[8].mxu0 %vm2292_vm0, %v6029_v63  ;;  %v5659_v40 = vrot.slane %v5412_v52, 4  ;;  %v5665_v48 = vrot.slane %v9100_v15, 4  ;;  %v5663_v58 = vrot.slane %v13588_v18, 4 }
 0x5c8   :  { %v5654_v26 = vsel %vm5507_vm4, %v5651_v11, %v5653_v5  ;;  %v5656_v42 = vsel %vm5507_vm4, %v5653_v5, %v5655_v28  ;;  %9177 = vmatprep.mubr.msk.bf16.mxu1 %vm2292_vm0, %v6030_v62  ;;  %9265 = vmatprep.mubr.msk.bf16.mxu0 %vm2292_vm0, %v6030_v62  ;;  %v5661_v14 = vrot.slane %v5415_v30, 4  ;;  %v5910_v9 = vadd.f32 %v13342_v44, %v5823_v17  ;;  %v13656_v17 = vld [vmem:[%s14100_s6] ss:$0 sm:$0xff] }
 0x5c9   :  { %v6031_v29 = vpack.c.bf16 %v5987_v12, %v5986_v3  ;;  %v5821_v0 = vadd.f32 %v5654_v26, %v5033_v4  ;;  %v5822_v41 = vadd.f32 %v5656_v42, %v5034_v8  ;;  %v5660_v31 = vsel %vm5507_vm4, %v5657_v61, %v5659_v40 }
 0x5ca   :  { %v5666_v10 = vsel %vm5507_vm4, %v5663_v58, %v5665_v48  ;;  %v14862_v43 = vrot.slane %v14861_v13, 4  ;;  %v5662_v56 = vsel %vm5507_vm4, %v5659_v40, %v5661_v14  ;;  %v5824_v52 = vadd.f32 %v5660_v31, %v5036_v2 }
 0x5cb   :  { %v5908_v37 = vadd.f32 %v13342_v44, %v5821_v0  ;;  %v5909_v18 = vadd.f32 %v13342_v44, %v5822_v41  ;;  %v5827_v57 = vadd.f32 %v5666_v10, %v5039_v20  ;;  %v5664_v4 = vsel %vm5507_vm4, %v5661_v14, %v5663_v58 }
 0x5cc   :  { %v5748_v47 = vsel %vm5507_vm4, %v5665_v48, %v14862_v43  ;;  %v5825_v8 = vadd.f32 %v5662_v56, %v5037_v27  ;;  %v5911_v15 = vadd.f32 %v13342_v44, %v5824_v52  ;;  %v5826_v11 = vadd.f32 %v5664_v4, %v5038_v60 }
 0x5cd   :  { %v5828_v7 = vadd.f32 %v5748_v47, %v5040_v54  ;;  %v5988_v33 = vmax.f32 %v5908_v37, 0.0  ;;  %v5989_v28 = vmax.f32 %v5909_v18, 0.0  ;;  %v5914_v63 = vadd.f32 %v13342_v44, %v5827_v57 }
 0x5ce   :  { %v5912_v35 = vadd.f32 %v13342_v44, %v5825_v8  ;;  %v5990_v30 = vmax.f32 %v5910_v9, 0.0  ;;  %v5991_v38 = vmax.f32 %v5911_v15, 0.0  ;;  %v5913_v36 = vadd.f32 %v13342_v44, %v5826_v11 }
 0x5cf   :  { %v5915_v55 = vadd.f32 %v13342_v44, %v5828_v7  ;;  %v5994_v49 = vmax.f32 %v5914_v63, 0.0  ;;  %9178 = vmatmul.mubr.msk.bf16.gmra.mrb[12].mxu1 %vm2292_vm0, %v6031_v29  ;;  %9266 = vmatmul.mubr.msk.bf16.gmra.mrb[12].mxu0 %vm2292_vm0, %v6031_v29  ;;  %v6032_v61 = vpack.c.bf16 %v5989_v28, %v5988_v33 }
 0x5d0   :  { %v5992_v59 = vmax.f32 %v5912_v35, 0.0  ;;  %v6033_v22 = vpack.c.bf16 %v5991_v38, %v5990_v30  ;;  %v5993_v6 = vmax.f32 %v5913_v36, 0.0 }
 0x5d1   :  { %v5995_v1 = vmax.f32 %v5915_v55, 0.0  ;;  %9181 = vmatprep.mubr.msk.bf16.mxu1 %vm2292_vm0, %v6032_v61  ;;  %9269 = vmatprep.mubr.msk.bf16.mxu0 %vm2292_vm0, %v6032_v61 }
 0x5d2   :  { %v6034_v23 = vpack.c.bf16 %v5993_v6, %v5992_v59 }
 0x5d3   :  { %v6035_v25 = vpack.c.bf16 %v5995_v1, %v5994_v49 }
 0x5d7   :  { %9182 = vmatmul.mubr.msk.bf16.gmra.mrb[16].mxu1 %vm2292_vm0, %v6033_v22  ;;  %9270 = vmatmul.mubr.msk.bf16.gmra.mrb[16].mxu0 %vm2292_vm0, %v6033_v22 }
 0x5d8   :  { %9185 = vmatprep.mubr.msk.bf16.mxu1 %vm2292_vm0, %v6034_v23  ;;  %9273 = vmatprep.mubr.msk.bf16.mxu0 %vm2292_vm0, %v6034_v23 }
 0x5df   :  { %9186 = vmatmul.mubr.msk.bf16.gmra.mrb[20].mxu1 %vm2292_vm0, %v6035_v25  ;;  %9274 = vmatmul.mubr.msk.bf16.gmra.mrb[20].mxu0 %vm2292_vm0, %v6035_v25 }
 0x60e   :  { %v9111_v44 = vpop.f32.mrb[200].mxu1  ;;  %v9199_v21 = vpop.f32.mrb[200].mxu0 }
 0x60f   :  { %v6231_v16 = vpop.f32.mrb[201].mxu1  ;;  %v6929_v24 = vpop.f32.mrb[201].mxu0  ;;  %v6633_v51 = vrot.slane %v9111_v44, 1 }
 0x610   :  { %v9112_v2 = vpop.f32.mrb[202].mxu1  ;;  %v9200_v19 = vpop.f32.mrb[202].mxu0  ;;  %v6630_v39 = vrot.slane %v6231_v16, 1 }
 0x611   :  { %v6635_v20 = vrot.slane %v9112_v2, 1  ;;  %v6234_v32 = vpop.f32.mrb[203].mxu1  ;;  %v6932_v54 = vpop.f32.mrb[203].mxu0 }
 0x612   :  { %v6631_v34 = vrot.slane %v6234_v32, 1 }
 0x613   :  { %v6636_v50 = vsel %vm2846_vm1, %v6633_v51, %v6635_v20 }
 0x614   :  { %v6938_v46 = vadd.f32 %v9199_v21, %v6636_v50  ;;  %v6632_v53 = vsel %vm2846_vm1, %v6630_v39, %v6631_v34  ;;  %v6634_v27 = vsel %vm2846_vm1, %v6631_v34, %v6633_v51 }
 0x615   :  { %v6930_v45 = vadd.f32 %v6929_v24, %v6632_v53  ;;  %v6933_v60 = vadd.f32 %v6932_v54, %v6634_v27 }
 0x616   :  { %v7257_v5 = vadd.f32 %v13656_v17, %v6938_v46 }
 0x617   :  { %v7255_v62 = vadd.f32 %v13656_v17, %v6930_v45  ;;  %v7256_v3 = vadd.f32 %v13656_v17, %v6933_v60 }
 0x618   :  { %v7337_v12 = vmax.f32 %v7257_v5, 0.0 }
 0x619   :  { %v7335_v40 = vmax.f32 %v7255_v62, 0.0  ;;  %v7336_v48 = vmax.f32 %v7256_v3, 0.0 }
 0x61a   :  { %v8283_v26 = vpack.c.bf16 %v7337_v12, %v7337_v12 }
 0x61b   :  { %v8281_v42 = vpack.c.bf16 %v7335_v40, %v7335_v40  ;;  %v8282_v58 = vpack.c.bf16 %v7336_v48, %v7336_v48  ;;  %v9115_v14 = vpop.f32.mrb[204].mxu1  ;;  %v9203_v29 = vpop.f32.mrb[204].mxu0 }
 0x61c   :  { %7490 = vst.msk [vmem:[%s14101_s7 + $0x8] sm:$0xf] %vm7487_vm5, %v8283_v26  ;;  %v6247_v9 = vpop.f32.mrb[205].mxu1  ;;  %v6945_v0 = vpop.f32.mrb[205].mxu0  ;;  %v6641_v13 = vrot.slane %v9115_v14, 1 }
 0x61d   :  { %7488 = vst.msk [vmem:[%s14101_s7] sm:$0xf] %vm7487_vm5, %v8281_v42  ;;  %7489 = vst.msk [vmem:[%s14101_s7 + $0x4] sm:$0xf] %vm7487_vm5, %v8282_v58  ;;  %v6637_v41 = vrot.slane %v6247_v9, 1  ;;  %v9116_v31 = vpop.f32.mrb[206].mxu1 }
 0x61e   :  { %v9204_v10 = vpop.f32.mrb[206].mxu0  ;;  %v6643_v43 = vrot.slane %v9116_v31, 1  ;;  %v6250_v47 = vpop.f32.mrb[207].mxu1 }
 0x61f   :  { %v6948_v56 = vpop.f32.mrb[207].mxu0  ;;  %v6638_v37 = vsel %vm2846_vm1, %v6635_v20, %v6637_v41  ;;  %v6639_v18 = vrot.slane %v6250_v47, 1 }
 0x620   :  { %v6941_v52 = vadd.f32 %v9200_v19, %v6638_v37  ;;  %v6644_v57 = vsel %vm2846_vm1, %v6641_v13, %v6643_v43 }
 0x621   :  { %v6954_v7 = vadd.f32 %v9203_v29, %v6644_v57  ;;  %v6640_v4 = vsel %vm2846_vm1, %v6637_v41, %v6639_v18  ;;  %v6642_v8 = vsel %vm2846_vm1, %v6639_v18, %v6641_v13 }
 0x622   :  { %v7258_v33 = vadd.f32 %v13656_v17, %v6941_v52  ;;  %v6946_v28 = vadd.f32 %v6945_v0, %v6640_v4  ;;  %v6949_v15 = vadd.f32 %v6948_v56, %v6642_v8 }
 0x623   :  { %v7261_v63 = vadd.f32 %v13656_v17, %v6954_v7 }
 0x624   :  { %v7338_v55 = vmax.f32 %v7258_v33, 0.0  ;;  %v7259_v11 = vadd.f32 %v13656_v17, %v6946_v28  ;;  %v7260_v35 = vadd.f32 %v13656_v17, %v6949_v15  ;;  %v9119_v30 = vpop.f32.mrb[208].mxu1  ;;  %v9207_v38 = vpop.f32.mrb[208].mxu0 }
 0x625   :  { %v7341_v49 = vmax.f32 %v7261_v63, 0.0  ;;  %v6263_v61 = vpop.f32.mrb[209].mxu1  ;;  %v6961_v1 = vpop.f32.mrb[209].mxu0  ;;  %v6649_v21 = vrot.slane %v9119_v30, 1 }
 0x626   :  { %v8284_v36 = vpack.c.bf16 %v7338_v55, %v7338_v55  ;;  %v7339_v59 = vmax.f32 %v7259_v11, 0.0  ;;  %v7340_v22 = vmax.f32 %v7260_v35, 0.0  ;;  %v6645_v25 = vrot.slane %v6263_v61, 1  ;;  %v9120_v6 = vpop.f32.mrb[210].mxu1  ;;  %v9208_v23 = vpop.f32.mrb[210].mxu0 }
 0x627   :  { %v8287_v44 = vpack.c.bf16 %v7341_v49, %v7341_v49  ;;  %v6651_v16 = vrot.slane %v9120_v6, 1  ;;  %v6266_v24 = vpop.f32.mrb[211].mxu1  ;;  %v6964_v2 = vpop.f32.mrb[211].mxu0 }
 0x628   :  { %7491 = vst.msk [vmem:[%s14101_s7 + $0xc] sm:$0xf] %vm7487_vm5, %v8284_v36  ;;  %v8285_v19 = vpack.c.bf16 %v7339_v59, %v7339_v59  ;;  %v8286_v51 = vpack.c.bf16 %v7340_v22, %v7340_v22  ;;  %v6646_v20 = vsel %vm2846_vm1, %v6643_v43, %v6645_v25  ;;  %v6647_v32 = vrot.slane %v6266_v24, 1 }
 0x629   :  { %7494 = vst.msk [vmem:[%s14101_s7 + $0x18] sm:$0xf] %vm7487_vm5, %v8287_v44  ;;  %v6957_v54 = vadd.f32 %v9204_v10, %v6646_v20  ;;  %v6652_v39 = vsel %vm2846_vm1, %v6649_v21, %v6651_v16 }
 0x62a   :  { %7492 = vst.msk [vmem:[%s14101_s7 + $0x10] sm:$0xf] %vm7487_vm5, %v8285_v19  ;;  %7493 = vst.msk [vmem:[%s14101_s7 + $0x14] sm:$0xf] %vm7487_vm5, %v8286_v51  ;;  %v6970_v34 = vadd.f32 %v9207_v38, %v6652_v39  ;;  %v6648_v50 = vsel %vm2846_vm1, %v6645_v25, %v6647_v32 }
 0x62b   :  { %v7262_v46 = vadd.f32 %v13656_v17, %v6957_v54  ;;  %v6962_v53 = vadd.f32 %v6961_v1, %v6648_v50 }
 0x62c   :  { %v7265_v27 = vadd.f32 %v13656_v17, %v6970_v34 }
 0x62d   :  { %v7342_v45 = vmax.f32 %v7262_v46, 0.0  ;;  %v7263_v60 = vadd.f32 %v13656_v17, %v6962_v53  ;;  %v9123_v5 = vpop.f32.mrb[212].mxu1  ;;  %v9211_v62 = vpop.f32.mrb[212].mxu0 }
 0x62e   :  { %v7345_v3 = vmax.f32 %v7265_v27, 0.0  ;;  %v6279_v12 = vpop.f32.mrb[213].mxu1  ;;  %v6977_v40 = vpop.f32.mrb[213].mxu0  ;;  %v6657_v9 = vrot.slane %v9123_v5, 1 }
 0x62f   :  { %v8288_v48 = vpack.c.bf16 %v7342_v45, %v7342_v45  ;;  %v7343_v26 = vmax.f32 %v7263_v60, 0.0  ;;  %v6653_v42 = vrot.slane %v6279_v12, 1  ;;  %v9124_v58 = vpop.f32.mrb[214].mxu1  ;;  %v9212_v14 = vpop.f32.mrb[214].mxu0 }
 0x630   :  { %v8290_v29 = vpack.c.bf16 %v7345_v3, %v7345_v3  ;;  %v6659_v0 = vrot.slane %v9124_v58, 1  ;;  %v6282_v41 = vpop.f32.mrb[215].mxu1  ;;  %v6980_v31 = vpop.f32.mrb[215].mxu0 }
 0x631   :  { %7495 = vst.msk [vmem:[%s14101_s7 + $0x1c] sm:$0xf] %vm7487_vm5, %v8288_v48  ;;  %v8289_v10 = vpack.c.bf16 %v7343_v26, %v7343_v26  ;;  %v6654_v13 = vsel %vm2846_vm1, %v6651_v16, %v6653_v42  ;;  %v6655_v43 = vrot.slane %v6282_v41, 1 }
 0x632   :  { %8164 = vst.msk [vmem:[%s14101_s7 + $0x24] sm:$0xf] %vm7487_vm5, %v8290_v29  ;;  %v6973_v47 = vadd.f32 %v9208_v23, %v6654_v13  ;;  %v6660_v56 = vsel %vm2846_vm1, %v6657_v9, %v6659_v0 }
 0x633   :  { %7496 = vst.msk [vmem:[%s14101_s7 + $0x20] sm:$0xf] %vm7487_vm5, %v8289_v10  ;;  %v6986_v37 = vadd.f32 %v9211_v62, %v6660_v56  ;;  %v6656_v18 = vsel %vm2846_vm1, %v6653_v42, %v6655_v43  ;;  %v6658_v52 = vsel %vm2846_vm1, %v6655_v43, %v6657_v9 }
 0x634   :  { %v7266_v57 = vadd.f32 %v13656_v17, %v6973_v47  ;;  %v6978_v7 = vadd.f32 %v6977_v40, %v6656_v18  ;;  %v6981_v4 = vadd.f32 %v6980_v31, %v6658_v52 }
 0x635   :  { %v7269_v8 = vadd.f32 %v13656_v17, %v6986_v37  ;;  %v9127_v33 = vpop.f32.mrb[216].mxu1  ;;  %v9215_v28 = vpop.f32.mrb[216].mxu0 }
 0x636   :  { %v7346_v15 = vmax.f32 %v7266_v57, 0.0  ;;  %v7267_v63 = vadd.f32 %v13656_v17, %v6978_v7  ;;  %v7268_v55 = vadd.f32 %v13656_v17, %v6981_v4  ;;  %v6295_v11 = vpop.f32.mrb[217].mxu1  ;;  %v6993_v35 = vpop.f32.mrb[217].mxu0  ;;  %v6665_v38 = vrot.slane %v9127_v33, 1 }
 0x637   :  { %v7349_v30 = vmax.f32 %v7269_v8, 0.0  ;;  %v6661_v49 = vrot.slane %v6295_v11, 1  ;;  %v9128_v61 = vpop.f32.mrb[218].mxu1  ;;  %v9216_v1 = vpop.f32.mrb[218].mxu0 }
 0x638   :  { %v8291_v36 = vpack.c.bf16 %v7346_v15, %v7346_v15  ;;  %v7347_v59 = vmax.f32 %v7267_v63, 0.0  ;;  %v7348_v22 = vmax.f32 %v7268_v55, 0.0  ;;  %v6667_v25 = vrot.slane %v9128_v61, 1  ;;  %v6298_v6 = vpop.f32.mrb[219].mxu1  ;;  %v6996_v23 = vpop.f32.mrb[219].mxu0 }
 0x639   :  { %v8294_v44 = vpack.c.bf16 %v7349_v30, %v7349_v30  ;;  %v6662_v21 = vsel %vm2846_vm1, %v6659_v0, %v6661_v49  ;;  %v6663_v16 = vrot.slane %v6298_v6, 1 }
 0x63a   :  { %8165 = vst.msk [vmem:[%s14101_s7 + $0x28] sm:$0xf] %vm7487_vm5, %v8291_v36  ;;  %v8292_v24 = vpack.c.bf16 %v7347_v59, %v7347_v59  ;;  %v8293_v2 = vpack.c.bf16 %v7348_v22, %v7348_v22  ;;  %v6989_v19 = vadd.f32 %v9212_v14, %v6662_v21  ;;  %v6668_v51 = vsel %vm2846_vm1, %v6665_v38, %v6667_v25 }
 0x63b   :  { %8168 = vst.msk [vmem:[%s14101_s7 + $0x34] sm:$0xf] %vm7487_vm5, %v8294_v44  ;;  %v7002_v20 = vadd.f32 %v9215_v28, %v6668_v51  ;;  %v6664_v32 = vsel %vm2846_vm1, %v6661_v49, %v6663_v16  ;;  %v6666_v54 = vsel %vm2846_vm1, %v6663_v16, %v6665_v38 }
 0x63c   :  { %8166 = vst.msk [vmem:[%s14101_s7 + $0x2c] sm:$0xf] %vm7487_vm5, %v8292_v24  ;;  %8167 = vst.msk [vmem:[%s14101_s7 + $0x30] sm:$0xf] %vm7487_vm5, %v8293_v2  ;;  %v7270_v39 = vadd.f32 %v13656_v17, %v6989_v19  ;;  %v6994_v34 = vadd.f32 %v6993_v35, %v6664_v32  ;;  %v6997_v50 = vadd.f32 %v6996_v23, %v6666_v54 }
 0x63d   :  { %v7273_v46 = vadd.f32 %v13656_v17, %v7002_v20 }
 0x63e   :  { %v7350_v53 = vmax.f32 %v7270_v39, 0.0  ;;  %v7271_v27 = vadd.f32 %v13656_v17, %v6994_v34  ;;  %v7272_v45 = vadd.f32 %v13656_v17, %v6997_v50  ;;  %v9131_v60 = vpop.f32.mrb[220].mxu1  ;;  %v9219_v5 = vpop.f32.mrb[220].mxu0 }
 0x63f   :  { %v7353_v62 = vmax.f32 %v7273_v46, 0.0  ;;  %v6311_v3 = vpop.f32.mrb[221].mxu1  ;;  %v7009_v12 = vpop.f32.mrb[221].mxu0  ;;  %v6673_v29 = vrot.slane %v9131_v60, 1 }
 0x640   :  { %v8295_v40 = vpack.c.bf16 %v7350_v53, %v7350_v53  ;;  %v7351_v48 = vmax.f32 %v7271_v27, 0.0  ;;  %v7352_v26 = vmax.f32 %v7272_v45, 0.0  ;;  %v9132_v42 = vpop.f32.mrb[222].mxu1  ;;  %v9220_v58 = vpop.f32.mrb[222].mxu0  ;;  %v6669_v13 = vrot.slane %v6311_v3, 1 }
 0x641   :  { %v8298_v14 = vpack.c.bf16 %v7353_v62, %v7353_v62  ;;  %v6675_v9 = vrot.slane %v9132_v42, 1  ;;  %v6314_v0 = vpop.f32.mrb[223].mxu1  ;;  %v7012_v41 = vpop.f32.mrb[223].mxu0 }
 0x642   :  { %8169 = vst.msk [vmem:[%s14101_s7 + $0x38] sm:$0xf] %vm7487_vm5, %v8295_v40  ;;  %v8296_v31 = vpack.c.bf16 %v7351_v48, %v7351_v48  ;;  %v8297_v10 = vpack.c.bf16 %v7352_v26, %v7352_v26  ;;  %v6671_v43 = vrot.slane %v6314_v0, 1 }
 0x643   :  { %8172 = vst.msk [vmem:[%s14101_s7 + $0x44] sm:$0xf] %vm7487_vm5, %v8298_v14  ;;  %v6676_v47 = vsel %vm2846_vm1, %v6673_v29, %v6675_v9 }
 0x644   :  { %8170 = vst.msk [vmem:[%s14101_s7 + $0x3c] sm:$0xf] %vm7487_vm5, %v8296_v31  ;;  %8171 = vst.msk [vmem:[%s14101_s7 + $0x40] sm:$0xf] %vm7487_vm5, %v8297_v10  ;;  %v7018_v56 = vadd.f32 %v9219_v5, %v6676_v47  ;;  %v6672_v37 = vsel %vm2846_vm1, %v6669_v13, %v6671_v43  ;;  %v6674_v18 = vsel %vm2846_vm1, %v6671_v43, %v6673_v29 }
 0x645   :  { %v7010_v52 = vadd.f32 %v7009_v12, %v6672_v37  ;;  %v7013_v57 = vadd.f32 %v7012_v41, %v6674_v18 }
 0x646   :  { %v7277_v7 = vadd.f32 %v13656_v17, %v7018_v56  ;;  %v9135_v4 = vpop.f32.mrb[224].mxu1  ;;  %v9223_v8 = vpop.f32.mrb[224].mxu0 }
 0x647   :  { %v7275_v33 = vadd.f32 %v13656_v17, %v7010_v52  ;;  %v7276_v28 = vadd.f32 %v13656_v17, %v7013_v57  ;;  %v6327_v15 = vpop.f32.mrb[225].mxu1  ;;  %v7025_v63 = vpop.f32.mrb[225].mxu0  ;;  %v6681_v61 = vrot.slane %v9135_v4, 1 }
 0x648   :  { %v7357_v55 = vmax.f32 %v7277_v7, 0.0  ;;  %v6677_v11 = vrot.slane %v6327_v15, 1  ;;  %v9136_v35 = vpop.f32.mrb[226].mxu1  ;;  %v9224_v30 = vpop.f32.mrb[226].mxu0 }
 0x649   :  { %v7355_v38 = vmax.f32 %v7275_v33, 0.0  ;;  %v7356_v49 = vmax.f32 %v7276_v28, 0.0  ;;  %v6683_v1 = vrot.slane %v9136_v35, 1  ;;  %v6330_v36 = vpop.f32.mrb[227].mxu1  ;;  %v7028_v59 = vpop.f32.mrb[227].mxu0 }
 0x64a   :  { %v8301_v22 = vpack.c.bf16 %v7357_v55, %v7357_v55  ;;  %v6678_v25 = vsel %vm2846_vm1, %v6675_v9, %v6677_v11  ;;  %v6679_v6 = vrot.slane %v6330_v36, 1 }
 0x64b   :  { %v8299_v23 = vpack.c.bf16 %v7355_v38, %v7355_v38  ;;  %v8300_v44 = vpack.c.bf16 %v7356_v49, %v7356_v49  ;;  %v7021_v21 = vadd.f32 %v9220_v58, %v6678_v25  ;;  %v6684_v16 = vsel %vm2846_vm1, %v6681_v61, %v6683_v1 }
 0x64c   :  { %8184 = vst.msk [vmem:[%s14101_s7 + $0x50] sm:$0xf] %vm7487_vm5, %v8301_v22  ;;  %v7034_v24 = vadd.f32 %v9223_v8, %v6684_v16  ;;  %v6680_v2 = vsel %vm2846_vm1, %v6677_v11, %v6679_v6  ;;  %v6682_v19 = vsel %vm2846_vm1, %v6679_v6, %v6681_v61 }
 0x64d   :  { %8182 = vst.msk [vmem:[%s14101_s7 + $0x48] sm:$0xf] %vm7487_vm5, %v8299_v23  ;;  %8183 = vst.msk [vmem:[%s14101_s7 + $0x4c] sm:$0xf] %vm7487_vm5, %v8300_v44  ;;  %v7278_v51 = vadd.f32 %v13656_v17, %v7021_v21  ;;  %v7026_v20 = vadd.f32 %v7025_v63, %v6680_v2  ;;  %v7029_v32 = vadd.f32 %v7028_v59, %v6682_v19 }
 0x64e   :  { %v7281_v54 = vadd.f32 %v13656_v17, %v7034_v24 }
 0x64f   :  { %v7358_v39 = vmax.f32 %v7278_v51, 0.0  ;;  %v7279_v34 = vadd.f32 %v13656_v17, %v7026_v20  ;;  %v7280_v50 = vadd.f32 %v13656_v17, %v7029_v32  ;;  %v9139_v46 = vpop.f32.mrb[228].mxu1  ;;  %v9227_v53 = vpop.f32.mrb[228].mxu0 }
 0x650   :  { %v7361_v27 = vmax.f32 %v7281_v54, 0.0  ;;  %v6343_v45 = vpop.f32.mrb[229].mxu1  ;;  %v7041_v60 = vpop.f32.mrb[229].mxu0  ;;  %v6689_v42 = vrot.slane %v9139_v46, 1 }
 0x651   :  { %v8302_v5 = vpack.c.bf16 %v7358_v39, %v7358_v39  ;;  %v7359_v62 = vmax.f32 %v7279_v34, 0.0  ;;  %v7360_v3 = vmax.f32 %v7280_v50, 0.0  ;;  %v6685_v12 = vrot.slane %v6343_v45, 1  ;;  %v9140_v40 = vpop.f32.mrb[230].mxu1  ;;  %v9228_v48 = vpop.f32.mrb[230].mxu0 }
 0x652   :  { %v8305_v26 = vpack.c.bf16 %v7361_v27, %v7361_v27  ;;  %v6691_v58 = vrot.slane %v9140_v40, 1  ;;  %v6346_v14 = vpop.f32.mrb[231].mxu1  ;;  %v7044_v29 = vpop.f32.mrb[231].mxu0 }
 0x653   :  { %8185 = vst.msk [vmem:[%s14101_s7 + $0x54] sm:$0xf] %vm7487_vm5, %v8302_v5  ;;  %v8303_v9 = vpack.c.bf16 %v7359_v62, %v7359_v62  ;;  %v8304_v0 = vpack.c.bf16 %v7360_v3, %v7360_v3  ;;  %v6686_v41 = vsel %vm2846_vm1, %v6683_v1, %v6685_v12  ;;  %v6687_v31 = vrot.slane %v6346_v14, 1 }
 0x654   :  { %8188 = vst.msk [vmem:[%s14101_s7 + $0x60] sm:$0xf] %vm7487_vm5, %v8305_v26  ;;  %v7037_v10 = vadd.f32 %v9224_v30, %v6686_v41  ;;  %v6692_v13 = vsel %vm2846_vm1, %v6689_v42, %v6691_v58 }
 0x655   :  { %8186 = vst.msk [vmem:[%s14101_s7 + $0x58] sm:$0xf] %vm7487_vm5, %v8303_v9  ;;  %8187 = vst.msk [vmem:[%s14101_s7 + $0x5c] sm:$0xf] %vm7487_vm5, %v8304_v0  ;;  %v7050_v43 = vadd.f32 %v9227_v53, %v6692_v13  ;;  %v6688_v47 = vsel %vm2846_vm1, %v6685_v12, %v6687_v31 }
 0x656   :  { %v7282_v56 = vadd.f32 %v13656_v17, %v7037_v10  ;;  %v7042_v37 = vadd.f32 %v7041_v60, %v6688_v47 }
 0x657   :  { %v7285_v18 = vadd.f32 %v13656_v17, %v7050_v43  ;;  %v9143_v52 = vpop.f32.mrb[232].mxu1  ;;  %v9231_v57 = vpop.f32.mrb[232].mxu0 }
 0x658   :  { %v7362_v7 = vmax.f32 %v7282_v56, 0.0  ;;  %v7283_v4 = vadd.f32 %v13656_v17, %v7042_v37  ;;  %v6359_v8 = vpop.f32.mrb[233].mxu1  ;;  %v7057_v33 = vpop.f32.mrb[233].mxu0  ;;  %v6697_v30 = vrot.slane %v9143_v52, 1 }
 0x659   :  { %v7365_v28 = vmax.f32 %v7285_v18, 0.0  ;;  %v6693_v15 = vrot.slane %v6359_v8, 1  ;;  %v9144_v63 = vpop.f32.mrb[234].mxu1  ;;  %v9232_v55 = vpop.f32.mrb[234].mxu0 }
 0x65a   :  { %v8306_v11 = vpack.c.bf16 %v7362_v7, %v7362_v7  ;;  %v7363_v35 = vmax.f32 %v7283_v4, 0.0  ;;  %v6699_v38 = vrot.slane %v9144_v63, 1  ;;  %v6362_v49 = vpop.f32.mrb[235].mxu1  ;;  %v7060_v61 = vpop.f32.mrb[235].mxu0 }
 0x65b   :  { %v8308_v1 = vpack.c.bf16 %v7365_v28, %v7365_v28  ;;  %v6694_v36 = vsel %vm2846_vm1, %v6691_v58, %v6693_v15  ;;  %v6695_v59 = vrot.slane %v6362_v49, 1 }
 0x65c   :  { %8189 = vst.msk [vmem:[%s14101_s7 + $0x64] sm:$0xf] %vm7487_vm5, %v8306_v11  ;;  %v8307_v22 = vpack.c.bf16 %v7363_v35, %v7363_v35  ;;  %v7053_v25 = vadd.f32 %v9228_v48, %v6694_v36  ;;  %v6700_v6 = vsel %vm2846_vm1, %v6697_v30, %v6699_v38 }
 0x65d   :  { %8200 = vst.msk [vmem:[%s14101_s7 + $0x6c] sm:$0xf] %vm7487_vm5, %v8308_v1  ;;  %v7066_v23 = vadd.f32 %v9231_v57, %v6700_v6  ;;  %v6696_v44 = vsel %vm2846_vm1, %v6693_v15, %v6695_v59  ;;  %v6698_v21 = vsel %vm2846_vm1, %v6695_v59, %v6697_v30 }
 0x65e   :  { %8190 = vst.msk [vmem:[%s14101_s7 + $0x68] sm:$0xf] %vm7487_vm5, %v8307_v22  ;;  %v7286_v16 = vadd.f32 %v13656_v17, %v7053_v25  ;;  %v7058_v24 = vadd.f32 %v7057_v33, %v6696_v44  ;;  %v7061_v2 = vadd.f32 %v7060_v61, %v6698_v21 }
 0x65f   :  { %v7289_v19 = vadd.f32 %v13656_v17, %v7066_v23 }
 0x660   :  { %v7366_v51 = vmax.f32 %v7286_v16, 0.0  ;;  %v7287_v20 = vadd.f32 %v13656_v17, %v7058_v24  ;;  %v7288_v32 = vadd.f32 %v13656_v17, %v7061_v2  ;;  %v9147_v54 = vpop.f32.mrb[236].mxu1  ;;  %v9235_v39 = vpop.f32.mrb[236].mxu0 }
 0x661   :  { %v7369_v34 = vmax.f32 %v7289_v19, 0.0  ;;  %v6375_v50 = vpop.f32.mrb[237].mxu1  ;;  %v7073_v46 = vpop.f32.mrb[237].mxu0  ;;  %v6705_v12 = vrot.slane %v9147_v54, 1 }
 0x662   :  { %v8309_v53 = vpack.c.bf16 %v7366_v51, %v7366_v51  ;;  %v7367_v27 = vmax.f32 %v7287_v20, 0.0  ;;  %v7368_v45 = vmax.f32 %v7288_v32, 0.0  ;;  %v6701_v60 = vrot.slane %v6375_v50, 1  ;;  %v9148_v5 = vpop.f32.mrb[238].mxu1  ;;  %v9236_v62 = vpop.f32.mrb[238].mxu0 }
 0x663   :  { %v8312_v3 = vpack.c.bf16 %v7369_v34, %v7369_v34  ;;  %v6707_v40 = vrot.slane %v9148_v5, 1  ;;  %v6378_v48 = vpop.f32.mrb[239].mxu1  ;;  %v7076_v26 = vpop.f32.mrb[239].mxu0 }
 0x664   :  { %8201 = vst.msk [vmem:[%s14101_s7 + $0x70] sm:$0xf] %vm7487_vm5, %v8309_v53  ;;  %v8310_v42 = vpack.c.bf16 %v7367_v27, %v7367_v27  ;;  %v8311_v58 = vpack.c.bf16 %v7368_v45, %v7368_v45  ;;  %v6702_v14 = vsel %vm2846_vm1, %v6699_v38, %v6701_v60  ;;  %v6703_v29 = vrot.slane %v6378_v48, 1 }
 0x665   :  { %8204 = vst.msk [vmem:[%s14101_s7 + $0x7c] sm:$0xf] %vm7487_vm5, %v8312_v3  ;;  %v7069_v9 = vadd.f32 %v9232_v55, %v6702_v14  ;;  %v6708_v0 = vsel %vm2846_vm1, %v6705_v12, %v6707_v40 }
 0x666   :  { %8202 = vst.msk [vmem:[%s14101_s7 + $0x74] sm:$0xf] %vm7487_vm5, %v8310_v42  ;;  %8203 = vst.msk [vmem:[%s14101_s7 + $0x78] sm:$0xf] %vm7487_vm5, %v8311_v58  ;;  %v7082_v41 = vadd.f32 %v9235_v39, %v6708_v0  ;;  %v6704_v31 = vsel %vm2846_vm1, %v6701_v60, %v6703_v29  ;;  %v6706_v10 = vsel %vm2846_vm1, %v6703_v29, %v6705_v12 }
 0x667   :  { %v7290_v13 = vadd.f32 %v13656_v17, %v7069_v9  ;;  %v7074_v43 = vadd.f32 %v7073_v46, %v6704_v31  ;;  %v7077_v47 = vadd.f32 %v7076_v26, %v6706_v10 }
 0x668   :  { %v7293_v56 = vadd.f32 %v13656_v17, %v7082_v41  ;;  %v9151_v37 = vpop.f32.mrb[240].mxu1  ;;  %v9239_v18 = vpop.f32.mrb[240].mxu0 }
 0x669   :  { %v7370_v52 = vmax.f32 %v7290_v13, 0.0  ;;  %v7291_v57 = vadd.f32 %v13656_v17, %v7074_v43  ;;  %v7292_v7 = vadd.f32 %v13656_v17, %v7077_v47  ;;  %v6391_v4 = vpop.f32.mrb[241].mxu1  ;;  %v7089_v8 = vpop.f32.mrb[241].mxu0  ;;  %v6713_v28 = vrot.slane %v9151_v37, 1 }
 0x66a   :  { %v7373_v33 = vmax.f32 %v7293_v56, 0.0  ;;  %v9152_v15 = vpop.f32.mrb[242].mxu1  ;;  %v9240_v63 = vpop.f32.mrb[242].mxu0  ;;  %v6709_v1 = vrot.slane %v6391_v4, 1 }
 0x66b   :  { %v8313_v55 = vpack.c.bf16 %v7370_v52, %v7370_v52  ;;  %v7371_v11 = vmax.f32 %v7291_v57, 0.0  ;;  %v7372_v35 = vmax.f32 %v7292_v7, 0.0  ;;  %v6715_v30 = vrot.slane %v9152_v15, 1  ;;  %v6394_v38 = vpop.f32.mrb[243].mxu1  ;;  %v7092_v49 = vpop.f32.mrb[243].mxu0 }
 0x66c   :  { %v8316_v61 = vpack.c.bf16 %v7373_v33, %v7373_v33  ;;  %v6711_v36 = vrot.slane %v6394_v38, 1 }
 0x66d   :  { %8205 = vst.msk [vmem:[%s14101_s7 + $0x80] sm:$0xf] %vm7487_vm5, %v8313_v55  ;;  %v8314_v59 = vpack.c.bf16 %v7371_v11, %v7371_v11  ;;  %v8315_v22 = vpack.c.bf16 %v7372_v35, %v7372_v35  ;;  %v6716_v25 = vsel %vm2846_vm1, %v6713_v28, %v6715_v30 }
 0x66e   :  { %8208 = vst.msk [vmem:[%s14101_s7 + $0x8c] sm:$0xf] %vm7487_vm5, %v8316_v61  ;;  %v7098_v6 = vadd.f32 %v9239_v18, %v6716_v25  ;;  %v6712_v23 = vsel %vm2846_vm1, %v6709_v1, %v6711_v36  ;;  %v6714_v44 = vsel %vm2846_vm1, %v6711_v36, %v6713_v28 }
 0x66f   :  { %8206 = vst.msk [vmem:[%s14101_s7 + $0x84] sm:$0xf] %vm7487_vm5, %v8314_v59  ;;  %8207 = vst.msk [vmem:[%s14101_s7 + $0x88] sm:$0xf] %vm7487_vm5, %v8315_v22  ;;  %v7090_v21 = vadd.f32 %v7089_v8, %v6712_v23  ;;  %v7093_v16 = vadd.f32 %v7092_v49, %v6714_v44 }
 0x670   :  { %v7297_v24 = vadd.f32 %v13656_v17, %v7098_v6 }
 0x671   :  { %v7295_v2 = vadd.f32 %v13656_v17, %v7090_v21  ;;  %v7296_v19 = vadd.f32 %v13656_v17, %v7093_v16  ;;  %v9155_v51 = vpop.f32.mrb[244].mxu1  ;;  %v9243_v20 = vpop.f32.mrb[244].mxu0 }
 0x672   :  { %v7377_v32 = vmax.f32 %v7297_v24, 0.0  ;;  %v6407_v54 = vpop.f32.mrb[245].mxu1  ;;  %v7105_v39 = vpop.f32.mrb[245].mxu0  ;;  %v6721_v60 = vrot.slane %v9155_v51, 1 }
 0x673   :  { %v7375_v34 = vmax.f32 %v7295_v2, 0.0  ;;  %v7376_v50 = vmax.f32 %v7296_v19, 0.0  ;;  %v6717_v46 = vrot.slane %v6407_v54, 1  ;;  %v9156_v53 = vpop.f32.mrb[246].mxu1  ;;  %v9244_v27 = vpop.f32.mrb[246].mxu0 }
 0x674   :  { %v8319_v45 = vpack.c.bf16 %v7377_v32, %v7377_v32  ;;  %v6723_v5 = vrot.slane %v9156_v53, 1  ;;  %v6410_v62 = vpop.f32.mrb[247].mxu1  ;;  %v7108_v3 = vpop.f32.mrb[247].mxu0 }
 0x675   :  { %v8317_v12 = vpack.c.bf16 %v7375_v34, %v7375_v34  ;;  %v8318_v40 = vpack.c.bf16 %v7376_v50, %v7376_v50  ;;  %v6718_v48 = vsel %vm2846_vm1, %v6715_v30, %v6717_v46  ;;  %v6719_v26 = vrot.slane %v6410_v62, 1 }
 0x676   :  { %8220 = vst.msk [vmem:[%s14101_s7 + $0x98] sm:$0xf] %vm7487_vm5, %v8319_v45  ;;  %v7101_v42 = vadd.f32 %v9240_v63, %v6718_v48  ;;  %v6724_v58 = vsel %vm2846_vm1, %v6721_v60, %v6723_v5 }
 0x677   :  { %8218 = vst.msk [vmem:[%s14101_s7 + $0x90] sm:$0xf] %vm7487_vm5, %v8317_v12  ;;  %8219 = vst.msk [vmem:[%s14101_s7 + $0x94] sm:$0xf] %vm7487_vm5, %v8318_v40  ;;  %v7114_v14 = vadd.f32 %v9243_v20, %v6724_v58  ;;  %v6720_v29 = vsel %vm2846_vm1, %v6717_v46, %v6719_v26  ;;  %v6722_v9 = vsel %vm2846_vm1, %v6719_v26, %v6721_v60 }
 0x678   :  { %v7298_v0 = vadd.f32 %v13656_v17, %v7101_v42  ;;  %v7106_v41 = vadd.f32 %v7105_v39, %v6720_v29  ;;  %v7109_v31 = vadd.f32 %v7108_v3, %v6722_v9 }
 0x679   :  { %v7301_v10 = vadd.f32 %v13656_v17, %v7114_v14  ;;  %v9159_v13 = vpop.f32.mrb[248].mxu1  ;;  %v9247_v43 = vpop.f32.mrb[248].mxu0 }
 0x67a   :  { %v7378_v47 = vmax.f32 %v7298_v0, 0.0  ;;  %v7299_v56 = vadd.f32 %v13656_v17, %v7106_v41  ;;  %v7300_v37 = vadd.f32 %v13656_v17, %v7109_v31  ;;  %v6423_v18 = vpop.f32.mrb[249].mxu1  ;;  %v7121_v52 = vpop.f32.mrb[249].mxu0  ;;  %v6729_v7 = vrot.slane %v9159_v13, 1 }
 0x67b   :  { %v7381_v57 = vmax.f32 %v7301_v10, 0.0  ;;  %v6725_v4 = vrot.slane %v6423_v18, 1  ;;  %v9160_v8 = vpop.f32.mrb[250].mxu1  ;;  %v9248_v33 = vpop.f32.mrb[250].mxu0 }
 0x67c   :  { %v8320_v28 = vpack.c.bf16 %v7378_v47, %v7378_v47  ;;  %v7379_v15 = vmax.f32 %v7299_v56, 0.0  ;;  %v7380_v63 = vmax.f32 %v7300_v37, 0.0  ;;  %v6731_v55 = vrot.slane %v9160_v8, 1  ;;  %v6426_v11 = vpop.f32.mrb[251].mxu1  ;;  %v7124_v35 = vpop.f32.mrb[251].mxu0 }
 0x67d   :  { %v8323_v30 = vpack.c.bf16 %v7381_v57, %v7381_v57  ;;  %v6726_v38 = vsel %vm2846_vm1, %v6723_v5, %v6725_v4  ;;  %v6727_v49 = vrot.slane %v6426_v11, 1 }
 0x67e   :  { %8221 = vst.msk [vmem:[%s14101_s7 + $0x9c] sm:$0xf] %vm7487_vm5, %v8320_v28  ;;  %v8321_v61 = vpack.c.bf16 %v7379_v15, %v7379_v15  ;;  %v8322_v1 = vpack.c.bf16 %v7380_v63, %v7380_v63  ;;  %v7117_v36 = vadd.f32 %v9244_v27, %v6726_v38  ;;  %v6732_v59 = vsel %vm2846_vm1, %v6729_v7, %v6731_v55 }
 0x67f   :  { %8224 = vst.msk [vmem:[%s14101_s7 + $0xa8] sm:$0xf] %vm7487_vm5, %v8323_v30  ;;  %v7130_v22 = vadd.f32 %v9247_v43, %v6732_v59  ;;  %v6728_v25 = vsel %vm2846_vm1, %v6725_v4, %v6727_v49 }
 0x680   :  { %8222 = vst.msk [vmem:[%s14101_s7 + $0xa0] sm:$0xf] %vm7487_vm5, %v8321_v61  ;;  %8223 = vst.msk [vmem:[%s14101_s7 + $0xa4] sm:$0xf] %vm7487_vm5, %v8322_v1  ;;  %v7302_v6 = vadd.f32 %v13656_v17, %v7117_v36  ;;  %v7122_v23 = vadd.f32 %v7121_v52, %v6728_v25 }
 0x681   :  { %v7305_v44 = vadd.f32 %v13656_v17, %v7130_v22 }
 0x682   :  { %v7382_v21 = vmax.f32 %v7302_v6, 0.0  ;;  %v7303_v16 = vadd.f32 %v13656_v17, %v7122_v23  ;;  %v9163_v24 = vpop.f32.mrb[252].mxu1  ;;  %v9251_v2 = vpop.f32.mrb[252].mxu0 }
 0x683   :  { %v7385_v19 = vmax.f32 %v7305_v44, 0.0  ;;  %v6439_v51 = vpop.f32.mrb[253].mxu1  ;;  %v7137_v20 = vpop.f32.mrb[253].mxu0  ;;  %v6737_v53 = vrot.slane %v9163_v24, 1 }
 0x684   :  { %v8324_v32 = vpack.c.bf16 %v7382_v21, %v7382_v21  ;;  %v7383_v54 = vmax.f32 %v7303_v16, 0.0  ;;  %v6733_v39 = vrot.slane %v6439_v51, 1  ;;  %v9164_v34 = vpop.f32.mrb[254].mxu1  ;;  %v9252_v50 = vpop.f32.mrb[254].mxu0 }
 0x685   :  { %v8326_v46 = vpack.c.bf16 %v7385_v19, %v7385_v19  ;;  %v6739_v27 = vrot.slane %v9164_v34, 1  ;;  %v6442_v45 = vpop.f32.mrb[255].mxu1  ;;  %v7140_v60 = vpop.f32.mrb[255].mxu0 }
 0x686   :  { %8225 = vst.msk [vmem:[%s14101_s7 + $0xac] sm:$0xf] %vm7487_vm5, %v8324_v32  ;;  %v8325_v5 = vpack.c.bf16 %v7383_v54, %v7383_v54  ;;  %v6734_v62 = vsel %vm2846_vm1, %v6731_v55, %v6733_v39  ;;  %v6735_v3 = vrot.slane %v6442_v45, 1 }
 0x687   :  { %8236 = vst.msk [vmem:[%s14101_s7 + $0xb4] sm:$0xf] %vm7487_vm5, %v8326_v46  ;;  %v7133_v12 = vadd.f32 %v9248_v33, %v6734_v62  ;;  %v6740_v40 = vsel %vm2846_vm1, %v6737_v53, %v6739_v27 }
 0x688   :  { %8226 = vst.msk [vmem:[%s14101_s7 + $0xb0] sm:$0xf] %vm7487_vm5, %v8325_v5  ;;  %v7146_v48 = vadd.f32 %v9251_v2, %v6740_v40  ;;  %v6736_v26 = vsel %vm2846_vm1, %v6733_v39, %v6735_v3  ;;  %v6738_v42 = vsel %vm2846_vm1, %v6735_v3, %v6737_v53 }
 0x689   :  { %v7306_v58 = vadd.f32 %v13656_v17, %v7133_v12  ;;  %v7138_v14 = vadd.f32 %v7137_v20, %v6736_v26  ;;  %v7141_v29 = vadd.f32 %v7140_v60, %v6738_v42 }
 0x68a   :  { %v7309_v9 = vadd.f32 %v13656_v17, %v7146_v48  ;;  %v9167_v0 = vpop.f32.mrb[0].mxu1  ;;  %v9255_v41 = vpop.f32.mrb[0].mxu0 }
 0x68b   :  { %v7386_v31 = vmax.f32 %v7306_v58, 0.0  ;;  %v7307_v10 = vadd.f32 %v13656_v17, %v7138_v14  ;;  %v7308_v13 = vadd.f32 %v13656_v17, %v7141_v29  ;;  %v6455_v43 = vpop.f32.mrb[1].mxu1  ;;  %v7153_v47 = vpop.f32.mrb[1].mxu0  ;;  %v6745_v37 = vrot.slane %v9167_v0, 1  ;;  %v13987_v58 = vld [vmem:[%s14100_s6] ss:$0 sm:$0xff] }
 0x68c   :  { %v7389_v56 = vmax.f32 %v7309_v9, 0.0  ;;  %v6741_v18 = vrot.slane %v6455_v43, 1  ;;  %v9168_v52 = vpop.f32.mrb[2].mxu1  ;;  %v9256_v57 = vpop.f32.mrb[2].mxu0 }
 0x68d   :  { %v8327_v7 = vpack.c.bf16 %v7386_v31, %v7386_v31  ;;  %v7387_v4 = vmax.f32 %v7307_v10, 0.0  ;;  %v7388_v8 = vmax.f32 %v7308_v13, 0.0  ;;  %v6747_v33 = vrot.slane %v9168_v52, 1  ;;  %v6458_v28 = vpop.f32.mrb[3].mxu1  ;;  %v7156_v15 = vpop.f32.mrb[3].mxu0 }
 0x68e   :  { %v8330_v63 = vpack.c.bf16 %v7389_v56, %v7389_v56  ;;  %v6742_v55 = vsel %vm2846_vm1, %v6739_v27, %v6741_v18  ;;  %v6743_v11 = vrot.slane %v6458_v28, 1 }
 0x68f   :  { %8237 = vst.msk [vmem:[%s14101_s7 + $0xb8] sm:$0xf] %vm7487_vm5, %v8327_v7  ;;  %v8328_v35 = vpack.c.bf16 %v7387_v4, %v7387_v4  ;;  %v8329_v30 = vpack.c.bf16 %v7388_v8, %v7388_v8  ;;  %v7149_v38 = vadd.f32 %v9252_v50, %v6742_v55  ;;  %v6748_v49 = vsel %vm2846_vm1, %v6745_v37, %v6747_v33 }
 0x690   :  { %8240 = vst.msk [vmem:[%s14101_s7 + $0xc4] sm:$0xf] %vm7487_vm5, %v8330_v63  ;;  %v7162_v61 = vadd.f32 %v9255_v41, %v6748_v49  ;;  %v6744_v1 = vsel %vm2846_vm1, %v6741_v18, %v6743_v11  ;;  %v6746_v36 = vsel %vm2846_vm1, %v6743_v11, %v6745_v37 }
 0x691   :  { %8238 = vst.msk [vmem:[%s14101_s7 + $0xbc] sm:$0xf] %vm7487_vm5, %v8328_v35  ;;  %8239 = vst.msk [vmem:[%s14101_s7 + $0xc0] sm:$0xf] %vm7487_vm5, %v8329_v30  ;;  %v7310_v59 = vadd.f32 %v13656_v17, %v7149_v38  ;;  %v7154_v22 = vadd.f32 %v7153_v47, %v6744_v1  ;;  %v7157_v25 = vadd.f32 %v7156_v15, %v6746_v36 }
 0x692   :  { %v7313_v6 = vadd.f32 %v13656_v17, %v7162_v61  ;;  %v9171_v23 = vpop.f32.mrb[4].mxu1  ;;  %v9259_v44 = vpop.f32.mrb[4].mxu0 }
 0x693   :  { %v7390_v21 = vmax.f32 %v7310_v59, 0.0  ;;  %v7311_v16 = vadd.f32 %v13656_v17, %v7154_v22  ;;  %v7312_v24 = vadd.f32 %v13656_v17, %v7157_v25  ;;  %v6471_v2 = vpop.f32.mrb[5].mxu1  ;;  %v7169_v19 = vpop.f32.mrb[5].mxu0  ;;  %v6753_v20 = vrot.slane %v9171_v23, 1 }
 0x694   :  { %v7393_v51 = vmax.f32 %v7313_v6, 0.0  ;;  %v9172_v32 = vpop.f32.mrb[6].mxu1  ;;  %v9260_v54 = vpop.f32.mrb[6].mxu0  ;;  %v6749_v60 = vrot.slane %v6471_v2, 1 }
 0x695   :  { %v8331_v39 = vpack.c.bf16 %v7390_v21, %v7390_v21  ;;  %v7391_v34 = vmax.f32 %v7311_v16, 0.0  ;;  %v7392_v50 = vmax.f32 %v7312_v24, 0.0  ;;  %v6755_v46 = vrot.slane %v9172_v32, 1  ;;  %v6474_v53 = vpop.f32.mrb[7].mxu1  ;;  %v7172_v27 = vpop.f32.mrb[7].mxu0 }
 0x696   :  { %v8334_v45 = vpack.c.bf16 %v7393_v51, %v7393_v51  ;;  %v6751_v5 = vrot.slane %v6474_v53, 1 }
 0x697   :  { %8241 = vst.msk [vmem:[%s14101_s7 + $0xc8] sm:$0xf] %vm7487_vm5, %v8331_v39  ;;  %v8332_v17 = vpack.c.bf16 %v7391_v34, %v7391_v34  ;;  %v8333_v62 = vpack.c.bf16 %v7392_v50, %v7392_v50  ;;  %v6756_v3 = vsel %vm2846_vm1, %v6753_v20, %v6755_v46 }
 0x698   :  { %8244 = vst.msk [vmem:[%s14101_s7 + $0xd4] sm:$0xf] %vm7487_vm5, %v8334_v45  ;;  %v7178_v12 = vadd.f32 %v9259_v44, %v6756_v3  ;;  %v6752_v40 = vsel %vm2846_vm1, %v6749_v60, %v6751_v5  ;;  %v6754_v48 = vsel %vm2846_vm1, %v6751_v5, %v6753_v20 }
 0x699   :  { %8242 = vst.msk [vmem:[%s14101_s7 + $0xcc] sm:$0xf] %vm7487_vm5, %v8332_v17  ;;  %8243 = vst.msk [vmem:[%s14101_s7 + $0xd0] sm:$0xf] %vm7487_vm5, %v8333_v62  ;;  %v7170_v26 = vadd.f32 %v7169_v19, %v6752_v40  ;;  %v7173_v42 = vadd.f32 %v7172_v27, %v6754_v48 }
 0x69a   :  { %v7317_v14 = vadd.f32 %v13987_v58, %v7178_v12  ;;  %v9175_v29 = vpop.f32.mrb[8].mxu1  ;;  %v9263_v9 = vpop.f32.mrb[8].mxu0 }
 0x69b   :  { %v7315_v0 = vadd.f32 %v13987_v58, %v7170_v26  ;;  %v7316_v41 = vadd.f32 %v13987_v58, %v7173_v42  ;;  %v6487_v31 = vpop.f32.mrb[9].mxu1  ;;  %v7185_v10 = vpop.f32.mrb[9].mxu0  ;;  %v6761_v52 = vrot.slane %v9175_v29, 1 }
 0x69c   :  { %v7397_v13 = vmax.f32 %v7317_v14, 0.0  ;;  %v6757_v43 = vrot.slane %v6487_v31, 1  ;;  %v9176_v47 = vpop.f32.mrb[10].mxu1  ;;  %v9264_v56 = vpop.f32.mrb[10].mxu0 }
 0x69d   :  { %v7395_v37 = vmax.f32 %v7315_v0, 0.0  ;;  %v7396_v18 = vmax.f32 %v7316_v41, 0.0  ;;  %v6763_v57 = vrot.slane %v9176_v47, 1  ;;  %v6490_v7 = vpop.f32.mrb[11].mxu1  ;;  %v7188_v4 = vpop.f32.mrb[11].mxu0 }
 0x69e   :  { %v8337_v8 = vpack.c.bf16 %v7397_v13, %v7397_v13  ;;  %v6758_v33 = vsel %vm2846_vm1, %v6755_v46, %v6757_v43  ;;  %v6759_v28 = vrot.slane %v6490_v7, 1 }
 0x69f   :  { %v8335_v15 = vpack.c.bf16 %v7395_v37, %v7395_v37  ;;  %v8336_v63 = vpack.c.bf16 %v7396_v18, %v7396_v18  ;;  %v7181_v55 = vadd.f32 %v9260_v54, %v6758_v33  ;;  %v6764_v11 = vsel %vm2846_vm1, %v6761_v52, %v6763_v57 }
 0x6a0   :  { %8256 = vst.msk [vmem:[%s14101_s7 + $0xe0] sm:$0xf] %vm7487_vm5, %v8337_v8  ;;  %v7194_v35 = vadd.f32 %v9263_v9, %v6764_v11  ;;  %v6760_v30 = vsel %vm2846_vm1, %v6757_v43, %v6759_v28  ;;  %v6762_v38 = vsel %vm2846_vm1, %v6759_v28, %v6761_v52 }
 0x6a1   :  { %8254 = vst.msk [vmem:[%s14101_s7 + $0xd8] sm:$0xf] %vm7487_vm5, %v8335_v15  ;;  %8255 = vst.msk [vmem:[%s14101_s7 + $0xdc] sm:$0xf] %vm7487_vm5, %v8336_v63  ;;  %v7318_v49 = vadd.f32 %v13987_v58, %v7181_v55  ;;  %v7186_v61 = vadd.f32 %v7185_v10, %v6760_v30  ;;  %v7189_v1 = vadd.f32 %v7188_v4, %v6762_v38 }
 0x6a2   :  { %v7321_v36 = vadd.f32 %v13987_v58, %v7194_v35  ;;  %v9179_v59 = vpop.f32.mrb[12].mxu1  ;;  %v9267_v22 = vpop.f32.mrb[12].mxu0 }
 0x6a3   :  { %v7398_v25 = vmax.f32 %v7318_v49, 0.0  ;;  %v7319_v6 = vadd.f32 %v13987_v58, %v7186_v61  ;;  %v7320_v23 = vadd.f32 %v13987_v58, %v7189_v1  ;;  %v6503_v44 = vpop.f32.mrb[13].mxu1  ;;  %v7201_v21 = vpop.f32.mrb[13].mxu0  ;;  %v6769_v24 = vrot.slane %v9179_v59, 1 }
 0x6a4   :  { %v7401_v16 = vmax.f32 %v7321_v36, 0.0  ;;  %v6765_v2 = vrot.slane %v6503_v44, 1  ;;  %v9180_v19 = vpop.f32.mrb[14].mxu1  ;;  %v9268_v51 = vpop.f32.mrb[14].mxu0 }
 0x6a5   :  { %v8338_v20 = vpack.c.bf16 %v7398_v25, %v7398_v25  ;;  %v7399_v32 = vmax.f32 %v7319_v6, 0.0  ;;  %v7400_v54 = vmax.f32 %v7320_v23, 0.0  ;;  %v6771_v39 = vrot.slane %v9180_v19, 1  ;;  %v6506_v34 = vpop.f32.mrb[15].mxu1  ;;  %v7204_v50 = vpop.f32.mrb[15].mxu0 }
 0x6a6   :  { %v8341_v46 = vpack.c.bf16 %v7401_v16, %v7401_v16  ;;  %v6766_v53 = vsel %vm2846_vm1, %v6763_v57, %v6765_v2  ;;  %v6767_v27 = vrot.slane %v6506_v34, 1 }
 0x6a7   :  { %8257 = vst.msk [vmem:[%s14101_s7 + $0xe4] sm:$0xf] %vm7487_vm5, %v8338_v20  ;;  %v8339_v45 = vpack.c.bf16 %v7399_v32, %v7399_v32  ;;  %v8340_v60 = vpack.c.bf16 %v7400_v54, %v7400_v54  ;;  %v7197_v5 = vadd.f32 %v9264_v56, %v6766_v53  ;;  %v6772_v17 = vsel %vm2846_vm1, %v6769_v24, %v6771_v39 }
 0x6a8   :  { %8260 = vst.msk [vmem:[%s14101_s7 + $0xf0] sm:$0xf] %vm7487_vm5, %v8341_v46  ;;  %v7210_v62 = vadd.f32 %v9267_v22, %v6772_v17  ;;  %v6768_v3 = vsel %vm2846_vm1, %v6765_v2, %v6767_v27 }
 0x6a9   :  { %8258 = vst.msk [vmem:[%s14101_s7 + $0xe8] sm:$0xf] %vm7487_vm5, %v8339_v45  ;;  %8259 = vst.msk [vmem:[%s14101_s7 + $0xec] sm:$0xf] %vm7487_vm5, %v8340_v60  ;;  %v7322_v12 = vadd.f32 %v13987_v58, %v7197_v5  ;;  %v7202_v40 = vadd.f32 %v7201_v21, %v6768_v3 }
 0x6aa   :  { %v7325_v48 = vadd.f32 %v13987_v58, %v7210_v62  ;;  %v9183_v26 = vpop.f32.mrb[16].mxu1  ;;  %v9271_v42 = vpop.f32.mrb[16].mxu0 }
 0x6ab   :  { %v7402_v14 = vmax.f32 %v7322_v12, 0.0  ;;  %v7323_v29 = vadd.f32 %v13987_v58, %v7202_v40  ;;  %v6519_v9 = vpop.f32.mrb[17].mxu1  ;;  %v7217_v0 = vpop.f32.mrb[17].mxu0  ;;  %v6777_v56 = vrot.slane %v9183_v26, 1 }
 0x6ac   :  { %v7405_v41 = vmax.f32 %v7325_v48, 0.0  ;;  %v6773_v31 = vrot.slane %v6519_v9, 1  ;;  %v9184_v10 = vpop.f32.mrb[18].mxu1  ;;  %v9272_v13 = vpop.f32.mrb[18].mxu0 }
 0x6ad   :  { %v8342_v43 = vpack.c.bf16 %v7402_v14, %v7402_v14  ;;  %v7403_v47 = vmax.f32 %v7323_v29, 0.0  ;;  %v6779_v37 = vrot.slane %v9184_v10, 1  ;;  %v6522_v18 = vpop.f32.mrb[19].mxu1  ;;  %v7220_v52 = vpop.f32.mrb[19].mxu0 }
 0x6ae   :  { %v8344_v57 = vpack.c.bf16 %v7405_v41, %v7405_v41  ;;  %v6774_v7 = vsel %vm2846_vm1, %v6771_v39, %v6773_v31  ;;  %v6775_v4 = vrot.slane %v6522_v18, 1 }
 0x6af   :  { %8261 = vst.msk [vmem:[%s14101_s7 + $0xf4] sm:$0xf] %vm7487_vm5, %v8342_v43  ;;  %v8343_v8 = vpack.c.bf16 %v7403_v47, %v7403_v47  ;;  %v7213_v33 = vadd.f32 %v9268_v51, %v6774_v7  ;;  %v6780_v28 = vsel %vm2846_vm1, %v6777_v56, %v6779_v37 }
 0x6b0   :  { %8272 = vst.msk [vmem:[%s14101_s7 + $0xfc] sm:$0xf] %vm7487_vm5, %v8344_v57  ;;  %v7226_v15 = vadd.f32 %v9271_v42, %v6780_v28  ;;  %v6776_v63 = vsel %vm2846_vm1, %v6773_v31, %v6775_v4  ;;  %v6778_v55 = vsel %vm2846_vm1, %v6775_v4, %v6777_v56 }
 0x6b1   :  { %8262 = vst.msk [vmem:[%s14101_s7 + $0xf8] sm:$0xf] %vm7487_vm5, %v8343_v8  ;;  %v7326_v11 = vadd.f32 %v13987_v58, %v7213_v33  ;;  %v7218_v35 = vadd.f32 %v7217_v0, %v6776_v63  ;;  %v7221_v30 = vadd.f32 %v7220_v52, %v6778_v55 }
 0x6b2   :  { %v7329_v38 = vadd.f32 %v13987_v58, %v7226_v15  ;;  %v9187_v49 = vpop.f32.mrb[20].mxu1  ;;  %v9275_v61 = vpop.f32.mrb[20].mxu0 }
 0x6b3   :  { %v7406_v1 = vmax.f32 %v7326_v11, 0.0  ;;  %v7327_v36 = vadd.f32 %v13987_v58, %v7218_v35  ;;  %v7328_v59 = vadd.f32 %v13987_v58, %v7221_v30  ;;  %v6535_v22 = vpop.f32.mrb[21].mxu1  ;;  %v7233_v25 = vpop.f32.mrb[21].mxu0  ;;  %v6785_v23 = vrot.slane %v9187_v49, 1 }
 0x6b4   :  { %v7409_v6 = vmax.f32 %v7329_v38, 0.0  ;;  %v6781_v44 = vrot.slane %v6535_v22, 1  ;;  %v9188_v21 = vpop.f32.mrb[22].mxu1  ;;  %v9276_v16 = vpop.f32.mrb[22].mxu0 }
 0x6b5   :  { %v8345_v24 = vpack.c.bf16 %v7406_v1, %v7406_v1  ;;  %v7407_v2 = vmax.f32 %v7327_v36, 0.0  ;;  %v7408_v19 = vmax.f32 %v7328_v59, 0.0  ;;  %v6787_v51 = vrot.slane %v9188_v21, 1  ;;  %v6538_v20 = vpop.f32.mrb[23].mxu1  ;;  %v7236_v32 = vpop.f32.mrb[23].mxu0 }
 0x6b6   :  { %v8348_v54 = vpack.c.bf16 %v7409_v6, %v7409_v6  ;;  %v6782_v39 = vsel %vm2846_vm1, %v6779_v37, %v6781_v44  ;;  %v6783_v34 = vrot.slane %v6538_v20, 1 }
 0x6b7   :  { %8273 = vst.msk [vmem:[%s14101_s7 + $0x100] sm:$0xf] %vm7487_vm5, %v8345_v24  ;;  %v8346_v50 = vpack.c.bf16 %v7407_v2, %v7407_v2  ;;  %v8347_v46 = vpack.c.bf16 %v7408_v19, %v7408_v19  ;;  %v7229_v53 = vadd.f32 %v9272_v13, %v6782_v39  ;;  %v6788_v27 = vsel %vm2846_vm1, %v6785_v23, %v6787_v51 }
 0x6b8   :  { %8276 = vst.msk [vmem:[%s14101_s7 + $0x10c] sm:$0xf] %vm7487_vm5, %v8348_v54  ;;  %v7242_v45 = vadd.f32 %v9275_v61, %v6788_v27  ;;  %v6784_v60 = vsel %vm2846_vm1, %v6781_v44, %v6783_v34  ;;  %v6786_v5 = vsel %vm2846_vm1, %v6783_v34, %v6785_v23 }
 0x6b9   :  { %8274 = vst.msk [vmem:[%s14101_s7 + $0x104] sm:$0xf] %vm7487_vm5, %v8346_v50  ;;  %8275 = vst.msk [vmem:[%s14101_s7 + $0x108] sm:$0xf] %vm7487_vm5, %v8347_v46  ;;  %v7330_v17 = vadd.f32 %v13987_v58, %v7229_v53  ;;  %v7234_v62 = vadd.f32 %v7233_v25, %v6784_v60  ;;  %v7237_v3 = vadd.f32 %v7236_v32, %v6786_v5 }
 0x6ba   :  { %v7333_v12 = vadd.f32 %v13987_v58, %v7242_v45 }
 0x6bb   :  { %v7410_v40 = vmax.f32 %v7330_v17, 0.0  ;;  %v7331_v48 = vadd.f32 %v13987_v58, %v7234_v62  ;;  %v7332_v26 = vadd.f32 %v13987_v58, %v7237_v3 }
 0x6bc   :  { %v7413_v42 = vmax.f32 %v7333_v12, 0.0 }
 0x6bd   :  { %v8349_v14 = vpack.c.bf16 %v7410_v40, %v7410_v40  ;;  %v7411_v29 = vmax.f32 %v7331_v48, 0.0  ;;  %v7412_v9 = vmax.f32 %v7332_v26, 0.0 }
 0x6be   :  { %v8352_v0 = vpack.c.bf16 %v7413_v42, %v7413_v42 }
 0x6bf   :  { %8277 = vst.msk [vmem:[%s14101_s7 + $0x110] sm:$0xf] %vm7487_vm5, %v8349_v14  ;;  %v8350_v41 = vpack.c.bf16 %v7411_v29, %v7411_v29  ;;  %v8351_v31 = vpack.c.bf16 %v7412_v9, %v7412_v9 }
 0x6c0   :  { %8280 = vst.msk [vmem:[%s14101_s7 + $0x11c] sm:$0xf] %vm7487_vm5, %v8352_v0 }
 0x6c1   :  { %8278 = vst.msk [vmem:[%s14101_s7 + $0x114] sm:$0xf] %vm7487_vm5, %v8350_v41  ;;  %8279 = vst.msk [vmem:[%s14101_s7 + $0x118] sm:$0xf] %vm7487_vm5, %v8351_v31 }

</bundles_post_ra>
